<compile_context>
chip_gen: v6e
topology: v6e:2x2x1
jax: 0.10.0
libtpu: 0.0.40
codegen_flags: <defaults>
</compile_context>

<pallas_src>
import functools

import numpy as np
import jax
import jax.numpy as jnp
from jax.experimental import pallas as pl
from jax.experimental.pallas import tpu as pltpu

D_MOD = 768            # per-modality pooler dim (ViT/BERT hidden)
D_FUSE = 2 * D_MOD     # 1536, matches nn.Linear(1536, 1536)
N_CLASSES = 4
N_PAD = 128            # lane-dense padded class dim
LN_EPS = 1e-5
NEG_LARGE = -1e30      # baked into padded b3 lanes -> exp underflows to 0


# ---------------------------------------------------------------------------
# Feature probe: is single-buffering of resident operands (Buffered(1)) OK?
# ---------------------------------------------------------------------------
_SINGLE_BUFFER_OK = None


def _probe_single_buffer():
    try:
        def k(x_ref, o_ref):
            o_ref[...] = x_ref[...] + 1.0

        f = pl.pallas_call(
            k,
            out_shape=jax.ShapeDtypeStruct((8, 128), jnp.float32),
            grid=(2,),
            in_specs=[pl.BlockSpec((8, 128), lambda i: (0, 0),
                                   pipeline_mode=pl.Buffered(1))],
            out_specs=pl.BlockSpec((8, 128), lambda i: (0, 0)),
        )
        jax.block_until_ready(f(jnp.zeros((8, 128), jnp.float32)))
        return True
    except Exception:
        return False


def _single_buffer_ok():
    global _SINGLE_BUFFER_OK
    if _SINGLE_BUFFER_OK is None:
        _SINGLE_BUFFER_OK = _probe_single_buffer()
    return _SINGLE_BUFFER_OK


# ---------------------------------------------------------------------------
# Pallas kernel: fused classification head (one batch tile per grid step)
# ---------------------------------------------------------------------------
def _fused_head_kernel(x_ref, w1_ref, b1_ref, g1_ref, be1_ref,
                       w2_ref, b2_ref, g2_ref, be2_ref,
                       w3_ref, b3_ref,
                       logits_ref, probs_ref):
    x = x_ref[...]                                            # (TILE_B, 1536) f32
    inv_d = jnp.float32(1.0 / D_FUSE)

    def layer_norm(h, gamma, beta):
        # single pass: E[x] and E[x^2] together, var = E[x^2] - mu^2
        s1 = jnp.sum(h, axis=-1, keepdims=True)
        s2 = jnp.sum(h * h, axis=-1, keepdims=True)
        mu = s1 * inv_d
        var = s2 * inv_d - mu * mu
        return (h - mu) * jax.lax.rsqrt(var + LN_EPS) * gamma + beta

    # linear1 (bf16 operands, f32 accumulate) + LayerNorm + (dropout=id) + ReLU
    h = jnp.dot(x.astype(jnp.bfloat16), w1_ref[...],
                preferred_element_type=jnp.float32) + b1_ref[...]
    h = jnp.maximum(layer_norm(h, g1_ref[...], be1_ref[...]), 0.0)

    # linear2 + LayerNorm2 + (dropout=id) + ReLU
    h = jnp.dot(h.astype(jnp.bfloat16), w2_ref[...],
                preferred_element_type=jnp.float32) + b2_ref[...]
    h = jnp.maximum(layer_norm(h, g2_ref[...], be2_ref[...]), 0.0)

    # linear3 -> (TILE_B, 128) lane-padded logits. Padded w3 columns are zero and
    # padded b3 lanes are NEG_LARGE, so padded logits are ~-1e30 and need no mask.
    logits = jnp.dot(h.astype(jnp.bfloat16), w3_ref[...],
                     preferred_element_type=jnp.float32) + b3_ref[...]
    logits_ref[...] = logits

    m = jnp.max(logits, axis=-1, keepdims=True)
    e = jnp.exp(logits - m)                                   # padded lanes -> 0
    probs_ref[...] = e * pl.reciprocal(jnp.sum(e, axis=-1, keepdims=True),
                                       approx=True)


@functools.partial(jax.jit, static_argnames=("single_buffer",))
def _fused_head_impl(x, params, *, single_buffer):
    """x: (B, 1536) fused [image ; text] embeddings -> (logits, probs), (B, 128) padded."""
    B = x.shape[0]

    # Adaptive batch tile: large tiles for real batches (MXU M-dim utilization,
    # amortized per-step overhead), small tile for tiny batches.
    cap = 256 if single_buffer else 128
    tile_b = min(cap, ((B + 7) // 8) * 8)
    b_pad = ((B + tile_b - 1) // tile_b) * tile_b
    x_pad = jnp.pad(x, ((0, b_pad - B), (0, 0)))
    grid = (b_pad // tile_b,)

    # grid-invariant (resident) weights; only the batch tiles stream.
    res = lambda i: (0, 0)

    def res_spec(shape):
        if single_buffer:
            return pl.BlockSpec(shape, res, pipeline_mode=pl.Buffered(1))
        return pl.BlockSpec(shape, res)

    in_specs = [
        pl.BlockSpec((tile_b, D_FUSE), lambda i: (i, 0)),     # x
        res_spec((D_FUSE, D_FUSE)),                           # w1 (bf16)
        res_spec((1, D_FUSE)),                                # b1
        res_spec((1, D_FUSE)),                                # g1
        res_spec((1, D_FUSE)),                                # be1
        res_spec((D_FUSE, D_FUSE)),                           # w2 (bf16)
        res_spec((1, D_FUSE)),                                # b2
        res_spec((1, D_FUSE)),                                # g2
        res_spec((1, D_FUSE)),                                # be2
        res_spec((D_FUSE, N_PAD)),                            # w3 (bf16, lane-padded)
        res_spec((1, N_PAD)),                                 # b3 (lane-padded, -1e30)
    ]
    out_specs = (pl.BlockSpec((tile_b, N_PAD), lambda i: (i, 0)),
                 pl.BlockSpec((tile_b, N_PAD), lambda i: (i, 0)))

    weight_bytes = (2 * D_FUSE * D_FUSE * 2 + D_FUSE * N_PAD * 2   # bf16 weights
                    + 6 * D_FUSE * 4 + N_PAD * 4)                  # f32 vectors
    io_bytes = b_pad * D_FUSE * 4 + 2 * b_pad * N_PAD * 4
    cost = pl.CostEstimate(
        flops=2 * b_pad * D_FUSE * (D_FUSE + D_FUSE + N_PAD),
        transcendentals=b_pad * (N_PAD + 3),
        bytes_accessed=weight_bytes + io_bytes,
    )

    # Only shard across TensorCores when there are >= 2 real batch tiles;
    # otherwise a weight-DMA-bound call would duplicate the resident-weight DMA.
    dim_sem = ("parallel",) if grid[0] >= 2 else ("arbitrary",)
    vmem_limit = (32 if single_buffer else 40) * 1024 * 1024

    logits_p, probs_p = pl.pallas_call(
        _fused_head_kernel,
        out_shape=(jax.ShapeDtypeStruct((b_pad, N_PAD), jnp.float32),
                   jax.ShapeDtypeStruct((b_pad, N_PAD), jnp.float32)),
        grid_spec=pltpu.PrefetchScalarGridSpec(
            num_scalar_prefetch=0, grid=grid,
            in_specs=in_specs, out_specs=out_specs),
        compiler_params=pltpu.CompilerParams(
            dimension_semantics=dim_sem,
            vmem_limit_bytes=vmem_limit),
        cost_estimate=cost,
    )(x_pad,
      params["w1"], params["b1"], params["g1"], params["be1"],
      params["w2"], params["b2"], params["g2"], params["be2"],
      params["w3"], params["b3"])

    return logits_p[:B], probs_p[:B]


def fused_head(x, params):
    logits_p, probs_p = _fused_head_impl(x, params,
                                         single_buffer=_single_buffer_ok())
    return logits_p[:, :N_CLASSES], probs_p[:, :N_CLASSES]


# ---------------------------------------------------------------------------
# Deterministic parameter / stand-in encoder setup (glue)
# ---------------------------------------------------------------------------
def make_params(key):
    ks = jax.random.split(key, 10)

    def lin(kw, kb, fan_in, fan_out, pad_out=None, pad_bias_value=0.0):
        # PyTorch nn.Linear stores (out, in) with U(-1/sqrt(fan_in)) init for W and b;
        # we store the transpose (in, out) so the kernel computes x @ W + b.
        bound = 1.0 / np.sqrt(fan_in)
        w = jax.random.uniform(kw, (fan_in, fan_out), jnp.float32, -bound, bound)
        b = jax.random.uniform(kb, (1, fan_out), jnp.float32, -bound, bound)
        if pad_out is not None and pad_out > fan_out:
            w = jnp.pad(w, ((0, 0), (0, pad_out - fan_out)))
            b = jnp.pad(b, ((0, 0), (0, pad_out - fan_out)),
                        constant_values=pad_bias_value)
        return w.astype(jnp.bfloat16), b    # weights bf16, bias f32

    w1, b1 = lin(ks[0], ks[1], D_FUSE, D_FUSE)
    w2, b2 = lin(ks[2], ks[3], D_FUSE, D_FUSE)
    # b3 pad lanes baked to -1e30 so the in-kernel softmax needs no masking.
    w3, b3 = lin(ks[4], ks[5], D_FUSE, N_CLASSES, pad_out=N_PAD,
                 pad_bias_value=NEG_LARGE)

    head = dict(
        w1=w1, b1=b1,
        g1=jnp.ones((1, D_FUSE), jnp.float32), be1=jnp.zeros((1, D_FUSE), jnp.float32),
        w2=w2, b2=b2,
        g2=jnp.ones((1, D_FUSE), jnp.float32), be2=jnp.zeros((1, D_FUSE), jnp.float32),
        w3=w3, b3=b3,
    )

    # Stand-in encoders (deterministic).
    vocab, img_flat = 128, 3 * 16 * 16   # 3x16x16 = 768
    enc = dict(
        vit_w=jax.random.normal(ks[6], (img_flat, D_MOD), jnp.float32) * 0.02,
        vit_b=jnp.zeros((D_MOD,), jnp.float32),
        bert_emb=jax.random.normal(ks[7], (vocab, D_MOD), jnp.float32) * 0.02,
        bert_w=jax.random.normal(ks[8], (D_MOD, D_MOD), jnp.float32) * 0.02,
        bert_b=jnp.zeros((D_MOD,), jnp.float32),
    )
    return head, enc


def vit_pooler_standin(pixel_values, enc):
    # pixel_values: (num_images_total, 3, 16, 16) NCHW -> (num_images_total, 768)
    flat = pixel_values.reshape(pixel_values.shape[0], -1)
    return jnp.tanh(flat @ enc["vit_w"] + enc["vit_b"])


def bert_pooler_standin(input_ids, attention_mask, enc):
    # input_ids, attention_mask: (B, S) -> (B, 768)
    emb = enc["bert_emb"][input_ids]                              # (B, S, 768)
    mask = attention_mask[..., None].astype(jnp.float32)
    pooled = (emb * mask).sum(axis=1) / jnp.maximum(mask.sum(axis=1), 1.0)
    return jnp.tanh(pooled @ enc["bert_w"] + enc["bert_b"])


def model_forward(input_ids, attention_mask, pixel_values, nums_images, head, enc):
    # nums_images is a host-side Python list (mirrors torch loop semantics).
    i_embeddings = vit_pooler_standin(pixel_values, enc)          # (total_imgs, 768)
    B = len(nums_images)
    # Static-shape segmented max (replaces the per-sample dynamic-slice loop).
    segment_ids = jnp.asarray(np.repeat(np.arange(B), nums_images), jnp.int32)
    embeddings_images = jax.ops.segment_max(i_embeddings, segment_ids,
                                            num_segments=B)        # (B, 768)
    embeddings_text = bert_pooler_standin(input_ids, attention_mask, enc)  # (B, 768)
    fused = jnp.concatenate((embeddings_images, embeddings_text), axis=1)  # (B, 1536)
    return fused_head(fused, head)


# ---------------------------------------------------------------------------
if __name__ == "__main__":
    key = jax.random.PRNGKey(0)
    k_par, k_ids, k_pix = jax.random.split(key, 3)

    head_params, enc_params = make_params(k_par)

    B, S = 2, 8
    nums_images = [2, 1]                       # per-sample image counts
    total_imgs = sum(nums_images)

    input_ids = jax.random.randint(k_ids, (B, S), 0, 128, dtype=jnp.int32)
    attention_mask = jnp.ones((B, S), jnp.int32)
    pixel_values = jax.random.normal(k_pix, (total_imgs, 3, 16, 16), jnp.float32)  # NCHW

    logits, probs = model_forward(input_ids, attention_mask, pixel_values,
                                  nums_images, head_params, enc_params)
    jax.block_until_ready((logits, probs))

    assert logits.shape == (B, N_CLASSES) and probs.shape == (B, N_CLASSES)
    assert bool(jnp.all(jnp.isfinite(logits))) and bool(jnp.all(jnp.isfinite(probs)))
    assert jnp.allclose(jnp.sum(probs, axis=1), 1.0, atol=2e-3)
    print("KERNEL_OK")
</pallas_src>

<mosaic_0001>
module attributes {stable_mosaic.version = 11 : i64} {
  func.func @k(%arg0: i32, %arg1: memref<8x128xf32, #tpu.memory_space<vmem>>, %arg2: memref<8x128xf32, #tpu.memory_space<vmem>>) attributes {dimension_semantics = [#tpu.dimension_semantics<arbitrary>], iteration_bounds = array<i64: 2>, scalar_prefetch = 0 : i64, scratch_operands = 0 : i64, tpu.core_type = #tpu.core_type<tc>, window_params = [{pipeline_mode = #tpu.pipeline_mode<synchronous>, transform_indices = @transform_0, window_bounds = array<i64: 8, 128>}, {pipeline_mode = #tpu.pipeline_mode<synchronous>, transform_indices = @transform_1, window_bounds = array<i64: 8, 128>}]} {
    %c0 = arith.constant 0 : index
    %c0_0 = arith.constant 0 : index
    %0 = vector.load %arg1[%c0, %c0_0] : memref<8x128xf32, #tpu.memory_space<vmem>>, vector<8x128xf32>
    %cst = arith.constant 1.000000e+00 : f32
    %1 = vector.broadcast %cst : f32 to vector<8x128xf32>
    %2 = arith.addf %0, %1 : vector<8x128xf32>
    %c0_1 = arith.constant 0 : index
    %c0_2 = arith.constant 0 : index
    %3 = vector.load %arg2[%c0_1, %c0_2] : memref<8x128xf32, #tpu.memory_space<vmem>>, vector<8x128xf32>
    tpu.vector_store %arg2[%c0_1, %c0_2], %2 {strides = array<i32>} : memref<8x128xf32, #tpu.memory_space<vmem>>, vector<8x128xf32>,
    return
  }
  func.func @transform_0(%arg0: i32) -> (i32, i32) {
    %c0_i32 = arith.constant 0 : i32
    %c0_i32_0 = arith.constant 0 : i32
    %c0_i32_1 = arith.constant 0 : i32
    return %c0_i32, %c0_i32_0 : i32, i32
  }
  func.func @transform_1(%arg0: i32) -> (i32, i32) {
    %c0_i32 = arith.constant 0 : i32
    %c0_i32_0 = arith.constant 0 : i32
    %c0_i32_1 = arith.constant 0 : i32
    return %c0_i32, %c0_i32_0 : i32, i32
  }
}

module attributes {stable_mosaic.version = 11 : i64} {
  func.func @_fused_head_kernel(%arg0: i32, %arg1: memref<8x1536xf32, #tpu.memory_space<vmem>>, %arg2: memref<1536x1536xbf16, #tpu.memory_space<vmem>>, %arg3: memref<1x1536xf32, #tpu.memory_space<vmem>>, %arg4: memref<1x1536xf32, #tpu.memory_space<vmem>>, %arg5: memref<1x1536xf32, #tpu.memory_space<vmem>>, %arg6: memref<1536x1536xbf16, #tpu.memory_space<vmem>>, %arg7: memref<1x1536xf32, #tpu.memory_space<vmem>>, %arg8: memref<1x1536xf32, #tpu.memory_space<vmem>>, %arg9: memref<1x1536xf32, #tpu.memory_space<vmem>>, %arg10: memref<1536x128xbf16, #tpu.memory_space<vmem>>, %arg11: memref<1x128xf32, #tpu.memory_space<vmem>>, %arg12: memref<8x128xf32, #tpu.memory_space<vmem>>, %arg13: memref<8x128xf32, #tpu.memory_space<vmem>>) attributes {dimension_semantics = [#tpu.dimension_semantics<arbitrary>], iteration_bounds = array<i64: 1>, scalar_prefetch = 0 : i64, scratch_operands = 0 : i64, tpu.core_type = #tpu.core_type<tc>, window_params = [{transform_indices = @transform_0, window_bounds = array<i64: 8, 1536>}, {pipeline_mode = #tpu.pipeline_mode<synchronous>, transform_indices = @transform_1, window_bounds = array<i64: 1536, 1536>}, {pipeline_mode = #tpu.pipeline_mode<synchronous>, transform_indices = @transform_2, window_bounds = array<i64: 1, 1536>}, {pipeline_mode = #tpu.pipeline_mode<synchronous>, transform_indices = @transform_3, window_bounds = array<i64: 1, 1536>}, {pipeline_mode = #tpu.pipeline_mode<synchronous>, transform_indices = @transform_4, window_bounds = array<i64: 1, 1536>}, {pipeline_mode = #tpu.pipeline_mode<synchronous>, transform_indices = @transform_5, window_bounds = array<i64: 1536, 1536>}, {pipeline_mode = #tpu.pipeline_mode<synchronous>, transform_indices = @transform_6, window_bounds = array<i64: 1, 1536>}, {pipeline_mode = #tpu.pipeline_mode<synchronous>, transform_indices = @transform_7, window_bounds = array<i64: 1, 1536>}, {pipeline_mode = #tpu.pipeline_mode<synchronous>, transform_indices = @transform_8, window_bounds = array<i64: 1, 1536>}, {pipeline_mode = #tpu.pipeline_mode<synchronous>, transform_indices = @transform_9, window_bounds = array<i64: 1536, 128>}, {pipeline_mode = #tpu.pipeline_mode<synchronous>, transform_indices = @transform_10, window_bounds = array<i64: 1, 128>}, {transform_indices = @transform_11, window_bounds = array<i64: 8, 128>}, {transform_indices = @transform_12, window_bounds = array<i64: 8, 128>}]} {
    %c0 = arith.constant 0 : index
    %c0_0 = arith.constant 0 : index
    %0 = vector.load %arg1[%c0, %c0_0] : memref<8x1536xf32, #tpu.memory_space<vmem>>, vector<8x1536xf32>
    %1 = arith.truncf %0 : vector<8x1536xf32> to vector<8x1536xbf16>
    %c0_1 = arith.constant 0 : index
    %c0_2 = arith.constant 0 : index
    %2 = vector.load %arg2[%c0_1, %c0_2] : memref<1536x1536xbf16, #tpu.memory_space<vmem>>, vector<1536x1536xbf16>
    %cst = arith.constant dense<0.000000e+00> : vector<8x1536xf32>
    %3 = tpu.matmul %1, %2, %cst {dimension_numbers = #tpu.dot_dimension_numbers<[1], [0], [0], [1], [0, 0, 1, 1], [], []>} : vector<8x1536xbf16>, vector<1536x1536xbf16>, vector<8x1536xf32> -> vector<8x1536xf32>
    %c0_3 = arith.constant 0 : index
    %c0_4 = arith.constant 0 : index
    %4 = vector.load %arg3[%c0_3, %c0_4] : memref<1x1536xf32, #tpu.memory_space<vmem>>, vector<1x1536xf32>
    %5 = vector.broadcast %4 : vector<1x1536xf32> to vector<8x1536xf32>
    %6 = arith.addf %3, %5 : vector<8x1536xf32>
    %c0_5 = arith.constant 0 : index
    %c0_6 = arith.constant 0 : index
    %7 = vector.load %arg4[%c0_5, %c0_6] : memref<1x1536xf32, #tpu.memory_space<vmem>>, vector<1x1536xf32>
    %c0_7 = arith.constant 0 : index
    %c0_8 = arith.constant 0 : index
    %8 = vector.load %arg5[%c0_7, %c0_8] : memref<1x1536xf32, #tpu.memory_space<vmem>>, vector<1x1536xf32>
    %cst_9 = arith.constant dense<0.000000e+00> : vector<8xf32>
    %9 = vector.multi_reduction <add>, %6, %cst_9 [1] : vector<8x1536xf32> to vector<8xf32>
    %10 = vector.shape_cast %9 : vector<8xf32> to vector<8x1xf32>
    %11 = arith.mulf %6, %6 : vector<8x1536xf32>
    %cst_10 = arith.constant dense<0.000000e+00> : vector<8xf32>
    %12 = vector.multi_reduction <add>, %11, %cst_10 [1] : vector<8x1536xf32> to vector<8xf32>
    %13 = vector.shape_cast %12 : vector<8xf32> to vector<8x1xf32>
    %cst_11 = arith.constant 6.51041686E-4 : f32
    %14 = vector.broadcast %cst_11 : f32 to vector<8x1xf32>
    %15 = arith.mulf %10, %14 : vector<8x1xf32>
    %cst_12 = arith.constant 6.51041686E-4 : f32
    %16 = vector.broadcast %cst_12 : f32 to vector<8x1xf32>
    %17 = arith.mulf %13, %16 : vector<8x1xf32>
    %18 = arith.mulf %15, %15 : vector<8x1xf32>
    %19 = arith.subf %17, %18 : vector<8x1xf32>
    %20 = vector.broadcast %15 : vector<8x1xf32> to vector<8x1536xf32>
    %21 = arith.subf %6, %20 : vector<8x1536xf32>
    %cst_13 = arith.constant 9.99999974E-6 : f32
    %22 = vector.broadcast %cst_13 : f32 to vector<8x1xf32>
    %23 = arith.addf %19, %22 : vector<8x1xf32>
    %24 = math.rsqrt %23 : vector<8x1xf32>
    %25 = vector.broadcast %24 : vector<8x1xf32> to vector<8x1536xf32>
    %26 = arith.mulf %21, %25 : vector<8x1536xf32>
    %27 = vector.broadcast %7 : vector<1x1536xf32> to vector<8x1536xf32>
    %28 = arith.mulf %26, %27 : vector<8x1536xf32>
    %29 = vector.broadcast %8 : vector<1x1536xf32> to vector<8x1536xf32>
    %30 = arith.addf %28, %29 : vector<8x1536xf32>
    %cst_14 = arith.constant 0.000000e+00 : f32
    %31 = vector.broadcast %cst_14 : f32 to vector<8x1536xf32>
    %32 = arith.maximumf %30, %31 : vector<8x1536xf32>
    %33 = arith.truncf %32 : vector<8x1536xf32> to vector<8x1536xbf16>
    %c0_15 = arith.constant 0 : index
    %c0_16 = arith.constant 0 : index
    %34 = vector.load %arg6[%c0_15, %c0_16] : memref<1536x1536xbf16, #tpu.memory_space<vmem>>, vector<1536x1536xbf16>
    %cst_17 = arith.constant dense<0.000000e+00> : vector<8x1536xf32>
    %35 = tpu.matmul %33, %34, %cst_17 {dimension_numbers = #tpu.dot_dimension_numbers<[1], [0], [0], [1], [0, 0, 1, 1], [], []>} : vector<8x1536xbf16>, vector<1536x1536xbf16>, vector<8x1536xf32> -> vector<8x1536xf32>
    %c0_18 = arith.constant 0 : index
    %c0_19 = arith.constant 0 : index
    %36 = vector.load %arg7[%c0_18, %c0_19] : memref<1x1536xf32, #tpu.memory_space<vmem>>, vector<1x1536xf32>
    %37 = vector.broadcast %36 : vector<1x1536xf32> to vector<8x1536xf32>
    %38 = arith.addf %35, %37 : vector<8x1536xf32>
    %c0_20 = arith.constant 0 : index
    %c0_21 = arith.constant 0 : index
    %39 = vector.load %arg8[%c0_20, %c0_21] : memref<1x1536xf32, #tpu.memory_space<vmem>>, vector<1x1536xf32>
    %c0_22 = arith.constant 0 : index
    %c0_23 = arith.constant 0 : index
    %40 = vector.load %arg9[%c0_22, %c0_23] : memref<1x1536xf32, #tpu.memory_space<vmem>>, vector<1x1536xf32>
    %cst_24 = arith.constant dense<0.000000e+00> : vector<8xf32>
    %41 = vector.multi_reduction <add>, %38, %cst_24 [1] : vector<8x1536xf32> to vector<8xf32>
    %42 = vector.shape_cast %41 : vector<8xf32> to vector<8x1xf32>
    %43 = arith.mulf %38, %38 : vector<8x1536xf32>
    %cst_25 = arith.constant dense<0.000000e+00> : vector<8xf32>
    %44 = vector.multi_reduction <add>, %43, %cst_25 [1] : vector<8x1536xf32> to vector<8xf32>
    %45 = vector.shape_cast %44 : vector<8xf32> to vector<8x1xf32>
    %cst_26 = arith.constant 6.51041686E-4 : f32
    %46 = vector.broadcast %cst_26 : f32 to vector<8x1xf32>
    %47 = arith.mulf %42, %46 : vector<8x1xf32>
    %cst_27 = arith.constant 6.51041686E-4 : f32
    %48 = vector.broadcast %cst_27 : f32 to vector<8x1xf32>
    %49 = arith.mulf %45, %48 : vector<8x1xf32>
    %50 = arith.mulf %47, %47 : vector<8x1xf32>
    %51 = arith.subf %49, %50 : vector<8x1xf32>
    %52 = vector.broadcast %47 : vector<8x1xf32> to vector<8x1536xf32>
    %53 = arith.subf %38, %52 : vector<8x1536xf32>
    %cst_28 = arith.constant 9.99999974E-6 : f32
    %54 = vector.broadcast %cst_28 : f32 to vector<8x1xf32>
    %55 = arith.addf %51, %54 : vector<8x1xf32>
    %56 = math.rsqrt %55 : vector<8x1xf32>
    %57 = vector.broadcast %56 : vector<8x1xf32> to vector<8x1536xf32>
    %58 = arith.mulf %53, %57 : vector<8x1536xf32>
    %59 = vector.broadcast %39 : vector<1x1536xf32> to vector<8x1536xf32>
    %60 = arith.mulf %58, %59 : vector<8x1536xf32>
    %61 = vector.broadcast %40 : vector<1x1536xf32> to vector<8x1536xf32>
    %62 = arith.addf %60, %61 : vector<8x1536xf32>
    %cst_29 = arith.constant 0.000000e+00 : f32
    %63 = vector.broadcast %cst_29 : f32 to vector<8x1536xf32>
    %64 = arith.maximumf %62, %63 : vector<8x1536xf32>
    %65 = arith.truncf %64 : vector<8x1536xf32> to vector<8x1536xbf16>
    %c0_30 = arith.constant 0 : index
    %c0_31 = arith.constant 0 : index
    %66 = vector.load %arg10[%c0_30, %c0_31] : memref<1536x128xbf16, #tpu.memory_space<vmem>>, vector<1536x128xbf16>
    %cst_32 = arith.constant dense<0.000000e+00> : vector<8x128xf32>
    %67 = tpu.matmul %65, %66, %cst_32 {dimension_numbers = #tpu.dot_dimension_numbers<[1], [0], [0], [1], [0, 0, 1, 1], [], []>} : vector<8x1536xbf16>, vector<1536x128xbf16>, vector<8x128xf32> -> vector<8x128xf32>
    %c0_33 = arith.constant 0 : index
    %c0_34 = arith.constant 0 : index
    %68 = vector.load %arg11[%c0_33, %c0_34] : memref<1x128xf32, #tpu.memory_space<vmem>>, vector<1x128xf32>
    %69 = vector.broadcast %68 : vector<1x128xf32> to vector<8x128xf32>
    %70 = arith.addf %67, %69 : vector<8x128xf32>
    %c0_35 = arith.constant 0 : index
    %c0_36 = arith.constant 0 : index
    %71 = vector.load %arg12[%c0_35, %c0_36] : memref<8x128xf32, #tpu.memory_space<vmem>>, vector<8x128xf32>
    tpu.vector_store %arg12[%c0_35, %c0_36], %70 {strides = array<i32>} : memref<8x128xf32, #tpu.memory_space<vmem>>, vector<8x128xf32>,
    %cst_37 = arith.constant dense<0xFF800000> : vector<8xf32>
    %72 = vector.multi_reduction <maximumf>, %70, %cst_37 [1] : vector<8x128xf32> to vector<8xf32>
    %73 = vector.shape_cast %72 : vector<8xf32> to vector<8x1xf32>
    %74 = vector.broadcast %73 : vector<8x1xf32> to vector<8x128xf32>
    %75 = arith.subf %70, %74 : vector<8x128xf32>
    %76 = math.exp %75 : vector<8x128xf32>
    %cst_38 = arith.constant dense<0.000000e+00> : vector<8xf32>
    %77 = vector.multi_reduction <add>, %76, %cst_38 [1] : vector<8x128xf32> to vector<8xf32>
    %78 = vector.shape_cast %77 : vector<8xf32> to vector<8x1xf32>
    %79 = tpu.reciprocal %78 {approx = true} : vector<8x1xf32> -> vector<8x1xf32>
    %80 = vector.broadcast %79 : vector<8x1xf32> to vector<8x128xf32>
    %81 = arith.mulf %76, %80 : vector<8x128xf32>
    %c0_39 = arith.constant 0 : index
    %c0_40 = arith.constant 0 : index
    %82 = vector.load %arg13[%c0_39, %c0_40] : memref<8x128xf32, #tpu.memory_space<vmem>>, vector<8x128xf32>
    tpu.vector_store %arg13[%c0_39, %c0_40], %81 {strides = array<i32>} : memref<8x128xf32, #tpu.memory_space<vmem>>, vector<8x128xf32>,
    return
  }
  func.func @transform_0(%arg0: i32) -> (i32, i32) {
    %c0_i32 = arith.constant 0 : i32
    %c0_i32_0 = arith.constant 0 : i32
    return %arg0, %c0_i32 : i32, i32
  }
  func.func @transform_1(%arg0: i32) -> (i32, i32) {
    %c0_i32 = arith.constant 0 : i32
    %c0_i32_0 = arith.constant 0 : i32
    %c0_i32_1 = arith.constant 0 : i32
    return %c0_i32, %c0_i32_0 : i32, i32
  }
  func.func @transform_2(%arg0: i32) -> (i32, i32) {
    %c0_i32 = arith.constant 0 : i32
    %c0_i32_0 = arith.constant 0 : i32
    %c0_i32_1 = arith.constant 0 : i32
    return %c0_i32, %c0_i32_0 : i32, i32
  }
  func.func @transform_3(%arg0: i32) -> (i32, i32) {
    %c0_i32 = arith.constant 0 : i32
    %c0_i32_0 = arith.constant 0 : i32
    %c0_i32_1 = arith.constant 0 : i32
    return %c0_i32, %c0_i32_0 : i32, i32
  }
  func.func @transform_4(%arg0: i32) -> (i32, i32) {
    %c0_i32 = arith.constant 0 : i32
    %c0_i32_0 = arith.constant 0 : i32
    %c0_i32_1 = arith.constant 0 : i32
    return %c0_i32, %c0_i32_0 : i32, i32
  }
  func.func @transform_5(%arg0: i32) -> (i32, i32) {
    %c0_i32 = arith.constant 0 : i32
    %c0_i32_0 = arith.constant 0 : i32
    %c0_i32_1 = arith.constant 0 : i32
    return %c0_i32, %c0_i32_0 : i32, i32
  }
  func.func @transform_6(%arg0: i32) -> (i32, i32) {
    %c0_i32 = arith.constant 0 : i32
    %c0_i32_0 = arith.constant 0 : i32
    %c0_i32_1 = arith.constant 0 : i32
    return %c0_i32, %c0_i32_0 : i32, i32
  }
  func.func @transform_7(%arg0: i32) -> (i32, i32) {
    %c0_i32 = arith.constant 0 : i32
    %c0_i32_0 = arith.constant 0 : i32
    %c0_i32_1 = arith.constant 0 : i32
    return %c0_i32, %c0_i32_0 : i32, i32
  }
  func.func @transform_8(%arg0: i32) -> (i32, i32) {
    %c0_i32 = arith.constant 0 : i32
    %c0_i32_0 = arith.constant 0 : i32
    %c0_i32_1 = arith.constant 0 : i32
    return %c0_i32, %c0_i32_0 : i32, i32
  }
  func.func @transform_9(%arg0: i32) -> (i32, i32) {
    %c0_i32 = arith.constant 0 : i32
    %c0_i32_0 = arith.constant 0 : i32
    %c0_i32_1 = arith.constant 0 : i32
    return %c0_i32, %c0_i32_0 : i32, i32
  }
  func.func @transform_10(%arg0: i32) -> (i32, i32) {
    %c0_i32 = arith.constant 0 : i32
    %c0_i32_0 = arith.constant 0 : i32
    %c0_i32_1 = arith.constant 0 : i32
    return %c0_i32, %c0_i32_0 : i32, i32
  }
  func.func @transform_11(%arg0: i32) -> (i32, i32) {
    %c0_i32 = arith.constant 0 : i32
    %c0_i32_0 = arith.constant 0 : i32
    return %arg0, %c0_i32 : i32, i32
  }
  func.func @transform_12(%arg0: i32) -> (i32, i32) {
    %c0_i32 = arith.constant 0 : i32
    %c0_i32_0 = arith.constant 0 : i32
    return %arg0, %c0_i32 : i32, i32
  }
}

</mosaic_0001>

<bundles_post_ra>
// kernel: tpu_custom_call.1
= control target key start
LH: loop header
LB: loop body
LE: loop exit
PB: predicated region body
PF: predicated region fallthrough
CT: control target
= control target key end

     0   :  { %6 = vsyncpa [#allocation3], 0  ;;  %s305_s0 = inlined_call_operand.hbm [shape: f32[8,128], index: 0, kind: input, shape index: {}]   ;;  %s306_s1 = inlined_call_operand.hbm [shape: f32[8,128], index: 1, kind: output, shape index: {}]  }
   0x1   :  { %7 = vsyncpa [#allocation4], 0  ;;  %s258_s6 = smov 0  }
   0x2 LB: > { %s145_s7 = sadd.s32 4294967295, %s244_s6   ;;  %p146_p0 = scmp.ge.s32.totalorder %s244_s6, 1  ;;  %s244_s6 = sphi %s258_s6, %s13_s6  }
   0x3   : > { %p60_p1 = scmp.lt.s32.totalorder %s244_s6, 3  ;;  %p270_p3 = scmp.eq.s32.totalorder %s145_s7, 0 }
   0x4   : > { %s246_s10 = smov [#allocation2]  }
   0x5   : > { %p266_p2 = pnand %p146_p0, %p60_p1  ;;  %s73_s11 = sshll.u32 %s246_s10, 4  ;;  %s74_s11 = int_to_ptr.vmem [resolvable:$true] %s73_s11 }
   0x6   : > { %s191_s12 = scalar_lea.vmem %s74_s11, 128  ;;  %p199_p10 = scmp.lt.s32.totalorder %s74_s11, %s74_s11 }
   0x7   : > { %p162_p4 = pneg %p266_p2  ;;  %p192_p7 = scmp.ne.s32.totalorder %s74_s11, %s191_s12 }
   0x8   : > { %p200_p11 = scmp.lt.s32.totalorder %s191_s12, %s191_s12 }
   0x9   : > { %p163_p5 = pnand %p270_p3, %p162_p4 }
   0xa   : > { %p201_p12 = por %p200_p11, %p199_p10 }
   0xb   : > { %p182_p6 = pneg %p163_p5 }
   0xd   : > { %p194_p8 = pnand %p192_p7, %p182_p6 }
   0xf   : > { %p195_p9 = pneg %p194_p8 }
  0x11   : > { %p202_p13 = pnand %p201_p12, %p195_p9 }
  0x13   : > { %205 = shalt.err (!%p202_p13)
}
  0x14   : > { %165 = dma.hbm_to_vmem [thread:$0]  (!%p163_p5), %s305_s0, 128, %s74_s11, [#allocation3]  }
  0x15   : > { %86 = sbr.rel (%p266_p2) target bundleno = 42 (0x2a), region = 24 }
  0x1a   : > { %235 = dma.done.wait (%p270_p3), [#allocation3], 128  }
  0x1b   : > { %237 = vsyncadd (%p270_p3), [#allocation3], 4294967168  ;;  %s247_s15 = smov [#allocation5]   ;;  %v96_v0 = vld [vmem:[#allocation2] sm:$0xff]  ;;  %p287_p0 = scmp.eq.s32.totalorder %s145_s7, 1 }
  0x1c   : > { %s106_s16 = sshll.u32 %s247_s15, 4  ;;  %v97_v1 = vadd.f32 1.0, %v96_v0  ;;  %s107_s16 = int_to_ptr.vmem [resolvable:$true] %s106_s16 }
  0x1d   : > { %s206_s18 = scalar_lea.vmem %s107_s16, 128  ;;  %p213_p5 = scmp.lt.s32.totalorder %s107_s16, %s107_s16 }
  0x1e   : > { %98 = vst [vmem:[#allocation5] sm:$0xff] %v97_v1  ;;  %p207_p1 = scmp.ne.s32.totalorder %s107_s16, %s206_s18  ;;  %p214_p6 = scmp.lt.s32.totalorder %s206_s18, %s206_s18 }
  0x20   : > { %p208_p2 = pnand %p207_p1, %p287_p0  ;;  %p215_p7 = por %p214_p6, %p213_p5 }
  0x22   : > { %p209_p4 = pneg %p208_p2 }
  0x24   : > { %p216_p3 = pnand %p215_p7, %p209_p4 }
  0x26   : > { %219 = shalt.err (!%p216_p3)
}
  0x27   : > { %159 = dma.vmem_to_hbm [thread:$0]  (%p287_p0), %s107_s16, 128, %s306_s1, [#allocation4]  }
  0x28   : > { %239 = dma.done.wait (%p287_p0), [#allocation4], 128  }
  0x29   : > { %241 = vsyncadd (%p287_p0), [#allocation4], 4294967168 }
  0x2a PF: > { %s13_s6 = sadd.s32 1, %s244_s6  }
  0x2b   : > { %p10_p8 = scmp.ge.s32.totalorder %s13_s6, 4  }
  0x2d   :  { %12 = sbr.rel (!%p10_p8) target bundleno = 2 (0x2), region = 53 }
  0x32   :  { %119 = vsyncpa [#allocation3], 1 }
  0x33   :  { %121 = vsyncpa [#allocation3 + $0x1], 1 }
  0x34   :  { %122 = vsyncpa [#allocation4], 1 }
  0x35   :  { %124 = vsyncpa [#allocation4 + $0x1], 1 }

// kernel: _fused_head_impl.1
= control target key start
LH: loop header
LB: loop body
LE: loop exit
PB: predicated region body
PF: predicated region fallthrough
CT: control target
= control target key end

     0   :  { %18 = vsyncpa [#allocation3], 0  ;;  %s25786_s0 = inlined_call_operand.vmem [shape: f32[8,1536], index: 0, kind: input, shape index: {}]   ;;  %s25787_s1 = inlined_call_operand.hbm [shape: bf16[1536,1536], index: 1, kind: input, shape index: {}]   ;;  %s25788_s2 = inlined_call_operand.hbm [shape: f32[1,1536], index: 2, kind: input, shape index: {}]   ;;  %s25789_s3 = inlined_call_operand.hbm [shape: f32[1,1536], index: 3, kind: input, shape index: {}]   ;;  %s25790_s4 = inlined_call_operand.hbm [shape: f32[1,1536], index: 4, kind: input, shape index: {}]   ;;  %s25791_s5 = inlined_call_operand.hbm [shape: bf16[1536,1536], index: 5, kind: input, shape index: {}]   ;;  %s25792_s6 = inlined_call_operand.hbm [shape: f32[1,1536], index: 6, kind: input, shape index: {}]   ;;  %s25793_s7 = inlined_call_operand.hbm [shape: f32[1,1536], index: 7, kind: input, shape index: {}]   ;;  %s25794_s8 = inlined_call_operand.hbm [shape: f32[1,1536], index: 8, kind: input, shape index: {}]   ;;  %s25795_s9 = inlined_call_operand.hbm [shape: bf16[1536,128], index: 9, kind: input, shape index: {}]   ;;  %s25796_s10 = inlined_call_operand.hbm [shape: f32[1,128], index: 10, kind: input, shape index: {}]   ;;  %s25797_s11 = inlined_call_operand.vmem [shape: f32[8,128], index: 11, kind: output, shape index: {0}]   ;;  %s25798_s12 = inlined_call_operand.vmem [shape: f32[8,128], index: 12, kind: output, shape index: {1}]  }
   0x1   :  { %19 = vsyncpa [#allocation5], 0 }
   0x2   :  { %20 = vsyncpa [#allocation8], 0 }
   0x3   :  { %21 = vsyncpa [#allocation11], 0 }
   0x4   :  { %22 = vsyncpa [#allocation14], 0 }
   0x5   :  { %23 = vsyncpa [#allocation17], 0  ;;  %s24943_s21 = smov [#allocation4]   ;;  %s24944_s23 = smov [#allocation7]  }
   0x6   :  { %s44_s22 = sshll.u32 %s24943_s21, 4  ;;  %s64_s24 = sshll.u32 %s24944_s23, 4  ;;  %s45_s22 = int_to_ptr.vmem [resolvable:$true] %s44_s22  ;;  %s65_s24 = int_to_ptr.vmem [resolvable:$true] %s64_s24 }
   0x7   :  { %s24739_s25 = scalar_lea.vmem %s45_s22, 192  ;;  %p24744_p1 = scmp.lt.s32.totalorder %s45_s22, %s45_s22 }
   0x8   :  { %p24740_p0 = scmp.ne.s32.totalorder %s45_s22, %s24739_s25  ;;  %p24745_p2 = scmp.lt.s32.totalorder %s24739_s25, %s24739_s25 }
   0xa   :  { %p24746_p3 = por %p24745_p2, %p24744_p1 }
   0xc   :  { %p24747_p4 = pnand %p24746_p3, %p24740_p0 }
   0xe   :  { %24750 = shalt.err (!%p24747_p4)
}
   0xf   :  { %47 = dma.hbm_to_vmem [thread:$0]  %s25788_s2, 192, %s45_s22, [#allocation5]  }
  0x10   :  { %s24759_s28 = scalar_lea.vmem %s65_s24, 192  ;;  %p24764_p6 = scmp.lt.s32.totalorder %s65_s24, %s65_s24 }
  0x11   :  { %p24760_p5 = scmp.ne.s32.totalorder %s65_s24, %s24759_s28  ;;  %p24765_p7 = scmp.lt.s32.totalorder %s24759_s28, %s24759_s28 }
  0x13   :  { %p24766_p8 = por %p24765_p7, %p24764_p6 }
  0x15   :  { %p24767_p9 = pnand %p24766_p8, %p24760_p5 }
  0x17   :  { %24770 = shalt.err (!%p24767_p9)
}
  0x18   :  { %67 = dma.hbm_to_vmem [thread:$0]  %s25790_s4, 192, %s65_s24, [#allocation8]  }
  0x19   :  { %s24945_s13 = smov [#allocation10]   ;;  %s24946_s15 = smov [#allocation13]  }
  0x1a   :  { %s86_s14 = sshll.u32 %s24945_s13, 4  ;;  %s106_s16 = sshll.u32 %s24946_s15, 4  ;;  %s87_s14 = int_to_ptr.vmem [resolvable:$true] %s86_s14  ;;  %s107_s16 = int_to_ptr.vmem [resolvable:$true] %s106_s16 }
  0x1b   :  { %s24779_s17 = scalar_lea.vmem %s87_s14, 192  ;;  %p24784_p11 = scmp.lt.s32.totalorder %s87_s14, %s87_s14 }
  0x1c   :  { %p24780_p10 = scmp.ne.s32.totalorder %s87_s14, %s24779_s17  ;;  %p24785_p12 = scmp.lt.s32.totalorder %s24779_s17, %s24779_s17 }
  0x1e   :  { %p24786_p13 = por %p24785_p12, %p24784_p11 }
  0x20   :  { %p24787_p0 = pnand %p24786_p13, %p24780_p10 }
  0x22   :  { %24790 = shalt.err (!%p24787_p0)
}
  0x23   :  { %89 = dma.hbm_to_vmem [thread:$0]  %s25792_s6, 192, %s87_s14, [#allocation11]  }
  0x24   :  { %s24799_s19 = scalar_lea.vmem %s107_s16, 192  ;;  %p24804_p2 = scmp.lt.s32.totalorder %s107_s16, %s107_s16 }
  0x25   :  { %p24800_p1 = scmp.ne.s32.totalorder %s107_s16, %s24799_s19  ;;  %p24805_p3 = scmp.lt.s32.totalorder %s24799_s19, %s24799_s19 }
  0x27   :  { %p24806_p4 = por %p24805_p3, %p24804_p2 }
  0x29   :  { %p24807_p5 = pnand %p24806_p4, %p24800_p1 }
  0x2b   :  { %24810 = shalt.err (!%p24807_p5)
}
  0x2c   :  { %109 = dma.hbm_to_vmem [thread:$0]  %s25794_s8, 192, %s107_s16, [#allocation14]  }
  0x2d   :  { %s24947_s21 = smov [#allocation2]  }
  0x2e   :  { %s31_s22 = sshll.u32 %s24947_s21, 4  ;;  %s32_s22 = int_to_ptr.vmem [resolvable:$true] %s31_s22 }
  0x2f   :  { %s24819_s23 = scalar_lea.vmem %s32_s22, 147456  ;;  %p24824_p7 = scmp.lt.s32.totalorder %s32_s22, %s32_s22 }
  0x30   :  { %p24820_p6 = scmp.ne.s32.totalorder %s32_s22, %s24819_s23  ;;  %p24825_p8 = scmp.lt.s32.totalorder %s24819_s23, %s24819_s23 }
  0x32   :  { %p24826_p9 = por %p24825_p8, %p24824_p7 }
  0x34   :  { %p24827_p10 = pnand %p24826_p9, %p24820_p6 }
  0x36   :  { %24830 = shalt.err (!%p24827_p10)
}
  0x37   :  { %s24948_s6 = smov 768   ;;  %s24949_s24 = smov 48  }
  0x38   :  { %37 = dma.hbm_to_vmem [thread:$0]  %s25787_s1, 147456, %s32_s22, [#allocation3], %s24948_s6, %s24948_s6, %s24949_s24  }
  0x39   :  { %s24950_s27 = smov [#allocation6]   ;;  %s24951_s8 = smov [#allocation9]  }
  0x3a   :  { %s54_s28 = sshll.u32 %s24950_s27, 4  ;;  %s73_s29 = sshll.u32 %s24951_s8, 4  ;;  %s55_s28 = int_to_ptr.vmem [resolvable:$true] %s54_s28  ;;  %s74_s29 = int_to_ptr.vmem [resolvable:$true] %s73_s29 }
  0x3b   :  { %s24839_s30 = scalar_lea.vmem %s55_s28, 192  ;;  %p24844_p12 = scmp.lt.s32.totalorder %s55_s28, %s55_s28 }
  0x3c   :  { %p24840_p11 = scmp.ne.s32.totalorder %s55_s28, %s24839_s30  ;;  %p24845_p13 = scmp.lt.s32.totalorder %s24839_s30, %s24839_s30 }
  0x3e   :  { %p24846_p0 = por %p24845_p13, %p24844_p12 }
  0x40   :  { %p24847_p1 = pnand %p24846_p0, %p24840_p11 }
  0x42   :  { %24850 = shalt.err (!%p24847_p1)
}
  0x43   :  { %57 = dma.hbm_to_vmem [thread:$0]  %s25789_s3, 192, %s55_s28, [#allocation5]  }
  0x44   :  { %s24859_s15 = scalar_lea.vmem %s74_s29, 147456  ;;  %p24864_p3 = scmp.lt.s32.totalorder %s74_s29, %s74_s29 }
  0x45   :  { %p24860_p2 = scmp.ne.s32.totalorder %s74_s29, %s24859_s15  ;;  %p24865_p4 = scmp.lt.s32.totalorder %s24859_s15, %s24859_s15 }
  0x47   :  { %p24866_p5 = por %p24865_p4, %p24864_p3 }
  0x49   :  { %p24867_p6 = pnand %p24866_p5, %p24860_p2 }
  0x4b   :  { %24870 = shalt.err (!%p24867_p6)
}
  0x4c   :  { %79 = dma.hbm_to_vmem [thread:$0]  %s25791_s5, 147456, %s74_s29, [#allocation8], %s24948_s6, %s24948_s6, %s24949_s24  }
  0x4d   :  { %s24952_s17 = smov [#allocation12]   ;;  %s24953_s18 = smov [#allocation15]  }
  0x4e   :  { %s96_s2 = sshll.u32 %s24952_s17, 4  ;;  %s115_s19 = sshll.u32 %s24953_s18, 4  ;;  %s97_s2 = int_to_ptr.vmem [resolvable:$true] %s96_s2  ;;  %s116_s19 = int_to_ptr.vmem [resolvable:$true] %s115_s19 }
  0x4f   :  { %s24879_s4 = scalar_lea.vmem %s97_s2, 192  ;;  %p24884_p8 = scmp.lt.s32.totalorder %s97_s2, %s97_s2 }
  0x50   :  { %p24880_p7 = scmp.ne.s32.totalorder %s97_s2, %s24879_s4  ;;  %p24885_p9 = scmp.lt.s32.totalorder %s24879_s4, %s24879_s4 }
  0x52   :  { %p24886_p10 = por %p24885_p9, %p24884_p8 }
  0x54   :  { %p24887_p11 = pnand %p24886_p10, %p24880_p7 }
  0x56   :  { %24890 = shalt.err (!%p24887_p11)
}
  0x57   :  { %99 = dma.hbm_to_vmem [thread:$0]  %s25793_s7, 192, %s97_s2, [#allocation11]  }
  0x58   :  { %s24899_s21 = scalar_lea.vmem %s116_s19, 12288  ;;  %p24904_p13 = scmp.lt.s32.totalorder %s116_s19, %s116_s19 }
  0x59   :  { %p24900_p12 = scmp.ne.s32.totalorder %s116_s19, %s24899_s21  ;;  %p24905_p0 = scmp.lt.s32.totalorder %s24899_s21, %s24899_s21 }
  0x5b   :  { %p24906_p1 = por %p24905_p0, %p24904_p13 }
  0x5d   :  { %p24907_p2 = pnand %p24906_p1, %p24900_p12 }
  0x5f   :  { %24910 = shalt.err (!%p24907_p2)
}
  0x60   :  { %s24954_s5 = smov 64   ;;  %s24955_s22 = smov 4  }
  0x61   :  { %121 = dma.hbm_to_vmem [thread:$0]  %s25795_s9, 12288, %s116_s19, [#allocation14], %s24954_s5, %s24954_s5, %s24955_s22  }
  0x62   :  { %s24956_s24 = smov [#allocation16]  }
  0x63   :  { %s128_s25 = sshll.u32 %s24956_s24, 4  ;;  %s129_s25 = int_to_ptr.vmem [resolvable:$true] %s128_s25 }
  0x64   :  { %s24919_s26 = scalar_lea.vmem %s129_s25, 16  ;;  %s24923_s7 = scalar_lea.vmem %s129_s25, 32 }
  0x65   :  { %p24920_p3 = scmp.ne.s32.totalorder %s129_s25, %s24919_s26  ;;  %p24924_p4 = scmp.lt.s32.totalorder %s129_s25, %s129_s25 }
  0x66   :  { %p24925_p5 = scmp.lt.s32.totalorder %s24923_s7, %s24919_s26 }
  0x68   :  { %p24926_p6 = por %p24925_p5, %p24924_p4 }
  0x6a   :  { %p24927_p7 = pnand %p24926_p6, %p24920_p3 }
  0x6c   :  { %24930 = shalt.err (!%p24927_p7)
}
  0x6d   :  { %131 = dma.hbm_to_vmem [thread:$0]  %s25796_s10, 16, %s129_s25, [#allocation17]  }
  0x6e   :  { %24931 = dma.done.wait [#allocation3], 147456  }
  0x6f   :  { %24932 = vsyncadd [#allocation3], 4294819840 }
  0x70   :  { %24933 = dma.done.wait [#allocation5], 384  }
  0x71   :  { %24934 = vsyncadd [#allocation5], 4294966912 }
  0x72   :  { %24935 = dma.done.wait [#allocation8], 147648  }
  0x73   :  { %24936 = vsyncadd [#allocation8], 4294819648 }
  0x74   :  { %24937 = dma.done.wait [#allocation11], 384  }
  0x75   :  { %24938 = vsyncadd [#allocation11], 4294966912 }
  0x76   :  { %24939 = dma.done.wait [#allocation14], 12480  }
  0x77   :  { %24940 = vsyncadd [#allocation14], 4294954816 }
  0x78   :  { %24941 = dma.done.wait [#allocation17], 16  }
  0x79   :  { %24942 = vsyncadd [#allocation17], 4294967280  ;;  %v21166_v0 = vld [vmem:[#allocation2 + $0x2a4] ss:$48 sps:$4 sm:$0xff]   ;;  %v21170_v2 = vld [vmem:[#allocation2 + $0x2a0] ss:$48 sps:$4 sm:$0xff]  }
  0x7a   :  { %v21168_v1 = vld [vmem:[#allocation2 + $0x8a4] ss:$48 sps:$4 sm:$0xff]   ;;  %7163 = vmatprep.subr.bf16.mxu0 %v21166_v0  ;;  %v21171_v3 = vld [vmem:[#allocation2 + $0x8a0] ss:$48 sps:$4 sm:$0xff]   ;;  %v164_v46 = vld [vmem:[%s25786_s0 + $0x8] sm:$0xff] }
  0x7b   :  { %7204 = vmatprep.subr.bf16.mxu1 %v21168_v1  ;;  %v21172_v4 = vld [vmem:[#allocation2 + $0x244] ss:$48 sps:$4 sm:$0xff]   ;;  %7164 = vmatpush1.bf16.msra.mxu0 %v21170_v2  ;;  %v21176_v6 = vld [vmem:[#allocation2 + $0x240] ss:$48 sps:$4 sm:$0xff]   ;;  %v25055_v49 = vpack.c.bf16 %v164_v46, %v164_v46  ;;  %v166_v50 = vld [vmem:[%s25786_s0 + $0x18] sm:$0xff] }
  0x7c   :  { %7205 = vmatpush1.bf16.msra.mxu1 %v21171_v3  ;;  %v21174_v5 = vld [vmem:[#allocation2 + $0x844] ss:$48 sps:$4 sm:$0xff]   ;;  %7165 = vmatprep.subr.bf16.mxu0 %v21172_v4  ;;  %v21177_v7 = vld [vmem:[#allocation2 + $0x840] ss:$48 sps:$4 sm:$0xff]   ;;  %v25060_v52 = vpack.c.bf16 %v166_v50, %v166_v50 }
  0x7d   :  { %7206 = vmatprep.subr.bf16.mxu1 %v21174_v5  ;;  %v21178_v8 = vld [vmem:[#allocation2 + $0x1e4] ss:$48 sps:$4 sm:$0xff]   ;;  %v21182_v10 = vld [vmem:[#allocation2 + $0x1e0] ss:$48 sps:$4 sm:$0xff]   ;;  %7195 = vmatprep.mubr.bf16.mxu0 %v25055_v49 }
  0x7e   :  { %v21180_v9 = vld [vmem:[#allocation2 + $0x7e4] ss:$48 sps:$4 sm:$0xff]   ;;  %v21183_v11 = vld [vmem:[#allocation2 + $0x7e0] ss:$48 sps:$4 sm:$0xff]   ;;  %7236 = vmatprep.mubr.bf16.mxu1 %v25060_v52 }
  0x7f   :  { %7166 = vmatpush1.bf16.msra.mxu0 %v21176_v6  ;;  %v21184_v12 = vld [vmem:[#allocation2 + $0x184] ss:$48 sps:$4 sm:$0xff]   ;;  %v21188_v14 = vld [vmem:[#allocation2 + $0x180] ss:$48 sps:$4 sm:$0xff]  }
  0x80   :  { %7207 = vmatpush1.bf16.msra.mxu1 %v21177_v7  ;;  %7167 = vmatprep.subr.bf16.mxu0 %v21178_v8  ;;  %v21186_v13 = vld [vmem:[#allocation2 + $0x784] ss:$48 sps:$4 sm:$0xff]   ;;  %v21189_v15 = vld [vmem:[#allocation2 + $0x780] ss:$48 sps:$4 sm:$0xff]  }
  0x81   :  { %7208 = vmatprep.subr.bf16.mxu1 %v21180_v9  ;;  %v21190_v16 = vld [vmem:[#allocation2 + $0x124] ss:$48 sps:$4 sm:$0xff]   ;;  %v21194_v18 = vld [vmem:[#allocation2 + $0x120] ss:$48 sps:$4 sm:$0xff]  }
  0x82   :  { %v21192_v17 = vld [vmem:[#allocation2 + $0x724] ss:$48 sps:$4 sm:$0xff]   ;;  %v21195_v19 = vld [vmem:[#allocation2 + $0x720] ss:$48 sps:$4 sm:$0xff]  }
  0x83   :  { %7168 = vmatpush1.bf16.msra.mxu0 %v21182_v10  ;;  %v21196_v20 = vld [vmem:[#allocation2 + $0xc4] ss:$48 sps:$4 sm:$0xff]   ;;  %v21200_v22 = vld [vmem:[#allocation2 + $0xc0] ss:$48 sps:$4 sm:$0xff]  }
  0x84   :  { %7209 = vmatpush1.bf16.msra.mxu1 %v21183_v11  ;;  %7169 = vmatprep.subr.bf16.mxu0 %v21184_v12  ;;  %v21198_v21 = vld [vmem:[#allocation2 + $0x6c4] ss:$48 sps:$4 sm:$0xff]   ;;  %v21201_v23 = vld [vmem:[#allocation2 + $0x6c0] ss:$48 sps:$4 sm:$0xff]  }
  0x85   :  { %7210 = vmatprep.subr.bf16.mxu1 %v21186_v13  ;;  %v21202_v24 = vld [vmem:[#allocation2 + $0x64] ss:$48 sps:$4 sm:$0xff]   ;;  %v21206_v26 = vld [vmem:[#allocation2 + $0x60] ss:$48 sps:$4 sm:$0xff]  }
  0x86   :  { %v21204_v25 = vld [vmem:[#allocation2 + $0x664] ss:$48 sps:$4 sm:$0xff]   ;;  %v21207_v27 = vld [vmem:[#allocation2 + $0x660] ss:$48 sps:$4 sm:$0xff]  }
  0x87   :  { %7170 = vmatpush1.bf16.msra.mxu0 %v21188_v14  ;;  %v21208_v28 = vld [vmem:[#allocation2 + $0x4] ss:$48 sps:$4 sm:$0xff]   ;;  %v21212_v30 = vld [vmem:[#allocation2] ss:$48 sps:$4 sm:$0xff]  }
  0x88   :  { %7211 = vmatpush1.bf16.msra.mxu1 %v21189_v15  ;;  %7171 = vmatprep.subr.bf16.mxu0 %v21190_v16  ;;  %v21210_v29 = vld [vmem:[#allocation2 + $0x604] ss:$48 sps:$4 sm:$0xff]   ;;  %v21213_v31 = vld [vmem:[#allocation2 + $0x600] ss:$48 sps:$4 sm:$0xff]  }
  0x89   :  { %7212 = vmatprep.subr.bf16.mxu1 %v21192_v17  ;;  %v21214_v32 = vld [vmem:[#allocation2 + $0x5a4] ss:$48 sps:$4 sm:$0xff]   ;;  %v21218_v34 = vld [vmem:[#allocation2 + $0x5a0] ss:$48 sps:$4 sm:$0xff]  }
  0x8a   :  { %v21216_v33 = vld [vmem:[#allocation2 + $0xba4] ss:$48 sps:$4 sm:$0xff]   ;;  %v21219_v35 = vld [vmem:[#allocation2 + $0xba0] ss:$48 sps:$4 sm:$0xff]  }
  0x8b   :  { %7172 = vmatpush1.bf16.msra.mxu0 %v21194_v18  ;;  %v21220_v36 = vld [vmem:[#allocation2 + $0x544] ss:$48 sps:$4 sm:$0xff]   ;;  %v21224_v38 = vld [vmem:[#allocation2 + $0x540] ss:$48 sps:$4 sm:$0xff]  }
  0x8c   :  { %7213 = vmatpush1.bf16.msra.mxu1 %v21195_v19  ;;  %7173 = vmatprep.subr.bf16.mxu0 %v21196_v20  ;;  %v21222_v37 = vld [vmem:[#allocation2 + $0xb44] ss:$48 sps:$4 sm:$0xff]   ;;  %v21225_v39 = vld [vmem:[#allocation2 + $0xb40] ss:$48 sps:$4 sm:$0xff]  }
  0x8d   :  { %7214 = vmatprep.subr.bf16.mxu1 %v21198_v21  ;;  %v21226_v40 = vld [vmem:[#allocation2 + $0x4e4] ss:$48 sps:$4 sm:$0xff]   ;;  %v21230_v42 = vld [vmem:[#allocation2 + $0x4e0] ss:$48 sps:$4 sm:$0xff]  }
  0x8e   :  { %v21228_v41 = vld [vmem:[#allocation2 + $0xae4] ss:$48 sps:$4 sm:$0xff]   ;;  %v21231_v43 = vld [vmem:[#allocation2 + $0xae0] ss:$48 sps:$4 sm:$0xff]  }
  0x8f   :  { %7174 = vmatpush1.bf16.msra.mxu0 %v21200_v22  ;;  %v21232_v44 = vld [vmem:[#allocation2 + $0x484] ss:$48 sps:$4 sm:$0xff]   ;;  %v21236_v47 = vld [vmem:[#allocation2 + $0x480] ss:$48 sps:$4 sm:$0xff]  }
  0x90   :  { %7215 = vmatpush1.bf16.msra.mxu1 %v21201_v23  ;;  %7175 = vmatprep.subr.bf16.mxu0 %v21202_v24  ;;  %v21234_v45 = vld [vmem:[#allocation2 + $0xa84] ss:$48 sps:$4 sm:$0xff]   ;;  %v21237_v48 = vld [vmem:[#allocation2 + $0xa80] ss:$48 sps:$4 sm:$0xff]  }
  0x91   :  { %7216 = vmatprep.subr.bf16.mxu1 %v21204_v25  ;;  %v21238_v51 = vld [vmem:[#allocation2 + $0x424] ss:$48 sps:$4 sm:$0xff]   ;;  %v21242_v54 = vld [vmem:[#allocation2 + $0x420] ss:$48 sps:$4 sm:$0xff]  }
  0x92   :  { %v21240_v53 = vld [vmem:[#allocation2 + $0xa24] ss:$48 sps:$4 sm:$0xff]   ;;  %v21243_v55 = vld [vmem:[#allocation2 + $0xa20] ss:$48 sps:$4 sm:$0xff]  }
  0x93   :  { %7176 = vmatpush1.bf16.msra.mxu0 %v21206_v26  ;;  %v21244_v56 = vld [vmem:[#allocation2 + $0x3c4] ss:$48 sps:$4 sm:$0xff]   ;;  %v21248_v58 = vld [vmem:[#allocation2 + $0x3c0] ss:$48 sps:$4 sm:$0xff]  }
  0x94   :  { %7217 = vmatpush1.bf16.msra.mxu1 %v21207_v27  ;;  %7177 = vmatprep.subr.bf16.mxu0 %v21208_v28  ;;  %v21246_v57 = vld [vmem:[#allocation2 + $0x9c4] ss:$48 sps:$4 sm:$0xff]   ;;  %v21249_v59 = vld [vmem:[#allocation2 + $0x9c0] ss:$48 sps:$4 sm:$0xff]  }
  0x95   :  { %7218 = vmatprep.subr.bf16.mxu1 %v21210_v29  ;;  %v21250_v60 = vld [vmem:[#allocation2 + $0x364] ss:$48 sps:$4 sm:$0xff]   ;;  %v21254_v62 = vld [vmem:[#allocation2 + $0x360] ss:$48 sps:$4 sm:$0xff]  }
  0x96   :  { %v21252_v61 = vld [vmem:[#allocation2 + $0x964] ss:$48 sps:$4 sm:$0xff]   ;;  %v21255_v63 = vld [vmem:[#allocation2 + $0x960] ss:$48 sps:$4 sm:$0xff]  }
  0x97   :  { %7178 = vmatpush1.bf16.msra.mxu0 %v21212_v30  ;;  %v21256_v0 = vld [vmem:[#allocation2 + $0x304] ss:$48 sps:$4 sm:$0xff]   ;;  %v21260_v2 = vld [vmem:[#allocation2 + $0x300] ss:$48 sps:$4 sm:$0xff]  }
  0x98   :  { %7219 = vmatpush1.bf16.msra.mxu1 %v21213_v31  ;;  %7179 = vmatprep.subr.bf16.mxu0 %v21214_v32  ;;  %v21258_v1 = vld [vmem:[#allocation2 + $0x904] ss:$48 sps:$4 sm:$0xff]   ;;  %v21261_v3 = vld [vmem:[#allocation2 + $0x900] ss:$48 sps:$4 sm:$0xff]  }
  0x99   :  { %7220 = vmatprep.subr.bf16.mxu1 %v21216_v33  ;;  %v163_v4 = vld [vmem:[%s25786_s0] sm:$0xff]  ;;  %v165_v5 = vld [vmem:[%s25786_s0 + $0x10] sm:$0xff] }
  0x9a   :  { %v21264_v6 = vld [vmem:[#allocation2 + $0xea4] ss:$48 sps:$4 sm:$0xff]   ;;  %v25070_v8 = vpack.c.bf16 %v163_v4, %v163_v4  ;;  %v25072_v9 = vpack.c.bf16 %v165_v5, %v165_v5  ;;  %v21262_v10 = vld [vmem:[#allocation2 + $0xea0] ss:$48 sps:$4 sm:$0xff]  }
  0x9b   :  { %7180 = vmatpush2.bf16.msra.mxu0 %v21218_v34  ;;  %v21267_v7 = vld [vmem:[#allocation2 + $0x14a4] ss:$48 sps:$4 sm:$0xff]   ;;  %v21265_v11 = vld [vmem:[#allocation2 + $0x14a0] ss:$48 sps:$4 sm:$0xff]   ;;  %v168_v34 = vld [vmem:[%s25786_s0 + $0x28] sm:$0xff] }
  0x9c   :  { %7221 = vmatpush2.bf16.msra.mxu1 %v21219_v35  ;;  %7181 = vmatprep.subr.bf16.mxu0 %v21220_v36  ;;  %v21270_v12 = vld [vmem:[#allocation2 + $0xe44] ss:$48 sps:$4 sm:$0xff]   ;;  %v21268_v14 = vld [vmem:[#allocation2 + $0xe40] ss:$48 sps:$4 sm:$0xff]  }
  0x9d   :  { %7222 = vmatprep.subr.bf16.mxu1 %v21222_v37  ;;  %v21273_v13 = vld [vmem:[#allocation2 + $0x1444] ss:$48 sps:$4 sm:$0xff]   ;;  %v21271_v15 = vld [vmem:[#allocation2 + $0x1440] ss:$48 sps:$4 sm:$0xff]   ;;  %v25079_v37 = vpack.c.bf16 %v168_v34, %v168_v34 }
  0x9e   :  { %v21276_v16 = vld [vmem:[#allocation2 + $0xde4] ss:$48 sps:$4 sm:$0xff]   ;;  %v21274_v18 = vld [vmem:[#allocation2 + $0xde0] ss:$48 sps:$4 sm:$0xff]  }
  0x9f   :  { %7182 = vmatpush2.bf16.msra.mxu0 %v21224_v38  ;;  %v21279_v17 = vld [vmem:[#allocation2 + $0x13e4] ss:$48 sps:$4 sm:$0xff]   ;;  %v21277_v19 = vld [vmem:[#allocation2 + $0x13e0] ss:$48 sps:$4 sm:$0xff]   ;;  %v170_v38 = vld [vmem:[%s25786_s0 + $0x38] sm:$0xff] }
  0xa0   :  { %7223 = vmatpush2.bf16.msra.mxu1 %v21225_v39  ;;  %7183 = vmatprep.subr.bf16.mxu0 %v21226_v40  ;;  %v21282_v20 = vld [vmem:[#allocation2 + $0xd84] ss:$48 sps:$4 sm:$0xff]   ;;  %v21280_v22 = vld [vmem:[#allocation2 + $0xd80] ss:$48 sps:$4 sm:$0xff]   ;;  %v25084_v40 = vpack.c.bf16 %v170_v38, %v170_v38 }
  0xa1   :  { %7224 = vmatprep.subr.bf16.mxu1 %v21228_v41  ;;  %v21285_v21 = vld [vmem:[#allocation2 + $0x1384] ss:$48 sps:$4 sm:$0xff]   ;;  %v21283_v23 = vld [vmem:[#allocation2 + $0x1380] ss:$48 sps:$4 sm:$0xff]  }
  0xa2   :  { %v21288_v24 = vld [vmem:[#allocation2 + $0xd24] ss:$48 sps:$4 sm:$0xff]   ;;  %v21286_v26 = vld [vmem:[#allocation2 + $0xd20] ss:$48 sps:$4 sm:$0xff]  }
  0xa3   :  { %7184 = vmatpush2.bf16.msra.mxu0 %v21230_v42  ;;  %v21291_v25 = vld [vmem:[#allocation2 + $0x1324] ss:$48 sps:$4 sm:$0xff]   ;;  %v21289_v27 = vld [vmem:[#allocation2 + $0x1320] ss:$48 sps:$4 sm:$0xff]  }
  0xa4   :  { %7225 = vmatpush2.bf16.msra.mxu1 %v21231_v43  ;;  %7185 = vmatprep.subr.bf16.mxu0 %v21232_v44  ;;  %v21294_v28 = vld [vmem:[#allocation2 + $0xcc4] ss:$48 sps:$4 sm:$0xff]   ;;  %v21292_v30 = vld [vmem:[#allocation2 + $0xcc0] ss:$48 sps:$4 sm:$0xff]  }
  0xa5   :  { %7226 = vmatprep.subr.bf16.mxu1 %v21234_v45  ;;  %v21297_v29 = vld [vmem:[#allocation2 + $0x12c4] ss:$48 sps:$4 sm:$0xff]   ;;  %v21295_v31 = vld [vmem:[#allocation2 + $0x12c0] ss:$48 sps:$4 sm:$0xff]  }
  0xa6   :  { %v21300_v32 = vld [vmem:[#allocation2 + $0xc64] ss:$48 sps:$4 sm:$0xff]   ;;  %v21298_v35 = vld [vmem:[#allocation2 + $0xc60] ss:$48 sps:$4 sm:$0xff]  }
  0xa7   :  { %7186 = vmatpush2.bf16.msra.mxu0 %v21236_v47  ;;  %v21303_v33 = vld [vmem:[#allocation2 + $0x1264] ss:$48 sps:$4 sm:$0xff]   ;;  %v21301_v36 = vld [vmem:[#allocation2 + $0x1260] ss:$48 sps:$4 sm:$0xff]  }
  0xa8   :  { %7227 = vmatpush2.bf16.msra.mxu1 %v21237_v48  ;;  %7187 = vmatprep.subr.bf16.mxu0 %v21238_v51  ;;  %v21306_v39 = vld [vmem:[#allocation2 + $0xc04] ss:$48 sps:$4 sm:$0xff]   ;;  %v21304_v42 = vld [vmem:[#allocation2 + $0xc00] ss:$48 sps:$4 sm:$0xff]  }
  0xa9   :  { %7228 = vmatprep.subr.bf16.mxu1 %v21240_v53  ;;  %v21309_v41 = vld [vmem:[#allocation2 + $0x1204] ss:$48 sps:$4 sm:$0xff]   ;;  %v21307_v43 = vld [vmem:[#allocation2 + $0x1200] ss:$48 sps:$4 sm:$0xff]  }
  0xaa   :  { %v21312_v44 = vld [vmem:[#allocation2 + $0x11a4] ss:$48 sps:$4 sm:$0xff]   ;;  %v21310_v46 = vld [vmem:[#allocation2 + $0x11a0] ss:$48 sps:$4 sm:$0xff]  }
  0xab   :  { %7188 = vmatpush2.bf16.msra.mxu0 %v21242_v54  ;;  %v21315_v45 = vld [vmem:[#allocation2 + $0x17a4] ss:$48 sps:$4 sm:$0xff]   ;;  %v21313_v47 = vld [vmem:[#allocation2 + $0x17a0] ss:$48 sps:$4 sm:$0xff]  }
  0xac   :  { %7229 = vmatpush2.bf16.msra.mxu1 %v21243_v55  ;;  %7189 = vmatprep.subr.bf16.mxu0 %v21244_v56  ;;  %v21318_v48 = vld [vmem:[#allocation2 + $0x1144] ss:$48 sps:$4 sm:$0xff]   ;;  %v21316_v51 = vld [vmem:[#allocation2 + $0x1140] ss:$48 sps:$4 sm:$0xff]  }
  0xad   :  { %7230 = vmatprep.subr.bf16.mxu1 %v21246_v57  ;;  %v21321_v50 = vld [vmem:[#allocation2 + $0x1744] ss:$48 sps:$4 sm:$0xff]   ;;  %v21319_v53 = vld [vmem:[#allocation2 + $0x1740] ss:$48 sps:$4 sm:$0xff]  }
  0xae   :  { %v21324_v54 = vld [vmem:[#allocation2 + $0x10e4] ss:$48 sps:$4 sm:$0xff]   ;;  %v21322_v56 = vld [vmem:[#allocation2 + $0x10e0] ss:$48 sps:$4 sm:$0xff]  }
  0xaf   :  { %7190 = vmatpush2.bf16.msra.mxu0 %v21248_v58  ;;  %v21327_v55 = vld [vmem:[#allocation2 + $0x16e4] ss:$48 sps:$4 sm:$0xff]   ;;  %v21325_v57 = vld [vmem:[#allocation2 + $0x16e0] ss:$48 sps:$4 sm:$0xff]  }
  0xb0   :  { %7231 = vmatpush2.bf16.msra.mxu1 %v21249_v59  ;;  %7191 = vmatprep.subr.bf16.mxu0 %v21250_v60  ;;  %v21330_v58 = vld [vmem:[#allocation2 + $0x1084] ss:$48 sps:$4 sm:$0xff]   ;;  %v21328_v60 = vld [vmem:[#allocation2 + $0x1080] ss:$48 sps:$4 sm:$0xff]  }
  0xb1   :  { %7232 = vmatprep.subr.bf16.mxu1 %v21252_v61  ;;  %v21333_v59 = vld [vmem:[#allocation2 + $0x1684] ss:$48 sps:$4 sm:$0xff]   ;;  %v21331_v61 = vld [vmem:[#allocation2 + $0x1680] ss:$48 sps:$4 sm:$0xff]  }
  0xb2   :  { %v21340_v4 = vld [vmem:[#allocation2 + $0xfc0] ss:$48 sps:$4 sm:$0xff]   ;;  %v21381_v38 = vld [vmem:[#allocation2 + $0x1f84] ss:$48 sps:$4 sm:$0xff]  }
  0xb3   :  { %7192 = vmatpush2.bf16.msra.mxu0 %v21254_v62  ;;  %v21336_v62 = vld [vmem:[#allocation2 + $0x1024] ss:$48 sps:$4 sm:$0xff]   ;;  %v21343_v5 = vld [vmem:[#allocation2 + $0x15c0] ss:$48 sps:$4 sm:$0xff]  }
  0xb4   :  { %7233 = vmatpush2.bf16.msra.mxu1 %v21255_v63  ;;  %7193 = vmatprep.subr.bf16.mxu0 %v21256_v0  ;;  %v21339_v63 = vld [vmem:[#allocation2 + $0x1624] ss:$48 sps:$4 sm:$0xff]   ;;  %v21334_v0 = vld [vmem:[#allocation2 + $0x1020] ss:$48 sps:$4 sm:$0xff]  }
  0xb5   :  { %7234 = vmatprep.subr.bf16.mxu1 %v21258_v1  ;;  %v21337_v1 = vld [vmem:[#allocation2 + $0x1620] ss:$48 sps:$4 sm:$0xff]  }
  0xb6   :  { %v21370_v34 = vld [vmem:[#allocation2 + $0x19e0] ss:$48 sps:$4 sm:$0xff]  }
  0xb7   :  { %7194 = vmatpush2.bf16.msra.mxu0 %v21260_v2  ;;  %v21342_v2 = vld [vmem:[#allocation2 + $0xfc4] ss:$48 sps:$4 sm:$0xff]  }
  0xb8   :  { %7235 = vmatpush2.bf16.msra.mxu1 %v21261_v3  ;;  %7245 = vmatprep.subr.bf16.mxu0 %v21264_v6  ;;  %v21345_v3 = vld [vmem:[#allocation2 + $0x15c4] ss:$48 sps:$4 sm:$0xff]  }
  0xb9   :  { %7286 = vmatprep.subr.bf16.mxu1 %v21267_v7  ;;  %v21348_v6 = vld [vmem:[#allocation2 + $0xf64] ss:$48 sps:$4 sm:$0xff]  }
  0xba   :  { %7196 = vmatmul.mubr.bf16.vlgmr.msra.gmra.mxu0 %v25070_v8  ;;  %v21351_v7 = vld [vmem:[#allocation2 + $0x1564] ss:$48 sps:$4 sm:$0xff]  }
  0xbb   :  { %7237 = vmatmul.mubr.bf16.vlgmr.msra.gmra.mxu1 %v25072_v9  ;;  %7246 = vmatpush1.bf16.msra.mxu0 %v21262_v10  ;;  %v21346_v10 = vld [vmem:[#allocation2 + $0xf60] ss:$48 sps:$4 sm:$0xff]  }
  0xbc   :  { %7287 = vmatpush1.bf16.msra.mxu1 %v21265_v11  ;;  %7247 = vmatprep.subr.bf16.mxu0 %v21270_v12  ;;  %v21349_v11 = vld [vmem:[#allocation2 + $0x1560] ss:$48 sps:$4 sm:$0xff]   ;;  %v21354_v12 = vld [vmem:[#allocation2 + $0xf04] ss:$48 sps:$4 sm:$0xff]  }
  0xbd   :  { %7288 = vmatprep.subr.bf16.mxu1 %v21273_v13  ;;  %7277 = vmatprep.mubr.bf16.mxu0 %v25079_v37  ;;  %v21357_v13 = vld [vmem:[#allocation2 + $0x1504] ss:$48 sps:$4 sm:$0xff]  }
  0xbe   :  { %7318 = vmatprep.mubr.bf16.mxu1 %v25084_v40 }
  0xbf   :  { %7248 = vmatpush1.bf16.msra.mxu0 %v21268_v14  ;;  %v21352_v14 = vld [vmem:[#allocation2 + $0xf00] ss:$48 sps:$4 sm:$0xff]  }
  0xc0   :  { %7289 = vmatpush1.bf16.msra.mxu1 %v21271_v15  ;;  %7249 = vmatprep.subr.bf16.mxu0 %v21276_v16  ;;  %v21355_v15 = vld [vmem:[#allocation2 + $0x1500] ss:$48 sps:$4 sm:$0xff]  }
  0xc1   :  { %7290 = vmatprep.subr.bf16.mxu1 %v21279_v17  ;;  %v167_v16 = vld [vmem:[%s25786_s0 + $0x20] sm:$0xff]  ;;  %v169_v17 = vld [vmem:[%s25786_s0 + $0x30] sm:$0xff] }
  0xc3   :  { %7250 = vmatpush1.bf16.msra.mxu0 %v21274_v18  ;;  %v21360_v18 = vld [vmem:[#allocation2 + $0x1aa4] ss:$48 sps:$4 sm:$0xff]  }
  0xc4   :  { %7291 = vmatpush1.bf16.msra.mxu1 %v21277_v19  ;;  %7251 = vmatprep.subr.bf16.mxu0 %v21282_v20  ;;  %v21363_v19 = vld [vmem:[#allocation2 + $0x20a4] ss:$48 sps:$4 sm:$0xff]   ;;  %v25094_v20 = vpack.c.bf16 %v167_v16, %v167_v16  ;;  %v21430_v16 = vld [vmem:[#allocation2 + $0x1c20] ss:$48 sps:$4 sm:$0xff]  }
  0xc5   :  { %7292 = vmatprep.subr.bf16.mxu1 %v21285_v21  ;;  %v25096_v21 = vpack.c.bf16 %v169_v17, %v169_v17  ;;  %v21433_v17 = vld [vmem:[#allocation2 + $0x2220] ss:$48 sps:$4 sm:$0xff]  }
  0xc7   :  { %7252 = vmatpush1.bf16.msra.mxu0 %v21280_v22  ;;  %v21358_v22 = vld [vmem:[#allocation2 + $0x1aa0] ss:$48 sps:$4 sm:$0xff]  }
  0xc8   :  { %7293 = vmatpush1.bf16.msra.mxu1 %v21283_v23  ;;  %7253 = vmatprep.subr.bf16.mxu0 %v21288_v24  ;;  %v21361_v23 = vld [vmem:[#allocation2 + $0x20a0] ss:$48 sps:$4 sm:$0xff]   ;;  %v21366_v24 = vld [vmem:[#allocation2 + $0x1a44] ss:$48 sps:$4 sm:$0xff]  }
  0xc9   :  { %7294 = vmatprep.subr.bf16.mxu1 %v21291_v25  ;;  %v21369_v25 = vld [vmem:[#allocation2 + $0x2044] ss:$48 sps:$4 sm:$0xff]  }
  0xcb   :  { %7254 = vmatpush1.bf16.msra.mxu0 %v21286_v26  ;;  %v172_v26 = vld [vmem:[%s25786_s0 + $0x48] sm:$0xff] }
  0xcc   :  { %7295 = vmatpush1.bf16.msra.mxu1 %v21289_v27  ;;  %7255 = vmatprep.subr.bf16.mxu0 %v21294_v28  ;;  %v21364_v27 = vld [vmem:[#allocation2 + $0x1a40] ss:$48 sps:$4 sm:$0xff]  }
  0xcd   :  { %7296 = vmatprep.subr.bf16.mxu1 %v21297_v29  ;;  %v21367_v28 = vld [vmem:[#allocation2 + $0x2040] ss:$48 sps:$4 sm:$0xff]   ;;  %v25103_v29 = vpack.c.bf16 %v172_v26, %v172_v26 }
  0xce   :  { %v21442_v26 = vld [vmem:[#allocation2 + $0x1b60] ss:$48 sps:$4 sm:$0xff]  }
  0xcf   :  { %7256 = vmatpush1.bf16.msra.mxu0 %v21292_v30  ;;  %v174_v30 = vld [vmem:[%s25786_s0 + $0x58] sm:$0xff] }
  0xd0   :  { %7297 = vmatpush1.bf16.msra.mxu1 %v21295_v31  ;;  %7257 = vmatprep.subr.bf16.mxu0 %v21300_v32  ;;  %v21372_v31 = vld [vmem:[#allocation2 + $0x19e4] ss:$48 sps:$4 sm:$0xff]   ;;  %v25108_v32 = vpack.c.bf16 %v174_v30, %v174_v30 }
  0xd1   :  { %7298 = vmatprep.subr.bf16.mxu1 %v21303_v33  ;;  %v21375_v33 = vld [vmem:[#allocation2 + $0x1fe4] ss:$48 sps:$4 sm:$0xff]  }
  0xd2   :  { %v21453_v30 = vld [vmem:[#allocation2 + $0x2104] ss:$48 sps:$4 sm:$0xff]  }
  0xd3   :  { %7258 = vmatpush1.bf16.msra.mxu0 %v21298_v35  ;;  %v21373_v35 = vld [vmem:[#allocation2 + $0x1fe0] ss:$48 sps:$4 sm:$0xff]  }
  0xd4   :  { %7299 = vmatpush1.bf16.msra.mxu1 %v21301_v36  ;;  %7259 = vmatprep.subr.bf16.mxu0 %v21306_v39  ;;  %v21378_v36 = vld [vmem:[#allocation2 + $0x1984] ss:$48 sps:$4 sm:$0xff]   ;;  %v21376_v39 = vld [vmem:[#allocation2 + $0x1980] ss:$48 sps:$4 sm:$0xff]  }
  0xd5   :  { %7300 = vmatprep.subr.bf16.mxu1 %v21309_v41  ;;  %v21379_v41 = vld [vmem:[#allocation2 + $0x1f80] ss:$48 sps:$4 sm:$0xff]  }
  0xd7   :  { %7260 = vmatpush1.bf16.msra.mxu0 %v21304_v42  ;;  %v21384_v42 = vld [vmem:[#allocation2 + $0x1924] ss:$48 sps:$4 sm:$0xff]  }
  0xd8   :  { %7301 = vmatpush1.bf16.msra.mxu1 %v21307_v43  ;;  %7261 = vmatprep.subr.bf16.mxu0 %v21312_v44  ;;  %v21387_v43 = vld [vmem:[#allocation2 + $0x1f24] ss:$48 sps:$4 sm:$0xff]   ;;  %v21382_v44 = vld [vmem:[#allocation2 + $0x1920] ss:$48 sps:$4 sm:$0xff]  }
  0xd9   :  { %7302 = vmatprep.subr.bf16.mxu1 %v21315_v45  ;;  %v21385_v45 = vld [vmem:[#allocation2 + $0x1f20] ss:$48 sps:$4 sm:$0xff]  }
  0xdb   :  { %7262 = vmatpush2.bf16.msra.mxu0 %v21310_v46  ;;  %v21390_v46 = vld [vmem:[#allocation2 + $0x18c4] ss:$48 sps:$4 sm:$0xff]  }
  0xdc   :  { %7303 = vmatpush2.bf16.msra.mxu1 %v21313_v47  ;;  %7263 = vmatprep.subr.bf16.mxu0 %v21318_v48  ;;  %v21393_v47 = vld [vmem:[#allocation2 + $0x1ec4] ss:$48 sps:$4 sm:$0xff]   ;;  %v21388_v48 = vld [vmem:[#allocation2 + $0x18c0] ss:$48 sps:$4 sm:$0xff]  }
  0xdd   :  { %7304 = vmatprep.subr.bf16.mxu1 %v21321_v50  ;;  %v21391_v50 = vld [vmem:[#allocation2 + $0x1ec0] ss:$48 sps:$4 sm:$0xff]  }
  0xdf   :  { %7264 = vmatpush2.bf16.msra.mxu0 %v21316_v51  ;;  %v21396_v51 = vld [vmem:[#allocation2 + $0x1864] ss:$48 sps:$4 sm:$0xff]  }
  0xe0   :  { %7305 = vmatpush2.bf16.msra.mxu1 %v21319_v53  ;;  %7265 = vmatprep.subr.bf16.mxu0 %v21324_v54  ;;  %v21399_v53 = vld [vmem:[#allocation2 + $0x1e64] ss:$48 sps:$4 sm:$0xff]   ;;  %v21394_v54 = vld [vmem:[#allocation2 + $0x1860] ss:$48 sps:$4 sm:$0xff]  }
  0xe1   :  { %7306 = vmatprep.subr.bf16.mxu1 %v21327_v55  ;;  %v21397_v55 = vld [vmem:[#allocation2 + $0x1e60] ss:$48 sps:$4 sm:$0xff]  }
  0xe3   :  { %7266 = vmatpush2.bf16.msra.mxu0 %v21322_v56  ;;  %v21402_v56 = vld [vmem:[#allocation2 + $0x1804] ss:$48 sps:$4 sm:$0xff]  }
  0xe4   :  { %7307 = vmatpush2.bf16.msra.mxu1 %v21325_v57  ;;  %7267 = vmatprep.subr.bf16.mxu0 %v21330_v58  ;;  %v21405_v57 = vld [vmem:[#allocation2 + $0x1e04] ss:$48 sps:$4 sm:$0xff]   ;;  %v21400_v58 = vld [vmem:[#allocation2 + $0x1800] ss:$48 sps:$4 sm:$0xff]  }
  0xe5   :  { %7308 = vmatprep.subr.bf16.mxu1 %v21333_v59  ;;  %v21403_v59 = vld [vmem:[#allocation2 + $0x1e00] ss:$48 sps:$4 sm:$0xff]  }
  0xe7   :  { %7268 = vmatpush2.bf16.msra.mxu0 %v21328_v60  ;;  %v21408_v60 = vld [vmem:[#allocation2 + $0x1da4] ss:$48 sps:$4 sm:$0xff]  }
  0xe8   :  { %7309 = vmatpush2.bf16.msra.mxu1 %v21331_v61  ;;  %7269 = vmatprep.subr.bf16.mxu0 %v21336_v62  ;;  %v21411_v61 = vld [vmem:[#allocation2 + $0x23a4] ss:$48 sps:$4 sm:$0xff]   ;;  %v21406_v62 = vld [vmem:[#allocation2 + $0x1da0] ss:$48 sps:$4 sm:$0xff]  }
  0xe9   :  { %7310 = vmatprep.subr.bf16.mxu1 %v21339_v63  ;;  %v21409_v63 = vld [vmem:[#allocation2 + $0x23a0] ss:$48 sps:$4 sm:$0xff]  }
  0xeb   :  { %7270 = vmatpush2.bf16.msra.mxu0 %v21334_v0  ;;  %v21414_v0 = vld [vmem:[#allocation2 + $0x1d44] ss:$48 sps:$4 sm:$0xff]  }
  0xec   :  { %7311 = vmatpush2.bf16.msra.mxu1 %v21337_v1  ;;  %7271 = vmatprep.subr.bf16.mxu0 %v21342_v2  ;;  %v21417_v1 = vld [vmem:[#allocation2 + $0x2344] ss:$48 sps:$4 sm:$0xff]   ;;  %v21412_v2 = vld [vmem:[#allocation2 + $0x1d40] ss:$48 sps:$4 sm:$0xff]  }
  0xed   :  { %7312 = vmatprep.subr.bf16.mxu1 %v21345_v3  ;;  %v21415_v3 = vld [vmem:[#allocation2 + $0x2340] ss:$48 sps:$4 sm:$0xff]  }
  0xef   :  { %7272 = vmatpush2.bf16.msra.mxu0 %v21340_v4  ;;  %v21420_v4 = vld [vmem:[#allocation2 + $0x1ce4] ss:$48 sps:$4 sm:$0xff]  }
  0xf0   :  { %7313 = vmatpush2.bf16.msra.mxu1 %v21343_v5  ;;  %7273 = vmatprep.subr.bf16.mxu0 %v21348_v6  ;;  %v21423_v5 = vld [vmem:[#allocation2 + $0x22e4] ss:$48 sps:$4 sm:$0xff]   ;;  %v21418_v6 = vld [vmem:[#allocation2 + $0x1ce0] ss:$48 sps:$4 sm:$0xff]  }
  0xf1   :  { %7314 = vmatprep.subr.bf16.mxu1 %v21351_v7  ;;  %v21421_v7 = vld [vmem:[#allocation2 + $0x22e0] ss:$48 sps:$4 sm:$0xff]  }
  0xf3   :  { %7274 = vmatpush2.bf16.msra.mxu0 %v21346_v10  ;;  %v21426_v10 = vld [vmem:[#allocation2 + $0x1c84] ss:$48 sps:$4 sm:$0xff]  }
  0xf4   :  { %7315 = vmatpush2.bf16.msra.mxu1 %v21349_v11  ;;  %7275 = vmatprep.subr.bf16.mxu0 %v21354_v12  ;;  %v21429_v11 = vld [vmem:[#allocation2 + $0x2284] ss:$48 sps:$4 sm:$0xff]   ;;  %v21424_v12 = vld [vmem:[#allocation2 + $0x1c80] ss:$48 sps:$4 sm:$0xff]  }
  0xf5   :  { %7316 = vmatprep.subr.bf16.mxu1 %v21357_v13  ;;  %v21427_v13 = vld [vmem:[#allocation2 + $0x2280] ss:$48 sps:$4 sm:$0xff]  }
  0xf7   :  { %7276 = vmatpush2.bf16.msra.mxu0 %v21352_v14  ;;  %v21432_v14 = vld [vmem:[#allocation2 + $0x1c24] ss:$48 sps:$4 sm:$0xff]  }
  0xf8   :  { %7317 = vmatpush2.bf16.msra.mxu1 %v21355_v15  ;;  %7327 = vmatprep.subr.bf16.mxu0 %v21360_v18  ;;  %v21435_v15 = vld [vmem:[#allocation2 + $0x2224] ss:$48 sps:$4 sm:$0xff]  }
  0xf9   :  { %7368 = vmatprep.subr.bf16.mxu1 %v21363_v19  ;;  %v21438_v18 = vld [vmem:[#allocation2 + $0x1bc4] ss:$48 sps:$4 sm:$0xff]  }
  0xfa   :  { %7278 = vmatmul.mubr.bf16.vlgmr.msra.gmra.mxu0 %v25094_v20  ;;  %v21441_v19 = vld [vmem:[#allocation2 + $0x21c4] ss:$48 sps:$4 sm:$0xff]  }
  0xfb   :  { %7319 = vmatmul.mubr.bf16.vlgmr.msra.gmra.mxu1 %v25096_v21  ;;  %7328 = vmatpush1.bf16.msra.mxu0 %v21358_v22  ;;  %v21436_v22 = vld [vmem:[#allocation2 + $0x1bc0] ss:$48 sps:$4 sm:$0xff]  }
  0xfc   :  { %7369 = vmatpush1.bf16.msra.mxu1 %v21361_v23  ;;  %7329 = vmatprep.subr.bf16.mxu0 %v21366_v24  ;;  %v21439_v23 = vld [vmem:[#allocation2 + $0x21c0] ss:$48 sps:$4 sm:$0xff]   ;;  %v21444_v24 = vld [vmem:[#allocation2 + $0x1b64] ss:$48 sps:$4 sm:$0xff]  }
  0xfd   :  { %7370 = vmatprep.subr.bf16.mxu1 %v21369_v25  ;;  %7359 = vmatprep.mubr.bf16.mxu0 %v25103_v29  ;;  %v21447_v25 = vld [vmem:[#allocation2 + $0x2164] ss:$48 sps:$4 sm:$0xff]  }
  0xfe   :  { %7400 = vmatprep.mubr.bf16.mxu1 %v25108_v32 }
  0xff   :  { %7330 = vmatpush1.bf16.msra.mxu0 %v21364_v27  ;;  %v21445_v27 = vld [vmem:[#allocation2 + $0x2160] ss:$48 sps:$4 sm:$0xff]  }
 0x100   :  { %7371 = vmatpush1.bf16.msra.mxu1 %v21367_v28  ;;  %7331 = vmatprep.subr.bf16.mxu0 %v21372_v31  ;;  %v21450_v28 = vld [vmem:[#allocation2 + $0x1b04] ss:$48 sps:$4 sm:$0xff]   ;;  %v21448_v31 = vld [vmem:[#allocation2 + $0x1b00] ss:$48 sps:$4 sm:$0xff]  }
 0x101   :  { %7372 = vmatprep.subr.bf16.mxu1 %v21375_v33  ;;  %v21451_v33 = vld [vmem:[#allocation2 + $0x2100] ss:$48 sps:$4 sm:$0xff]  }
 0x103   :  { %7332 = vmatpush1.bf16.msra.mxu0 %v21370_v34  ;;  %v171_v34 = vld [vmem:[%s25786_s0 + $0x40] sm:$0xff] }
 0x104   :  { %7373 = vmatpush1.bf16.msra.mxu1 %v21373_v35  ;;  %7333 = vmatprep.subr.bf16.mxu0 %v21378_v36  ;;  %v173_v35 = vld [vmem:[%s25786_s0 + $0x50] sm:$0xff]  ;;  %v21456_v36 = vld [vmem:[#allocation2 + $0x2ac] ss:$48 sps:$4 sm:$0xff]  }
 0x105   :  { %7374 = vmatprep.subr.bf16.mxu1 %v21381_v38  ;;  %v21459_v38 = vld [vmem:[#allocation2 + $0x8ac] ss:$48 sps:$4 sm:$0xff]  }
 0x107   :  { %7334 = vmatpush1.bf16.msra.mxu0 %v21376_v39  ;;  %v25118_v39 = vpack.c.bf16 %v171_v34, %v171_v34  ;;  %v21526_v34 = vld [vmem:[#allocation2 + $0x428] ss:$48 sps:$4 sm:$0xff]  }
 0x108   :  { %7375 = vmatpush1.bf16.msra.mxu1 %v21379_v41  ;;  %7335 = vmatprep.subr.bf16.mxu0 %v21384_v42  ;;  %v25120_v41 = vpack.c.bf16 %v173_v35, %v173_v35  ;;  %v21454_v42 = vld [vmem:[#allocation2 + $0x2a8] ss:$48 sps:$4 sm:$0xff]  }
 0x109   :  { %7376 = vmatprep.subr.bf16.mxu1 %v21387_v43  ;;  %v21457_v43 = vld [vmem:[#allocation2 + $0x8a8] ss:$48 sps:$4 sm:$0xff]  }
 0x10a   :  { %v21529_v35 = vld [vmem:[#allocation2 + $0xa28] ss:$48 sps:$4 sm:$0xff]  }
 0x10b   :  { %7336 = vmatpush1.bf16.msra.mxu0 %v21382_v44  ;;  %v21462_v44 = vld [vmem:[#allocation2 + $0x24c] ss:$48 sps:$4 sm:$0xff]  }
 0x10c   :  { %7377 = vmatpush1.bf16.msra.mxu1 %v21385_v45  ;;  %7337 = vmatprep.subr.bf16.mxu0 %v21390_v46  ;;  %v21465_v45 = vld [vmem:[#allocation2 + $0x84c] ss:$48 sps:$4 sm:$0xff]   ;;  %v21460_v46 = vld [vmem:[#allocation2 + $0x248] ss:$48 sps:$4 sm:$0xff]  }
 0x10d   :  { %7378 = vmatprep.subr.bf16.mxu1 %v21393_v47  ;;  %v21463_v47 = vld [vmem:[#allocation2 + $0x848] ss:$48 sps:$4 sm:$0xff]  }
 0x10f   :  { %7338 = vmatpush1.bf16.msra.mxu0 %v21388_v48  ;;  %v21468_v48 = vld [vmem:[#allocation2 + $0x1ec] ss:$48 sps:$4 sm:$0xff]  }
 0x110   :  { %7379 = vmatpush1.bf16.msra.mxu1 %v21391_v50  ;;  %7339 = vmatprep.subr.bf16.mxu0 %v21396_v51  ;;  %v21471_v50 = vld [vmem:[#allocation2 + $0x7ec] ss:$48 sps:$4 sm:$0xff]   ;;  %v21466_v51 = vld [vmem:[#allocation2 + $0x1e8] ss:$48 sps:$4 sm:$0xff]  }
 0x111   :  { %7380 = vmatprep.subr.bf16.mxu1 %v21399_v53  ;;  %v21469_v53 = vld [vmem:[#allocation2 + $0x7e8] ss:$48 sps:$4 sm:$0xff]  }
 0x113   :  { %7340 = vmatpush1.bf16.msra.mxu0 %v21394_v54  ;;  %v21474_v54 = vld [vmem:[#allocation2 + $0x18c] ss:$48 sps:$4 sm:$0xff]  }
 0x114   :  { %7381 = vmatpush1.bf16.msra.mxu1 %v21397_v55  ;;  %7341 = vmatprep.subr.bf16.mxu0 %v21402_v56  ;;  %v21477_v55 = vld [vmem:[#allocation2 + $0x78c] ss:$48 sps:$4 sm:$0xff]   ;;  %v21472_v56 = vld [vmem:[#allocation2 + $0x188] ss:$48 sps:$4 sm:$0xff]  }
 0x115   :  { %7382 = vmatprep.subr.bf16.mxu1 %v21405_v57  ;;  %v21475_v57 = vld [vmem:[#allocation2 + $0x788] ss:$48 sps:$4 sm:$0xff]  }
 0x117   :  { %7342 = vmatpush1.bf16.msra.mxu0 %v21400_v58  ;;  %v21480_v58 = vld [vmem:[#allocation2 + $0x12c] ss:$48 sps:$4 sm:$0xff]  }
 0x118   :  { %7383 = vmatpush1.bf16.msra.mxu1 %v21403_v59  ;;  %7343 = vmatprep.subr.bf16.mxu0 %v21408_v60  ;;  %v21483_v59 = vld [vmem:[#allocation2 + $0x72c] ss:$48 sps:$4 sm:$0xff]   ;;  %v21478_v60 = vld [vmem:[#allocation2 + $0x128] ss:$48 sps:$4 sm:$0xff]  }
 0x119   :  { %7384 = vmatprep.subr.bf16.mxu1 %v21411_v61  ;;  %v21481_v61 = vld [vmem:[#allocation2 + $0x728] ss:$48 sps:$4 sm:$0xff]  }
 0x11b   :  { %7344 = vmatpush2.bf16.msra.mxu0 %v21406_v62  ;;  %v21486_v62 = vld [vmem:[#allocation2 + $0xcc] ss:$48 sps:$4 sm:$0xff]  }
 0x11c   :  { %7385 = vmatpush2.bf16.msra.mxu1 %v21409_v63  ;;  %7345 = vmatprep.subr.bf16.mxu0 %v21414_v0  ;;  %v21489_v63 = vld [vmem:[#allocation2 + $0x6cc] ss:$48 sps:$4 sm:$0xff]   ;;  %v21484_v0 = vld [vmem:[#allocation2 + $0xc8] ss:$48 sps:$4 sm:$0xff]  }
 0x11d   :  { %7386 = vmatprep.subr.bf16.mxu1 %v21417_v1  ;;  %v21487_v1 = vld [vmem:[#allocation2 + $0x6c8] ss:$48 sps:$4 sm:$0xff]  }
 0x11f   :  { %7346 = vmatpush2.bf16.msra.mxu0 %v21412_v2  ;;  %v21492_v2 = vld [vmem:[#allocation2 + $0x6c] ss:$48 sps:$4 sm:$0xff]  }
 0x120   :  { %7387 = vmatpush2.bf16.msra.mxu1 %v21415_v3  ;;  %7347 = vmatprep.subr.bf16.mxu0 %v21420_v4  ;;  %v21495_v3 = vld [vmem:[#allocation2 + $0x66c] ss:$48 sps:$4 sm:$0xff]   ;;  %v21490_v4 = vld [vmem:[#allocation2 + $0x68] ss:$48 sps:$4 sm:$0xff]  }
 0x121   :  { %7388 = vmatprep.subr.bf16.mxu1 %v21423_v5  ;;  %v21493_v5 = vld [vmem:[#allocation2 + $0x668] ss:$48 sps:$4 sm:$0xff]  }
 0x123   :  { %7348 = vmatpush2.bf16.msra.mxu0 %v21418_v6  ;;  %v21498_v6 = vld [vmem:[#allocation2 + $0xc] ss:$48 sps:$4 sm:$0xff]  }
 0x124   :  { %7389 = vmatpush2.bf16.msra.mxu1 %v21421_v7  ;;  %7349 = vmatprep.subr.bf16.mxu0 %v21426_v10  ;;  %v21501_v7 = vld [vmem:[#allocation2 + $0x60c] ss:$48 sps:$4 sm:$0xff]   ;;  %v21496_v10 = vld [vmem:[#allocation2 + $0x8] ss:$48 sps:$4 sm:$0xff]  }
 0x125   :  { %7390 = vmatprep.subr.bf16.mxu1 %v21429_v11  ;;  %v21499_v11 = vld [vmem:[#allocation2 + $0x608] ss:$48 sps:$4 sm:$0xff]  }
 0x127   :  { %7350 = vmatpush2.bf16.msra.mxu0 %v21424_v12  ;;  %v21504_v12 = vld [vmem:[#allocation2 + $0x5ac] ss:$48 sps:$4 sm:$0xff]  }
 0x128   :  { %7391 = vmatpush2.bf16.msra.mxu1 %v21427_v13  ;;  %7351 = vmatprep.subr.bf16.mxu0 %v21432_v14  ;;  %v21507_v13 = vld [vmem:[#allocation2 + $0xbac] ss:$48 sps:$4 sm:$0xff]   ;;  %v21502_v14 = vld [vmem:[#allocation2 + $0x5a8] ss:$48 sps:$4 sm:$0xff]  }
 0x129   :  { %7392 = vmatprep.subr.bf16.mxu1 %v21435_v15  ;;  %v21505_v15 = vld [vmem:[#allocation2 + $0xba8] ss:$48 sps:$4 sm:$0xff]  }
 0x12b   :  { %7352 = vmatpush2.bf16.msra.mxu0 %v21430_v16  ;;  %v21510_v16 = vld [vmem:[#allocation2 + $0x54c] ss:$48 sps:$4 sm:$0xff]  }
 0x12c   :  { %7393 = vmatpush2.bf16.msra.mxu1 %v21433_v17  ;;  %7353 = vmatprep.subr.bf16.mxu0 %v21438_v18  ;;  %v21513_v17 = vld [vmem:[#allocation2 + $0xb4c] ss:$48 sps:$4 sm:$0xff]   ;;  %v21508_v18 = vld [vmem:[#allocation2 + $0x548] ss:$48 sps:$4 sm:$0xff]  }
 0x12d   :  { %7394 = vmatprep.subr.bf16.mxu1 %v21441_v19  ;;  %v21511_v19 = vld [vmem:[#allocation2 + $0xb48] ss:$48 sps:$4 sm:$0xff]  }
 0x12f   :  { %7354 = vmatpush2.bf16.msra.mxu0 %v21436_v22  ;;  %v21516_v22 = vld [vmem:[#allocation2 + $0x4ec] ss:$48 sps:$4 sm:$0xff]  }
 0x130   :  { %7395 = vmatpush2.bf16.msra.mxu1 %v21439_v23  ;;  %7355 = vmatprep.subr.bf16.mxu0 %v21444_v24  ;;  %v21519_v23 = vld [vmem:[#allocation2 + $0xaec] ss:$48 sps:$4 sm:$0xff]   ;;  %v21514_v24 = vld [vmem:[#allocation2 + $0x4e8] ss:$48 sps:$4 sm:$0xff]  }
 0x131   :  { %7396 = vmatprep.subr.bf16.mxu1 %v21447_v25  ;;  %v21517_v25 = vld [vmem:[#allocation2 + $0xae8] ss:$48 sps:$4 sm:$0xff]  }
 0x133   :  { %7356 = vmatpush2.bf16.msra.mxu0 %v21442_v26  ;;  %v21522_v26 = vld [vmem:[#allocation2 + $0x48c] ss:$48 sps:$4 sm:$0xff]  }
 0x134   :  { %7397 = vmatpush2.bf16.msra.mxu1 %v21445_v27  ;;  %7357 = vmatprep.subr.bf16.mxu0 %v21450_v28  ;;  %v21525_v27 = vld [vmem:[#allocation2 + $0xa8c] ss:$48 sps:$4 sm:$0xff]   ;;  %v21520_v28 = vld [vmem:[#allocation2 + $0x488] ss:$48 sps:$4 sm:$0xff]  }
 0x135   :  { %7398 = vmatprep.subr.bf16.mxu1 %v21453_v30  ;;  %v21523_v30 = vld [vmem:[#allocation2 + $0xa88] ss:$48 sps:$4 sm:$0xff]  }
 0x137   :  { %7358 = vmatpush2.bf16.msra.mxu0 %v21448_v31  ;;  %v21528_v31 = vld [vmem:[#allocation2 + $0x42c] ss:$48 sps:$4 sm:$0xff]  }
 0x138   :  { %7399 = vmatpush2.bf16.msra.mxu1 %v21451_v33  ;;  %7409 = vmatprep.subr.bf16.mxu0 %v21456_v36  ;;  %v21531_v33 = vld [vmem:[#allocation2 + $0xa2c] ss:$48 sps:$4 sm:$0xff]  }
 0x139   :  { %7450 = vmatprep.subr.bf16.mxu1 %v21459_v38  ;;  %v21534_v36 = vld [vmem:[#allocation2 + $0x3cc] ss:$48 sps:$4 sm:$0xff]  }
 0x13a   :  { %7360 = vmatmul.mubr.bf16.vlgmr.msra.gmra.mxu0 %v25118_v39  ;;  %v21537_v38 = vld [vmem:[#allocation2 + $0x9cc] ss:$48 sps:$4 sm:$0xff]  }
 0x13b   :  { %7401 = vmatmul.mubr.bf16.vlgmr.msra.gmra.mxu1 %v25120_v41  ;;  %7410 = vmatpush1.bf16.msra.mxu0 %v21454_v42  ;;  %v21532_v42 = vld [vmem:[#allocation2 + $0x3c8] ss:$48 sps:$4 sm:$0xff]  }
 0x13c   :  { %7451 = vmatpush1.bf16.msra.mxu1 %v21457_v43  ;;  %7411 = vmatprep.subr.bf16.mxu0 %v21462_v44  ;;  %v21535_v43 = vld [vmem:[#allocation2 + $0x9c8] ss:$48 sps:$4 sm:$0xff]   ;;  %v1343_v44 = vlaneseq }
 0x13d   :  { %7452 = vmatprep.subr.bf16.mxu1 %v21465_v45  ;;  %7441 = vmatprep.mubr.bf16.mxu0 %v25055_v49  ;;  %v21540_v45 = vld [vmem:[#allocation2 + $0x36c] ss:$48 sps:$4 sm:$0xff]  }
 0x13e   :  { %7482 = vmatprep.mubr.bf16.mxu1 %v25060_v52 }
 0x13f   :  { %7412 = vmatpush1.bf16.msra.mxu0 %v21460_v46  ;;  %v21543_v46 = vld [vmem:[#allocation2 + $0x96c] ss:$48 sps:$4 sm:$0xff]  }
 0x140   :  { %7453 = vmatpush1.bf16.msra.mxu1 %v21463_v47  ;;  %7413 = vmatprep.subr.bf16.mxu0 %v21468_v48  ;;  %v21538_v47 = vld [vmem:[#allocation2 + $0x368] ss:$48 sps:$4 sm:$0xff]  }
 0x141   :  { %7454 = vmatprep.subr.bf16.mxu1 %v21471_v50  ;;  %v21541_v48 = vld [vmem:[#allocation2 + $0x968] ss:$48 sps:$4 sm:$0xff]   ;;  %v25126_v50 = vshrl.u32 %v1343_v44, 7  ;;  %v21591_v44 = vld [vmem:[#allocation2 + $0x126c] ss:$48 sps:$4 sm:$0xff]  }
 0x143   :  { %7414 = vmatpush1.bf16.msra.mxu0 %v21466_v51  ;;  %v21546_v51 = vld [vmem:[#allocation2 + $0x30c] ss:$48 sps:$4 sm:$0xff]  }
 0x144   :  { %7455 = vmatpush1.bf16.msra.mxu1 %v21469_v53  ;;  %7415 = vmatprep.subr.bf16.mxu0 %v21474_v54  ;;  %v21549_v53 = vld [vmem:[#allocation2 + $0x90c] ss:$48 sps:$4 sm:$0xff]   ;;  %v21544_v54 = vld [vmem:[#allocation2 + $0x308] ss:$48 sps:$4 sm:$0xff]  }
 0x145   :  { %7456 = vmatprep.subr.bf16.mxu1 %v21477_v55  ;;  %v21547_v55 = vld [vmem:[#allocation2 + $0x908] ss:$48 sps:$4 sm:$0xff]  }
 0x147   :  { %7416 = vmatpush1.bf16.msra.mxu0 %v21472_v56  ;;  %v1339_v56 = vld [vmem:[#allocation4] sm:$0xff] }
 0x148   :  { %7457 = vmatpush1.bf16.msra.mxu1 %v21475_v57  ;;  %7417 = vmatprep.subr.bf16.mxu0 %v21480_v58  ;;  %v25129_v57 = vsub.s32 0, %v25126_v50  ;;  %v21552_v58 = vld [vmem:[#allocation2 + $0xeac] ss:$48 sps:$4 sm:$0xff]  }
 0x149   :  { %7458 = vmatprep.subr.bf16.mxu1 %v21483_v59  ;;  %v21555_v59 = vld [vmem:[#allocation2 + $0x14ac] ss:$48 sps:$4 sm:$0xff]  }
 0x14b   :  { %7418 = vmatpush1.bf16.msra.mxu0 %v21478_v60  ;;  %v25132_v60 = vsub.s32 1, %v25126_v50 }
 0x14c   :  { %7459 = vmatpush1.bf16.msra.mxu1 %v21481_v61  ;;  %7419 = vmatprep.subr.bf16.mxu0 %v21486_v62  ;;  %v21550_v61 = vld [vmem:[#allocation2 + $0xea8] ss:$48 sps:$4 sm:$0xff]   ;;  %v1346_v62 = vrot.slane %v1339_v56, %v25129_v57 }
 0x14d   :  { %7460 = vmatprep.subr.bf16.mxu1 %v21489_v63  ;;  %v21553_v63 = vld [vmem:[#allocation2 + $0x14a8] ss:$48 sps:$4 sm:$0xff]  }
 0x14f   :  { %7420 = vmatpush1.bf16.msra.mxu0 %v21484_v0  ;;  %v21558_v0 = vld [vmem:[#allocation2 + $0xe4c] ss:$48 sps:$4 sm:$0xff]  }
 0x150   :  { %7461 = vmatpush1.bf16.msra.mxu1 %v21487_v1  ;;  %7421 = vmatprep.subr.bf16.mxu0 %v21492_v2  ;;  %v21561_v1 = vld [vmem:[#allocation2 + $0x144c] ss:$48 sps:$4 sm:$0xff]   ;;  %v1350_v2 = vrot.slane %v1339_v56, %v25132_v60  ;;  %v21598_v56 = vld [vmem:[#allocation2 + $0x11a8] ss:$48 sps:$4 sm:$0xff]  }
 0x151   :  { %7462 = vmatprep.subr.bf16.mxu1 %v21495_v3 }
 0x153   :  { %7422 = vmatpush1.bf16.msra.mxu0 %v21490_v4 }
 0x154   :  { %7463 = vmatpush1.bf16.msra.mxu1 %v21493_v5  ;;  %7423 = vmatprep.subr.bf16.mxu0 %v21498_v6  ;;  %v21556_v5 = vld [vmem:[#allocation2 + $0xe48] ss:$48 sps:$4 sm:$0xff]  }
 0x155   :  { %7464 = vmatprep.subr.bf16.mxu1 %v21501_v7  ;;  %v21559_v7 = vld [vmem:[#allocation2 + $0x1448] ss:$48 sps:$4 sm:$0xff]  }
 0x157   :  { %7424 = vmatpush1.bf16.msra.mxu0 %v21496_v10 }
 0x158   :  { %7465 = vmatpush1.bf16.msra.mxu1 %v21499_v11  ;;  %7425 = vmatprep.subr.bf16.mxu0 %v21504_v12  ;;  %v21564_v12 = vld [vmem:[#allocation2 + $0xdec] ss:$48 sps:$4 sm:$0xff]  }
 0x159   :  { %7466 = vmatprep.subr.bf16.mxu1 %v21507_v13  ;;  %v21567_v13 = vld [vmem:[#allocation2 + $0x13ec] ss:$48 sps:$4 sm:$0xff]  }
 0x15b   :  { %7426 = vmatpush2.bf16.msra.mxu0 %v21502_v14 }
 0x15c   :  { %7467 = vmatpush2.bf16.msra.mxu1 %v21505_v15  ;;  %7427 = vmatprep.subr.bf16.mxu0 %v21510_v16 }
 0x15d   :  { %7468 = vmatprep.subr.bf16.mxu1 %v21513_v17 }
 0x15f   :  { %7428 = vmatpush2.bf16.msra.mxu0 %v21508_v18  ;;  %v21562_v18 = vld [vmem:[#allocation2 + $0xde8] ss:$48 sps:$4 sm:$0xff]  }
 0x160   :  { %7469 = vmatpush2.bf16.msra.mxu1 %v21511_v19  ;;  %7429 = vmatprep.subr.bf16.mxu0 %v21516_v22  ;;  %v21565_v22 = vld [vmem:[#allocation2 + $0x13e8] ss:$48 sps:$4 sm:$0xff]  }
 0x161   :  { %7470 = vmatprep.subr.bf16.mxu1 %v21519_v23 }
 0x163   :  { %7430 = vmatpush2.bf16.msra.mxu0 %v21514_v24 }
 0x164   :  { %7471 = vmatpush2.bf16.msra.mxu1 %v21517_v25  ;;  %7431 = vmatprep.subr.bf16.mxu0 %v21522_v26  ;;  %v21570_v25 = vld [vmem:[#allocation2 + $0xd8c] ss:$48 sps:$4 sm:$0xff]  }
 0x165   :  { %7472 = vmatprep.subr.bf16.mxu1 %v21525_v27  ;;  %v21573_v26 = vld [vmem:[#allocation2 + $0x138c] ss:$48 sps:$4 sm:$0xff]   ;;  %v21568_v27 = vld [vmem:[#allocation2 + $0xd88] ss:$48 sps:$4 sm:$0xff]  }
 0x167   :  { %7432 = vmatpush2.bf16.msra.mxu0 %v21520_v28  ;;  %v21571_v28 = vld [vmem:[#allocation2 + $0x1388] ss:$48 sps:$4 sm:$0xff]  }
 0x168   :  { %7473 = vmatpush2.bf16.msra.mxu1 %v21523_v30  ;;  %7433 = vmatprep.subr.bf16.mxu0 %v21528_v31  ;;  %v21576_v30 = vld [vmem:[#allocation2 + $0xd2c] ss:$48 sps:$4 sm:$0xff]  }
 0x169   :  { %7474 = vmatprep.subr.bf16.mxu1 %v21531_v33  ;;  %v21579_v31 = vld [vmem:[#allocation2 + $0x132c] ss:$48 sps:$4 sm:$0xff]   ;;  %v21574_v33 = vld [vmem:[#allocation2 + $0xd28] ss:$48 sps:$4 sm:$0xff]  }
 0x16b   :  { %7434 = vmatpush2.bf16.msra.mxu0 %v21526_v34  ;;  %v21577_v34 = vld [vmem:[#allocation2 + $0x1328] ss:$48 sps:$4 sm:$0xff]  }
 0x16c   :  { %7475 = vmatpush2.bf16.msra.mxu1 %v21529_v35  ;;  %7435 = vmatprep.subr.bf16.mxu0 %v21534_v36  ;;  %v21582_v35 = vld [vmem:[#allocation2 + $0xccc] ss:$48 sps:$4 sm:$0xff]  }
 0x16d   :  { %7476 = vmatprep.subr.bf16.mxu1 %v21537_v38  ;;  %v21585_v36 = vld [vmem:[#allocation2 + $0x12cc] ss:$48 sps:$4 sm:$0xff]   ;;  %v21580_v38 = vld [vmem:[#allocation2 + $0xcc8] ss:$48 sps:$4 sm:$0xff]  }
 0x16f   :  { %7436 = vmatpush2.bf16.msra.mxu0 %v21532_v42  ;;  %v21583_v42 = vld [vmem:[#allocation2 + $0x12c8] ss:$48 sps:$4 sm:$0xff]  }
 0x170   :  { %7477 = vmatpush2.bf16.msra.mxu1 %v21535_v43  ;;  %7437 = vmatprep.subr.bf16.mxu0 %v21540_v45  ;;  %v21588_v43 = vld [vmem:[#allocation2 + $0xc6c] ss:$48 sps:$4 sm:$0xff]   ;;  %v21586_v45 = vld [vmem:[#allocation2 + $0xc68] ss:$48 sps:$4 sm:$0xff]  }
 0x171   :  { %7478 = vmatprep.subr.bf16.mxu1 %v21543_v46  ;;  %v21589_v46 = vld [vmem:[#allocation2 + $0x1268] ss:$48 sps:$4 sm:$0xff]  }
 0x173   :  { %7438 = vmatpush2.bf16.msra.mxu0 %v21538_v47  ;;  %v21594_v47 = vld [vmem:[#allocation2 + $0xc0c] ss:$48 sps:$4 sm:$0xff]  }
 0x174   :  { %7479 = vmatpush2.bf16.msra.mxu1 %v21541_v48  ;;  %7439 = vmatprep.subr.bf16.mxu0 %v21546_v51  ;;  %v21597_v48 = vld [vmem:[#allocation2 + $0x120c] ss:$48 sps:$4 sm:$0xff]   ;;  %v21592_v51 = vld [vmem:[#allocation2 + $0xc08] ss:$48 sps:$4 sm:$0xff]  }
 0x175   :  { %7480 = vmatprep.subr.bf16.mxu1 %v21549_v53  ;;  %v21595_v53 = vld [vmem:[#allocation2 + $0x1208] ss:$48 sps:$4 sm:$0xff]  }
 0x177   :  { %7440 = vmatpush2.bf16.msra.mxu0 %v21544_v54  ;;  %v21600_v54 = vld [vmem:[#allocation2 + $0x11ac] ss:$48 sps:$4 sm:$0xff]  }
 0x178   :  { %7481 = vmatpush2.bf16.msra.mxu1 %v21547_v55  ;;  %7491 = vmatprep.subr.bf16.mxu0 %v21552_v58  ;;  %v21603_v55 = vld [vmem:[#allocation2 + $0x17ac] ss:$48 sps:$4 sm:$0xff]   ;;  %v21601_v58 = vld [vmem:[#allocation2 + $0x17a8] ss:$48 sps:$4 sm:$0xff]  }
 0x179   :  { %7532 = vmatprep.subr.bf16.mxu1 %v21555_v59  ;;  %v21606_v59 = vld [vmem:[#allocation2 + $0x114c] ss:$48 sps:$4 sm:$0xff]  }
 0x17a   :  { %v7197_v3 = vpop.f32.mrf.mxu0  ;;  %7442 = vmatmul.mubr.bf16.vlgmr.msra.gmra.mxu0 %v25070_v8 }
 0x17b   :  { %v7238_v4 = vpop.f32.mrf.mxu1  ;;  %7483 = vmatmul.mubr.bf16.vlgmr.msra.gmra.mxu1 %v25072_v9  ;;  %v7198_v6 = vadd.f32 %v7197_v3, %v1346_v62  ;;  %7492 = vmatpush1.bf16.msra.mxu0 %v21550_v61  ;;  %v21609_v61 = vld [vmem:[#allocation2 + $0x174c] ss:$48 sps:$4 sm:$0xff]   ;;  %v21604_v62 = vld [vmem:[#allocation2 + $0x1148] ss:$48 sps:$4 sm:$0xff]  }
 0x17c   :  { %7533 = vmatpush1.bf16.msra.mxu1 %v21553_v63  ;;  %v7199_v10 = vpop.f32.mrf.mxu0  ;;  %7493 = vmatprep.subr.bf16.mxu0 %v21558_v0  ;;  %v21607_v63 = vld [vmem:[#allocation2 + $0x1748] ss:$48 sps:$4 sm:$0xff]   ;;  %v21612_v0 = vld [vmem:[#allocation2 + $0x10ec] ss:$48 sps:$4 sm:$0xff]  }
 0x17d   :  { %v7240_v11 = vpop.f32.mrf.mxu1  ;;  %7534 = vmatprep.subr.bf16.mxu1 %v21561_v1  ;;  %v25138_v14 = vadd.f32 %v7238_v4, %v7198_v6  ;;  %v7200_v15 = vadd.f32 %v7199_v10, %v1350_v2  ;;  %7523 = vmatprep.mubr.bf16.mxu0 %v25079_v37  ;;  %v21615_v1 = vld [vmem:[#allocation2 + $0x16ec] ss:$48 sps:$4 sm:$0xff]   ;;  %v21610_v2 = vld [vmem:[#allocation2 + $0x10e8] ss:$48 sps:$4 sm:$0xff]  }
 0x17e   :  { %7564 = vmatprep.mubr.bf16.mxu1 %v25084_v40  ;;  %v7201_v16 = vpop.f32.mrf.mxu0  ;;  %v21613_v3 = vld [vmem:[#allocation2 + $0x16e8] ss:$48 sps:$4 sm:$0xff]   ;;  %v21618_v4 = vld [vmem:[#allocation2 + $0x108c] ss:$48 sps:$4 sm:$0xff]  }
 0x17f   :  { %v7242_v17 = vpop.f32.mrf.mxu1  ;;  %v25142_v19 = vadd.f32 %v7240_v11, %v7200_v15  ;;  %7494 = vmatpush1.bf16.msra.mxu0 %v21556_v5  ;;  %v21621_v5 = vld [vmem:[#allocation2 + $0x168c] ss:$48 sps:$4 sm:$0xff]   ;;  %v21616_v6 = vld [vmem:[#allocation2 + $0x1088] ss:$48 sps:$4 sm:$0xff]  }
 0x180   :  { %7535 = vmatpush1.bf16.msra.mxu1 %v21559_v7  ;;  %v7202_v23 = vpop.f32.mrf.mxu0  ;;  %7495 = vmatprep.subr.bf16.mxu0 %v21564_v12  ;;  %v21619_v7 = vld [vmem:[#allocation2 + $0x1688] ss:$48 sps:$4 sm:$0xff]   ;;  %v21624_v10 = vld [vmem:[#allocation2 + $0x102c] ss:$48 sps:$4 sm:$0xff]  }
 0x181   :  { %v7243_v24 = vpop.f32.mrf.mxu1  ;;  %7536 = vmatprep.subr.bf16.mxu1 %v21567_v13  ;;  %v21627_v11 = vld [vmem:[#allocation2 + $0x162c] ss:$48 sps:$4 sm:$0xff]   ;;  %v21622_v12 = vld [vmem:[#allocation2 + $0x1028] ss:$48 sps:$4 sm:$0xff]  }
 0x182   :  { %v21625_v13 = vld [vmem:[#allocation2 + $0x1628] ss:$48 sps:$4 sm:$0xff]   ;;  %v21630_v15 = vld [vmem:[#allocation2 + $0xfcc] ss:$48 sps:$4 sm:$0xff]  }
 0x183   :  { %7496 = vmatpush1.bf16.msra.mxu0 %v21562_v18  ;;  %v21633_v16 = vld [vmem:[#allocation2 + $0x15cc] ss:$48 sps:$4 sm:$0xff]   ;;  %v21628_v17 = vld [vmem:[#allocation2 + $0xfc8] ss:$48 sps:$4 sm:$0xff]  }
 0x184   :  { %7537 = vmatpush1.bf16.msra.mxu1 %v21565_v22  ;;  %7497 = vmatprep.subr.bf16.mxu0 %v21570_v25  ;;  %v21631_v18 = vld [vmem:[#allocation2 + $0x15c8] ss:$48 sps:$4 sm:$0xff]   ;;  %v21636_v22 = vld [vmem:[#allocation2 + $0xf6c] ss:$48 sps:$4 sm:$0xff]  }
 0x185   :  { %7538 = vmatprep.subr.bf16.mxu1 %v21573_v26  ;;  %v21639_v23 = vld [vmem:[#allocation2 + $0x156c] ss:$48 sps:$4 sm:$0xff]   ;;  %v21634_v24 = vld [vmem:[#allocation2 + $0xf68] ss:$48 sps:$4 sm:$0xff]  }
 0x186   :  { %v21637_v25 = vld [vmem:[#allocation2 + $0x1568] ss:$48 sps:$4 sm:$0xff]   ;;  %v21642_v26 = vld [vmem:[#allocation2 + $0xf0c] ss:$48 sps:$4 sm:$0xff]  }
 0x187   :  { %7498 = vmatpush1.bf16.msra.mxu0 %v21568_v27  ;;  %v21645_v27 = vld [vmem:[#allocation2 + $0x150c] ss:$48 sps:$4 sm:$0xff]  }
 0x188   :  { %7539 = vmatpush1.bf16.msra.mxu1 %v21571_v28  ;;  %7499 = vmatprep.subr.bf16.mxu0 %v21576_v30  ;;  %v21640_v28 = vld [vmem:[#allocation2 + $0xf08] ss:$48 sps:$4 sm:$0xff]  }
 0x189   :  { %7540 = vmatprep.subr.bf16.mxu1 %v21579_v31  ;;  %v21643_v30 = vld [vmem:[#allocation2 + $0x1508] ss:$48 sps:$4 sm:$0xff]   ;;  %v21648_v31 = vld [vmem:[#allocation2 + $0x1aac] ss:$48 sps:$4 sm:$0xff]  }
 0x18b   :  { %7500 = vmatpush1.bf16.msra.mxu0 %v21574_v33  ;;  %v21651_v33 = vld [vmem:[#allocation2 + $0x20ac] ss:$48 sps:$4 sm:$0xff]  }
 0x18c   :  { %7541 = vmatpush1.bf16.msra.mxu1 %v21577_v34  ;;  %7501 = vmatprep.subr.bf16.mxu0 %v21582_v35  ;;  %v21646_v34 = vld [vmem:[#allocation2 + $0x1aa8] ss:$48 sps:$4 sm:$0xff]  }
 0x18d   :  { %7542 = vmatprep.subr.bf16.mxu1 %v21585_v36  ;;  %v21649_v35 = vld [vmem:[#allocation2 + $0x20a8] ss:$48 sps:$4 sm:$0xff]   ;;  %v21654_v36 = vld [vmem:[#allocation2 + $0x1a4c] ss:$48 sps:$4 sm:$0xff]  }
 0x18f   :  { %7502 = vmatpush1.bf16.msra.mxu0 %v21580_v38  ;;  %v21657_v38 = vld [vmem:[#allocation2 + $0x204c] ss:$48 sps:$4 sm:$0xff]  }
 0x190   :  { %7543 = vmatpush1.bf16.msra.mxu1 %v21583_v42  ;;  %7503 = vmatprep.subr.bf16.mxu0 %v21588_v43  ;;  %v21652_v42 = vld [vmem:[#allocation2 + $0x1a48] ss:$48 sps:$4 sm:$0xff]  }
 0x191   :  { %7544 = vmatprep.subr.bf16.mxu1 %v21591_v44  ;;  %v21655_v43 = vld [vmem:[#allocation2 + $0x2048] ss:$48 sps:$4 sm:$0xff]  }
 0x193   :  { %7504 = vmatpush1.bf16.msra.mxu0 %v21586_v45 }
 0x194   :  { %7545 = vmatpush1.bf16.msra.mxu1 %v21589_v46  ;;  %7505 = vmatprep.subr.bf16.mxu0 %v21594_v47 }
 0x195   :  { %7546 = vmatprep.subr.bf16.mxu1 %v21597_v48 }
 0x197   :  { %7506 = vmatpush1.bf16.msra.mxu0 %v21592_v51  ;;  %v21660_v51 = vld [vmem:[#allocation2 + $0x19ec] ss:$48 sps:$4 sm:$0xff]  }
 0x198   :  { %7547 = vmatpush1.bf16.msra.mxu1 %v21595_v53  ;;  %7507 = vmatprep.subr.bf16.mxu0 %v21600_v54  ;;  %v21663_v53 = vld [vmem:[#allocation2 + $0x1fec] ss:$48 sps:$4 sm:$0xff]  }
 0x199   :  { %7548 = vmatprep.subr.bf16.mxu1 %v21603_v55 }
 0x19b   :  { %7508 = vmatpush2.bf16.msra.mxu0 %v21598_v56  ;;  %v21658_v56 = vld [vmem:[#allocation2 + $0x19e8] ss:$48 sps:$4 sm:$0xff]  }
 0x19c   :  { %7549 = vmatpush2.bf16.msra.mxu1 %v21601_v58  ;;  %7509 = vmatprep.subr.bf16.mxu0 %v21606_v59  ;;  %v21661_v58 = vld [vmem:[#allocation2 + $0x1fe8] ss:$48 sps:$4 sm:$0xff]  }
 0x19d   :  { %7550 = vmatprep.subr.bf16.mxu1 %v21609_v61 }
 0x19f   :  { %7510 = vmatpush2.bf16.msra.mxu0 %v21604_v62 }
 0x1a0   :  { %7551 = vmatpush2.bf16.msra.mxu1 %v21607_v63  ;;  %7511 = vmatprep.subr.bf16.mxu0 %v21612_v0  ;;  %v21666_v0 = vld [vmem:[#allocation2 + $0x198c] ss:$48 sps:$4 sm:$0xff]  }
 0x1a1   :  { %7552 = vmatprep.subr.bf16.mxu1 %v21615_v1  ;;  %v21669_v1 = vld [vmem:[#allocation2 + $0x1f8c] ss:$48 sps:$4 sm:$0xff]  }
 0x1a3   :  { %7512 = vmatpush2.bf16.msra.mxu0 %v21610_v2  ;;  %v21667_v2 = vld [vmem:[#allocation2 + $0x1f88] ss:$48 sps:$4 sm:$0xff]  }
 0x1a4   :  { %7553 = vmatpush2.bf16.msra.mxu1 %v21613_v3  ;;  %7513 = vmatprep.subr.bf16.mxu0 %v21618_v4  ;;  %v21672_v3 = vld [vmem:[#allocation2 + $0x192c] ss:$48 sps:$4 sm:$0xff]  }
 0x1a5   :  { %7554 = vmatprep.subr.bf16.mxu1 %v21621_v5  ;;  %v21675_v4 = vld [vmem:[#allocation2 + $0x1f2c] ss:$48 sps:$4 sm:$0xff]   ;;  %v21670_v5 = vld [vmem:[#allocation2 + $0x1928] ss:$48 sps:$4 sm:$0xff]  }
 0x1a7   :  { %7514 = vmatpush2.bf16.msra.mxu0 %v21616_v6  ;;  %v21673_v6 = vld [vmem:[#allocation2 + $0x1f28] ss:$48 sps:$4 sm:$0xff]  }
 0x1a8   :  { %7555 = vmatpush2.bf16.msra.mxu1 %v21619_v7  ;;  %7515 = vmatprep.subr.bf16.mxu0 %v21624_v10  ;;  %v21678_v7 = vld [vmem:[#allocation2 + $0x18cc] ss:$48 sps:$4 sm:$0xff]  }
 0x1a9   :  { %7556 = vmatprep.subr.bf16.mxu1 %v21627_v11  ;;  %v21681_v10 = vld [vmem:[#allocation2 + $0x1ecc] ss:$48 sps:$4 sm:$0xff]   ;;  %v21676_v11 = vld [vmem:[#allocation2 + $0x18c8] ss:$48 sps:$4 sm:$0xff]  }
 0x1ab   :  { %7516 = vmatpush2.bf16.msra.mxu0 %v21622_v12  ;;  %v21679_v12 = vld [vmem:[#allocation2 + $0x1ec8] ss:$48 sps:$4 sm:$0xff]  }
 0x1ac   :  { %7557 = vmatpush2.bf16.msra.mxu1 %v21625_v13  ;;  %7517 = vmatprep.subr.bf16.mxu0 %v21630_v15  ;;  %v21684_v13 = vld [vmem:[#allocation2 + $0x186c] ss:$48 sps:$4 sm:$0xff]  }
 0x1ad   :  { %7558 = vmatprep.subr.bf16.mxu1 %v21633_v16  ;;  %v21687_v15 = vld [vmem:[#allocation2 + $0x1e6c] ss:$48 sps:$4 sm:$0xff]   ;;  %v21682_v16 = vld [vmem:[#allocation2 + $0x1868] ss:$48 sps:$4 sm:$0xff]  }
 0x1af   :  { %7518 = vmatpush2.bf16.msra.mxu0 %v21628_v17  ;;  %v21685_v17 = vld [vmem:[#allocation2 + $0x1e68] ss:$48 sps:$4 sm:$0xff]  }
 0x1b0   :  { %7559 = vmatpush2.bf16.msra.mxu1 %v21631_v18  ;;  %7519 = vmatprep.subr.bf16.mxu0 %v21636_v22  ;;  %v21690_v18 = vld [vmem:[#allocation2 + $0x180c] ss:$48 sps:$4 sm:$0xff]  }
 0x1b1   :  { %7560 = vmatprep.subr.bf16.mxu1 %v21639_v23  ;;  %v21693_v22 = vld [vmem:[#allocation2 + $0x1e0c] ss:$48 sps:$4 sm:$0xff]   ;;  %v21688_v23 = vld [vmem:[#allocation2 + $0x1808] ss:$48 sps:$4 sm:$0xff]  }
 0x1b3   :  { %7520 = vmatpush2.bf16.msra.mxu0 %v21634_v24  ;;  %v21691_v24 = vld [vmem:[#allocation2 + $0x1e08] ss:$48 sps:$4 sm:$0xff]  }
 0x1b4   :  { %7561 = vmatpush2.bf16.msra.mxu1 %v21637_v25  ;;  %7521 = vmatprep.subr.bf16.mxu0 %v21642_v26  ;;  %v21696_v25 = vld [vmem:[#allocation2 + $0x1dac] ss:$48 sps:$4 sm:$0xff]  }
 0x1b5   :  { %7562 = vmatprep.subr.bf16.mxu1 %v21645_v27  ;;  %v21699_v26 = vld [vmem:[#allocation2 + $0x23ac] ss:$48 sps:$4 sm:$0xff]   ;;  %v21694_v27 = vld [vmem:[#allocation2 + $0x1da8] ss:$48 sps:$4 sm:$0xff]  }
 0x1b7   :  { %7522 = vmatpush2.bf16.msra.mxu0 %v21640_v28  ;;  %v21697_v28 = vld [vmem:[#allocation2 + $0x23a8] ss:$48 sps:$4 sm:$0xff]  }
 0x1b8   :  { %7563 = vmatpush2.bf16.msra.mxu1 %v21643_v30  ;;  %7573 = vmatprep.subr.bf16.mxu0 %v21648_v31  ;;  %v21702_v30 = vld [vmem:[#allocation2 + $0x1d4c] ss:$48 sps:$4 sm:$0xff]  }
 0x1b9   :  { %7614 = vmatprep.subr.bf16.mxu1 %v21651_v33  ;;  %v21705_v31 = vld [vmem:[#allocation2 + $0x234c] ss:$48 sps:$4 sm:$0xff]   ;;  %v21700_v33 = vld [vmem:[#allocation2 + $0x1d48] ss:$48 sps:$4 sm:$0xff]  }
 0x1ba   :  { %v7279_v44 = vpop.f32.mrf.mxu0  ;;  %7524 = vmatmul.mubr.bf16.vlgmr.msra.gmra.mxu0 %v25094_v20 }
 0x1bb   :  { %v7320_v45 = vpop.f32.mrf.mxu1  ;;  %7565 = vmatmul.mubr.bf16.vlgmr.msra.gmra.mxu1 %v25096_v21  ;;  %v7280_v46 = vadd.f32 %v7279_v44, %v25138_v14  ;;  %7574 = vmatpush1.bf16.msra.mxu0 %v21646_v34  ;;  %v21703_v34 = vld [vmem:[#allocation2 + $0x2348] ss:$48 sps:$4 sm:$0xff]   ;;  %v21717_v44 = vld [vmem:[#allocation2 + $0x228c] ss:$48 sps:$4 sm:$0xff]  }
 0x1bc   :  { %7615 = vmatpush1.bf16.msra.mxu1 %v21649_v35  ;;  %v7281_v47 = vpop.f32.mrf.mxu0  ;;  %7575 = vmatprep.subr.bf16.mxu0 %v21654_v36  ;;  %v21708_v35 = vld [vmem:[#allocation2 + $0x1cec] ss:$48 sps:$4 sm:$0xff]  }
 0x1bd   :  { %v7322_v48 = vpop.f32.mrf.mxu1  ;;  %7616 = vmatprep.subr.bf16.mxu1 %v21657_v38  ;;  %v25147_v54 = vadd.f32 %v7320_v45, %v7280_v46  ;;  %v7282_v55 = vadd.f32 %v7281_v47, %v25142_v19  ;;  %7605 = vmatprep.mubr.bf16.mxu0 %v25103_v29  ;;  %v21664_v19 = vld [vmem:[#allocation2 + $0x1988] ss:$48 sps:$4 sm:$0xff]   ;;  %v21711_v36 = vld [vmem:[#allocation2 + $0x22ec] ss:$48 sps:$4 sm:$0xff]  }
 0x1be   :  { %7646 = vmatprep.mubr.bf16.mxu1 %v25108_v32  ;;  %v7283_v59 = vpop.f32.mrf.mxu0  ;;  %v21706_v38 = vld [vmem:[#allocation2 + $0x1ce8] ss:$48 sps:$4 sm:$0xff]   ;;  %v21720_v47 = vld [vmem:[#allocation2 + $0x1c2c] ss:$48 sps:$4 sm:$0xff]  }
 0x1bf   :  { %v7324_v14 = vpop.f32.mrf.mxu1  ;;  %v25152_v61 = vadd.f32 %v7322_v48, %v7282_v55  ;;  %7576 = vmatpush1.bf16.msra.mxu0 %v21652_v42  ;;  %v21709_v42 = vld [vmem:[#allocation2 + $0x22e8] ss:$48 sps:$4 sm:$0xff]   ;;  %v21723_v48 = vld [vmem:[#allocation2 + $0x222c] ss:$48 sps:$4 sm:$0xff]  }
 0x1c0   :  { %7617 = vmatpush1.bf16.msra.mxu1 %v21655_v43  ;;  %v7284_v62 = vpop.f32.mrf.mxu0  ;;  %7577 = vmatprep.subr.bf16.mxu0 %v21660_v51  ;;  %v21714_v43 = vld [vmem:[#allocation2 + $0x1c8c] ss:$48 sps:$4 sm:$0xff]   ;;  %v21712_v45 = vld [vmem:[#allocation2 + $0x1c88] ss:$48 sps:$4 sm:$0xff]  }
 0x1c1   :  { %v7325_v63 = vpop.f32.mrf.mxu1  ;;  %7618 = vmatprep.subr.bf16.mxu1 %v21663_v53  ;;  %v21715_v46 = vld [vmem:[#allocation2 + $0x2288] ss:$48 sps:$4 sm:$0xff]   ;;  %v21726_v55 = vld [vmem:[#allocation2 + $0x1bcc] ss:$48 sps:$4 sm:$0xff]  }
 0x1c2   :  { %v21718_v51 = vld [vmem:[#allocation2 + $0x1c28] ss:$48 sps:$4 sm:$0xff]   ;;  %v21732_v14 = vld [vmem:[#allocation2 + $0x1b6c] ss:$48 sps:$4 sm:$0xff]  }
 0x1c3   :  { %7578 = vmatpush1.bf16.msra.mxu0 %v21658_v56  ;;  %v21721_v53 = vld [vmem:[#allocation2 + $0x2228] ss:$48 sps:$4 sm:$0xff]   ;;  %v21729_v56 = vld [vmem:[#allocation2 + $0x21cc] ss:$48 sps:$4 sm:$0xff]  }
 0x1c4   :  { %7619 = vmatpush1.bf16.msra.mxu1 %v21661_v58  ;;  %7579 = vmatprep.subr.bf16.mxu0 %v21666_v0  ;;  %v21724_v58 = vld [vmem:[#allocation2 + $0x1bc8] ss:$48 sps:$4 sm:$0xff]   ;;  %v21735_v62 = vld [vmem:[#allocation2 + $0x216c] ss:$48 sps:$4 sm:$0xff]  }
 0x1c5   :  { %7620 = vmatprep.subr.bf16.mxu1 %v21669_v1  ;;  %v21727_v59 = vld [vmem:[#allocation2 + $0x21c8] ss:$48 sps:$4 sm:$0xff]   ;;  %v21738_v1 = vld [vmem:[#allocation2 + $0x1b0c] ss:$48 sps:$4 sm:$0xff]  }
 0x1c6   :  { %v21730_v63 = vld [vmem:[#allocation2 + $0x1b68] ss:$48 sps:$4 sm:$0xff]  }
 0x1c7   :  { %7580 = vmatpush1.bf16.msra.mxu0 %v21664_v19  ;;  %v21733_v0 = vld [vmem:[#allocation2 + $0x2168] ss:$48 sps:$4 sm:$0xff]   ;;  %v21741_v19 = vld [vmem:[#allocation2 + $0x210c] ss:$48 sps:$4 sm:$0xff]  }
 0x1c8   :  { %7621 = vmatpush1.bf16.msra.mxu1 %v21667_v2  ;;  %7581 = vmatprep.subr.bf16.mxu0 %v21672_v3  ;;  %v21736_v2 = vld [vmem:[#allocation2 + $0x1b08] ss:$48 sps:$4 sm:$0xff]  }
 0x1c9   :  { %7622 = vmatprep.subr.bf16.mxu1 %v21675_v4  ;;  %v21739_v3 = vld [vmem:[#allocation2 + $0x2108] ss:$48 sps:$4 sm:$0xff]   ;;  %v21744_v4 = vld [vmem:[#allocation2 + $0x2b4] ss:$48 sps:$4 sm:$0xff]  }
 0x1cb   :  { %7582 = vmatpush1.bf16.msra.mxu0 %v21670_v5  ;;  %v21747_v5 = vld [vmem:[#allocation2 + $0x8b4] ss:$48 sps:$4 sm:$0xff]  }
 0x1cc   :  { %7623 = vmatpush1.bf16.msra.mxu1 %v21673_v6  ;;  %7583 = vmatprep.subr.bf16.mxu0 %v21678_v7  ;;  %v21742_v6 = vld [vmem:[#allocation2 + $0x2b0] ss:$48 sps:$4 sm:$0xff]  }
 0x1cd   :  { %7624 = vmatprep.subr.bf16.mxu1 %v21681_v10  ;;  %v21745_v7 = vld [vmem:[#allocation2 + $0x8b0] ss:$48 sps:$4 sm:$0xff]   ;;  %v21750_v10 = vld [vmem:[#allocation2 + $0x254] ss:$48 sps:$4 sm:$0xff]  }
 0x1cf   :  { %7584 = vmatpush1.bf16.msra.mxu0 %v21676_v11  ;;  %v21753_v11 = vld [vmem:[#allocation2 + $0x854] ss:$48 sps:$4 sm:$0xff]  }
 0x1d0   :  { %7625 = vmatpush1.bf16.msra.mxu1 %v21679_v12  ;;  %7585 = vmatprep.subr.bf16.mxu0 %v21684_v13  ;;  %v21748_v12 = vld [vmem:[#allocation2 + $0x250] ss:$48 sps:$4 sm:$0xff]  }
 0x1d1   :  { %7626 = vmatprep.subr.bf16.mxu1 %v21687_v15  ;;  %v21751_v13 = vld [vmem:[#allocation2 + $0x850] ss:$48 sps:$4 sm:$0xff]  }
 0x1d3   :  { %7586 = vmatpush1.bf16.msra.mxu0 %v21682_v16 }
 0x1d4   :  { %7627 = vmatpush1.bf16.msra.mxu1 %v21685_v17  ;;  %7587 = vmatprep.subr.bf16.mxu0 %v21690_v18 }
 0x1d5   :  { %7628 = vmatprep.subr.bf16.mxu1 %v21693_v22 }
 0x1d7   :  { %7588 = vmatpush1.bf16.msra.mxu0 %v21688_v23  ;;  %v21756_v23 = vld [vmem:[#allocation2 + $0x1f4] ss:$48 sps:$4 sm:$0xff]  }
 0x1d8   :  { %7629 = vmatpush1.bf16.msra.mxu1 %v21691_v24  ;;  %7589 = vmatprep.subr.bf16.mxu0 %v21696_v25  ;;  %v21759_v24 = vld [vmem:[#allocation2 + $0x7f4] ss:$48 sps:$4 sm:$0xff]  }
 0x1d9   :  { %7630 = vmatprep.subr.bf16.mxu1 %v21699_v26 }
 0x1db   :  { %7590 = vmatpush2.bf16.msra.mxu0 %v21694_v27  ;;  %v21754_v27 = vld [vmem:[#allocation2 + $0x1f0] ss:$48 sps:$4 sm:$0xff]  }
 0x1dc   :  { %7631 = vmatpush2.bf16.msra.mxu1 %v21697_v28  ;;  %7591 = vmatprep.subr.bf16.mxu0 %v21702_v30  ;;  %v21757_v28 = vld [vmem:[#allocation2 + $0x7f0] ss:$48 sps:$4 sm:$0xff]  }
 0x1dd   :  { %7632 = vmatprep.subr.bf16.mxu1 %v21705_v31 }
 0x1df   :  { %7592 = vmatpush2.bf16.msra.mxu0 %v21700_v33 }
 0x1e0   :  { %7633 = vmatpush2.bf16.msra.mxu1 %v21703_v34  ;;  %7593 = vmatprep.subr.bf16.mxu0 %v21708_v35  ;;  %v21762_v35 = vld [vmem:[#allocation2 + $0x194] ss:$48 sps:$4 sm:$0xff]  }
 0x1e1   :  { %7634 = vmatprep.subr.bf16.mxu1 %v21711_v36  ;;  %v21765_v36 = vld [vmem:[#allocation2 + $0x794] ss:$48 sps:$4 sm:$0xff]  }
 0x1e3   :  { %7594 = vmatpush2.bf16.msra.mxu0 %v21706_v38  ;;  %v21763_v38 = vld [vmem:[#allocation2 + $0x790] ss:$48 sps:$4 sm:$0xff]  }
 0x1e4   :  { %7635 = vmatpush2.bf16.msra.mxu1 %v21709_v42  ;;  %7595 = vmatprep.subr.bf16.mxu0 %v21714_v43  ;;  %v21768_v42 = vld [vmem:[#allocation2 + $0x134] ss:$48 sps:$4 sm:$0xff]  }
 0x1e5   :  { %7636 = vmatprep.subr.bf16.mxu1 %v21717_v44  ;;  %v21771_v43 = vld [vmem:[#allocation2 + $0x734] ss:$48 sps:$4 sm:$0xff]   ;;  %v21766_v44 = vld [vmem:[#allocation2 + $0x130] ss:$48 sps:$4 sm:$0xff]  }
 0x1e7   :  { %7596 = vmatpush2.bf16.msra.mxu0 %v21712_v45  ;;  %v21769_v45 = vld [vmem:[#allocation2 + $0x730] ss:$48 sps:$4 sm:$0xff]  }
 0x1e8   :  { %7637 = vmatpush2.bf16.msra.mxu1 %v21715_v46  ;;  %7597 = vmatprep.subr.bf16.mxu0 %v21720_v47  ;;  %v21774_v46 = vld [vmem:[#allocation2 + $0xd4] ss:$48 sps:$4 sm:$0xff]  }
 0x1e9   :  { %7638 = vmatprep.subr.bf16.mxu1 %v21723_v48  ;;  %v21777_v47 = vld [vmem:[#allocation2 + $0x6d4] ss:$48 sps:$4 sm:$0xff]   ;;  %v21772_v48 = vld [vmem:[#allocation2 + $0xd0] ss:$48 sps:$4 sm:$0xff]  }
 0x1eb   :  { %7598 = vmatpush2.bf16.msra.mxu0 %v21718_v51  ;;  %v21775_v51 = vld [vmem:[#allocation2 + $0x6d0] ss:$48 sps:$4 sm:$0xff]  }
 0x1ec   :  { %7639 = vmatpush2.bf16.msra.mxu1 %v21721_v53  ;;  %7599 = vmatprep.subr.bf16.mxu0 %v21726_v55  ;;  %v21780_v53 = vld [vmem:[#allocation2 + $0x74] ss:$48 sps:$4 sm:$0xff]  }
 0x1ed   :  { %7640 = vmatprep.subr.bf16.mxu1 %v21729_v56  ;;  %v21783_v55 = vld [vmem:[#allocation2 + $0x674] ss:$48 sps:$4 sm:$0xff]   ;;  %v21778_v56 = vld [vmem:[#allocation2 + $0x70] ss:$48 sps:$4 sm:$0xff]  }
 0x1ef   :  { %7600 = vmatpush2.bf16.msra.mxu0 %v21724_v58  ;;  %v21781_v58 = vld [vmem:[#allocation2 + $0x670] ss:$48 sps:$4 sm:$0xff]  }
 0x1f0   :  { %7641 = vmatpush2.bf16.msra.mxu1 %v21727_v59  ;;  %7601 = vmatprep.subr.bf16.mxu0 %v21732_v14  ;;  %v21786_v59 = vld [vmem:[#allocation2 + $0x14] ss:$48 sps:$4 sm:$0xff]  }
 0x1f1   :  { %7642 = vmatprep.subr.bf16.mxu1 %v21735_v62  ;;  %v21789_v14 = vld [vmem:[#allocation2 + $0x614] ss:$48 sps:$4 sm:$0xff]   ;;  %v21784_v62 = vld [vmem:[#allocation2 + $0x10] ss:$48 sps:$4 sm:$0xff]  }
 0x1f3   :  { %7602 = vmatpush2.bf16.msra.mxu0 %v21730_v63  ;;  %v21787_v63 = vld [vmem:[#allocation2 + $0x610] ss:$48 sps:$4 sm:$0xff]  }
 0x1f4   :  { %7643 = vmatpush2.bf16.msra.mxu1 %v21733_v0  ;;  %7603 = vmatprep.subr.bf16.mxu0 %v21738_v1  ;;  %v21792_v0 = vld [vmem:[#allocation2 + $0x5b4] ss:$48 sps:$4 sm:$0xff]  }
 0x1f5   :  { %7644 = vmatprep.subr.bf16.mxu1 %v21741_v19  ;;  %v21795_v1 = vld [vmem:[#allocation2 + $0xbb4] ss:$48 sps:$4 sm:$0xff]   ;;  %v21790_v19 = vld [vmem:[#allocation2 + $0x5b0] ss:$48 sps:$4 sm:$0xff]  }
 0x1f7   :  { %7604 = vmatpush2.bf16.msra.mxu0 %v21736_v2  ;;  %v21793_v2 = vld [vmem:[#allocation2 + $0xbb0] ss:$48 sps:$4 sm:$0xff]  }
 0x1f8   :  { %7645 = vmatpush2.bf16.msra.mxu1 %v21739_v3  ;;  %7655 = vmatprep.subr.bf16.mxu0 %v21744_v4  ;;  %v21798_v3 = vld [vmem:[#allocation2 + $0x554] ss:$48 sps:$4 sm:$0xff]  }
 0x1f9   :  { %7696 = vmatprep.subr.bf16.mxu1 %v21747_v5  ;;  %v21801_v4 = vld [vmem:[#allocation2 + $0xb54] ss:$48 sps:$4 sm:$0xff]   ;;  %v21796_v5 = vld [vmem:[#allocation2 + $0x550] ss:$48 sps:$4 sm:$0xff]  }
 0x1fa   :  { %v7361_v15 = vpop.f32.mrf.mxu0  ;;  %7606 = vmatmul.mubr.bf16.vlgmr.msra.gmra.mxu0 %v25118_v39 }
 0x1fb   :  { %v7402_v16 = vpop.f32.mrf.mxu1  ;;  %7647 = vmatmul.mubr.bf16.vlgmr.msra.gmra.mxu1 %v25120_v41  ;;  %v7362_v17 = vadd.f32 %v7361_v15, %v25147_v54  ;;  %7656 = vmatpush1.bf16.msra.mxu0 %v21742_v6  ;;  %v21799_v6 = vld [vmem:[#allocation2 + $0xb50] ss:$48 sps:$4 sm:$0xff]   ;;  %v21813_v15 = vld [vmem:[#allocation2 + $0xa94] ss:$48 sps:$4 sm:$0xff]  }
 0x1fc   :  { %7697 = vmatpush1.bf16.msra.mxu1 %v21745_v7  ;;  %v7363_v18 = vpop.f32.mrf.mxu0  ;;  %7657 = vmatprep.subr.bf16.mxu0 %v21750_v10  ;;  %v21804_v7 = vld [vmem:[#allocation2 + $0x4f4] ss:$48 sps:$4 sm:$0xff]  }
 0x1fd   :  { %v7404_v22 = vpop.f32.mrf.mxu1  ;;  %7698 = vmatprep.subr.bf16.mxu1 %v21753_v11  ;;  %v25157_v25 = vadd.f32 %v7402_v16, %v7362_v17  ;;  %v7364_v26 = vadd.f32 %v7363_v18, %v25152_v61  ;;  %7687 = vmatprep.mubr.bf16.mxu0 %v25055_v49  ;;  %v21760_v61 = vld [vmem:[#allocation2 + $0x190] ss:$48 sps:$4 sm:$0xff]   ;;  %v21807_v10 = vld [vmem:[#allocation2 + $0xaf4] ss:$48 sps:$4 sm:$0xff]  }
 0x1fe   :  { %7728 = vmatprep.mubr.bf16.mxu1 %v25060_v52  ;;  %v7365_v30 = vpop.f32.mrf.mxu0  ;;  %v21802_v11 = vld [vmem:[#allocation2 + $0x4f0] ss:$48 sps:$4 sm:$0xff]   ;;  %v21816_v18 = vld [vmem:[#allocation2 + $0x434] ss:$48 sps:$4 sm:$0xff]  }
 0x1ff   :  { %v7406_v54 = vpop.f32.mrf.mxu1  ;;  %v25162_v31 = vadd.f32 %v7404_v22, %v7364_v26  ;;  %7658 = vmatpush1.bf16.msra.mxu0 %v21748_v12  ;;  %v21805_v12 = vld [vmem:[#allocation2 + $0xaf0] ss:$48 sps:$4 sm:$0xff]   ;;  %v21819_v22 = vld [vmem:[#allocation2 + $0xa34] ss:$48 sps:$4 sm:$0xff]  }
 0x200   :  { %7699 = vmatpush1.bf16.msra.mxu1 %v21751_v13  ;;  %v7366_v33 = vpop.f32.mrf.mxu0  ;;  %7659 = vmatprep.subr.bf16.mxu0 %v21756_v23  ;;  %v21810_v13 = vld [vmem:[#allocation2 + $0x494] ss:$48 sps:$4 sm:$0xff]   ;;  %v21808_v16 = vld [vmem:[#allocation2 + $0x490] ss:$48 sps:$4 sm:$0xff]  }
 0x201   :  { %v7407_v34 = vpop.f32.mrf.mxu1  ;;  %7700 = vmatprep.subr.bf16.mxu1 %v21759_v24  ;;  %v21811_v17 = vld [vmem:[#allocation2 + $0xa90] ss:$48 sps:$4 sm:$0xff]   ;;  %v21822_v26 = vld [vmem:[#allocation2 + $0x3d4] ss:$48 sps:$4 sm:$0xff]  }
 0x202   :  { %v21814_v23 = vld [vmem:[#allocation2 + $0x430] ss:$48 sps:$4 sm:$0xff]   ;;  %v21828_v54 = vld [vmem:[#allocation2 + $0x374] ss:$48 sps:$4 sm:$0xff]  }
 0x203   :  { %7660 = vmatpush1.bf16.msra.mxu0 %v21754_v27  ;;  %v21817_v24 = vld [vmem:[#allocation2 + $0xa30] ss:$48 sps:$4 sm:$0xff]   ;;  %v21825_v27 = vld [vmem:[#allocation2 + $0x9d4] ss:$48 sps:$4 sm:$0xff]  }
 0x204   :  { %7701 = vmatpush1.bf16.msra.mxu1 %v21757_v28  ;;  %7661 = vmatprep.subr.bf16.mxu0 %v21762_v35  ;;  %v21820_v28 = vld [vmem:[#allocation2 + $0x3d0] ss:$48 sps:$4 sm:$0xff]   ;;  %v21831_v33 = vld [vmem:[#allocation2 + $0x974] ss:$48 sps:$4 sm:$0xff]  }
 0x205   :  { %7702 = vmatprep.subr.bf16.mxu1 %v21765_v36  ;;  %v21823_v30 = vld [vmem:[#allocation2 + $0x9d0] ss:$48 sps:$4 sm:$0xff]   ;;  %v21834_v36 = vld [vmem:[#allocation2 + $0x314] ss:$48 sps:$4 sm:$0xff]  }
 0x206   :  { %v21826_v34 = vld [vmem:[#allocation2 + $0x370] ss:$48 sps:$4 sm:$0xff]  }
 0x207   :  { %7662 = vmatpush1.bf16.msra.mxu0 %v21760_v61  ;;  %v21829_v35 = vld [vmem:[#allocation2 + $0x970] ss:$48 sps:$4 sm:$0xff]   ;;  %v21837_v61 = vld [vmem:[#allocation2 + $0x914] ss:$48 sps:$4 sm:$0xff]  }
 0x208   :  { %7703 = vmatpush1.bf16.msra.mxu1 %v21763_v38  ;;  %7663 = vmatprep.subr.bf16.mxu0 %v21768_v42  ;;  %v21832_v38 = vld [vmem:[#allocation2 + $0x310] ss:$48 sps:$4 sm:$0xff]  }
 0x209   :  { %7704 = vmatprep.subr.bf16.mxu1 %v21771_v43  ;;  %v21835_v42 = vld [vmem:[#allocation2 + $0x910] ss:$48 sps:$4 sm:$0xff]   ;;  %v25165_v43 = vsub.s32 2, %v25126_v50 }
 0x20b   :  { %7664 = vmatpush1.bf16.msra.mxu0 %v21766_v44  ;;  %v21840_v44 = vld [vmem:[#allocation2 + $0xeb4] ss:$48 sps:$4 sm:$0xff]  }
 0x20c   :  { %7705 = vmatpush1.bf16.msra.mxu1 %v21769_v45  ;;  %7665 = vmatprep.subr.bf16.mxu0 %v21774_v46  ;;  %v21843_v45 = vld [vmem:[#allocation2 + $0x14b4] ss:$48 sps:$4 sm:$0xff]   ;;  %v21838_v46 = vld [vmem:[#allocation2 + $0xeb0] ss:$48 sps:$4 sm:$0xff]  }
 0x20d   :  { %7706 = vmatprep.subr.bf16.mxu1 %v21777_v47  ;;  %v21841_v47 = vld [vmem:[#allocation2 + $0x14b0] ss:$48 sps:$4 sm:$0xff]  }
 0x20f   :  { %7666 = vmatpush1.bf16.msra.mxu0 %v21772_v48  ;;  %v25168_v48 = vsub.s32 3, %v25126_v50 }
 0x210   :  { %7707 = vmatpush1.bf16.msra.mxu1 %v21775_v51  ;;  %7667 = vmatprep.subr.bf16.mxu0 %v21780_v53  ;;  %v24726_v51 = vld [vmem:[#allocation4] sm:$0xff] }
 0x211   :  { %7708 = vmatprep.subr.bf16.mxu1 %v21783_v55  ;;  %v1354_v53 = vrot.slane %v24726_v51, %v25165_v43  ;;  %v21846_v55 = vld [vmem:[#allocation2 + $0xe54] ss:$48 sps:$4 sm:$0xff]  }
 0x213   :  { %7668 = vmatpush1.bf16.msra.mxu0 %v21778_v56  ;;  %v21849_v56 = vld [vmem:[#allocation2 + $0x1454] ss:$48 sps:$4 sm:$0xff]  }
 0x214   :  { %7709 = vmatpush1.bf16.msra.mxu1 %v21781_v58  ;;  %7669 = vmatprep.subr.bf16.mxu0 %v21786_v59  ;;  %v1358_v58 = vrot.slane %v24726_v51, %v25168_v48  ;;  %v21844_v59 = vld [vmem:[#allocation2 + $0xe50] ss:$48 sps:$4 sm:$0xff]  }
 0x215   :  { %7710 = vmatprep.subr.bf16.mxu1 %v21789_v14  ;;  %v21847_v14 = vld [vmem:[#allocation2 + $0x1450] ss:$48 sps:$4 sm:$0xff]  }
 0x216   :  { %v21886_v51 = vld [vmem:[#allocation2 + $0x11b0] ss:$48 sps:$4 sm:$0xff]  }
 0x217   :  { %7670 = vmatpush1.bf16.msra.mxu0 %v21784_v62 }
 0x218   :  { %7711 = vmatpush1.bf16.msra.mxu1 %v21787_v63  ;;  %7671 = vmatprep.subr.bf16.mxu0 %v21792_v0 }
 0x219   :  { %7712 = vmatprep.subr.bf16.mxu1 %v21795_v1 }
 0x21b   :  { %7672 = vmatpush2.bf16.msra.mxu0 %v21790_v19 }
 0x21c   :  { %7713 = vmatpush2.bf16.msra.mxu1 %v21793_v2  ;;  %7673 = vmatprep.subr.bf16.mxu0 %v21798_v3  ;;  %v21852_v2 = vld [vmem:[#allocation2 + $0xdf4] ss:$48 sps:$4 sm:$0xff]  }
 0x21d   :  { %7714 = vmatprep.subr.bf16.mxu1 %v21801_v4  ;;  %v21855_v3 = vld [vmem:[#allocation2 + $0x13f4] ss:$48 sps:$4 sm:$0xff]  }
 0x21f   :  { %7674 = vmatpush2.bf16.msra.mxu0 %v21796_v5 }
 0x220   :  { %7715 = vmatpush2.bf16.msra.mxu1 %v21799_v6  ;;  %7675 = vmatprep.subr.bf16.mxu0 %v21804_v7  ;;  %v21850_v6 = vld [vmem:[#allocation2 + $0xdf0] ss:$48 sps:$4 sm:$0xff]  }
 0x221   :  { %7716 = vmatprep.subr.bf16.mxu1 %v21807_v10  ;;  %v21853_v7 = vld [vmem:[#allocation2 + $0x13f0] ss:$48 sps:$4 sm:$0xff]  }
 0x223   :  { %7676 = vmatpush2.bf16.msra.mxu0 %v21802_v11 }
 0x224   :  { %7717 = vmatpush2.bf16.msra.mxu1 %v21805_v12  ;;  %7677 = vmatprep.subr.bf16.mxu0 %v21810_v13 }
 0x225   :  { %7718 = vmatprep.subr.bf16.mxu1 %v21813_v15 }
 0x227   :  { %7678 = vmatpush2.bf16.msra.mxu0 %v21808_v16  ;;  %v21858_v16 = vld [vmem:[#allocation2 + $0xd94] ss:$48 sps:$4 sm:$0xff]  }
 0x228   :  { %7719 = vmatpush2.bf16.msra.mxu1 %v21811_v17  ;;  %7679 = vmatprep.subr.bf16.mxu0 %v21816_v18  ;;  %v21861_v17 = vld [vmem:[#allocation2 + $0x1394] ss:$48 sps:$4 sm:$0xff]   ;;  %v21856_v18 = vld [vmem:[#allocation2 + $0xd90] ss:$48 sps:$4 sm:$0xff]  }
 0x229   :  { %7720 = vmatprep.subr.bf16.mxu1 %v21819_v22  ;;  %v21859_v22 = vld [vmem:[#allocation2 + $0x1390] ss:$48 sps:$4 sm:$0xff]  }
 0x22b   :  { %7680 = vmatpush2.bf16.msra.mxu0 %v21814_v23  ;;  %v21864_v23 = vld [vmem:[#allocation2 + $0xd34] ss:$48 sps:$4 sm:$0xff]  }
 0x22c   :  { %7721 = vmatpush2.bf16.msra.mxu1 %v21817_v24  ;;  %7681 = vmatprep.subr.bf16.mxu0 %v21822_v26  ;;  %v21867_v24 = vld [vmem:[#allocation2 + $0x1334] ss:$48 sps:$4 sm:$0xff]   ;;  %v21862_v26 = vld [vmem:[#allocation2 + $0xd30] ss:$48 sps:$4 sm:$0xff]  }
 0x22d   :  { %7722 = vmatprep.subr.bf16.mxu1 %v21825_v27  ;;  %v21865_v27 = vld [vmem:[#allocation2 + $0x1330] ss:$48 sps:$4 sm:$0xff]  }
 0x22f   :  { %7682 = vmatpush2.bf16.msra.mxu0 %v21820_v28  ;;  %v21870_v28 = vld [vmem:[#allocation2 + $0xcd4] ss:$48 sps:$4 sm:$0xff]  }
 0x230   :  { %7723 = vmatpush2.bf16.msra.mxu1 %v21823_v30  ;;  %7683 = vmatprep.subr.bf16.mxu0 %v21828_v54  ;;  %v21873_v30 = vld [vmem:[#allocation2 + $0x12d4] ss:$48 sps:$4 sm:$0xff]   ;;  %v21868_v54 = vld [vmem:[#allocation2 + $0xcd0] ss:$48 sps:$4 sm:$0xff]  }
 0x231   :  { %7724 = vmatprep.subr.bf16.mxu1 %v21831_v33  ;;  %v21871_v33 = vld [vmem:[#allocation2 + $0x12d0] ss:$48 sps:$4 sm:$0xff]  }
 0x233   :  { %7684 = vmatpush2.bf16.msra.mxu0 %v21826_v34  ;;  %v21876_v34 = vld [vmem:[#allocation2 + $0xc74] ss:$48 sps:$4 sm:$0xff]  }
 0x234   :  { %7725 = vmatpush2.bf16.msra.mxu1 %v21829_v35  ;;  %7685 = vmatprep.subr.bf16.mxu0 %v21834_v36  ;;  %v21879_v35 = vld [vmem:[#allocation2 + $0x1274] ss:$48 sps:$4 sm:$0xff]   ;;  %v21874_v36 = vld [vmem:[#allocation2 + $0xc70] ss:$48 sps:$4 sm:$0xff]  }
 0x235   :  { %7726 = vmatprep.subr.bf16.mxu1 %v21837_v61  ;;  %v21877_v61 = vld [vmem:[#allocation2 + $0x1270] ss:$48 sps:$4 sm:$0xff]  }
 0x237   :  { %7686 = vmatpush2.bf16.msra.mxu0 %v21832_v38  ;;  %v21882_v38 = vld [vmem:[#allocation2 + $0xc14] ss:$48 sps:$4 sm:$0xff]  }
 0x238   :  { %7727 = vmatpush2.bf16.msra.mxu1 %v21835_v42  ;;  %7737 = vmatprep.subr.bf16.mxu0 %v21840_v44  ;;  %v21885_v42 = vld [vmem:[#allocation2 + $0x1214] ss:$48 sps:$4 sm:$0xff]   ;;  %v21880_v44 = vld [vmem:[#allocation2 + $0xc10] ss:$48 sps:$4 sm:$0xff]  }
 0x239   :  { %7778 = vmatprep.subr.bf16.mxu1 %v21843_v45  ;;  %v21883_v45 = vld [vmem:[#allocation2 + $0x1210] ss:$48 sps:$4 sm:$0xff]  }
 0x23a   :  { %v7443_v62 = vpop.f32.mrf.mxu0  ;;  %7688 = vmatmul.mubr.bf16.vlgmr.msra.gmra.mxu0 %v25070_v8 }
 0x23b   :  { %v7484_v63 = vpop.f32.mrf.mxu1  ;;  %7729 = vmatmul.mubr.bf16.vlgmr.msra.gmra.mxu1 %v25072_v9  ;;  %v7444_v0 = vadd.f32 %v7443_v62, %v1354_v53  ;;  %7738 = vmatpush1.bf16.msra.mxu0 %v21838_v46  ;;  %v21888_v46 = vld [vmem:[#allocation2 + $0x11b4] ss:$48 sps:$4 sm:$0xff]   ;;  %v21889_v53 = vld [vmem:[#allocation2 + $0x17b0] ss:$48 sps:$4 sm:$0xff]  }
 0x23c   :  { %7779 = vmatpush1.bf16.msra.mxu1 %v21841_v47  ;;  %v7445_v1 = vpop.f32.mrf.mxu0  ;;  %7739 = vmatprep.subr.bf16.mxu0 %v21846_v55  ;;  %v21891_v47 = vld [vmem:[#allocation2 + $0x17b4] ss:$48 sps:$4 sm:$0xff]  }
 0x23d   :  { %v7486_v19 = vpop.f32.mrf.mxu1  ;;  %7780 = vmatprep.subr.bf16.mxu1 %v21849_v56  ;;  %v25174_v4 = vadd.f32 %v7484_v63, %v7444_v0  ;;  %v7446_v5 = vadd.f32 %v7445_v1, %v1358_v58  ;;  %7769 = vmatprep.mubr.bf16.mxu0 %v25079_v37  ;;  %v21894_v55 = vld [vmem:[#allocation2 + $0x1154] ss:$48 sps:$4 sm:$0xff]   ;;  %v21892_v58 = vld [vmem:[#allocation2 + $0x1150] ss:$48 sps:$4 sm:$0xff]  }
 0x23e   :  { %7810 = vmatprep.mubr.bf16.mxu1 %v25084_v40  ;;  %v7447_v10 = vpop.f32.mrf.mxu0  ;;  %v21897_v56 = vld [vmem:[#allocation2 + $0x1754] ss:$48 sps:$4 sm:$0xff]   ;;  %v21898_v63 = vld [vmem:[#allocation2 + $0x10f0] ss:$48 sps:$4 sm:$0xff]  }
 0x23f   :  { %v7488_v11 = vpop.f32.mrf.mxu1  ;;  %v25178_v12 = vadd.f32 %v7486_v19, %v7446_v5  ;;  %7740 = vmatpush1.bf16.msra.mxu0 %v21844_v59  ;;  %v21895_v59 = vld [vmem:[#allocation2 + $0x1750] ss:$48 sps:$4 sm:$0xff]   ;;  %v21903_v62 = vld [vmem:[#allocation2 + $0x16f4] ss:$48 sps:$4 sm:$0xff]  }
 0x240   :  { %7781 = vmatpush1.bf16.msra.mxu1 %v21847_v14  ;;  %v7448_v13 = vpop.f32.mrf.mxu0  ;;  %7741 = vmatprep.subr.bf16.mxu0 %v21852_v2  ;;  %v21900_v14 = vld [vmem:[#allocation2 + $0x10f4] ss:$48 sps:$4 sm:$0xff]   ;;  %v21901_v0 = vld [vmem:[#allocation2 + $0x16f0] ss:$48 sps:$4 sm:$0xff]  }
 0x241   :  { %v7489_v15 = vpop.f32.mrf.mxu1  ;;  %7782 = vmatprep.subr.bf16.mxu1 %v21855_v3  ;;  %v21906_v1 = vld [vmem:[#allocation2 + $0x1094] ss:$48 sps:$4 sm:$0xff]   ;;  %v21904_v2 = vld [vmem:[#allocation2 + $0x1090] ss:$48 sps:$4 sm:$0xff]  }
 0x242   :  { %v21909_v19 = vld [vmem:[#allocation2 + $0x1694] ss:$48 sps:$4 sm:$0xff]   ;;  %v21907_v3 = vld [vmem:[#allocation2 + $0x1690] ss:$48 sps:$4 sm:$0xff]  }
 0x243   :  { %7742 = vmatpush1.bf16.msra.mxu0 %v21850_v6  ;;  %v21912_v5 = vld [vmem:[#allocation2 + $0x1034] ss:$48 sps:$4 sm:$0xff]   ;;  %v21913_v10 = vld [vmem:[#allocation2 + $0x1630] ss:$48 sps:$4 sm:$0xff]  }
 0x244   :  { %7783 = vmatpush1.bf16.msra.mxu1 %v21853_v7  ;;  %7743 = vmatprep.subr.bf16.mxu0 %v21858_v16  ;;  %v21915_v6 = vld [vmem:[#allocation2 + $0x1634] ss:$48 sps:$4 sm:$0xff]   ;;  %v21910_v7 = vld [vmem:[#allocation2 + $0x1030] ss:$48 sps:$4 sm:$0xff]  }
 0x245   :  { %7784 = vmatprep.subr.bf16.mxu1 %v21861_v17  ;;  %v21918_v11 = vld [vmem:[#allocation2 + $0xfd4] ss:$48 sps:$4 sm:$0xff]   ;;  %v21916_v15 = vld [vmem:[#allocation2 + $0xfd0] ss:$48 sps:$4 sm:$0xff]  }
 0x246   :  { %v21921_v13 = vld [vmem:[#allocation2 + $0x15d4] ss:$48 sps:$4 sm:$0xff]   ;;  %v21919_v16 = vld [vmem:[#allocation2 + $0x15d0] ss:$48 sps:$4 sm:$0xff]  }
 0x247   :  { %7744 = vmatpush1.bf16.msra.mxu0 %v21856_v18  ;;  %v21924_v17 = vld [vmem:[#allocation2 + $0xf74] ss:$48 sps:$4 sm:$0xff]  }
 0x248   :  { %7785 = vmatpush1.bf16.msra.mxu1 %v21859_v22  ;;  %7745 = vmatprep.subr.bf16.mxu0 %v21864_v23  ;;  %v21927_v18 = vld [vmem:[#allocation2 + $0x1574] ss:$48 sps:$4 sm:$0xff]   ;;  %v21922_v22 = vld [vmem:[#allocation2 + $0xf70] ss:$48 sps:$4 sm:$0xff]  }
 0x249   :  { %7786 = vmatprep.subr.bf16.mxu1 %v21867_v24  ;;  %v21925_v23 = vld [vmem:[#allocation2 + $0x1570] ss:$48 sps:$4 sm:$0xff]   ;;  %v21930_v24 = vld [vmem:[#allocation2 + $0xf14] ss:$48 sps:$4 sm:$0xff]  }
 0x24b   :  { %7746 = vmatpush1.bf16.msra.mxu0 %v21862_v26  ;;  %v21933_v26 = vld [vmem:[#allocation2 + $0x1514] ss:$48 sps:$4 sm:$0xff]  }
 0x24c   :  { %7787 = vmatpush1.bf16.msra.mxu1 %v21865_v27  ;;  %7747 = vmatprep.subr.bf16.mxu0 %v21870_v28  ;;  %v21928_v27 = vld [vmem:[#allocation2 + $0xf10] ss:$48 sps:$4 sm:$0xff]  }
 0x24d   :  { %7788 = vmatprep.subr.bf16.mxu1 %v21873_v30  ;;  %v21931_v28 = vld [vmem:[#allocation2 + $0x1510] ss:$48 sps:$4 sm:$0xff]   ;;  %v21936_v30 = vld [vmem:[#allocation2 + $0x1ab4] ss:$48 sps:$4 sm:$0xff]  }
 0x24f   :  { %7748 = vmatpush1.bf16.msra.mxu0 %v21868_v54  ;;  %v21939_v54 = vld [vmem:[#allocation2 + $0x20b4] ss:$48 sps:$4 sm:$0xff]  }
 0x250   :  { %7789 = vmatpush1.bf16.msra.mxu1 %v21871_v33  ;;  %7749 = vmatprep.subr.bf16.mxu0 %v21876_v34  ;;  %v21934_v33 = vld [vmem:[#allocation2 + $0x1ab0] ss:$48 sps:$4 sm:$0xff]  }
 0x251   :  { %7790 = vmatprep.subr.bf16.mxu1 %v21879_v35  ;;  %v21937_v34 = vld [vmem:[#allocation2 + $0x20b0] ss:$48 sps:$4 sm:$0xff]   ;;  %v21942_v35 = vld [vmem:[#allocation2 + $0x1a54] ss:$48 sps:$4 sm:$0xff]  }
 0x253   :  { %7750 = vmatpush1.bf16.msra.mxu0 %v21874_v36  ;;  %v21945_v36 = vld [vmem:[#allocation2 + $0x2054] ss:$48 sps:$4 sm:$0xff]  }
 0x254   :  { %7791 = vmatpush1.bf16.msra.mxu1 %v21877_v61  ;;  %7751 = vmatprep.subr.bf16.mxu0 %v21882_v38  ;;  %v21940_v61 = vld [vmem:[#allocation2 + $0x1a50] ss:$48 sps:$4 sm:$0xff]  }
 0x255   :  { %7792 = vmatprep.subr.bf16.mxu1 %v21885_v42  ;;  %v21943_v38 = vld [vmem:[#allocation2 + $0x2050] ss:$48 sps:$4 sm:$0xff]  }
 0x257   :  { %7752 = vmatpush1.bf16.msra.mxu0 %v21880_v44 }
 0x258   :  { %7793 = vmatpush1.bf16.msra.mxu1 %v21883_v45  ;;  %7753 = vmatprep.subr.bf16.mxu0 %v21888_v46 }
 0x259   :  { %7794 = vmatprep.subr.bf16.mxu1 %v21891_v47 }
 0x25b   :  { %7754 = vmatpush2.bf16.msra.mxu0 %v21886_v51  ;;  %v21948_v51 = vld [vmem:[#allocation2 + $0x19f4] ss:$48 sps:$4 sm:$0xff]  }
 0x25c   :  { %7795 = vmatpush2.bf16.msra.mxu1 %v21889_v53  ;;  %7755 = vmatprep.subr.bf16.mxu0 %v21894_v55  ;;  %v21951_v53 = vld [vmem:[#allocation2 + $0x1ff4] ss:$48 sps:$4 sm:$0xff]  }
 0x25d   :  { %7796 = vmatprep.subr.bf16.mxu1 %v21897_v56 }
 0x25f   :  { %7756 = vmatpush2.bf16.msra.mxu0 %v21892_v58  ;;  %v21946_v58 = vld [vmem:[#allocation2 + $0x19f0] ss:$48 sps:$4 sm:$0xff]  }
 0x260   :  { %7797 = vmatpush2.bf16.msra.mxu1 %v21895_v59  ;;  %7757 = vmatprep.subr.bf16.mxu0 %v21900_v14  ;;  %v21949_v59 = vld [vmem:[#allocation2 + $0x1ff0] ss:$48 sps:$4 sm:$0xff]  }
 0x261   :  { %7798 = vmatprep.subr.bf16.mxu1 %v21903_v62 }
 0x263   :  { %7758 = vmatpush2.bf16.msra.mxu0 %v21898_v63 }
 0x264   :  { %7799 = vmatpush2.bf16.msra.mxu1 %v21901_v0  ;;  %7759 = vmatprep.subr.bf16.mxu0 %v21906_v1  ;;  %v21954_v1 = vld [vmem:[#allocation2 + $0x1994] ss:$48 sps:$4 sm:$0xff]  }
 0x265   :  { %7800 = vmatprep.subr.bf16.mxu1 %v21909_v19  ;;  %v21957_v19 = vld [vmem:[#allocation2 + $0x1f94] ss:$48 sps:$4 sm:$0xff]  }
 0x267   :  { %7760 = vmatpush2.bf16.msra.mxu0 %v21904_v2  ;;  %v21955_v2 = vld [vmem:[#allocation2 + $0x1f90] ss:$48 sps:$4 sm:$0xff]  }
 0x268   :  { %7801 = vmatpush2.bf16.msra.mxu1 %v21907_v3  ;;  %7761 = vmatprep.subr.bf16.mxu0 %v21912_v5  ;;  %v21960_v3 = vld [vmem:[#allocation2 + $0x1934] ss:$48 sps:$4 sm:$0xff]  }
 0x269   :  { %7802 = vmatprep.subr.bf16.mxu1 %v21915_v6  ;;  %v21963_v5 = vld [vmem:[#allocation2 + $0x1f34] ss:$48 sps:$4 sm:$0xff]   ;;  %v21958_v6 = vld [vmem:[#allocation2 + $0x1930] ss:$48 sps:$4 sm:$0xff]  }
 0x26b   :  { %7762 = vmatpush2.bf16.msra.mxu0 %v21910_v7  ;;  %v21961_v7 = vld [vmem:[#allocation2 + $0x1f30] ss:$48 sps:$4 sm:$0xff]  }
 0x26c   :  { %7803 = vmatpush2.bf16.msra.mxu1 %v21913_v10  ;;  %7763 = vmatprep.subr.bf16.mxu0 %v21918_v11  ;;  %v21966_v10 = vld [vmem:[#allocation2 + $0x18d4] ss:$48 sps:$4 sm:$0xff]  }
 0x26d   :  { %7804 = vmatprep.subr.bf16.mxu1 %v21921_v13  ;;  %v21969_v11 = vld [vmem:[#allocation2 + $0x1ed4] ss:$48 sps:$4 sm:$0xff]   ;;  %v21964_v13 = vld [vmem:[#allocation2 + $0x18d0] ss:$48 sps:$4 sm:$0xff]  }
 0x26f   :  { %7764 = vmatpush2.bf16.msra.mxu0 %v21916_v15  ;;  %v21967_v15 = vld [vmem:[#allocation2 + $0x1ed0] ss:$48 sps:$4 sm:$0xff]  }
 0x270   :  { %7805 = vmatpush2.bf16.msra.mxu1 %v21919_v16  ;;  %7765 = vmatprep.subr.bf16.mxu0 %v21924_v17  ;;  %v21972_v16 = vld [vmem:[#allocation2 + $0x1874] ss:$48 sps:$4 sm:$0xff]  }
 0x271   :  { %7806 = vmatprep.subr.bf16.mxu1 %v21927_v18  ;;  %v21975_v17 = vld [vmem:[#allocation2 + $0x1e74] ss:$48 sps:$4 sm:$0xff]   ;;  %v21970_v18 = vld [vmem:[#allocation2 + $0x1870] ss:$48 sps:$4 sm:$0xff]  }
 0x273   :  { %7766 = vmatpush2.bf16.msra.mxu0 %v21922_v22  ;;  %v21973_v22 = vld [vmem:[#allocation2 + $0x1e70] ss:$48 sps:$4 sm:$0xff]  }
 0x274   :  { %7807 = vmatpush2.bf16.msra.mxu1 %v21925_v23  ;;  %7767 = vmatprep.subr.bf16.mxu0 %v21930_v24  ;;  %v21978_v23 = vld [vmem:[#allocation2 + $0x1814] ss:$48 sps:$4 sm:$0xff]  }
 0x275   :  { %7808 = vmatprep.subr.bf16.mxu1 %v21933_v26  ;;  %v21981_v24 = vld [vmem:[#allocation2 + $0x1e14] ss:$48 sps:$4 sm:$0xff]   ;;  %v21976_v26 = vld [vmem:[#allocation2 + $0x1810] ss:$48 sps:$4 sm:$0xff]  }
 0x277   :  { %7768 = vmatpush2.bf16.msra.mxu0 %v21928_v27  ;;  %v21979_v27 = vld [vmem:[#allocation2 + $0x1e10] ss:$48 sps:$4 sm:$0xff]  }
 0x278   :  { %7809 = vmatpush2.bf16.msra.mxu1 %v21931_v28  ;;  %7819 = vmatprep.subr.bf16.mxu0 %v21936_v30  ;;  %v21984_v28 = vld [vmem:[#allocation2 + $0x1db4] ss:$48 sps:$4 sm:$0xff]  }
 0x279   :  { %7860 = vmatprep.subr.bf16.mxu1 %v21939_v54  ;;  %v21987_v30 = vld [vmem:[#allocation2 + $0x23b4] ss:$48 sps:$4 sm:$0xff]   ;;  %v21982_v54 = vld [vmem:[#allocation2 + $0x1db0] ss:$48 sps:$4 sm:$0xff]  }
 0x27a   :  { %v7525_v42 = vpop.f32.mrf.mxu0  ;;  %7770 = vmatmul.mubr.bf16.vlgmr.msra.gmra.mxu0 %v25094_v20 }
 0x27b   :  { %v7566_v44 = vpop.f32.mrf.mxu1  ;;  %7811 = vmatmul.mubr.bf16.vlgmr.msra.gmra.mxu1 %v25096_v21  ;;  %v7526_v45 = vadd.f32 %v7525_v42, %v25174_v4  ;;  %7820 = vmatpush1.bf16.msra.mxu0 %v21934_v33  ;;  %v21985_v33 = vld [vmem:[#allocation2 + $0x23b0] ss:$48 sps:$4 sm:$0xff]   ;;  %v21999_v42 = vld [vmem:[#allocation2 + $0x22f4] ss:$48 sps:$4 sm:$0xff]  }
 0x27c   :  { %7861 = vmatpush1.bf16.msra.mxu1 %v21937_v34  ;;  %v7527_v46 = vpop.f32.mrf.mxu0  ;;  %7821 = vmatprep.subr.bf16.mxu0 %v21942_v35  ;;  %v21990_v34 = vld [vmem:[#allocation2 + $0x1d54] ss:$48 sps:$4 sm:$0xff]  }
 0x27d   :  { %v7568_v47 = vpop.f32.mrf.mxu1  ;;  %7862 = vmatprep.subr.bf16.mxu1 %v21945_v36  ;;  %v25183_v55 = vadd.f32 %v7566_v44, %v7526_v45  ;;  %v7528_v56 = vadd.f32 %v7527_v46, %v25178_v12  ;;  %7851 = vmatprep.mubr.bf16.mxu0 %v25103_v29  ;;  %v21952_v12 = vld [vmem:[#allocation2 + $0x1990] ss:$48 sps:$4 sm:$0xff]   ;;  %v21993_v35 = vld [vmem:[#allocation2 + $0x2354] ss:$48 sps:$4 sm:$0xff]  }
 0x27e   :  { %7892 = vmatprep.mubr.bf16.mxu1 %v25108_v32  ;;  %v7529_v14 = vpop.f32.mrf.mxu0  ;;  %v21988_v36 = vld [vmem:[#allocation2 + $0x1d50] ss:$48 sps:$4 sm:$0xff]   ;;  %v22002_v46 = vld [vmem:[#allocation2 + $0x1c94] ss:$48 sps:$4 sm:$0xff]  }
 0x27f   :  { %v7570_v4 = vpop.f32.mrf.mxu1  ;;  %v25188_v62 = vadd.f32 %v7568_v47, %v7528_v56  ;;  %7822 = vmatpush1.bf16.msra.mxu0 %v21940_v61  ;;  %v21991_v61 = vld [vmem:[#allocation2 + $0x2350] ss:$48 sps:$4 sm:$0xff]   ;;  %v22005_v47 = vld [vmem:[#allocation2 + $0x2294] ss:$48 sps:$4 sm:$0xff]  }
 0x280   :  { %7863 = vmatpush1.bf16.msra.mxu1 %v21943_v38  ;;  %v7530_v63 = vpop.f32.mrf.mxu0  ;;  %7823 = vmatprep.subr.bf16.mxu0 %v21948_v51  ;;  %v21996_v38 = vld [vmem:[#allocation2 + $0x1cf4] ss:$48 sps:$4 sm:$0xff]   ;;  %v21994_v44 = vld [vmem:[#allocation2 + $0x1cf0] ss:$48 sps:$4 sm:$0xff]  }
 0x281   :  { %v7571_v0 = vpop.f32.mrf.mxu1  ;;  %7864 = vmatprep.subr.bf16.mxu1 %v21951_v53  ;;  %v21997_v45 = vld [vmem:[#allocation2 + $0x22f0] ss:$48 sps:$4 sm:$0xff]   ;;  %v22008_v56 = vld [vmem:[#allocation2 + $0x1c34] ss:$48 sps:$4 sm:$0xff]  }
 0x282   :  { %v22000_v51 = vld [vmem:[#allocation2 + $0x1c90] ss:$48 sps:$4 sm:$0xff]   ;;  %v22014_v4 = vld [vmem:[#allocation2 + $0x1bd4] ss:$48 sps:$4 sm:$0xff]  }
 0x283   :  { %7824 = vmatpush1.bf16.msra.mxu0 %v21946_v58  ;;  %v22003_v53 = vld [vmem:[#allocation2 + $0x2290] ss:$48 sps:$4 sm:$0xff]   ;;  %v22011_v58 = vld [vmem:[#allocation2 + $0x2234] ss:$48 sps:$4 sm:$0xff]  }
 0x284   :  { %7865 = vmatpush1.bf16.msra.mxu1 %v21949_v59  ;;  %7825 = vmatprep.subr.bf16.mxu0 %v21954_v1  ;;  %v22006_v59 = vld [vmem:[#allocation2 + $0x1c30] ss:$48 sps:$4 sm:$0xff]   ;;  %v22017_v63 = vld [vmem:[#allocation2 + $0x21d4] ss:$48 sps:$4 sm:$0xff]  }
 0x285   :  { %7866 = vmatprep.subr.bf16.mxu1 %v21957_v19  ;;  %v22009_v14 = vld [vmem:[#allocation2 + $0x2230] ss:$48 sps:$4 sm:$0xff]   ;;  %v22020_v19 = vld [vmem:[#allocation2 + $0x1b74] ss:$48 sps:$4 sm:$0xff]  }
 0x286   :  { %v22012_v0 = vld [vmem:[#allocation2 + $0x1bd0] ss:$48 sps:$4 sm:$0xff]  }
 0x287   :  { %7826 = vmatpush1.bf16.msra.mxu0 %v21952_v12  ;;  %v22015_v1 = vld [vmem:[#allocation2 + $0x21d0] ss:$48 sps:$4 sm:$0xff]   ;;  %v22023_v12 = vld [vmem:[#allocation2 + $0x2174] ss:$48 sps:$4 sm:$0xff]  }
 0x288   :  { %7867 = vmatpush1.bf16.msra.mxu1 %v21955_v2  ;;  %7827 = vmatprep.subr.bf16.mxu0 %v21960_v3  ;;  %v22018_v2 = vld [vmem:[#allocation2 + $0x1b70] ss:$48 sps:$4 sm:$0xff]  }
 0x289   :  { %7868 = vmatprep.subr.bf16.mxu1 %v21963_v5  ;;  %v22021_v3 = vld [vmem:[#allocation2 + $0x2170] ss:$48 sps:$4 sm:$0xff]   ;;  %v22026_v5 = vld [vmem:[#allocation2 + $0x1b14] ss:$48 sps:$4 sm:$0xff]  }
 0x28b   :  { %7828 = vmatpush1.bf16.msra.mxu0 %v21958_v6  ;;  %v22029_v6 = vld [vmem:[#allocation2 + $0x2114] ss:$48 sps:$4 sm:$0xff]  }
 0x28c   :  { %7869 = vmatpush1.bf16.msra.mxu1 %v21961_v7  ;;  %7829 = vmatprep.subr.bf16.mxu0 %v21966_v10  ;;  %v22024_v7 = vld [vmem:[#allocation2 + $0x1b10] ss:$48 sps:$4 sm:$0xff]  }
 0x28d   :  { %7870 = vmatprep.subr.bf16.mxu1 %v21969_v11  ;;  %v22027_v10 = vld [vmem:[#allocation2 + $0x2110] ss:$48 sps:$4 sm:$0xff]   ;;  %v22032_v11 = vld [vmem:[#allocation2 + $0x2bc] ss:$48 sps:$4 sm:$0xff]  }
 0x28f   :  { %7830 = vmatpush1.bf16.msra.mxu0 %v21964_v13  ;;  %v22035_v13 = vld [vmem:[#allocation2 + $0x8bc] ss:$48 sps:$4 sm:$0xff]  }
 0x290   :  { %7871 = vmatpush1.bf16.msra.mxu1 %v21967_v15  ;;  %7831 = vmatprep.subr.bf16.mxu0 %v21972_v16  ;;  %v22030_v15 = vld [vmem:[#allocation2 + $0x2b8] ss:$48 sps:$4 sm:$0xff]  }
 0x291   :  { %7872 = vmatprep.subr.bf16.mxu1 %v21975_v17  ;;  %v22033_v16 = vld [vmem:[#allocation2 + $0x8b8] ss:$48 sps:$4 sm:$0xff]   ;;  %v22038_v17 = vld [vmem:[#allocation2 + $0x25c] ss:$48 sps:$4 sm:$0xff]  }
 0x293   :  { %7832 = vmatpush1.bf16.msra.mxu0 %v21970_v18  ;;  %v22041_v18 = vld [vmem:[#allocation2 + $0x85c] ss:$48 sps:$4 sm:$0xff]  }
 0x294   :  { %7873 = vmatpush1.bf16.msra.mxu1 %v21973_v22  ;;  %7833 = vmatprep.subr.bf16.mxu0 %v21978_v23  ;;  %v22036_v22 = vld [vmem:[#allocation2 + $0x258] ss:$48 sps:$4 sm:$0xff]  }
 0x295   :  { %7874 = vmatprep.subr.bf16.mxu1 %v21981_v24  ;;  %v22039_v23 = vld [vmem:[#allocation2 + $0x858] ss:$48 sps:$4 sm:$0xff]  }
 0x297   :  { %7834 = vmatpush1.bf16.msra.mxu0 %v21976_v26 }
 0x298   :  { %7875 = vmatpush1.bf16.msra.mxu1 %v21979_v27  ;;  %7835 = vmatprep.subr.bf16.mxu0 %v21984_v28 }
 0x299   :  { %7876 = vmatprep.subr.bf16.mxu1 %v21987_v30 }
 0x29b   :  { %7836 = vmatpush2.bf16.msra.mxu0 %v21982_v54  ;;  %v22044_v54 = vld [vmem:[#allocation2 + $0x1fc] ss:$48 sps:$4 sm:$0xff]  }
 0x29c   :  { %7877 = vmatpush2.bf16.msra.mxu1 %v21985_v33  ;;  %7837 = vmatprep.subr.bf16.mxu0 %v21990_v34  ;;  %v22047_v33 = vld [vmem:[#allocation2 + $0x7fc] ss:$48 sps:$4 sm:$0xff]  }
 0x29d   :  { %7878 = vmatprep.subr.bf16.mxu1 %v21993_v35 }
 0x29f   :  { %7838 = vmatpush2.bf16.msra.mxu0 %v21988_v36  ;;  %v22042_v36 = vld [vmem:[#allocation2 + $0x1f8] ss:$48 sps:$4 sm:$0xff]  }
 0x2a0   :  { %7879 = vmatpush2.bf16.msra.mxu1 %v21991_v61  ;;  %7839 = vmatprep.subr.bf16.mxu0 %v21996_v38  ;;  %v22045_v61 = vld [vmem:[#allocation2 + $0x7f8] ss:$48 sps:$4 sm:$0xff]  }
 0x2a1   :  { %7880 = vmatprep.subr.bf16.mxu1 %v21999_v42 }
 0x2a3   :  { %7840 = vmatpush2.bf16.msra.mxu0 %v21994_v44 }
 0x2a4   :  { %7881 = vmatpush2.bf16.msra.mxu1 %v21997_v45  ;;  %7841 = vmatprep.subr.bf16.mxu0 %v22002_v46  ;;  %v22050_v46 = vld [vmem:[#allocation2 + $0x19c] ss:$48 sps:$4 sm:$0xff]  }
 0x2a5   :  { %7882 = vmatprep.subr.bf16.mxu1 %v22005_v47  ;;  %v22053_v47 = vld [vmem:[#allocation2 + $0x79c] ss:$48 sps:$4 sm:$0xff]  }
 0x2a7   :  { %7842 = vmatpush2.bf16.msra.mxu0 %v22000_v51  ;;  %v22051_v51 = vld [vmem:[#allocation2 + $0x798] ss:$48 sps:$4 sm:$0xff]  }
 0x2a8   :  { %7883 = vmatpush2.bf16.msra.mxu1 %v22003_v53  ;;  %7843 = vmatprep.subr.bf16.mxu0 %v22008_v56  ;;  %v22056_v53 = vld [vmem:[#allocation2 + $0x13c] ss:$48 sps:$4 sm:$0xff]  }
 0x2a9   :  { %7884 = vmatprep.subr.bf16.mxu1 %v22011_v58  ;;  %v22059_v56 = vld [vmem:[#allocation2 + $0x73c] ss:$48 sps:$4 sm:$0xff]   ;;  %v22054_v58 = vld [vmem:[#allocation2 + $0x138] ss:$48 sps:$4 sm:$0xff]  }
 0x2ab   :  { %7844 = vmatpush2.bf16.msra.mxu0 %v22006_v59  ;;  %v22057_v59 = vld [vmem:[#allocation2 + $0x738] ss:$48 sps:$4 sm:$0xff]  }
 0x2ac   :  { %7885 = vmatpush2.bf16.msra.mxu1 %v22009_v14  ;;  %7845 = vmatprep.subr.bf16.mxu0 %v22014_v4  ;;  %v22062_v14 = vld [vmem:[#allocation2 + $0xdc] ss:$48 sps:$4 sm:$0xff]  }
 0x2ad   :  { %7886 = vmatprep.subr.bf16.mxu1 %v22017_v63  ;;  %v22065_v4 = vld [vmem:[#allocation2 + $0x6dc] ss:$48 sps:$4 sm:$0xff]   ;;  %v22060_v63 = vld [vmem:[#allocation2 + $0xd8] ss:$48 sps:$4 sm:$0xff]  }
 0x2af   :  { %7846 = vmatpush2.bf16.msra.mxu0 %v22012_v0  ;;  %v22063_v0 = vld [vmem:[#allocation2 + $0x6d8] ss:$48 sps:$4 sm:$0xff]  }
 0x2b0   :  { %7887 = vmatpush2.bf16.msra.mxu1 %v22015_v1  ;;  %7847 = vmatprep.subr.bf16.mxu0 %v22020_v19  ;;  %v22068_v1 = vld [vmem:[#allocation2 + $0x7c] ss:$48 sps:$4 sm:$0xff]  }
 0x2b1   :  { %7888 = vmatprep.subr.bf16.mxu1 %v22023_v12  ;;  %v22071_v19 = vld [vmem:[#allocation2 + $0x67c] ss:$48 sps:$4 sm:$0xff]   ;;  %v22066_v12 = vld [vmem:[#allocation2 + $0x78] ss:$48 sps:$4 sm:$0xff]  }
 0x2b3   :  { %7848 = vmatpush2.bf16.msra.mxu0 %v22018_v2  ;;  %v22069_v2 = vld [vmem:[#allocation2 + $0x678] ss:$48 sps:$4 sm:$0xff]  }
 0x2b4   :  { %7889 = vmatpush2.bf16.msra.mxu1 %v22021_v3  ;;  %7849 = vmatprep.subr.bf16.mxu0 %v22026_v5  ;;  %v22074_v3 = vld [vmem:[#allocation2 + $0x1c] ss:$48 sps:$4 sm:$0xff]  }
 0x2b5   :  { %7890 = vmatprep.subr.bf16.mxu1 %v22029_v6  ;;  %v22077_v5 = vld [vmem:[#allocation2 + $0x61c] ss:$48 sps:$4 sm:$0xff]   ;;  %v22072_v6 = vld [vmem:[#allocation2 + $0x18] ss:$48 sps:$4 sm:$0xff]  }
 0x2b7   :  { %7850 = vmatpush2.bf16.msra.mxu0 %v22024_v7  ;;  %v22075_v7 = vld [vmem:[#allocation2 + $0x618] ss:$48 sps:$4 sm:$0xff]  }
 0x2b8   :  { %7891 = vmatpush2.bf16.msra.mxu1 %v22027_v10  ;;  %7901 = vmatprep.subr.bf16.mxu0 %v22032_v11  ;;  %v22080_v10 = vld [vmem:[#allocation2 + $0x5bc] ss:$48 sps:$4 sm:$0xff]  }
 0x2b9   :  { %7942 = vmatprep.subr.bf16.mxu1 %v22035_v13  ;;  %v22083_v11 = vld [vmem:[#allocation2 + $0xbbc] ss:$48 sps:$4 sm:$0xff]   ;;  %v22078_v13 = vld [vmem:[#allocation2 + $0x5b8] ss:$48 sps:$4 sm:$0xff]  }
 0x2ba   :  { %v7607_v24 = vpop.f32.mrf.mxu0  ;;  %7852 = vmatmul.mubr.bf16.vlgmr.msra.gmra.mxu0 %v25118_v39 }
 0x2bb   :  { %v7648_v26 = vpop.f32.mrf.mxu1  ;;  %7893 = vmatmul.mubr.bf16.vlgmr.msra.gmra.mxu1 %v25120_v41  ;;  %v7608_v27 = vadd.f32 %v7607_v24, %v25183_v55  ;;  %7902 = vmatpush1.bf16.msra.mxu0 %v22030_v15  ;;  %v22081_v15 = vld [vmem:[#allocation2 + $0xbb8] ss:$48 sps:$4 sm:$0xff]   ;;  %v22095_v24 = vld [vmem:[#allocation2 + $0xafc] ss:$48 sps:$4 sm:$0xff]  }
 0x2bc   :  { %7943 = vmatpush1.bf16.msra.mxu1 %v22033_v16  ;;  %v7609_v28 = vpop.f32.mrf.mxu0  ;;  %7903 = vmatprep.subr.bf16.mxu0 %v22038_v17  ;;  %v22086_v16 = vld [vmem:[#allocation2 + $0x55c] ss:$48 sps:$4 sm:$0xff]  }
 0x2bd   :  { %v7650_v30 = vpop.f32.mrf.mxu1  ;;  %7944 = vmatprep.subr.bf16.mxu1 %v22041_v18  ;;  %v25193_v34 = vadd.f32 %v7648_v26, %v7608_v27  ;;  %v7610_v35 = vadd.f32 %v7609_v28, %v25188_v62  ;;  %7933 = vmatprep.mubr.bf16.mxu0 %v25055_v49  ;;  %v22048_v62 = vld [vmem:[#allocation2 + $0x198] ss:$48 sps:$4 sm:$0xff]   ;;  %v22089_v17 = vld [vmem:[#allocation2 + $0xb5c] ss:$48 sps:$4 sm:$0xff]  }
 0x2be   :  { %7974 = vmatprep.mubr.bf16.mxu1 %v25060_v52  ;;  %v7611_v38 = vpop.f32.mrf.mxu0  ;;  %v22084_v18 = vld [vmem:[#allocation2 + $0x558] ss:$48 sps:$4 sm:$0xff]   ;;  %v22098_v28 = vld [vmem:[#allocation2 + $0x49c] ss:$48 sps:$4 sm:$0xff]  }
 0x2bf   :  { %v7652_v55 = vpop.f32.mrf.mxu1  ;;  %v25198_v42 = vadd.f32 %v7650_v30, %v7610_v35  ;;  %7904 = vmatpush1.bf16.msra.mxu0 %v22036_v22  ;;  %v22087_v22 = vld [vmem:[#allocation2 + $0xb58] ss:$48 sps:$4 sm:$0xff]   ;;  %v22101_v30 = vld [vmem:[#allocation2 + $0xa9c] ss:$48 sps:$4 sm:$0xff]  }
 0x2c0   :  { %7945 = vmatpush1.bf16.msra.mxu1 %v22039_v23  ;;  %v7612_v44 = vpop.f32.mrf.mxu0  ;;  %7905 = vmatprep.subr.bf16.mxu0 %v22044_v54  ;;  %v22092_v23 = vld [vmem:[#allocation2 + $0x4fc] ss:$48 sps:$4 sm:$0xff]   ;;  %v22090_v26 = vld [vmem:[#allocation2 + $0x4f8] ss:$48 sps:$4 sm:$0xff]  }
 0x2c1   :  { %v7653_v45 = vpop.f32.mrf.mxu1  ;;  %7946 = vmatprep.subr.bf16.mxu1 %v22047_v33  ;;  %v22093_v27 = vld [vmem:[#allocation2 + $0xaf8] ss:$48 sps:$4 sm:$0xff]   ;;  %v22104_v35 = vld [vmem:[#allocation2 + $0x43c] ss:$48 sps:$4 sm:$0xff]  }
 0x2c2   :  { %v22096_v54 = vld [vmem:[#allocation2 + $0x498] ss:$48 sps:$4 sm:$0xff]   ;;  %v22110_v55 = vld [vmem:[#allocation2 + $0x3dc] ss:$48 sps:$4 sm:$0xff]  }
 0x2c3   :  { %7906 = vmatpush1.bf16.msra.mxu0 %v22042_v36  ;;  %v22099_v33 = vld [vmem:[#allocation2 + $0xa98] ss:$48 sps:$4 sm:$0xff]   ;;  %v22107_v36 = vld [vmem:[#allocation2 + $0xa3c] ss:$48 sps:$4 sm:$0xff]  }
 0x2c4   :  { %7947 = vmatpush1.bf16.msra.mxu1 %v22045_v61  ;;  %7907 = vmatprep.subr.bf16.mxu0 %v22050_v46  ;;  %v22102_v61 = vld [vmem:[#allocation2 + $0x438] ss:$48 sps:$4 sm:$0xff]   ;;  %v22113_v44 = vld [vmem:[#allocation2 + $0x9dc] ss:$48 sps:$4 sm:$0xff]  }
 0x2c5   :  { %7948 = vmatprep.subr.bf16.mxu1 %v22053_v47  ;;  %v22105_v38 = vld [vmem:[#allocation2 + $0xa38] ss:$48 sps:$4 sm:$0xff]   ;;  %v22116_v47 = vld [vmem:[#allocation2 + $0x37c] ss:$48 sps:$4 sm:$0xff]  }
 0x2c6   :  { %v22108_v45 = vld [vmem:[#allocation2 + $0x3d8] ss:$48 sps:$4 sm:$0xff]  }
 0x2c7   :  { %7908 = vmatpush1.bf16.msra.mxu0 %v22048_v62  ;;  %v22111_v46 = vld [vmem:[#allocation2 + $0x9d8] ss:$48 sps:$4 sm:$0xff]   ;;  %v22119_v62 = vld [vmem:[#allocation2 + $0x97c] ss:$48 sps:$4 sm:$0xff]  }
 0x2c8   :  { %7949 = vmatpush1.bf16.msra.mxu1 %v22051_v51  ;;  %7909 = vmatprep.subr.bf16.mxu0 %v22056_v53  ;;  %v22114_v51 = vld [vmem:[#allocation2 + $0x378] ss:$48 sps:$4 sm:$0xff]  }
 0x2c9   :  { %7950 = vmatprep.subr.bf16.mxu1 %v22059_v56  ;;  %v22117_v53 = vld [vmem:[#allocation2 + $0x978] ss:$48 sps:$4 sm:$0xff]   ;;  %v22122_v56 = vld [vmem:[#allocation2 + $0x31c] ss:$48 sps:$4 sm:$0xff]  }
 0x2cb   :  { %7910 = vmatpush1.bf16.msra.mxu0 %v22054_v58  ;;  %v22125_v58 = vld [vmem:[#allocation2 + $0x91c] ss:$48 sps:$4 sm:$0xff]  }
 0x2cc   :  { %7951 = vmatpush1.bf16.msra.mxu1 %v22057_v59  ;;  %7911 = vmatprep.subr.bf16.mxu0 %v22062_v14  ;;  %v22120_v59 = vld [vmem:[#allocation2 + $0x318] ss:$48 sps:$4 sm:$0xff]  }
 0x2cd   :  { %7952 = vmatprep.subr.bf16.mxu1 %v22065_v4  ;;  %v22123_v14 = vld [vmem:[#allocation2 + $0x918] ss:$48 sps:$4 sm:$0xff]   ;;  %v25201_v4 = vsub.s32 4, %v25126_v50 }
 0x2cf   :  { %7912 = vmatpush1.bf16.msra.mxu0 %v22060_v63  ;;  %v22128_v63 = vld [vmem:[#allocation2 + $0xebc] ss:$48 sps:$4 sm:$0xff]  }
 0x2d0   :  { %7953 = vmatpush1.bf16.msra.mxu1 %v22063_v0  ;;  %7913 = vmatprep.subr.bf16.mxu0 %v22068_v1  ;;  %v22131_v0 = vld [vmem:[#allocation2 + $0x14bc] ss:$48 sps:$4 sm:$0xff]   ;;  %v22126_v1 = vld [vmem:[#allocation2 + $0xeb8] ss:$48 sps:$4 sm:$0xff]  }
 0x2d1   :  { %7954 = vmatprep.subr.bf16.mxu1 %v22071_v19  ;;  %v22129_v19 = vld [vmem:[#allocation2 + $0x14b8] ss:$48 sps:$4 sm:$0xff]  }
 0x2d3   :  { %7914 = vmatpush1.bf16.msra.mxu0 %v22066_v12  ;;  %v25204_v12 = vsub.s32 5, %v25126_v50 }
 0x2d4   :  { %7955 = vmatpush1.bf16.msra.mxu1 %v22069_v2  ;;  %7915 = vmatprep.subr.bf16.mxu0 %v22074_v3  ;;  %v24727_v2 = vld [vmem:[#allocation4] sm:$0xff] }
 0x2d5   :  { %7956 = vmatprep.subr.bf16.mxu1 %v22077_v5  ;;  %v1362_v3 = vrot.slane %v24727_v2, %v25201_v4  ;;  %v22134_v5 = vld [vmem:[#allocation2 + $0xe5c] ss:$48 sps:$4 sm:$0xff]  }
 0x2d7   :  { %7916 = vmatpush1.bf16.msra.mxu0 %v22072_v6  ;;  %v22137_v6 = vld [vmem:[#allocation2 + $0x145c] ss:$48 sps:$4 sm:$0xff]  }
 0x2d8   :  { %7957 = vmatpush1.bf16.msra.mxu1 %v22075_v7  ;;  %7917 = vmatprep.subr.bf16.mxu0 %v22080_v10  ;;  %v1366_v7 = vrot.slane %v24727_v2, %v25204_v12  ;;  %v22132_v10 = vld [vmem:[#allocation2 + $0xe58] ss:$48 sps:$4 sm:$0xff]  }
 0x2d9   :  { %7958 = vmatprep.subr.bf16.mxu1 %v22083_v11  ;;  %v22135_v11 = vld [vmem:[#allocation2 + $0x1458] ss:$48 sps:$4 sm:$0xff]  }
 0x2da   :  { %v22168_v2 = vld [vmem:[#allocation2 + $0xc18] ss:$48 sps:$4 sm:$0xff]  }
 0x2db   :  { %7918 = vmatpush2.bf16.msra.mxu0 %v22078_v13 }
 0x2dc   :  { %7959 = vmatpush2.bf16.msra.mxu1 %v22081_v15  ;;  %7919 = vmatprep.subr.bf16.mxu0 %v22086_v16 }
 0x2dd   :  { %7960 = vmatprep.subr.bf16.mxu1 %v22089_v17 }
 0x2df   :  { %7920 = vmatpush2.bf16.msra.mxu0 %v22084_v18 }
 0x2e0   :  { %7961 = vmatpush2.bf16.msra.mxu1 %v22087_v22  ;;  %7921 = vmatprep.subr.bf16.mxu0 %v22092_v23  ;;  %v22140_v22 = vld [vmem:[#allocation2 + $0xdfc] ss:$48 sps:$4 sm:$0xff]  }
 0x2e1   :  { %7962 = vmatprep.subr.bf16.mxu1 %v22095_v24  ;;  %v22143_v23 = vld [vmem:[#allocation2 + $0x13fc] ss:$48 sps:$4 sm:$0xff]  }
 0x2e3   :  { %7922 = vmatpush2.bf16.msra.mxu0 %v22090_v26 }
 0x2e4   :  { %7963 = vmatpush2.bf16.msra.mxu1 %v22093_v27  ;;  %7923 = vmatprep.subr.bf16.mxu0 %v22098_v28  ;;  %v22138_v27 = vld [vmem:[#allocation2 + $0xdf8] ss:$48 sps:$4 sm:$0xff]  }
 0x2e5   :  { %7964 = vmatprep.subr.bf16.mxu1 %v22101_v30  ;;  %v22141_v28 = vld [vmem:[#allocation2 + $0x13f8] ss:$48 sps:$4 sm:$0xff]  }
 0x2e7   :  { %7924 = vmatpush2.bf16.msra.mxu0 %v22096_v54 }
 0x2e8   :  { %7965 = vmatpush2.bf16.msra.mxu1 %v22099_v33  ;;  %7925 = vmatprep.subr.bf16.mxu0 %v22104_v35 }
 0x2e9   :  { %7966 = vmatprep.subr.bf16.mxu1 %v22107_v36 }
 0x2eb   :  { %7926 = vmatpush2.bf16.msra.mxu0 %v22102_v61  ;;  %v22146_v61 = vld [vmem:[#allocation2 + $0xd9c] ss:$48 sps:$4 sm:$0xff]  }
 0x2ec   :  { %7967 = vmatpush2.bf16.msra.mxu1 %v22105_v38  ;;  %7927 = vmatprep.subr.bf16.mxu0 %v22110_v55  ;;  %v22149_v38 = vld [vmem:[#allocation2 + $0x139c] ss:$48 sps:$4 sm:$0xff]   ;;  %v22144_v55 = vld [vmem:[#allocation2 + $0xd98] ss:$48 sps:$4 sm:$0xff]  }
 0x2ed   :  { %7968 = vmatprep.subr.bf16.mxu1 %v22113_v44  ;;  %v22147_v44 = vld [vmem:[#allocation2 + $0x1398] ss:$48 sps:$4 sm:$0xff]  }
 0x2ef   :  { %7928 = vmatpush2.bf16.msra.mxu0 %v22108_v45  ;;  %v22152_v45 = vld [vmem:[#allocation2 + $0xd3c] ss:$48 sps:$4 sm:$0xff]  }
 0x2f0   :  { %7969 = vmatpush2.bf16.msra.mxu1 %v22111_v46  ;;  %7929 = vmatprep.subr.bf16.mxu0 %v22116_v47  ;;  %v22155_v46 = vld [vmem:[#allocation2 + $0x133c] ss:$48 sps:$4 sm:$0xff]   ;;  %v22150_v47 = vld [vmem:[#allocation2 + $0xd38] ss:$48 sps:$4 sm:$0xff]  }
 0x2f1   :  { %7970 = vmatprep.subr.bf16.mxu1 %v22119_v62  ;;  %v22153_v62 = vld [vmem:[#allocation2 + $0x1338] ss:$48 sps:$4 sm:$0xff]  }
 0x2f3   :  { %7930 = vmatpush2.bf16.msra.mxu0 %v22114_v51  ;;  %v22158_v51 = vld [vmem:[#allocation2 + $0xcdc] ss:$48 sps:$4 sm:$0xff]  }
 0x2f4   :  { %7971 = vmatpush2.bf16.msra.mxu1 %v22117_v53  ;;  %7931 = vmatprep.subr.bf16.mxu0 %v22122_v56  ;;  %v22161_v53 = vld [vmem:[#allocation2 + $0x12dc] ss:$48 sps:$4 sm:$0xff]   ;;  %v22156_v56 = vld [vmem:[#allocation2 + $0xcd8] ss:$48 sps:$4 sm:$0xff]  }
 0x2f5   :  { %7972 = vmatprep.subr.bf16.mxu1 %v22125_v58  ;;  %v22159_v58 = vld [vmem:[#allocation2 + $0x12d8] ss:$48 sps:$4 sm:$0xff]  }
 0x2f7   :  { %7932 = vmatpush2.bf16.msra.mxu0 %v22120_v59  ;;  %v22164_v59 = vld [vmem:[#allocation2 + $0xc7c] ss:$48 sps:$4 sm:$0xff]  }
 0x2f8   :  { %7973 = vmatpush2.bf16.msra.mxu1 %v22123_v14  ;;  %7983 = vmatprep.subr.bf16.mxu0 %v22128_v63  ;;  %v22167_v14 = vld [vmem:[#allocation2 + $0x127c] ss:$48 sps:$4 sm:$0xff]   ;;  %v22162_v63 = vld [vmem:[#allocation2 + $0xc78] ss:$48 sps:$4 sm:$0xff]  }
 0x2f9   :  { %8024 = vmatprep.subr.bf16.mxu1 %v22131_v0  ;;  %v22165_v0 = vld [vmem:[#allocation2 + $0x1278] ss:$48 sps:$4 sm:$0xff]  }
 0x2fa   :  { %v7689_v13 = vpop.f32.mrf.mxu0  ;;  %7934 = vmatmul.mubr.bf16.vlgmr.msra.gmra.mxu0 %v25070_v8 }
 0x2fb   :  { %v7730_v15 = vpop.f32.mrf.mxu1  ;;  %7975 = vmatmul.mubr.bf16.vlgmr.msra.gmra.mxu1 %v25072_v9  ;;  %v7690_v16 = vadd.f32 %v7689_v13, %v1362_v3  ;;  %7984 = vmatpush1.bf16.msra.mxu0 %v22126_v1  ;;  %v22170_v1 = vld [vmem:[#allocation2 + $0xc1c] ss:$48 sps:$4 sm:$0xff]   ;;  %v22171_v3 = vld [vmem:[#allocation2 + $0x1218] ss:$48 sps:$4 sm:$0xff]  }
 0x2fc   :  { %8025 = vmatpush1.bf16.msra.mxu1 %v22129_v19  ;;  %v7691_v17 = vpop.f32.mrf.mxu0  ;;  %7985 = vmatprep.subr.bf16.mxu0 %v22134_v5  ;;  %v22173_v19 = vld [vmem:[#allocation2 + $0x121c] ss:$48 sps:$4 sm:$0xff]  }
 0x2fd   :  { %v7732_v18 = vpop.f32.mrf.mxu1  ;;  %8026 = vmatprep.subr.bf16.mxu1 %v22137_v6  ;;  %v25210_v24 = vadd.f32 %v7730_v15, %v7690_v16  ;;  %v7692_v26 = vadd.f32 %v7691_v17, %v1366_v7  ;;  %8015 = vmatprep.mubr.bf16.mxu0 %v25079_v37  ;;  %v22176_v5 = vld [vmem:[#allocation2 + $0x11bc] ss:$48 sps:$4 sm:$0xff]   ;;  %v22174_v7 = vld [vmem:[#allocation2 + $0x11b8] ss:$48 sps:$4 sm:$0xff]  }
 0x2fe   :  { %8056 = vmatprep.mubr.bf16.mxu1 %v25084_v40  ;;  %v7693_v30 = vpop.f32.mrf.mxu0  ;;  %v22179_v6 = vld [vmem:[#allocation2 + $0x17bc] ss:$48 sps:$4 sm:$0xff]   ;;  %v22180_v15 = vld [vmem:[#allocation2 + $0x1158] ss:$48 sps:$4 sm:$0xff]  }
 0x2ff   :  { %v7734_v54 = vpop.f32.mrf.mxu1  ;;  %v25214_v33 = vadd.f32 %v7732_v18, %v7692_v26  ;;  %7986 = vmatpush1.bf16.msra.mxu0 %v22132_v10  ;;  %v22177_v10 = vld [vmem:[#allocation2 + $0x17b8] ss:$48 sps:$4 sm:$0xff]   ;;  %v22185_v13 = vld [vmem:[#allocation2 + $0x175c] ss:$48 sps:$4 sm:$0xff]  }
 0x300   :  { %8027 = vmatpush1.bf16.msra.mxu1 %v22135_v11  ;;  %v7694_v35 = vpop.f32.mrf.mxu0  ;;  %7987 = vmatprep.subr.bf16.mxu0 %v22140_v22  ;;  %v22182_v11 = vld [vmem:[#allocation2 + $0x115c] ss:$48 sps:$4 sm:$0xff]   ;;  %v22183_v16 = vld [vmem:[#allocation2 + $0x1758] ss:$48 sps:$4 sm:$0xff]  }
 0x301   :  { %v7735_v36 = vpop.f32.mrf.mxu1  ;;  %8028 = vmatprep.subr.bf16.mxu1 %v22143_v23  ;;  %v22188_v17 = vld [vmem:[#allocation2 + $0x10fc] ss:$48 sps:$4 sm:$0xff]   ;;  %v22186_v22 = vld [vmem:[#allocation2 + $0x10f8] ss:$48 sps:$4 sm:$0xff]  }
 0x302   :  { %v22191_v18 = vld [vmem:[#allocation2 + $0x16fc] ss:$48 sps:$4 sm:$0xff]   ;;  %v22189_v23 = vld [vmem:[#allocation2 + $0x16f8] ss:$48 sps:$4 sm:$0xff]  }
 0x303   :  { %7988 = vmatpush1.bf16.msra.mxu0 %v22138_v27  ;;  %v22194_v26 = vld [vmem:[#allocation2 + $0x109c] ss:$48 sps:$4 sm:$0xff]   ;;  %v22195_v30 = vld [vmem:[#allocation2 + $0x1698] ss:$48 sps:$4 sm:$0xff]  }
 0x304   :  { %8029 = vmatpush1.bf16.msra.mxu1 %v22141_v28  ;;  %7989 = vmatprep.subr.bf16.mxu0 %v22146_v61  ;;  %v22197_v27 = vld [vmem:[#allocation2 + $0x169c] ss:$48 sps:$4 sm:$0xff]   ;;  %v22192_v28 = vld [vmem:[#allocation2 + $0x1098] ss:$48 sps:$4 sm:$0xff]  }
 0x305   :  { %8030 = vmatprep.subr.bf16.mxu1 %v22149_v38  ;;  %v22200_v54 = vld [vmem:[#allocation2 + $0x103c] ss:$48 sps:$4 sm:$0xff]   ;;  %v22198_v36 = vld [vmem:[#allocation2 + $0x1038] ss:$48 sps:$4 sm:$0xff]  }
 0x306   :  { %v22203_v35 = vld [vmem:[#allocation2 + $0x163c] ss:$48 sps:$4 sm:$0xff]   ;;  %v22201_v61 = vld [vmem:[#allocation2 + $0x1638] ss:$48 sps:$4 sm:$0xff]  }
 0x307   :  { %7990 = vmatpush1.bf16.msra.mxu0 %v22144_v55  ;;  %v22206_v38 = vld [vmem:[#allocation2 + $0xfdc] ss:$48 sps:$4 sm:$0xff]  }
 0x308   :  { %8031 = vmatpush1.bf16.msra.mxu1 %v22147_v44  ;;  %7991 = vmatprep.subr.bf16.mxu0 %v22152_v45  ;;  %v22209_v55 = vld [vmem:[#allocation2 + $0x15dc] ss:$48 sps:$4 sm:$0xff]   ;;  %v22204_v44 = vld [vmem:[#allocation2 + $0xfd8] ss:$48 sps:$4 sm:$0xff]  }
 0x309   :  { %8032 = vmatprep.subr.bf16.mxu1 %v22155_v46  ;;  %v22207_v45 = vld [vmem:[#allocation2 + $0x15d8] ss:$48 sps:$4 sm:$0xff]   ;;  %v22212_v46 = vld [vmem:[#allocation2 + $0xf7c] ss:$48 sps:$4 sm:$0xff]  }
 0x30b   :  { %7992 = vmatpush1.bf16.msra.mxu0 %v22150_v47  ;;  %v22215_v47 = vld [vmem:[#allocation2 + $0x157c] ss:$48 sps:$4 sm:$0xff]  }
 0x30c   :  { %8033 = vmatpush1.bf16.msra.mxu1 %v22153_v62  ;;  %7993 = vmatprep.subr.bf16.mxu0 %v22158_v51  ;;  %v22210_v62 = vld [vmem:[#allocation2 + $0xf78] ss:$48 sps:$4 sm:$0xff]  }
 0x30d   :  { %8034 = vmatprep.subr.bf16.mxu1 %v22161_v53  ;;  %v22213_v51 = vld [vmem:[#allocation2 + $0x1578] ss:$48 sps:$4 sm:$0xff]   ;;  %v22218_v53 = vld [vmem:[#allocation2 + $0xf1c] ss:$48 sps:$4 sm:$0xff]  }
 0x30f   :  { %7994 = vmatpush1.bf16.msra.mxu0 %v22156_v56  ;;  %v22221_v56 = vld [vmem:[#allocation2 + $0x151c] ss:$48 sps:$4 sm:$0xff]  }
 0x310   :  { %8035 = vmatpush1.bf16.msra.mxu1 %v22159_v58  ;;  %7995 = vmatprep.subr.bf16.mxu0 %v22164_v59  ;;  %v22216_v58 = vld [vmem:[#allocation2 + $0xf18] ss:$48 sps:$4 sm:$0xff]  }
 0x311   :  { %8036 = vmatprep.subr.bf16.mxu1 %v22167_v14  ;;  %v22219_v59 = vld [vmem:[#allocation2 + $0x1518] ss:$48 sps:$4 sm:$0xff]   ;;  %v22224_v14 = vld [vmem:[#allocation2 + $0x1abc] ss:$48 sps:$4 sm:$0xff]  }
 0x313   :  { %7996 = vmatpush1.bf16.msra.mxu0 %v22162_v63  ;;  %v22227_v63 = vld [vmem:[#allocation2 + $0x20bc] ss:$48 sps:$4 sm:$0xff]  }
 0x314   :  { %8037 = vmatpush1.bf16.msra.mxu1 %v22165_v0  ;;  %7997 = vmatprep.subr.bf16.mxu0 %v22170_v1  ;;  %v22222_v0 = vld [vmem:[#allocation2 + $0x1ab8] ss:$48 sps:$4 sm:$0xff]  }
 0x315   :  { %8038 = vmatprep.subr.bf16.mxu1 %v22173_v19  ;;  %v22225_v1 = vld [vmem:[#allocation2 + $0x20b8] ss:$48 sps:$4 sm:$0xff]   ;;  %v22230_v19 = vld [vmem:[#allocation2 + $0x1a5c] ss:$48 sps:$4 sm:$0xff]  }
 0x317   :  { %7998 = vmatpush1.bf16.msra.mxu0 %v22168_v2  ;;  %v22233_v2 = vld [vmem:[#allocation2 + $0x205c] ss:$48 sps:$4 sm:$0xff]  }
 0x318   :  { %8039 = vmatpush1.bf16.msra.mxu1 %v22171_v3  ;;  %7999 = vmatprep.subr.bf16.mxu0 %v22176_v5  ;;  %v22228_v3 = vld [vmem:[#allocation2 + $0x1a58] ss:$48 sps:$4 sm:$0xff]  }
 0x319   :  { %8040 = vmatprep.subr.bf16.mxu1 %v22179_v6  ;;  %v22231_v5 = vld [vmem:[#allocation2 + $0x2058] ss:$48 sps:$4 sm:$0xff]  }
 0x31b   :  { %8000 = vmatpush2.bf16.msra.mxu0 %v22174_v7 }
 0x31c   :  { %8041 = vmatpush2.bf16.msra.mxu1 %v22177_v10  ;;  %8001 = vmatprep.subr.bf16.mxu0 %v22182_v11 }
 0x31d   :  { %8042 = vmatprep.subr.bf16.mxu1 %v22185_v13 }
 0x31f   :  { %8002 = vmatpush2.bf16.msra.mxu0 %v22180_v15  ;;  %v22236_v15 = vld [vmem:[#allocation2 + $0x19fc] ss:$48 sps:$4 sm:$0xff]  }
 0x320   :  { %8043 = vmatpush2.bf16.msra.mxu1 %v22183_v16  ;;  %8003 = vmatprep.subr.bf16.mxu0 %v22188_v17  ;;  %v22239_v16 = vld [vmem:[#allocation2 + $0x1ffc] ss:$48 sps:$4 sm:$0xff]  }
 0x321   :  { %8044 = vmatprep.subr.bf16.mxu1 %v22191_v18 }
 0x323   :  { %8004 = vmatpush2.bf16.msra.mxu0 %v22186_v22  ;;  %v22234_v22 = vld [vmem:[#allocation2 + $0x19f8] ss:$48 sps:$4 sm:$0xff]  }
 0x324   :  { %8045 = vmatpush2.bf16.msra.mxu1 %v22189_v23  ;;  %8005 = vmatprep.subr.bf16.mxu0 %v22194_v26  ;;  %v22237_v23 = vld [vmem:[#allocation2 + $0x1ff8] ss:$48 sps:$4 sm:$0xff]  }
 0x325   :  { %8046 = vmatprep.subr.bf16.mxu1 %v22197_v27 }
 0x327   :  { %8006 = vmatpush2.bf16.msra.mxu0 %v22192_v28 }
 0x328   :  { %8047 = vmatpush2.bf16.msra.mxu1 %v22195_v30  ;;  %8007 = vmatprep.subr.bf16.mxu0 %v22200_v54  ;;  %v22242_v54 = vld [vmem:[#allocation2 + $0x199c] ss:$48 sps:$4 sm:$0xff]  }
 0x329   :  { %8048 = vmatprep.subr.bf16.mxu1 %v22203_v35  ;;  %v22245_v35 = vld [vmem:[#allocation2 + $0x1f9c] ss:$48 sps:$4 sm:$0xff]  }
 0x32b   :  { %8008 = vmatpush2.bf16.msra.mxu0 %v22198_v36  ;;  %v22243_v36 = vld [vmem:[#allocation2 + $0x1f98] ss:$48 sps:$4 sm:$0xff]  }
 0x32c   :  { %8049 = vmatpush2.bf16.msra.mxu1 %v22201_v61  ;;  %8009 = vmatprep.subr.bf16.mxu0 %v22206_v38  ;;  %v22248_v61 = vld [vmem:[#allocation2 + $0x193c] ss:$48 sps:$4 sm:$0xff]  }
 0x32d   :  { %8050 = vmatprep.subr.bf16.mxu1 %v22209_v55  ;;  %v22251_v38 = vld [vmem:[#allocation2 + $0x1f3c] ss:$48 sps:$4 sm:$0xff]   ;;  %v22246_v55 = vld [vmem:[#allocation2 + $0x1938] ss:$48 sps:$4 sm:$0xff]  }
 0x32f   :  { %8010 = vmatpush2.bf16.msra.mxu0 %v22204_v44  ;;  %v22249_v44 = vld [vmem:[#allocation2 + $0x1f38] ss:$48 sps:$4 sm:$0xff]  }
 0x330   :  { %8051 = vmatpush2.bf16.msra.mxu1 %v22207_v45  ;;  %8011 = vmatprep.subr.bf16.mxu0 %v22212_v46  ;;  %v22254_v45 = vld [vmem:[#allocation2 + $0x18dc] ss:$48 sps:$4 sm:$0xff]  }
 0x331   :  { %8052 = vmatprep.subr.bf16.mxu1 %v22215_v47  ;;  %v22257_v46 = vld [vmem:[#allocation2 + $0x1edc] ss:$48 sps:$4 sm:$0xff]   ;;  %v22252_v47 = vld [vmem:[#allocation2 + $0x18d8] ss:$48 sps:$4 sm:$0xff]  }
 0x333   :  { %8012 = vmatpush2.bf16.msra.mxu0 %v22210_v62  ;;  %v22255_v62 = vld [vmem:[#allocation2 + $0x1ed8] ss:$48 sps:$4 sm:$0xff]  }
 0x334   :  { %8053 = vmatpush2.bf16.msra.mxu1 %v22213_v51  ;;  %8013 = vmatprep.subr.bf16.mxu0 %v22218_v53  ;;  %v22260_v51 = vld [vmem:[#allocation2 + $0x187c] ss:$48 sps:$4 sm:$0xff]  }
 0x335   :  { %8054 = vmatprep.subr.bf16.mxu1 %v22221_v56  ;;  %v22263_v53 = vld [vmem:[#allocation2 + $0x1e7c] ss:$48 sps:$4 sm:$0xff]   ;;  %v22258_v56 = vld [vmem:[#allocation2 + $0x1878] ss:$48 sps:$4 sm:$0xff]  }
 0x337   :  { %8014 = vmatpush2.bf16.msra.mxu0 %v22216_v58  ;;  %v22261_v58 = vld [vmem:[#allocation2 + $0x1e78] ss:$48 sps:$4 sm:$0xff]  }
 0x338   :  { %8055 = vmatpush2.bf16.msra.mxu1 %v22219_v59  ;;  %8065 = vmatprep.subr.bf16.mxu0 %v22224_v14  ;;  %v22266_v59 = vld [vmem:[#allocation2 + $0x181c] ss:$48 sps:$4 sm:$0xff]  }
 0x339   :  { %8106 = vmatprep.subr.bf16.mxu1 %v22227_v63  ;;  %v22269_v14 = vld [vmem:[#allocation2 + $0x1e1c] ss:$48 sps:$4 sm:$0xff]   ;;  %v22264_v63 = vld [vmem:[#allocation2 + $0x1818] ss:$48 sps:$4 sm:$0xff]  }
 0x33a   :  { %v7771_v6 = vpop.f32.mrf.mxu0  ;;  %8016 = vmatmul.mubr.bf16.vlgmr.msra.gmra.mxu0 %v25094_v20 }
 0x33b   :  { %v7812_v7 = vpop.f32.mrf.mxu1  ;;  %8057 = vmatmul.mubr.bf16.vlgmr.msra.gmra.mxu1 %v25096_v21  ;;  %v7772_v10 = vadd.f32 %v7771_v6, %v25210_v24  ;;  %8066 = vmatpush1.bf16.msra.mxu0 %v22222_v0  ;;  %v22267_v0 = vld [vmem:[#allocation2 + $0x1e18] ss:$48 sps:$4 sm:$0xff]   ;;  %v22281_v6 = vld [vmem:[#allocation2 + $0x235c] ss:$48 sps:$4 sm:$0xff]  }
 0x33c   :  { %8107 = vmatpush1.bf16.msra.mxu1 %v22225_v1  ;;  %v7773_v11 = vpop.f32.mrf.mxu0  ;;  %8067 = vmatprep.subr.bf16.mxu0 %v22230_v19  ;;  %v22272_v1 = vld [vmem:[#allocation2 + $0x1dbc] ss:$48 sps:$4 sm:$0xff]  }
 0x33d   :  { %v7814_v13 = vpop.f32.mrf.mxu1  ;;  %8108 = vmatprep.subr.bf16.mxu1 %v22233_v2  ;;  %v25219_v17 = vadd.f32 %v7812_v7, %v7772_v10  ;;  %v7774_v18 = vadd.f32 %v7773_v11, %v25214_v33  ;;  %8097 = vmatprep.mubr.bf16.mxu0 %v25103_v29  ;;  %v22240_v33 = vld [vmem:[#allocation2 + $0x1998] ss:$48 sps:$4 sm:$0xff]   ;;  %v22275_v19 = vld [vmem:[#allocation2 + $0x23bc] ss:$48 sps:$4 sm:$0xff]  }
 0x33e   :  { %8138 = vmatprep.mubr.bf16.mxu1 %v25108_v32  ;;  %v7775_v26 = vpop.f32.mrf.mxu0  ;;  %v22270_v2 = vld [vmem:[#allocation2 + $0x1db8] ss:$48 sps:$4 sm:$0xff]   ;;  %v22284_v11 = vld [vmem:[#allocation2 + $0x1cfc] ss:$48 sps:$4 sm:$0xff]  }
 0x33f   :  { %v7816_v24 = vpop.f32.mrf.mxu1  ;;  %v25224_v27 = vadd.f32 %v7814_v13, %v7774_v18  ;;  %8068 = vmatpush1.bf16.msra.mxu0 %v22228_v3  ;;  %v22273_v3 = vld [vmem:[#allocation2 + $0x23b8] ss:$48 sps:$4 sm:$0xff]   ;;  %v22287_v13 = vld [vmem:[#allocation2 + $0x22fc] ss:$48 sps:$4 sm:$0xff]  }
 0x340   :  { %8109 = vmatpush1.bf16.msra.mxu1 %v22231_v5  ;;  %v7776_v28 = vpop.f32.mrf.mxu0  ;;  %8069 = vmatprep.subr.bf16.mxu0 %v22236_v15  ;;  %v22278_v5 = vld [vmem:[#allocation2 + $0x1d5c] ss:$48 sps:$4 sm:$0xff]   ;;  %v22276_v7 = vld [vmem:[#allocation2 + $0x1d58] ss:$48 sps:$4 sm:$0xff]  }
 0x341   :  { %v7817_v30 = vpop.f32.mrf.mxu1  ;;  %8110 = vmatprep.subr.bf16.mxu1 %v22239_v16  ;;  %v22279_v10 = vld [vmem:[#allocation2 + $0x2358] ss:$48 sps:$4 sm:$0xff]   ;;  %v22290_v18 = vld [vmem:[#allocation2 + $0x1c9c] ss:$48 sps:$4 sm:$0xff]  }
 0x342   :  { %v22282_v15 = vld [vmem:[#allocation2 + $0x1cf8] ss:$48 sps:$4 sm:$0xff]   ;;  %v22296_v24 = vld [vmem:[#allocation2 + $0x1c3c] ss:$48 sps:$4 sm:$0xff]  }
 0x343   :  { %8070 = vmatpush1.bf16.msra.mxu0 %v22234_v22  ;;  %v22285_v16 = vld [vmem:[#allocation2 + $0x22f8] ss:$48 sps:$4 sm:$0xff]   ;;  %v22293_v22 = vld [vmem:[#allocation2 + $0x229c] ss:$48 sps:$4 sm:$0xff]  }
 0x344   :  { %8111 = vmatpush1.bf16.msra.mxu1 %v22237_v23  ;;  %8071 = vmatprep.subr.bf16.mxu0 %v22242_v54  ;;  %v22288_v23 = vld [vmem:[#allocation2 + $0x1c98] ss:$48 sps:$4 sm:$0xff]   ;;  %v22299_v28 = vld [vmem:[#allocation2 + $0x223c] ss:$48 sps:$4 sm:$0xff]  }
 0x345   :  { %8112 = vmatprep.subr.bf16.mxu1 %v22245_v35  ;;  %v22291_v26 = vld [vmem:[#allocation2 + $0x2298] ss:$48 sps:$4 sm:$0xff]   ;;  %v22302_v35 = vld [vmem:[#allocation2 + $0x1bdc] ss:$48 sps:$4 sm:$0xff]  }
 0x346   :  { %v22294_v30 = vld [vmem:[#allocation2 + $0x1c38] ss:$48 sps:$4 sm:$0xff]  }
 0x347   :  { %8072 = vmatpush1.bf16.msra.mxu0 %v22240_v33  ;;  %v22297_v54 = vld [vmem:[#allocation2 + $0x2238] ss:$48 sps:$4 sm:$0xff]   ;;  %v22305_v33 = vld [vmem:[#allocation2 + $0x21dc] ss:$48 sps:$4 sm:$0xff]  }
 0x348   :  { %8113 = vmatpush1.bf16.msra.mxu1 %v22243_v36  ;;  %8073 = vmatprep.subr.bf16.mxu0 %v22248_v61  ;;  %v22300_v36 = vld [vmem:[#allocation2 + $0x1bd8] ss:$48 sps:$4 sm:$0xff]  }
 0x349   :  { %8114 = vmatprep.subr.bf16.mxu1 %v22251_v38  ;;  %v22303_v61 = vld [vmem:[#allocation2 + $0x21d8] ss:$48 sps:$4 sm:$0xff]   ;;  %v22308_v38 = vld [vmem:[#allocation2 + $0x1b7c] ss:$48 sps:$4 sm:$0xff]  }
 0x34b   :  { %8074 = vmatpush1.bf16.msra.mxu0 %v22246_v55  ;;  %v22311_v55 = vld [vmem:[#allocation2 + $0x217c] ss:$48 sps:$4 sm:$0xff]  }
 0x34c   :  { %8115 = vmatpush1.bf16.msra.mxu1 %v22249_v44  ;;  %8075 = vmatprep.subr.bf16.mxu0 %v22254_v45  ;;  %v22306_v44 = vld [vmem:[#allocation2 + $0x1b78] ss:$48 sps:$4 sm:$0xff]  }
 0x34d   :  { %8116 = vmatprep.subr.bf16.mxu1 %v22257_v46  ;;  %v22309_v45 = vld [vmem:[#allocation2 + $0x2178] ss:$48 sps:$4 sm:$0xff]   ;;  %v22314_v46 = vld [vmem:[#allocation2 + $0x1b1c] ss:$48 sps:$4 sm:$0xff]  }
 0x34f   :  { %8076 = vmatpush1.bf16.msra.mxu0 %v22252_v47  ;;  %v22317_v47 = vld [vmem:[#allocation2 + $0x211c] ss:$48 sps:$4 sm:$0xff]  }
 0x350   :  { %8117 = vmatpush1.bf16.msra.mxu1 %v22255_v62  ;;  %8077 = vmatprep.subr.bf16.mxu0 %v22260_v51  ;;  %v22312_v62 = vld [vmem:[#allocation2 + $0x1b18] ss:$48 sps:$4 sm:$0xff]  }
 0x351   :  { %8118 = vmatprep.subr.bf16.mxu1 %v22263_v53  ;;  %v22315_v51 = vld [vmem:[#allocation2 + $0x2118] ss:$48 sps:$4 sm:$0xff]   ;;  %v22320_v53 = vld [vmem:[#allocation2 + $0x2c4] ss:$48 sps:$4 sm:$0xff]  }
 0x353   :  { %8078 = vmatpush1.bf16.msra.mxu0 %v22258_v56  ;;  %v22323_v56 = vld [vmem:[#allocation2 + $0x8c4] ss:$48 sps:$4 sm:$0xff]  }
 0x354   :  { %8119 = vmatpush1.bf16.msra.mxu1 %v22261_v58  ;;  %8079 = vmatprep.subr.bf16.mxu0 %v22266_v59  ;;  %v22318_v58 = vld [vmem:[#allocation2 + $0x2c0] ss:$48 sps:$4 sm:$0xff]  }
 0x355   :  { %8120 = vmatprep.subr.bf16.mxu1 %v22269_v14  ;;  %v22321_v59 = vld [vmem:[#allocation2 + $0x8c0] ss:$48 sps:$4 sm:$0xff]   ;;  %v22326_v14 = vld [vmem:[#allocation2 + $0x264] ss:$48 sps:$4 sm:$0xff]  }
 0x357   :  { %8080 = vmatpush1.bf16.msra.mxu0 %v22264_v63  ;;  %v22329_v63 = vld [vmem:[#allocation2 + $0x864] ss:$48 sps:$4 sm:$0xff]  }
 0x358   :  { %8121 = vmatpush1.bf16.msra.mxu1 %v22267_v0  ;;  %8081 = vmatprep.subr.bf16.mxu0 %v22272_v1  ;;  %v22324_v0 = vld [vmem:[#allocation2 + $0x260] ss:$48 sps:$4 sm:$0xff]  }
 0x359   :  { %8122 = vmatprep.subr.bf16.mxu1 %v22275_v19  ;;  %v22327_v1 = vld [vmem:[#allocation2 + $0x860] ss:$48 sps:$4 sm:$0xff]  }
 0x35b   :  { %8082 = vmatpush2.bf16.msra.mxu0 %v22270_v2 }
 0x35c   :  { %8123 = vmatpush2.bf16.msra.mxu1 %v22273_v3  ;;  %8083 = vmatprep.subr.bf16.mxu0 %v22278_v5 }
 0x35d   :  { %8124 = vmatprep.subr.bf16.mxu1 %v22281_v6 }
 0x35f   :  { %8084 = vmatpush2.bf16.msra.mxu0 %v22276_v7  ;;  %v22332_v7 = vld [vmem:[#allocation2 + $0x204] ss:$48 sps:$4 sm:$0xff]  }
 0x360   :  { %8125 = vmatpush2.bf16.msra.mxu1 %v22279_v10  ;;  %8085 = vmatprep.subr.bf16.mxu0 %v22284_v11  ;;  %v22335_v10 = vld [vmem:[#allocation2 + $0x804] ss:$48 sps:$4 sm:$0xff]  }
 0x361   :  { %8126 = vmatprep.subr.bf16.mxu1 %v22287_v13 }
 0x363   :  { %8086 = vmatpush2.bf16.msra.mxu0 %v22282_v15  ;;  %v22330_v15 = vld [vmem:[#allocation2 + $0x200] ss:$48 sps:$4 sm:$0xff]  }
 0x364   :  { %8127 = vmatpush2.bf16.msra.mxu1 %v22285_v16  ;;  %8087 = vmatprep.subr.bf16.mxu0 %v22290_v18  ;;  %v22333_v16 = vld [vmem:[#allocation2 + $0x800] ss:$48 sps:$4 sm:$0xff]  }
 0x365   :  { %8128 = vmatprep.subr.bf16.mxu1 %v22293_v22 }
 0x367   :  { %8088 = vmatpush2.bf16.msra.mxu0 %v22288_v23 }
 0x368   :  { %8129 = vmatpush2.bf16.msra.mxu1 %v22291_v26  ;;  %8089 = vmatprep.subr.bf16.mxu0 %v22296_v24  ;;  %v22338_v24 = vld [vmem:[#allocation2 + $0x1a4] ss:$48 sps:$4 sm:$0xff]  }
 0x369   :  { %8130 = vmatprep.subr.bf16.mxu1 %v22299_v28  ;;  %v22341_v28 = vld [vmem:[#allocation2 + $0x7a4] ss:$48 sps:$4 sm:$0xff]  }
 0x36b   :  { %8090 = vmatpush2.bf16.msra.mxu0 %v22294_v30  ;;  %v22339_v30 = vld [vmem:[#allocation2 + $0x7a0] ss:$48 sps:$4 sm:$0xff]  }
 0x36c   :  { %8131 = vmatpush2.bf16.msra.mxu1 %v22297_v54  ;;  %8091 = vmatprep.subr.bf16.mxu0 %v22302_v35  ;;  %v22344_v54 = vld [vmem:[#allocation2 + $0x144] ss:$48 sps:$4 sm:$0xff]  }
 0x36d   :  { %8132 = vmatprep.subr.bf16.mxu1 %v22305_v33  ;;  %v22347_v35 = vld [vmem:[#allocation2 + $0x744] ss:$48 sps:$4 sm:$0xff]   ;;  %v22342_v33 = vld [vmem:[#allocation2 + $0x140] ss:$48 sps:$4 sm:$0xff]  }
 0x36f   :  { %8092 = vmatpush2.bf16.msra.mxu0 %v22300_v36  ;;  %v22345_v36 = vld [vmem:[#allocation2 + $0x740] ss:$48 sps:$4 sm:$0xff]  }
 0x370   :  { %8133 = vmatpush2.bf16.msra.mxu1 %v22303_v61  ;;  %8093 = vmatprep.subr.bf16.mxu0 %v22308_v38  ;;  %v22350_v61 = vld [vmem:[#allocation2 + $0xe4] ss:$48 sps:$4 sm:$0xff]  }
 0x371   :  { %8134 = vmatprep.subr.bf16.mxu1 %v22311_v55  ;;  %v22353_v38 = vld [vmem:[#allocation2 + $0x6e4] ss:$48 sps:$4 sm:$0xff]   ;;  %v22348_v55 = vld [vmem:[#allocation2 + $0xe0] ss:$48 sps:$4 sm:$0xff]  }
 0x373   :  { %8094 = vmatpush2.bf16.msra.mxu0 %v22306_v44  ;;  %v22351_v44 = vld [vmem:[#allocation2 + $0x6e0] ss:$48 sps:$4 sm:$0xff]  }
 0x374   :  { %8135 = vmatpush2.bf16.msra.mxu1 %v22309_v45  ;;  %8095 = vmatprep.subr.bf16.mxu0 %v22314_v46  ;;  %v22356_v45 = vld [vmem:[#allocation2 + $0x84] ss:$48 sps:$4 sm:$0xff]  }
 0x375   :  { %8136 = vmatprep.subr.bf16.mxu1 %v22317_v47  ;;  %v22359_v46 = vld [vmem:[#allocation2 + $0x684] ss:$48 sps:$4 sm:$0xff]   ;;  %v22354_v47 = vld [vmem:[#allocation2 + $0x80] ss:$48 sps:$4 sm:$0xff]  }
 0x377   :  { %8096 = vmatpush2.bf16.msra.mxu0 %v22312_v62  ;;  %v22357_v62 = vld [vmem:[#allocation2 + $0x680] ss:$48 sps:$4 sm:$0xff]  }
 0x378   :  { %8137 = vmatpush2.bf16.msra.mxu1 %v22315_v51  ;;  %8147 = vmatprep.subr.bf16.mxu0 %v22320_v53  ;;  %v22362_v51 = vld [vmem:[#allocation2 + $0x24] ss:$48 sps:$4 sm:$0xff]  }
 0x379   :  { %8188 = vmatprep.subr.bf16.mxu1 %v22323_v56  ;;  %v22365_v53 = vld [vmem:[#allocation2 + $0x624] ss:$48 sps:$4 sm:$0xff]   ;;  %v22360_v56 = vld [vmem:[#allocation2 + $0x20] ss:$48 sps:$4 sm:$0xff]  }
 0x37a   :  { %v7853_v19 = vpop.f32.mrf.mxu0  ;;  %8098 = vmatmul.mubr.bf16.vlgmr.msra.gmra.mxu0 %v25118_v39 }
 0x37b   :  { %v7894_v2 = vpop.f32.mrf.mxu1  ;;  %8139 = vmatmul.mubr.bf16.vlgmr.msra.gmra.mxu1 %v25120_v41  ;;  %v7854_v3 = vadd.f32 %v7853_v19, %v25219_v17  ;;  %8148 = vmatpush1.bf16.msra.mxu0 %v22318_v58  ;;  %v22363_v58 = vld [vmem:[#allocation2 + $0x620] ss:$48 sps:$4 sm:$0xff]   ;;  %v22377_v19 = vld [vmem:[#allocation2 + $0xb64] ss:$48 sps:$4 sm:$0xff]  }
 0x37c   :  { %8189 = vmatpush1.bf16.msra.mxu1 %v22321_v59  ;;  %v7855_v5 = vpop.f32.mrf.mxu0  ;;  %8149 = vmatprep.subr.bf16.mxu0 %v22326_v14  ;;  %v22368_v59 = vld [vmem:[#allocation2 + $0x5c4] ss:$48 sps:$4 sm:$0xff]  }
 0x37d   :  { %v7896_v6 = vpop.f32.mrf.mxu1  ;;  %8190 = vmatprep.subr.bf16.mxu1 %v22329_v63  ;;  %v25229_v11 = vadd.f32 %v7894_v2, %v7854_v3  ;;  %v7856_v13 = vadd.f32 %v7855_v5, %v25224_v27  ;;  %8179 = vmatprep.mubr.bf16.mxu0 %v25055_v49  ;;  %v22336_v27 = vld [vmem:[#allocation2 + $0x1a0] ss:$48 sps:$4 sm:$0xff]   ;;  %v22371_v14 = vld [vmem:[#allocation2 + $0xbc4] ss:$48 sps:$4 sm:$0xff]  }
 0x37e   :  { %8220 = vmatprep.mubr.bf16.mxu1 %v25060_v52  ;;  %v7857_v18 = vpop.f32.mrf.mxu0  ;;  %v22366_v63 = vld [vmem:[#allocation2 + $0x5c0] ss:$48 sps:$4 sm:$0xff]   ;;  %v22380_v5 = vld [vmem:[#allocation2 + $0x504] ss:$48 sps:$4 sm:$0xff]  }
 0x37f   :  { %v7898_v17 = vpop.f32.mrf.mxu1  ;;  %v25234_v22 = vadd.f32 %v7896_v6, %v7856_v13  ;;  %8150 = vmatpush1.bf16.msra.mxu0 %v22324_v0  ;;  %v22369_v0 = vld [vmem:[#allocation2 + $0xbc0] ss:$48 sps:$4 sm:$0xff]   ;;  %v22383_v6 = vld [vmem:[#allocation2 + $0xb04] ss:$48 sps:$4 sm:$0xff]  }
 0x380   :  { %8191 = vmatpush1.bf16.msra.mxu1 %v22327_v1  ;;  %v7858_v23 = vpop.f32.mrf.mxu0  ;;  %8151 = vmatprep.subr.bf16.mxu0 %v22332_v7  ;;  %v22374_v1 = vld [vmem:[#allocation2 + $0x564] ss:$48 sps:$4 sm:$0xff]   ;;  %v22372_v2 = vld [vmem:[#allocation2 + $0x560] ss:$48 sps:$4 sm:$0xff]  }
 0x381   :  { %v7899_v26 = vpop.f32.mrf.mxu1  ;;  %8192 = vmatprep.subr.bf16.mxu1 %v22335_v10  ;;  %v22375_v3 = vld [vmem:[#allocation2 + $0xb60] ss:$48 sps:$4 sm:$0xff]   ;;  %v22386_v13 = vld [vmem:[#allocation2 + $0x4a4] ss:$48 sps:$4 sm:$0xff]  }
 0x382   :  { %v22378_v7 = vld [vmem:[#allocation2 + $0x500] ss:$48 sps:$4 sm:$0xff]   ;;  %v22392_v17 = vld [vmem:[#allocation2 + $0x444] ss:$48 sps:$4 sm:$0xff]  }
 0x383   :  { %8152 = vmatpush1.bf16.msra.mxu0 %v22330_v15  ;;  %v22381_v10 = vld [vmem:[#allocation2 + $0xb00] ss:$48 sps:$4 sm:$0xff]   ;;  %v22389_v15 = vld [vmem:[#allocation2 + $0xaa4] ss:$48 sps:$4 sm:$0xff]  }
 0x384   :  { %8193 = vmatpush1.bf16.msra.mxu1 %v22333_v16  ;;  %8153 = vmatprep.subr.bf16.mxu0 %v22338_v24  ;;  %v22384_v16 = vld [vmem:[#allocation2 + $0x4a0] ss:$48 sps:$4 sm:$0xff]   ;;  %v22395_v23 = vld [vmem:[#allocation2 + $0xa44] ss:$48 sps:$4 sm:$0xff]  }
 0x385   :  { %8194 = vmatprep.subr.bf16.mxu1 %v22341_v28  ;;  %v22387_v18 = vld [vmem:[#allocation2 + $0xaa0] ss:$48 sps:$4 sm:$0xff]   ;;  %v22398_v28 = vld [vmem:[#allocation2 + $0x3e4] ss:$48 sps:$4 sm:$0xff]  }
 0x386   :  { %v22390_v26 = vld [vmem:[#allocation2 + $0x440] ss:$48 sps:$4 sm:$0xff]  }
 0x387   :  { %8154 = vmatpush1.bf16.msra.mxu0 %v22336_v27  ;;  %v22393_v24 = vld [vmem:[#allocation2 + $0xa40] ss:$48 sps:$4 sm:$0xff]   ;;  %v22401_v27 = vld [vmem:[#allocation2 + $0x9e4] ss:$48 sps:$4 sm:$0xff]  }
 0x388   :  { %8195 = vmatpush1.bf16.msra.mxu1 %v22339_v30  ;;  %8155 = vmatprep.subr.bf16.mxu0 %v22344_v54  ;;  %v22396_v30 = vld [vmem:[#allocation2 + $0x3e0] ss:$48 sps:$4 sm:$0xff]  }
 0x389   :  { %8196 = vmatprep.subr.bf16.mxu1 %v22347_v35  ;;  %v22399_v54 = vld [vmem:[#allocation2 + $0x9e0] ss:$48 sps:$4 sm:$0xff]   ;;  %v22404_v35 = vld [vmem:[#allocation2 + $0x384] ss:$48 sps:$4 sm:$0xff]  }
 0x38b   :  { %8156 = vmatpush1.bf16.msra.mxu0 %v22342_v33  ;;  %v22407_v33 = vld [vmem:[#allocation2 + $0x984] ss:$48 sps:$4 sm:$0xff]  }
 0x38c   :  { %8197 = vmatpush1.bf16.msra.mxu1 %v22345_v36  ;;  %8157 = vmatprep.subr.bf16.mxu0 %v22350_v61  ;;  %v22402_v36 = vld [vmem:[#allocation2 + $0x380] ss:$48 sps:$4 sm:$0xff]  }
 0x38d   :  { %8198 = vmatprep.subr.bf16.mxu1 %v22353_v38  ;;  %v22405_v61 = vld [vmem:[#allocation2 + $0x980] ss:$48 sps:$4 sm:$0xff]   ;;  %v22410_v38 = vld [vmem:[#allocation2 + $0x324] ss:$48 sps:$4 sm:$0xff]  }
 0x38f   :  { %8158 = vmatpush1.bf16.msra.mxu0 %v22348_v55  ;;  %v22413_v55 = vld [vmem:[#allocation2 + $0x924] ss:$48 sps:$4 sm:$0xff]  }
 0x390   :  { %8199 = vmatpush1.bf16.msra.mxu1 %v22351_v44  ;;  %8159 = vmatprep.subr.bf16.mxu0 %v22356_v45  ;;  %v22408_v44 = vld [vmem:[#allocation2 + $0x320] ss:$48 sps:$4 sm:$0xff]  }
 0x391   :  { %8200 = vmatprep.subr.bf16.mxu1 %v22359_v46  ;;  %v22411_v45 = vld [vmem:[#allocation2 + $0x920] ss:$48 sps:$4 sm:$0xff]   ;;  %v25237_v46 = vsub.s32 6, %v25126_v50 }
 0x393   :  { %8160 = vmatpush1.bf16.msra.mxu0 %v22354_v47  ;;  %v22416_v47 = vld [vmem:[#allocation2 + $0xec4] ss:$48 sps:$4 sm:$0xff]  }
 0x394   :  { %8201 = vmatpush1.bf16.msra.mxu1 %v22357_v62  ;;  %8161 = vmatprep.subr.bf16.mxu0 %v22362_v51  ;;  %v22419_v62 = vld [vmem:[#allocation2 + $0x14c4] ss:$48 sps:$4 sm:$0xff]   ;;  %v22414_v51 = vld [vmem:[#allocation2 + $0xec0] ss:$48 sps:$4 sm:$0xff]  }
 0x395   :  { %8202 = vmatprep.subr.bf16.mxu1 %v22365_v53  ;;  %v22417_v53 = vld [vmem:[#allocation2 + $0x14c0] ss:$48 sps:$4 sm:$0xff]  }
 0x397   :  { %8162 = vmatpush1.bf16.msra.mxu0 %v22360_v56  ;;  %v25240_v56 = vsub.s32 7, %v25126_v50 }
 0x398   :  { %8203 = vmatpush1.bf16.msra.mxu1 %v22363_v58  ;;  %8163 = vmatprep.subr.bf16.mxu0 %v22368_v59  ;;  %v24728_v58 = vld [vmem:[#allocation4] sm:$0xff] }
 0x399   :  { %8204 = vmatprep.subr.bf16.mxu1 %v22371_v14  ;;  %v1370_v59 = vrot.slane %v24728_v58, %v25237_v46  ;;  %v22422_v14 = vld [vmem:[#allocation2 + $0xe64] ss:$48 sps:$4 sm:$0xff]  }
 0x39b   :  { %8164 = vmatpush2.bf16.msra.mxu0 %v22366_v63  ;;  %v22425_v63 = vld [vmem:[#allocation2 + $0x1464] ss:$48 sps:$4 sm:$0xff]  }
 0x39c   :  { %8205 = vmatpush2.bf16.msra.mxu1 %v22369_v0  ;;  %8165 = vmatprep.subr.bf16.mxu0 %v22374_v1  ;;  %v1374_v0 = vrot.slane %v24728_v58, %v25240_v56  ;;  %v22420_v1 = vld [vmem:[#allocation2 + $0xe60] ss:$48 sps:$4 sm:$0xff]  }
 0x39d   :  { %8206 = vmatprep.subr.bf16.mxu1 %v22377_v19  ;;  %v22423_v19 = vld [vmem:[#allocation2 + $0x1460] ss:$48 sps:$4 sm:$0xff]  }
 0x39e   :  { %v22453_v58 = vld [vmem:[#allocation2 + $0x1280] ss:$48 sps:$4 sm:$0xff]  }
 0x39f   :  { %8166 = vmatpush2.bf16.msra.mxu0 %v22372_v2 }
 0x3a0   :  { %8207 = vmatpush2.bf16.msra.mxu1 %v22375_v3  ;;  %8167 = vmatprep.subr.bf16.mxu0 %v22380_v5 }
 0x3a1   :  { %8208 = vmatprep.subr.bf16.mxu1 %v22383_v6 }
 0x3a3   :  { %8168 = vmatpush2.bf16.msra.mxu0 %v22378_v7  ;;  %v22428_v7 = vld [vmem:[#allocation2 + $0xe04] ss:$48 sps:$4 sm:$0xff]  }
 0x3a4   :  { %8209 = vmatpush2.bf16.msra.mxu1 %v22381_v10  ;;  %8169 = vmatprep.subr.bf16.mxu0 %v22386_v13  ;;  %v22431_v10 = vld [vmem:[#allocation2 + $0x1404] ss:$48 sps:$4 sm:$0xff]  }
 0x3a5   :  { %8210 = vmatprep.subr.bf16.mxu1 %v22389_v15 }
 0x3a7   :  { %8170 = vmatpush2.bf16.msra.mxu0 %v22384_v16  ;;  %v22426_v16 = vld [vmem:[#allocation2 + $0xe00] ss:$48 sps:$4 sm:$0xff]  }
 0x3a8   :  { %8211 = vmatpush2.bf16.msra.mxu1 %v22387_v18  ;;  %8171 = vmatprep.subr.bf16.mxu0 %v22392_v17  ;;  %v22429_v18 = vld [vmem:[#allocation2 + $0x1400] ss:$48 sps:$4 sm:$0xff]  }
 0x3a9   :  { %8212 = vmatprep.subr.bf16.mxu1 %v22395_v23 }
 0x3ab   :  { %8172 = vmatpush2.bf16.msra.mxu0 %v22390_v26 }
 0x3ac   :  { %8213 = vmatpush2.bf16.msra.mxu1 %v22393_v24  ;;  %8173 = vmatprep.subr.bf16.mxu0 %v22398_v28 }
 0x3ad   :  { %8214 = vmatprep.subr.bf16.mxu1 %v22401_v27  ;;  %v22434_v27 = vld [vmem:[#allocation2 + $0xda4] ss:$48 sps:$4 sm:$0xff]  }
 0x3af   :  { %8174 = vmatpush2.bf16.msra.mxu0 %v22396_v30  ;;  %v22437_v30 = vld [vmem:[#allocation2 + $0x13a4] ss:$48 sps:$4 sm:$0xff]  }
 0x3b0   :  { %8215 = vmatpush2.bf16.msra.mxu1 %v22399_v54  ;;  %8175 = vmatprep.subr.bf16.mxu0 %v22404_v35  ;;  %v22432_v54 = vld [vmem:[#allocation2 + $0xda0] ss:$48 sps:$4 sm:$0xff]  }
 0x3b1   :  { %8216 = vmatprep.subr.bf16.mxu1 %v22407_v33  ;;  %v22435_v35 = vld [vmem:[#allocation2 + $0x13a0] ss:$48 sps:$4 sm:$0xff]   ;;  %v22440_v33 = vld [vmem:[#allocation2 + $0xd44] ss:$48 sps:$4 sm:$0xff]  }
 0x3b3   :  { %8176 = vmatpush2.bf16.msra.mxu0 %v22402_v36  ;;  %v22443_v36 = vld [vmem:[#allocation2 + $0x1344] ss:$48 sps:$4 sm:$0xff]  }
 0x3b4   :  { %8217 = vmatpush2.bf16.msra.mxu1 %v22405_v61  ;;  %8177 = vmatprep.subr.bf16.mxu0 %v22410_v38  ;;  %v22438_v61 = vld [vmem:[#allocation2 + $0xd40] ss:$48 sps:$4 sm:$0xff]  }
 0x3b5   :  { %8218 = vmatprep.subr.bf16.mxu1 %v22413_v55  ;;  %v22441_v38 = vld [vmem:[#allocation2 + $0x1340] ss:$48 sps:$4 sm:$0xff]   ;;  %v22446_v55 = vld [vmem:[#allocation2 + $0xce4] ss:$48 sps:$4 sm:$0xff]  }
 0x3b7   :  { %8178 = vmatpush2.bf16.msra.mxu0 %v22408_v44  ;;  %v22449_v44 = vld [vmem:[#allocation2 + $0x12e4] ss:$48 sps:$4 sm:$0xff]  }
 0x3b8   :  { %8219 = vmatpush2.bf16.msra.mxu1 %v22411_v45  ;;  %8229 = vmatprep.subr.bf16.mxu0 %v22416_v47  ;;  %v22444_v45 = vld [vmem:[#allocation2 + $0xce0] ss:$48 sps:$4 sm:$0xff]  }
 0x3b9   :  { %8270 = vmatprep.subr.bf16.mxu1 %v22419_v62  ;;  %v22447_v47 = vld [vmem:[#allocation2 + $0x12e0] ss:$48 sps:$4 sm:$0xff]   ;;  %v22452_v62 = vld [vmem:[#allocation2 + $0xc84] ss:$48 sps:$4 sm:$0xff]  }
 0x3ba   :  { %v7935_v2 = vpop.f32.mrf.mxu0  ;;  %8180 = vmatmul.mubr.bf16.vlgmr.msra.gmra.mxu0 %v25070_v8 }
 0x3bb   :  { %v7976_v3 = vpop.f32.mrf.mxu1  ;;  %8221 = vmatmul.mubr.bf16.vlgmr.msra.gmra.mxu1 %v25072_v9  ;;  %v7936_v50 = vadd.f32 %v7935_v2, %v1370_v59  ;;  %8230 = vmatpush1.bf16.msra.mxu0 %v22414_v51  ;;  %v22455_v51 = vld [vmem:[#allocation2 + $0x1284] ss:$48 sps:$4 sm:$0xff]   ;;  %v22462_v2 = vld [vmem:[#allocation2 + $0x11c0] ss:$48 sps:$4 sm:$0xff]  }
 0x3bc   :  { %8271 = vmatpush1.bf16.msra.mxu1 %v22417_v53  ;;  %v7937_v5 = vpop.f32.mrf.mxu0  ;;  %8231 = vmatprep.subr.bf16.mxu0 %v22422_v14  ;;  %v22450_v53 = vld [vmem:[#allocation2 + $0xc80] ss:$48 sps:$4 sm:$0xff]   ;;  %v22458_v59 = vld [vmem:[#allocation2 + $0xc24] ss:$48 sps:$4 sm:$0xff]  }
 0x3bd   :  { %v7978_v6 = vpop.f32.mrf.mxu1  ;;  %8272 = vmatprep.subr.bf16.mxu1 %v22425_v63  ;;  %v25246_v13 = vadd.f32 %v7976_v3, %v7936_v50  ;;  %v7938_v15 = vadd.f32 %v7937_v5, %v1374_v0  ;;  %8261 = vmatprep.mubr.bf16.mxu0 %v25079_v37  ;;  %v22461_v14 = vld [vmem:[#allocation2 + $0x1224] ss:$48 sps:$4 sm:$0xff]   ;;  %v22456_v63 = vld [vmem:[#allocation2 + $0xc20] ss:$48 sps:$4 sm:$0xff]  }
 0x3be   :  { %8302 = vmatprep.mubr.bf16.mxu1 %v25084_v40  ;;  %v7939_v17 = vpop.f32.mrf.mxu0  ;;  %v22459_v0 = vld [vmem:[#allocation2 + $0x1220] ss:$48 sps:$4 sm:$0xff]   ;;  %v22470_v50 = vld [vmem:[#allocation2 + $0x1164] ss:$48 sps:$4 sm:$0xff]  }
 0x3bf   :  { %v7980_v23 = vpop.f32.mrf.mxu1  ;;  %v25250_v26 = vadd.f32 %v7978_v6, %v7938_v15  ;;  %8232 = vmatpush1.bf16.msra.mxu0 %v22420_v1  ;;  %v22464_v1 = vld [vmem:[#allocation2 + $0x11c4] ss:$48 sps:$4 sm:$0xff]   ;;  %v22465_v3 = vld [vmem:[#allocation2 + $0x17c0] ss:$48 sps:$4 sm:$0xff]  }
 0x3c0   :  { %8273 = vmatpush1.bf16.msra.mxu1 %v22423_v19  ;;  %v7940_v24 = vpop.f32.mrf.mxu0  ;;  %8233 = vmatprep.subr.bf16.mxu0 %v22428_v7  ;;  %v22467_v19 = vld [vmem:[#allocation2 + $0x17c4] ss:$48 sps:$4 sm:$0xff]   ;;  %v22468_v6 = vld [vmem:[#allocation2 + $0x1160] ss:$48 sps:$4 sm:$0xff]  }
 0x3c1   :  { %v7981_v28 = vpop.f32.mrf.mxu1  ;;  %8274 = vmatprep.subr.bf16.mxu1 %v22431_v10  ;;  %v22473_v5 = vld [vmem:[#allocation2 + $0x1764] ss:$48 sps:$4 sm:$0xff]   ;;  %v22471_v7 = vld [vmem:[#allocation2 + $0x1760] ss:$48 sps:$4 sm:$0xff]  }
 0x3c2   :  { %v22476_v10 = vld [vmem:[#allocation2 + $0x1104] ss:$48 sps:$4 sm:$0xff]   ;;  %v22480_v24 = vld [vmem:[#allocation2 + $0x10a0] ss:$48 sps:$4 sm:$0xff]  }
 0x3c3   :  { %8234 = vmatpush1.bf16.msra.mxu0 %v22426_v16  ;;  %v22479_v15 = vld [vmem:[#allocation2 + $0x1704] ss:$48 sps:$4 sm:$0xff]   ;;  %v22474_v16 = vld [vmem:[#allocation2 + $0x1100] ss:$48 sps:$4 sm:$0xff]  }
 0x3c4   :  { %8275 = vmatpush1.bf16.msra.mxu1 %v22429_v18  ;;  %8235 = vmatprep.subr.bf16.mxu0 %v22434_v27  ;;  %v22477_v18 = vld [vmem:[#allocation2 + $0x1700] ss:$48 sps:$4 sm:$0xff]   ;;  %v22482_v17 = vld [vmem:[#allocation2 + $0x10a4] ss:$48 sps:$4 sm:$0xff]  }
 0x3c5   :  { %8276 = vmatprep.subr.bf16.mxu1 %v22437_v30  ;;  %v22485_v23 = vld [vmem:[#allocation2 + $0x16a4] ss:$48 sps:$4 sm:$0xff]   ;;  %v22483_v28 = vld [vmem:[#allocation2 + $0x16a0] ss:$48 sps:$4 sm:$0xff]  }
 0x3c6   :  { %v22488_v27 = vld [vmem:[#allocation2 + $0x1044] ss:$48 sps:$4 sm:$0xff]  }
 0x3c7   :  { %8236 = vmatpush1.bf16.msra.mxu0 %v22432_v54  ;;  %v22491_v30 = vld [vmem:[#allocation2 + $0x1644] ss:$48 sps:$4 sm:$0xff]   ;;  %v22486_v54 = vld [vmem:[#allocation2 + $0x1040] ss:$48 sps:$4 sm:$0xff]  }
 0x3c8   :  { %8277 = vmatpush1.bf16.msra.mxu1 %v22435_v35  ;;  %8237 = vmatprep.subr.bf16.mxu0 %v22440_v33  ;;  %v22489_v35 = vld [vmem:[#allocation2 + $0x1640] ss:$48 sps:$4 sm:$0xff]   ;;  %v22494_v33 = vld [vmem:[#allocation2 + $0xfe4] ss:$48 sps:$4 sm:$0xff]  }
 0x3c9   :  { %8278 = vmatprep.subr.bf16.mxu1 %v22443_v36  ;;  %v22497_v36 = vld [vmem:[#allocation2 + $0x15e4] ss:$48 sps:$4 sm:$0xff]  }
 0x3cb   :  { %8238 = vmatpush1.bf16.msra.mxu0 %v22438_v61  ;;  %v22492_v61 = vld [vmem:[#allocation2 + $0xfe0] ss:$48 sps:$4 sm:$0xff]  }
 0x3cc   :  { %8279 = vmatpush1.bf16.msra.mxu1 %v22441_v38  ;;  %8239 = vmatprep.subr.bf16.mxu0 %v22446_v55  ;;  %v22495_v38 = vld [vmem:[#allocation2 + $0x15e0] ss:$48 sps:$4 sm:$0xff]   ;;  %v22500_v55 = vld [vmem:[#allocation2 + $0xf84] ss:$48 sps:$4 sm:$0xff]  }
 0x3cd   :  { %8280 = vmatprep.subr.bf16.mxu1 %v22449_v44  ;;  %v22503_v44 = vld [vmem:[#allocation2 + $0x1584] ss:$48 sps:$4 sm:$0xff]  }
 0x3cf   :  { %8240 = vmatpush1.bf16.msra.mxu0 %v22444_v45  ;;  %v22498_v45 = vld [vmem:[#allocation2 + $0xf80] ss:$48 sps:$4 sm:$0xff]  }
 0x3d0   :  { %8281 = vmatpush1.bf16.msra.mxu1 %v22447_v47  ;;  %8241 = vmatprep.subr.bf16.mxu0 %v22452_v62  ;;  %v22501_v47 = vld [vmem:[#allocation2 + $0x1580] ss:$48 sps:$4 sm:$0xff]   ;;  %v22506_v62 = vld [vmem:[#allocation2 + $0xf24] ss:$48 sps:$4 sm:$0xff]  }
 0x3d1   :  { %8282 = vmatprep.subr.bf16.mxu1 %v22455_v51  ;;  %v22509_v51 = vld [vmem:[#allocation2 + $0x1524] ss:$48 sps:$4 sm:$0xff]  }
 0x3d3   :  { %8242 = vmatpush1.bf16.msra.mxu0 %v22450_v53  ;;  %v22504_v53 = vld [vmem:[#allocation2 + $0xf20] ss:$48 sps:$4 sm:$0xff]  }
 0x3d4   :  { %8283 = vmatpush1.bf16.msra.mxu1 %v22453_v58  ;;  %8243 = vmatprep.subr.bf16.mxu0 %v22458_v59  ;;  %v22507_v58 = vld [vmem:[#allocation2 + $0x1520] ss:$48 sps:$4 sm:$0xff]   ;;  %v22512_v59 = vld [vmem:[#allocation2 + $0x1ac4] ss:$48 sps:$4 sm:$0xff]  }
 0x3d5   :  { %8284 = vmatprep.subr.bf16.mxu1 %v22461_v14  ;;  %v22515_v14 = vld [vmem:[#allocation2 + $0x20c4] ss:$48 sps:$4 sm:$0xff]  }
 0x3d7   :  { %8244 = vmatpush1.bf16.msra.mxu0 %v22456_v63  ;;  %v22510_v63 = vld [vmem:[#allocation2 + $0x1ac0] ss:$48 sps:$4 sm:$0xff]  }
 0x3d8   :  { %8285 = vmatpush1.bf16.msra.mxu1 %v22459_v0  ;;  %8245 = vmatprep.subr.bf16.mxu0 %v22464_v1  ;;  %v22513_v0 = vld [vmem:[#allocation2 + $0x20c0] ss:$48 sps:$4 sm:$0xff]   ;;  %v22518_v1 = vld [vmem:[#allocation2 + $0x1a64] ss:$48 sps:$4 sm:$0xff]  }
 0x3d9   :  { %8286 = vmatprep.subr.bf16.mxu1 %v22467_v19  ;;  %v22521_v19 = vld [vmem:[#allocation2 + $0x2064] ss:$48 sps:$4 sm:$0xff]  }
 0x3db   :  { %8246 = vmatpush2.bf16.msra.mxu0 %v22462_v2  ;;  %v22516_v2 = vld [vmem:[#allocation2 + $0x1a60] ss:$48 sps:$4 sm:$0xff]  }
 0x3dc   :  { %8287 = vmatpush2.bf16.msra.mxu1 %v22465_v3  ;;  %8247 = vmatprep.subr.bf16.mxu0 %v22470_v50  ;;  %v22519_v3 = vld [vmem:[#allocation2 + $0x2060] ss:$48 sps:$4 sm:$0xff]  }
 0x3dd   :  { %8288 = vmatprep.subr.bf16.mxu1 %v22473_v5 }
 0x3df   :  { %8248 = vmatpush2.bf16.msra.mxu0 %v22468_v6 }
 0x3e0   :  { %8289 = vmatpush2.bf16.msra.mxu1 %v22471_v7  ;;  %8249 = vmatprep.subr.bf16.mxu0 %v22476_v10 }
 0x3e1   :  { %8290 = vmatprep.subr.bf16.mxu1 %v22479_v15  ;;  %v22524_v15 = vld [vmem:[#allocation2 + $0x1a04] ss:$48 sps:$4 sm:$0xff]  }
 0x3e3   :  { %8250 = vmatpush2.bf16.msra.mxu0 %v22474_v16  ;;  %v22527_v16 = vld [vmem:[#allocation2 + $0x2004] ss:$48 sps:$4 sm:$0xff]  }
 0x3e4   :  { %8291 = vmatpush2.bf16.msra.mxu1 %v22477_v18  ;;  %8251 = vmatprep.subr.bf16.mxu0 %v22482_v17 }
 0x3e5   :  { %8292 = vmatprep.subr.bf16.mxu1 %v22485_v23  ;;  %v22522_v23 = vld [vmem:[#allocation2 + $0x1a00] ss:$48 sps:$4 sm:$0xff]  }
 0x3e7   :  { %8252 = vmatpush2.bf16.msra.mxu0 %v22480_v24  ;;  %v22525_v24 = vld [vmem:[#allocation2 + $0x2000] ss:$48 sps:$4 sm:$0xff]  }
 0x3e8   :  { %8293 = vmatpush2.bf16.msra.mxu1 %v22483_v28  ;;  %8253 = vmatprep.subr.bf16.mxu0 %v22488_v27 }
 0x3e9   :  { %8294 = vmatprep.subr.bf16.mxu1 %v22491_v30 }
 0x3eb   :  { %8254 = vmatpush2.bf16.msra.mxu0 %v22486_v54 }
 0x3ec   :  { %8295 = vmatpush2.bf16.msra.mxu1 %v22489_v35  ;;  %8255 = vmatprep.subr.bf16.mxu0 %v22494_v33  ;;  %v22530_v35 = vld [vmem:[#allocation2 + $0x19a4] ss:$48 sps:$4 sm:$0xff]  }
 0x3ed   :  { %8296 = vmatprep.subr.bf16.mxu1 %v22497_v36  ;;  %v22533_v33 = vld [vmem:[#allocation2 + $0x1fa4] ss:$48 sps:$4 sm:$0xff]   ;;  %v22531_v36 = vld [vmem:[#allocation2 + $0x1fa0] ss:$48 sps:$4 sm:$0xff]  }
 0x3ef   :  { %8256 = vmatpush2.bf16.msra.mxu0 %v22492_v61  ;;  %v22536_v61 = vld [vmem:[#allocation2 + $0x1944] ss:$48 sps:$4 sm:$0xff]  }
 0x3f0   :  { %8297 = vmatpush2.bf16.msra.mxu1 %v22495_v38  ;;  %8257 = vmatprep.subr.bf16.mxu0 %v22500_v55  ;;  %v22539_v38 = vld [vmem:[#allocation2 + $0x1f44] ss:$48 sps:$4 sm:$0xff]   ;;  %v22534_v55 = vld [vmem:[#allocation2 + $0x1940] ss:$48 sps:$4 sm:$0xff]  }
 0x3f1   :  { %8298 = vmatprep.subr.bf16.mxu1 %v22503_v44  ;;  %v22537_v44 = vld [vmem:[#allocation2 + $0x1f40] ss:$48 sps:$4 sm:$0xff]  }
 0x3f3   :  { %8258 = vmatpush2.bf16.msra.mxu0 %v22498_v45  ;;  %v22542_v45 = vld [vmem:[#allocation2 + $0x18e4] ss:$48 sps:$4 sm:$0xff]  }
 0x3f4   :  { %8299 = vmatpush2.bf16.msra.mxu1 %v22501_v47  ;;  %8259 = vmatprep.subr.bf16.mxu0 %v22506_v62  ;;  %v22545_v47 = vld [vmem:[#allocation2 + $0x1ee4] ss:$48 sps:$4 sm:$0xff]   ;;  %v22540_v62 = vld [vmem:[#allocation2 + $0x18e0] ss:$48 sps:$4 sm:$0xff]  }
 0x3f5   :  { %8300 = vmatprep.subr.bf16.mxu1 %v22509_v51  ;;  %v22543_v51 = vld [vmem:[#allocation2 + $0x1ee0] ss:$48 sps:$4 sm:$0xff]  }
 0x3f7   :  { %8260 = vmatpush2.bf16.msra.mxu0 %v22504_v53  ;;  %v22548_v53 = vld [vmem:[#allocation2 + $0x1884] ss:$48 sps:$4 sm:$0xff]  }
 0x3f8   :  { %8301 = vmatpush2.bf16.msra.mxu1 %v22507_v58  ;;  %8311 = vmatprep.subr.bf16.mxu0 %v22512_v59  ;;  %v22551_v58 = vld [vmem:[#allocation2 + $0x1e84] ss:$48 sps:$4 sm:$0xff]   ;;  %v22546_v59 = vld [vmem:[#allocation2 + $0x1880] ss:$48 sps:$4 sm:$0xff]  }
 0x3f9   :  { %8352 = vmatprep.subr.bf16.mxu1 %v22515_v14  ;;  %v22549_v14 = vld [vmem:[#allocation2 + $0x1e80] ss:$48 sps:$4 sm:$0xff]  }
 0x3fa   :  { %v8017_v50 = vpop.f32.mrf.mxu0  ;;  %8262 = vmatmul.mubr.bf16.vlgmr.msra.gmra.mxu0 %v25094_v20 }
 0x3fb   :  { %v8058_v5 = vpop.f32.mrf.mxu1  ;;  %8303 = vmatmul.mubr.bf16.vlgmr.msra.gmra.mxu1 %v25096_v21  ;;  %v8018_v6 = vadd.f32 %v8017_v50, %v25246_v13  ;;  %8312 = vmatpush1.bf16.msra.mxu0 %v22510_v63  ;;  %v22554_v63 = vld [vmem:[#allocation2 + $0x1824] ss:$48 sps:$4 sm:$0xff]   ;;  %v22558_v50 = vld [vmem:[#allocation2 + $0x1dc0] ss:$48 sps:$4 sm:$0xff]  }
 0x3fc   :  { %8353 = vmatpush1.bf16.msra.mxu1 %v22513_v0  ;;  %v8019_v7 = vpop.f32.mrf.mxu0  ;;  %8313 = vmatprep.subr.bf16.mxu0 %v22518_v1  ;;  %v22557_v0 = vld [vmem:[#allocation2 + $0x1e24] ss:$48 sps:$4 sm:$0xff]   ;;  %v22552_v1 = vld [vmem:[#allocation2 + $0x1820] ss:$48 sps:$4 sm:$0xff]  }
 0x3fd   :  { %v8060_v10 = vpop.f32.mrf.mxu1  ;;  %8354 = vmatprep.subr.bf16.mxu1 %v22521_v19  ;;  %v25255_v18 = vadd.f32 %v8058_v5, %v8018_v6  ;;  %v8020_v17 = vadd.f32 %v8019_v7, %v25250_v26  ;;  %8343 = vmatprep.mubr.bf16.mxu0 %v25103_v29  ;;  %v22528_v26 = vld [vmem:[#allocation2 + $0x19a0] ss:$48 sps:$4 sm:$0xff]   ;;  %v22566_v6 = vld [vmem:[#allocation2 + $0x1d64] ss:$48 sps:$4 sm:$0xff]  }
 0x3fe   :  { %8384 = vmatprep.mubr.bf16.mxu1 %v25108_v32  ;;  %v8021_v28 = vpop.f32.mrf.mxu0  ;;  %v22555_v19 = vld [vmem:[#allocation2 + $0x1e20] ss:$48 sps:$4 sm:$0xff]   ;;  %v22569_v7 = vld [vmem:[#allocation2 + $0x2364] ss:$48 sps:$4 sm:$0xff]  }
 0x3ff   :  { %v8062_v13 = vpop.f32.mrf.mxu1  ;;  %v25260_v27 = vadd.f32 %v8060_v10, %v8020_v17  ;;  %8314 = vmatpush1.bf16.msra.mxu0 %v22516_v2  ;;  %v22560_v2 = vld [vmem:[#allocation2 + $0x1dc4] ss:$48 sps:$4 sm:$0xff]   ;;  %v22561_v5 = vld [vmem:[#allocation2 + $0x23c0] ss:$48 sps:$4 sm:$0xff]  }
 0x400   :  { %8355 = vmatpush1.bf16.msra.mxu1 %v22519_v3  ;;  %v8022_v30 = vpop.f32.mrf.mxu0  ;;  %8315 = vmatprep.subr.bf16.mxu0 %v22524_v15  ;;  %v22563_v3 = vld [vmem:[#allocation2 + $0x23c4] ss:$48 sps:$4 sm:$0xff]   ;;  %v22564_v10 = vld [vmem:[#allocation2 + $0x1d60] ss:$48 sps:$4 sm:$0xff]  }
 0x401   :  { %v8063_v54 = vpop.f32.mrf.mxu1  ;;  %8356 = vmatprep.subr.bf16.mxu1 %v22527_v16  ;;  %v22567_v15 = vld [vmem:[#allocation2 + $0x2360] ss:$48 sps:$4 sm:$0xff]   ;;  %v22572_v16 = vld [vmem:[#allocation2 + $0x1d04] ss:$48 sps:$4 sm:$0xff]  }
 0x402   :  { %v22575_v17 = vld [vmem:[#allocation2 + $0x2304] ss:$48 sps:$4 sm:$0xff]   ;;  %v22576_v30 = vld [vmem:[#allocation2 + $0x1ca0] ss:$48 sps:$4 sm:$0xff]  }
 0x403   :  { %8316 = vmatpush1.bf16.msra.mxu0 %v22522_v23  ;;  %v22570_v23 = vld [vmem:[#allocation2 + $0x1d00] ss:$48 sps:$4 sm:$0xff]   ;;  %v22578_v28 = vld [vmem:[#allocation2 + $0x1ca4] ss:$48 sps:$4 sm:$0xff]  }
 0x404   :  { %8357 = vmatpush1.bf16.msra.mxu1 %v22525_v24  ;;  %8317 = vmatprep.subr.bf16.mxu0 %v22530_v35  ;;  %v22573_v24 = vld [vmem:[#allocation2 + $0x2300] ss:$48 sps:$4 sm:$0xff]   ;;  %v22581_v13 = vld [vmem:[#allocation2 + $0x22a4] ss:$48 sps:$4 sm:$0xff]  }
 0x405   :  { %8358 = vmatprep.subr.bf16.mxu1 %v22533_v33  ;;  %v22579_v54 = vld [vmem:[#allocation2 + $0x22a0] ss:$48 sps:$4 sm:$0xff]   ;;  %v22584_v35 = vld [vmem:[#allocation2 + $0x1c44] ss:$48 sps:$4 sm:$0xff]  }
 0x406   :  { %v22587_v33 = vld [vmem:[#allocation2 + $0x2244] ss:$48 sps:$4 sm:$0xff]  }
 0x407   :  { %8318 = vmatpush1.bf16.msra.mxu0 %v22528_v26  ;;  %v22582_v26 = vld [vmem:[#allocation2 + $0x1c40] ss:$48 sps:$4 sm:$0xff]  }
 0x408   :  { %8359 = vmatpush1.bf16.msra.mxu1 %v22531_v36  ;;  %8319 = vmatprep.subr.bf16.mxu0 %v22536_v61  ;;  %v22585_v36 = vld [vmem:[#allocation2 + $0x2240] ss:$48 sps:$4 sm:$0xff]   ;;  %v22590_v61 = vld [vmem:[#allocation2 + $0x1be4] ss:$48 sps:$4 sm:$0xff]  }
 0x409   :  { %8360 = vmatprep.subr.bf16.mxu1 %v22539_v38  ;;  %v22593_v38 = vld [vmem:[#allocation2 + $0x21e4] ss:$48 sps:$4 sm:$0xff]  }
 0x40b   :  { %8320 = vmatpush1.bf16.msra.mxu0 %v22534_v55  ;;  %v22588_v55 = vld [vmem:[#allocation2 + $0x1be0] ss:$48 sps:$4 sm:$0xff]  }
 0x40c   :  { %8361 = vmatpush1.bf16.msra.mxu1 %v22537_v44  ;;  %8321 = vmatprep.subr.bf16.mxu0 %v22542_v45  ;;  %v22591_v44 = vld [vmem:[#allocation2 + $0x21e0] ss:$48 sps:$4 sm:$0xff]   ;;  %v22596_v45 = vld [vmem:[#allocation2 + $0x1b84] ss:$48 sps:$4 sm:$0xff]  }
 0x40d   :  { %8362 = vmatprep.subr.bf16.mxu1 %v22545_v47  ;;  %v22599_v47 = vld [vmem:[#allocation2 + $0x2184] ss:$48 sps:$4 sm:$0xff]  }
 0x40f   :  { %8322 = vmatpush1.bf16.msra.mxu0 %v22540_v62  ;;  %v22594_v62 = vld [vmem:[#allocation2 + $0x1b80] ss:$48 sps:$4 sm:$0xff]  }
 0x410   :  { %8363 = vmatpush1.bf16.msra.mxu1 %v22543_v51  ;;  %8323 = vmatprep.subr.bf16.mxu0 %v22548_v53  ;;  %v22597_v51 = vld [vmem:[#allocation2 + $0x2180] ss:$48 sps:$4 sm:$0xff]   ;;  %v22602_v53 = vld [vmem:[#allocation2 + $0x1b24] ss:$48 sps:$4 sm:$0xff]  }
 0x411   :  { %8364 = vmatprep.subr.bf16.mxu1 %v22551_v58  ;;  %v22605_v58 = vld [vmem:[#allocation2 + $0x2124] ss:$48 sps:$4 sm:$0xff]  }
 0x413   :  { %8324 = vmatpush1.bf16.msra.mxu0 %v22546_v59  ;;  %v22600_v59 = vld [vmem:[#allocation2 + $0x1b20] ss:$48 sps:$4 sm:$0xff]  }
 0x414   :  { %8365 = vmatpush1.bf16.msra.mxu1 %v22549_v14  ;;  %8325 = vmatprep.subr.bf16.mxu0 %v22554_v63  ;;  %v22603_v14 = vld [vmem:[#allocation2 + $0x2120] ss:$48 sps:$4 sm:$0xff]   ;;  %v22608_v63 = vld [vmem:[#allocation2 + $0x2cc] ss:$48 sps:$4 sm:$0xff]  }
 0x415   :  { %8366 = vmatprep.subr.bf16.mxu1 %v22557_v0  ;;  %v22611_v0 = vld [vmem:[#allocation2 + $0x8cc] ss:$48 sps:$4 sm:$0xff]  }
 0x417   :  { %8326 = vmatpush1.bf16.msra.mxu0 %v22552_v1  ;;  %v22606_v1 = vld [vmem:[#allocation2 + $0x2c8] ss:$48 sps:$4 sm:$0xff]  }
 0x418   :  { %8367 = vmatpush1.bf16.msra.mxu1 %v22555_v19  ;;  %8327 = vmatprep.subr.bf16.mxu0 %v22560_v2  ;;  %v22609_v19 = vld [vmem:[#allocation2 + $0x8c8] ss:$48 sps:$4 sm:$0xff]   ;;  %v22614_v2 = vld [vmem:[#allocation2 + $0x26c] ss:$48 sps:$4 sm:$0xff]  }
 0x419   :  { %8368 = vmatprep.subr.bf16.mxu1 %v22563_v3  ;;  %v22617_v3 = vld [vmem:[#allocation2 + $0x86c] ss:$48 sps:$4 sm:$0xff]  }
 0x41b   :  { %8328 = vmatpush2.bf16.msra.mxu0 %v22558_v50  ;;  %v22612_v50 = vld [vmem:[#allocation2 + $0x268] ss:$48 sps:$4 sm:$0xff]  }
 0x41c   :  { %8369 = vmatpush2.bf16.msra.mxu1 %v22561_v5  ;;  %8329 = vmatprep.subr.bf16.mxu0 %v22566_v6  ;;  %v22615_v5 = vld [vmem:[#allocation2 + $0x868] ss:$48 sps:$4 sm:$0xff]  }
 0x41d   :  { %8370 = vmatprep.subr.bf16.mxu1 %v22569_v7 }
 0x41f   :  { %8330 = vmatpush2.bf16.msra.mxu0 %v22564_v10 }
 0x420   :  { %8371 = vmatpush2.bf16.msra.mxu1 %v22567_v15  ;;  %8331 = vmatprep.subr.bf16.mxu0 %v22572_v16 }
 0x421   :  { %8372 = vmatprep.subr.bf16.mxu1 %v22575_v17  ;;  %v22620_v17 = vld [vmem:[#allocation2 + $0x20c] ss:$48 sps:$4 sm:$0xff]  }
 0x423   :  { %8332 = vmatpush2.bf16.msra.mxu0 %v22570_v23  ;;  %v22623_v23 = vld [vmem:[#allocation2 + $0x80c] ss:$48 sps:$4 sm:$0xff]  }
 0x424   :  { %8373 = vmatpush2.bf16.msra.mxu1 %v22573_v24  ;;  %8333 = vmatprep.subr.bf16.mxu0 %v22578_v28 }
 0x425   :  { %8374 = vmatprep.subr.bf16.mxu1 %v22581_v13  ;;  %v22618_v13 = vld [vmem:[#allocation2 + $0x208] ss:$48 sps:$4 sm:$0xff]  }
 0x427   :  { %8334 = vmatpush2.bf16.msra.mxu0 %v22576_v30  ;;  %v22621_v30 = vld [vmem:[#allocation2 + $0x808] ss:$48 sps:$4 sm:$0xff]  }
 0x428   :  { %8375 = vmatpush2.bf16.msra.mxu1 %v22579_v54  ;;  %8335 = vmatprep.subr.bf16.mxu0 %v22584_v35 }
 0x429   :  { %8376 = vmatprep.subr.bf16.mxu1 %v22587_v33 }
 0x42b   :  { %8336 = vmatpush2.bf16.msra.mxu0 %v22582_v26 }
 0x42c   :  { %8377 = vmatpush2.bf16.msra.mxu1 %v22585_v36  ;;  %8337 = vmatprep.subr.bf16.mxu0 %v22590_v61  ;;  %v22626_v36 = vld [vmem:[#allocation2 + $0x1ac] ss:$48 sps:$4 sm:$0xff]  }
 0x42d   :  { %8378 = vmatprep.subr.bf16.mxu1 %v22593_v38  ;;  %v22629_v61 = vld [vmem:[#allocation2 + $0x7ac] ss:$48 sps:$4 sm:$0xff]   ;;  %v22627_v38 = vld [vmem:[#allocation2 + $0x7a8] ss:$48 sps:$4 sm:$0xff]  }
 0x42f   :  { %8338 = vmatpush2.bf16.msra.mxu0 %v22588_v55  ;;  %v22630_v55 = vld [vmem:[#allocation2 + $0x148] ss:$48 sps:$4 sm:$0xff]  }
 0x430   :  { %8379 = vmatpush2.bf16.msra.mxu1 %v22591_v44  ;;  %8339 = vmatprep.subr.bf16.mxu0 %v22596_v45  ;;  %v22633_v44 = vld [vmem:[#allocation2 + $0x748] ss:$48 sps:$4 sm:$0xff]   ;;  %v22638_v45 = vld [vmem:[#allocation2 + $0xec] ss:$48 sps:$4 sm:$0xff]  }
 0x431   :  { %8380 = vmatprep.subr.bf16.mxu1 %v22599_v47  ;;  %v22641_v47 = vld [vmem:[#allocation2 + $0x6ec] ss:$48 sps:$4 sm:$0xff]  }
 0x433   :  { %8340 = vmatpush2.bf16.msra.mxu0 %v22594_v62  ;;  %v22636_v62 = vld [vmem:[#allocation2 + $0xe8] ss:$48 sps:$4 sm:$0xff]  }
 0x434   :  { %8381 = vmatpush2.bf16.msra.mxu1 %v22597_v51  ;;  %8341 = vmatprep.subr.bf16.mxu0 %v22602_v53  ;;  %v22639_v51 = vld [vmem:[#allocation2 + $0x6e8] ss:$48 sps:$4 sm:$0xff]   ;;  %v22644_v53 = vld [vmem:[#allocation2 + $0x8c] ss:$48 sps:$4 sm:$0xff]  }
 0x435   :  { %8382 = vmatprep.subr.bf16.mxu1 %v22605_v58  ;;  %v22647_v58 = vld [vmem:[#allocation2 + $0x68c] ss:$48 sps:$4 sm:$0xff]  }
 0x437   :  { %8342 = vmatpush2.bf16.msra.mxu0 %v22600_v59  ;;  %v22642_v59 = vld [vmem:[#allocation2 + $0x88] ss:$48 sps:$4 sm:$0xff]  }
 0x438   :  { %8383 = vmatpush2.bf16.msra.mxu1 %v22603_v14  ;;  %8393 = vmatprep.subr.bf16.mxu0 %v22608_v63  ;;  %v22645_v14 = vld [vmem:[#allocation2 + $0x688] ss:$48 sps:$4 sm:$0xff]   ;;  %v22650_v63 = vld [vmem:[#allocation2 + $0x2c] ss:$48 sps:$4 sm:$0xff]  }
 0x439   :  { %8434 = vmatprep.subr.bf16.mxu1 %v22611_v0  ;;  %v22653_v0 = vld [vmem:[#allocation2 + $0x62c] ss:$48 sps:$4 sm:$0xff]  }
 0x43a   :  { %v8099_v6 = vpop.f32.mrf.mxu0  ;;  %8344 = vmatmul.mubr.bf16.vlgmr.msra.gmra.mxu0 %v25118_v39 }
 0x43b   :  { %v8140_v7 = vpop.f32.mrf.mxu1  ;;  %8385 = vmatmul.mubr.bf16.vlgmr.msra.gmra.mxu1 %v25120_v41  ;;  %v8100_v10 = vadd.f32 %v8099_v6, %v25255_v18  ;;  %8394 = vmatpush1.bf16.msra.mxu0 %v22606_v1  ;;  %v22648_v1 = vld [vmem:[#allocation2 + $0x28] ss:$48 sps:$4 sm:$0xff]   ;;  %v22662_v6 = vld [vmem:[#allocation2 + $0x56c] ss:$48 sps:$4 sm:$0xff]  }
 0x43c   :  { %8435 = vmatpush1.bf16.msra.mxu1 %v22609_v19  ;;  %v8101_v15 = vpop.f32.mrf.mxu0  ;;  %8395 = vmatprep.subr.bf16.mxu0 %v22614_v2  ;;  %v22651_v19 = vld [vmem:[#allocation2 + $0x628] ss:$48 sps:$4 sm:$0xff]   ;;  %v22656_v2 = vld [vmem:[#allocation2 + $0x5cc] ss:$48 sps:$4 sm:$0xff]  }
 0x43d   :  { %v8142_v16 = vpop.f32.mrf.mxu1  ;;  %8436 = vmatprep.subr.bf16.mxu1 %v22617_v3  ;;  %v25265_v24 = vadd.f32 %v8140_v7, %v8100_v10  ;;  %v8102_v28 = vadd.f32 %v8101_v15, %v25260_v27  ;;  %8425 = vmatprep.mubr.bf16.mxu0 %v25055_v49  ;;  %v22624_v27 = vld [vmem:[#allocation2 + $0x1a8] ss:$48 sps:$4 sm:$0xff]   ;;  %v22632_v49 = vld [vmem:[#allocation2 + $0x14c] ss:$48 sps:$4 sm:$0xff]  }
 0x43e   :  { %8466 = vmatprep.mubr.bf16.mxu1 %v25060_v52  ;;  %v8103_v54 = vpop.f32.mrf.mxu0  ;;  %v22635_v52 = vld [vmem:[#allocation2 + $0x74c] ss:$48 sps:$4 sm:$0xff]   ;;  %v22660_v10 = vld [vmem:[#allocation2 + $0x568] ss:$48 sps:$4 sm:$0xff]  }
 0x43f   :  { %v8144_v18 = vpop.f32.mrf.mxu1  ;;  %v25270_v35 = vadd.f32 %v8142_v16, %v8102_v28  ;;  %8396 = vmatpush1.bf16.msra.mxu0 %v22612_v50  ;;  %v22659_v3 = vld [vmem:[#allocation2 + $0xbcc] ss:$48 sps:$4 sm:$0xff]   ;;  %v22654_v50 = vld [vmem:[#allocation2 + $0x5c8] ss:$48 sps:$4 sm:$0xff]  }
 0x440   :  { %8437 = vmatpush1.bf16.msra.mxu1 %v22615_v5  ;;  %v8104_v33 = vpop.f32.mrf.mxu0  ;;  %8397 = vmatprep.subr.bf16.mxu0 %v22620_v17  ;;  %v22657_v5 = vld [vmem:[#allocation2 + $0xbc8] ss:$48 sps:$4 sm:$0xff]   ;;  %v22665_v7 = vld [vmem:[#allocation2 + $0xb6c] ss:$48 sps:$4 sm:$0xff]  }
 0x441   :  { %v8145_v26 = vpop.f32.mrf.mxu1  ;;  %8438 = vmatprep.subr.bf16.mxu1 %v22623_v23  ;;  %v22663_v15 = vld [vmem:[#allocation2 + $0xb68] ss:$48 sps:$4 sm:$0xff]   ;;  %v22668_v16 = vld [vmem:[#allocation2 + $0x50c] ss:$48 sps:$4 sm:$0xff]  }
 0x442   :  { %v22671_v17 = vld [vmem:[#allocation2 + $0xb0c] ss:$48 sps:$4 sm:$0xff]   ;;  %v22666_v23 = vld [vmem:[#allocation2 + $0x508] ss:$48 sps:$4 sm:$0xff]  }
 0x443   :  { %8398 = vmatpush1.bf16.msra.mxu0 %v22618_v13  ;;  %v22669_v28 = vld [vmem:[#allocation2 + $0xb08] ss:$48 sps:$4 sm:$0xff]   ;;  %v22674_v13 = vld [vmem:[#allocation2 + $0x4ac] ss:$48 sps:$4 sm:$0xff]  }
 0x444   :  { %8439 = vmatpush1.bf16.msra.mxu1 %v22621_v30  ;;  %8399 = vmatprep.subr.bf16.mxu0 %v22626_v36  ;;  %v22677_v30 = vld [vmem:[#allocation2 + $0xaac] ss:$48 sps:$4 sm:$0xff]   ;;  %v22672_v54 = vld [vmem:[#allocation2 + $0x4a8] ss:$48 sps:$4 sm:$0xff]  }
 0x445   :  { %8440 = vmatprep.subr.bf16.mxu1 %v22629_v61  ;;  %v22675_v18 = vld [vmem:[#allocation2 + $0xaa8] ss:$48 sps:$4 sm:$0xff]   ;;  %v22680_v33 = vld [vmem:[#allocation2 + $0x44c] ss:$48 sps:$4 sm:$0xff]  }
 0x446   :  { %v22683_v26 = vld [vmem:[#allocation2 + $0xa4c] ss:$48 sps:$4 sm:$0xff]   ;;  %v22678_v36 = vld [vmem:[#allocation2 + $0x448] ss:$48 sps:$4 sm:$0xff]  }
 0x447   :  { %8400 = vmatpush1.bf16.msra.mxu0 %v22624_v27  ;;  %v22681_v61 = vld [vmem:[#allocation2 + $0xa48] ss:$48 sps:$4 sm:$0xff]   ;;  %v22686_v27 = vld [vmem:[#allocation2 + $0x3ec] ss:$48 sps:$4 sm:$0xff]  }
 0x448   :  { %8441 = vmatpush1.bf16.msra.mxu1 %v22627_v38  ;;  %8401 = vmatprep.subr.bf16.mxu0 %v22632_v49  ;;  %v22689_v38 = vld [vmem:[#allocation2 + $0x9ec] ss:$48 sps:$4 sm:$0xff]   ;;  %v22684_v49 = vld [vmem:[#allocation2 + $0x3e8] ss:$48 sps:$4 sm:$0xff]  }
 0x449   :  { %8442 = vmatprep.subr.bf16.mxu1 %v22635_v52  ;;  %v22687_v52 = vld [vmem:[#allocation2 + $0x9e8] ss:$48 sps:$4 sm:$0xff]  }
 0x44b   :  { %8402 = vmatpush1.bf16.msra.mxu0 %v22630_v55  ;;  %v22692_v55 = vld [vmem:[#allocation2 + $0x38c] ss:$48 sps:$4 sm:$0xff]  }
 0x44c   :  { %8443 = vmatpush1.bf16.msra.mxu1 %v22633_v44  ;;  %8403 = vmatprep.subr.bf16.mxu0 %v22638_v45  ;;  %v22695_v44 = vld [vmem:[#allocation2 + $0x98c] ss:$48 sps:$4 sm:$0xff]   ;;  %v22690_v45 = vld [vmem:[#allocation2 + $0x388] ss:$48 sps:$4 sm:$0xff]  }
 0x44d   :  { %8444 = vmatprep.subr.bf16.mxu1 %v22641_v47  ;;  %v22693_v47 = vld [vmem:[#allocation2 + $0x988] ss:$48 sps:$4 sm:$0xff]  }
 0x44f   :  { %8404 = vmatpush1.bf16.msra.mxu0 %v22636_v62  ;;  %v22698_v62 = vld [vmem:[#allocation2 + $0x32c] ss:$48 sps:$4 sm:$0xff]  }
 0x450   :  { %8445 = vmatpush1.bf16.msra.mxu1 %v22639_v51  ;;  %8405 = vmatprep.subr.bf16.mxu0 %v22644_v53  ;;  %v22701_v51 = vld [vmem:[#allocation2 + $0x92c] ss:$48 sps:$4 sm:$0xff]   ;;  %v22696_v53 = vld [vmem:[#allocation2 + $0x328] ss:$48 sps:$4 sm:$0xff]  }
 0x451   :  { %8446 = vmatprep.subr.bf16.mxu1 %v22647_v58  ;;  %v22699_v58 = vld [vmem:[#allocation2 + $0x928] ss:$48 sps:$4 sm:$0xff]  }
 0x453   :  { %8406 = vmatpush1.bf16.msra.mxu0 %v22642_v59  ;;  %v1340_v59 = vld [vmem:[#allocation4 + $0x8] sm:$0xf] }
 0x454   :  { %8447 = vmatpush1.bf16.msra.mxu1 %v22645_v14  ;;  %8407 = vmatprep.subr.bf16.mxu0 %v22650_v63  ;;  %v22704_v14 = vld [vmem:[#allocation2 + $0xecc] ss:$48 sps:$4 sm:$0xff]  }
 0x455   :  { %8448 = vmatprep.subr.bf16.mxu1 %v22653_v0  ;;  %v22707_v63 = vld [vmem:[#allocation2 + $0x14cc] ss:$48 sps:$4 sm:$0xff]   ;;  %v22702_v0 = vld [vmem:[#allocation2 + $0xec8] ss:$48 sps:$4 sm:$0xff]  }
 0x457   :  { %8408 = vmatpush1.bf16.msra.mxu0 %v22648_v1  ;;  %v22705_v1 = vld [vmem:[#allocation2 + $0x14c8] ss:$48 sps:$4 sm:$0xff]  }
 0x458   :  { %8449 = vmatpush1.bf16.msra.mxu1 %v22651_v19  ;;  %8409 = vmatprep.subr.bf16.mxu0 %v22656_v2  ;;  %v22710_v19 = vld [vmem:[#allocation2 + $0xe6c] ss:$48 sps:$4 sm:$0xff]  }
 0x459   :  { %8450 = vmatprep.subr.bf16.mxu1 %v22659_v3  ;;  %v22713_v2 = vld [vmem:[#allocation2 + $0x146c] ss:$48 sps:$4 sm:$0xff]   ;;  %v1378_v3 = vrot.slane %v1340_v59, %v25129_v57 }
 0x45b   :  { %8410 = vmatpush2.bf16.msra.mxu0 %v22654_v50  ;;  %v1382_v50 = vrot.slane %v1340_v59, %v25132_v60  ;;  %v22741_v59 = vld [vmem:[#allocation2 + $0x1288] ss:$48 sps:$4 sm:$0xff]  }
 0x45c   :  { %8451 = vmatpush2.bf16.msra.mxu1 %v22657_v5  ;;  %8411 = vmatprep.subr.bf16.mxu0 %v22662_v6  ;;  %v22708_v5 = vld [vmem:[#allocation2 + $0xe68] ss:$48 sps:$4 sm:$0xff]  }
 0x45d   :  { %8452 = vmatprep.subr.bf16.mxu1 %v22665_v7  ;;  %v22711_v6 = vld [vmem:[#allocation2 + $0x1468] ss:$48 sps:$4 sm:$0xff]  }
 0x45f   :  { %8412 = vmatpush2.bf16.msra.mxu0 %v22660_v10 }
 0x460   :  { %8453 = vmatpush2.bf16.msra.mxu1 %v22663_v15  ;;  %8413 = vmatprep.subr.bf16.mxu0 %v22668_v16  ;;  %v22716_v15 = vld [vmem:[#allocation2 + $0xe0c] ss:$48 sps:$4 sm:$0xff]  }
 0x461   :  { %8454 = vmatprep.subr.bf16.mxu1 %v22671_v17  ;;  %v22719_v16 = vld [vmem:[#allocation2 + $0x140c] ss:$48 sps:$4 sm:$0xff]  }
 0x463   :  { %8414 = vmatpush2.bf16.msra.mxu0 %v22666_v23 }
 0x464   :  { %8455 = vmatpush2.bf16.msra.mxu1 %v22669_v28  ;;  %8415 = vmatprep.subr.bf16.mxu0 %v22674_v13 }
 0x465   :  { %8456 = vmatprep.subr.bf16.mxu1 %v22677_v30 }
 0x467   :  { %8416 = vmatpush2.bf16.msra.mxu0 %v22672_v54  ;;  %v22714_v54 = vld [vmem:[#allocation2 + $0xe08] ss:$48 sps:$4 sm:$0xff]  }
 0x468   :  { %8457 = vmatpush2.bf16.msra.mxu1 %v22675_v18  ;;  %8417 = vmatprep.subr.bf16.mxu0 %v22680_v33  ;;  %v22717_v18 = vld [vmem:[#allocation2 + $0x1408] ss:$48 sps:$4 sm:$0xff]   ;;  %v22722_v33 = vld [vmem:[#allocation2 + $0xdac] ss:$48 sps:$4 sm:$0xff]  }
 0x469   :  { %8458 = vmatprep.subr.bf16.mxu1 %v22683_v26  ;;  %v22725_v26 = vld [vmem:[#allocation2 + $0x13ac] ss:$48 sps:$4 sm:$0xff]  }
 0x46b   :  { %8418 = vmatpush2.bf16.msra.mxu0 %v22678_v36 }
 0x46c   :  { %8459 = vmatpush2.bf16.msra.mxu1 %v22681_v61  ;;  %8419 = vmatprep.subr.bf16.mxu0 %v22686_v27 }
 0x46d   :  { %8460 = vmatprep.subr.bf16.mxu1 %v22689_v38  ;;  %v22720_v38 = vld [vmem:[#allocation2 + $0xda8] ss:$48 sps:$4 sm:$0xff]  }
 0x46f   :  { %8420 = vmatpush2.bf16.msra.mxu0 %v22684_v49  ;;  %v22723_v49 = vld [vmem:[#allocation2 + $0x13a8] ss:$48 sps:$4 sm:$0xff]  }
 0x470   :  { %8461 = vmatpush2.bf16.msra.mxu1 %v22687_v52  ;;  %8421 = vmatprep.subr.bf16.mxu0 %v22692_v55  ;;  %v22728_v52 = vld [vmem:[#allocation2 + $0xd4c] ss:$48 sps:$4 sm:$0xff]  }
 0x471   :  { %8462 = vmatprep.subr.bf16.mxu1 %v22695_v44  ;;  %v22731_v55 = vld [vmem:[#allocation2 + $0x134c] ss:$48 sps:$4 sm:$0xff]  }
 0x472   :  { %v22734_v44 = vld [vmem:[#allocation2 + $0xcec] ss:$48 sps:$4 sm:$0xff]  }
 0x473   :  { %8422 = vmatpush2.bf16.msra.mxu0 %v22690_v45  ;;  %v22737_v45 = vld [vmem:[#allocation2 + $0x12ec] ss:$48 sps:$4 sm:$0xff]  }
 0x474   :  { %8463 = vmatpush2.bf16.msra.mxu1 %v22693_v47  ;;  %8423 = vmatprep.subr.bf16.mxu0 %v22698_v62  ;;  %v22732_v47 = vld [vmem:[#allocation2 + $0xce8] ss:$48 sps:$4 sm:$0xff]  }
 0x475   :  { %8464 = vmatprep.subr.bf16.mxu1 %v22701_v51  ;;  %v22735_v62 = vld [vmem:[#allocation2 + $0x12e8] ss:$48 sps:$4 sm:$0xff]   ;;  %v22740_v51 = vld [vmem:[#allocation2 + $0xc8c] ss:$48 sps:$4 sm:$0xff]  }
 0x477   :  { %8424 = vmatpush2.bf16.msra.mxu0 %v22696_v53  ;;  %v22743_v53 = vld [vmem:[#allocation2 + $0x128c] ss:$48 sps:$4 sm:$0xff]  }
 0x478   :  { %8465 = vmatpush2.bf16.msra.mxu1 %v22699_v58  ;;  %8475 = vmatprep.subr.bf16.mxu0 %v22704_v14  ;;  %v22738_v58 = vld [vmem:[#allocation2 + $0xc88] ss:$48 sps:$4 sm:$0xff]   ;;  %v22746_v14 = vld [vmem:[#allocation2 + $0xc2c] ss:$48 sps:$4 sm:$0xff]  }
 0x479   :  { %8516 = vmatprep.subr.bf16.mxu1 %v22707_v63  ;;  %v22749_v63 = vld [vmem:[#allocation2 + $0x122c] ss:$48 sps:$4 sm:$0xff]  }
 0x47a   :  { %v8181_v7 = vpop.f32.mrf.mxu0  ;;  %8426 = vmatmul.mubr.bf16.vlgmr.msra.gmra.mxu0 %v25070_v8 }
 0x47b   :  { %v8222_v10 = vpop.f32.mrf.mxu1  ;;  %8467 = vmatmul.mubr.bf16.vlgmr.msra.gmra.mxu1 %v25072_v9  ;;  %v8182_v17 = vadd.f32 %v8181_v7, %v1378_v3  ;;  %8476 = vmatpush1.bf16.msra.mxu0 %v22702_v0  ;;  %v22744_v0 = vld [vmem:[#allocation2 + $0xc28] ss:$48 sps:$4 sm:$0xff]  }
 0x47c   :  { %8517 = vmatpush1.bf16.msra.mxu1 %v22705_v1  ;;  %v8183_v23 = vpop.f32.mrf.mxu0  ;;  %8477 = vmatprep.subr.bf16.mxu0 %v22710_v19  ;;  %v22747_v1 = vld [vmem:[#allocation2 + $0x1228] ss:$48 sps:$4 sm:$0xff]   ;;  %v22752_v19 = vld [vmem:[#allocation2 + $0x11cc] ss:$48 sps:$4 sm:$0xff]  }
 0x47d   :  { %v8224_v28 = vpop.f32.mrf.mxu1  ;;  %8518 = vmatprep.subr.bf16.mxu1 %v22713_v2  ;;  %v25276_v13 = vadd.f32 %v8222_v10, %v8182_v17  ;;  %v8184_v30 = vadd.f32 %v8183_v23, %v1382_v50  ;;  %8507 = vmatprep.mubr.bf16.mxu0 %v25079_v37  ;;  %v22726_v37 = vld [vmem:[#allocation2 + $0xd48] ss:$48 sps:$4 sm:$0xff]   ;;  %v22755_v2 = vld [vmem:[#allocation2 + $0x17cc] ss:$48 sps:$4 sm:$0xff]  }
 0x47e   :  { %8548 = vmatprep.mubr.bf16.mxu1 %v25084_v40  ;;  %v8185_v8 = vpop.f32.mrf.mxu0  ;;  %v22729_v40 = vld [vmem:[#allocation2 + $0x1348] ss:$48 sps:$4 sm:$0xff]  }
 0x47f   :  { %v8226_v9 = vpop.f32.mrf.mxu1  ;;  %v25280_v36 = vadd.f32 %v8224_v28, %v8184_v30  ;;  %8478 = vmatpush1.bf16.msra.mxu0 %v22708_v5  ;;  %v22750_v3 = vld [vmem:[#allocation2 + $0x11c8] ss:$48 sps:$4 sm:$0xff]   ;;  %v22758_v5 = vld [vmem:[#allocation2 + $0x116c] ss:$48 sps:$4 sm:$0xff]  }
 0x480   :  { %8519 = vmatpush1.bf16.msra.mxu1 %v22711_v6  ;;  %v8186_v61 = vpop.f32.mrf.mxu0  ;;  %8479 = vmatprep.subr.bf16.mxu0 %v22716_v15  ;;  %v22753_v50 = vld [vmem:[#allocation2 + $0x17c8] ss:$48 sps:$4 sm:$0xff]   ;;  %v22761_v6 = vld [vmem:[#allocation2 + $0x176c] ss:$48 sps:$4 sm:$0xff]  }
 0x481   :  { %v8227_v27 = vpop.f32.mrf.mxu1  ;;  %8520 = vmatprep.subr.bf16.mxu1 %v22719_v16  ;;  %v22756_v7 = vld [vmem:[#allocation2 + $0x1168] ss:$48 sps:$4 sm:$0xff]   ;;  %v22764_v15 = vld [vmem:[#allocation2 + $0x110c] ss:$48 sps:$4 sm:$0xff]  }
 0x482   :  { %v22759_v10 = vld [vmem:[#allocation2 + $0x1768] ss:$48 sps:$4 sm:$0xff]   ;;  %v22767_v16 = vld [vmem:[#allocation2 + $0x170c] ss:$48 sps:$4 sm:$0xff]  }
 0x483   :  { %8480 = vmatpush1.bf16.msra.mxu0 %v22714_v54  ;;  %v22762_v17 = vld [vmem:[#allocation2 + $0x1108] ss:$48 sps:$4 sm:$0xff]   ;;  %v22770_v28 = vld [vmem:[#allocation2 + $0x10ac] ss:$48 sps:$4 sm:$0xff]  }
 0x484   :  { %8521 = vmatpush1.bf16.msra.mxu1 %v22717_v18  ;;  %8481 = vmatprep.subr.bf16.mxu0 %v22722_v33  ;;  %v22765_v23 = vld [vmem:[#allocation2 + $0x1708] ss:$48 sps:$4 sm:$0xff]   ;;  %v22773_v30 = vld [vmem:[#allocation2 + $0x16ac] ss:$48 sps:$4 sm:$0xff]  }
 0x485   :  { %8522 = vmatprep.subr.bf16.mxu1 %v22725_v26  ;;  %v22768_v54 = vld [vmem:[#allocation2 + $0x10a8] ss:$48 sps:$4 sm:$0xff]   ;;  %v22776_v8 = vld [vmem:[#allocation2 + $0x104c] ss:$48 sps:$4 sm:$0xff]  }
 0x486   :  { %v22771_v18 = vld [vmem:[#allocation2 + $0x16a8] ss:$48 sps:$4 sm:$0xff]   ;;  %v22779_v9 = vld [vmem:[#allocation2 + $0x164c] ss:$48 sps:$4 sm:$0xff]  }
 0x487   :  { %8482 = vmatpush1.bf16.msra.mxu0 %v22720_v38  ;;  %v22774_v33 = vld [vmem:[#allocation2 + $0x1048] ss:$48 sps:$4 sm:$0xff]   ;;  %v22782_v61 = vld [vmem:[#allocation2 + $0xfec] ss:$48 sps:$4 sm:$0xff]  }
 0x488   :  { %8523 = vmatpush1.bf16.msra.mxu1 %v22723_v49  ;;  %8483 = vmatprep.subr.bf16.mxu0 %v22728_v52  ;;  %v22777_v26 = vld [vmem:[#allocation2 + $0x1648] ss:$48 sps:$4 sm:$0xff]   ;;  %v22785_v27 = vld [vmem:[#allocation2 + $0x15ec] ss:$48 sps:$4 sm:$0xff]  }
 0x489   :  { %8524 = vmatprep.subr.bf16.mxu1 %v22731_v55  ;;  %v22780_v38 = vld [vmem:[#allocation2 + $0xfe8] ss:$48 sps:$4 sm:$0xff]   ;;  %v22788_v52 = vld [vmem:[#allocation2 + $0xf8c] ss:$48 sps:$4 sm:$0xff]  }
 0x48a   :  { %v22783_v49 = vld [vmem:[#allocation2 + $0x15e8] ss:$48 sps:$4 sm:$0xff]   ;;  %v22791_v55 = vld [vmem:[#allocation2 + $0x158c] ss:$48 sps:$4 sm:$0xff]  }
 0x48b   :  { %8484 = vmatpush1.bf16.msra.mxu0 %v22726_v37  ;;  %v22786_v37 = vld [vmem:[#allocation2 + $0xf88] ss:$48 sps:$4 sm:$0xff]  }
 0x48c   :  { %8525 = vmatpush1.bf16.msra.mxu1 %v22729_v40  ;;  %8485 = vmatprep.subr.bf16.mxu0 %v22734_v44  ;;  %v22789_v40 = vld [vmem:[#allocation2 + $0x1588] ss:$48 sps:$4 sm:$0xff]   ;;  %v22794_v44 = vld [vmem:[#allocation2 + $0xf2c] ss:$48 sps:$4 sm:$0xff]  }
 0x48d   :  { %8526 = vmatprep.subr.bf16.mxu1 %v22737_v45  ;;  %v22797_v45 = vld [vmem:[#allocation2 + $0x152c] ss:$48 sps:$4 sm:$0xff]  }
 0x48f   :  { %8486 = vmatpush1.bf16.msra.mxu0 %v22732_v47  ;;  %v22792_v47 = vld [vmem:[#allocation2 + $0xf28] ss:$48 sps:$4 sm:$0xff]  }
 0x490   :  { %8527 = vmatpush1.bf16.msra.mxu1 %v22735_v62  ;;  %8487 = vmatprep.subr.bf16.mxu0 %v22740_v51  ;;  %v22795_v62 = vld [vmem:[#allocation2 + $0x1528] ss:$48 sps:$4 sm:$0xff]   ;;  %v22800_v51 = vld [vmem:[#allocation2 + $0x1acc] ss:$48 sps:$4 sm:$0xff]  }
 0x491   :  { %8528 = vmatprep.subr.bf16.mxu1 %v22743_v53  ;;  %v22803_v53 = vld [vmem:[#allocation2 + $0x20cc] ss:$48 sps:$4 sm:$0xff]  }
 0x493   :  { %8488 = vmatpush1.bf16.msra.mxu0 %v22738_v58  ;;  %v22798_v58 = vld [vmem:[#allocation2 + $0x1ac8] ss:$48 sps:$4 sm:$0xff]  }
 0x494   :  { %8529 = vmatpush1.bf16.msra.mxu1 %v22741_v59  ;;  %8489 = vmatprep.subr.bf16.mxu0 %v22746_v14  ;;  %v22801_v59 = vld [vmem:[#allocation2 + $0x20c8] ss:$48 sps:$4 sm:$0xff]   ;;  %v22806_v14 = vld [vmem:[#allocation2 + $0x1a6c] ss:$48 sps:$4 sm:$0xff]  }
 0x495   :  { %8530 = vmatprep.subr.bf16.mxu1 %v22749_v63  ;;  %v22809_v63 = vld [vmem:[#allocation2 + $0x206c] ss:$48 sps:$4 sm:$0xff]  }
 0x497   :  { %8490 = vmatpush1.bf16.msra.mxu0 %v22744_v0  ;;  %v22804_v0 = vld [vmem:[#allocation2 + $0x1a68] ss:$48 sps:$4 sm:$0xff]  }
 0x498   :  { %8531 = vmatpush1.bf16.msra.mxu1 %v22747_v1  ;;  %8491 = vmatprep.subr.bf16.mxu0 %v22752_v19  ;;  %v22807_v1 = vld [vmem:[#allocation2 + $0x2068] ss:$48 sps:$4 sm:$0xff]  }
 0x499   :  { %8532 = vmatprep.subr.bf16.mxu1 %v22755_v2 }
 0x49b   :  { %8492 = vmatpush2.bf16.msra.mxu0 %v22750_v3  ;;  %v22812_v3 = vld [vmem:[#allocation2 + $0x1a0c] ss:$48 sps:$4 sm:$0xff]  }
 0x49c   :  { %8533 = vmatpush2.bf16.msra.mxu1 %v22753_v50  ;;  %8493 = vmatprep.subr.bf16.mxu0 %v22758_v5  ;;  %v22815_v50 = vld [vmem:[#allocation2 + $0x200c] ss:$48 sps:$4 sm:$0xff]  }
 0x49d   :  { %8534 = vmatprep.subr.bf16.mxu1 %v22761_v6 }
 0x49f   :  { %8494 = vmatpush2.bf16.msra.mxu0 %v22756_v7 }
 0x4a0   :  { %8535 = vmatpush2.bf16.msra.mxu1 %v22759_v10  ;;  %8495 = vmatprep.subr.bf16.mxu0 %v22764_v15 }
 0x4a1   :  { %8536 = vmatprep.subr.bf16.mxu1 %v22767_v16  ;;  %v22810_v16 = vld [vmem:[#allocation2 + $0x1a08] ss:$48 sps:$4 sm:$0xff]  }
 0x4a3   :  { %8496 = vmatpush2.bf16.msra.mxu0 %v22762_v17  ;;  %v22813_v17 = vld [vmem:[#allocation2 + $0x2008] ss:$48 sps:$4 sm:$0xff]  }
 0x4a4   :  { %8537 = vmatpush2.bf16.msra.mxu1 %v22765_v23  ;;  %8497 = vmatprep.subr.bf16.mxu0 %v22770_v28  ;;  %v22818_v23 = vld [vmem:[#allocation2 + $0x19ac] ss:$48 sps:$4 sm:$0xff]  }
 0x4a5   :  { %8538 = vmatprep.subr.bf16.mxu1 %v22773_v30 }
 0x4a7   :  { %8498 = vmatpush2.bf16.msra.mxu0 %v22768_v54 }
 0x4a8   :  { %8539 = vmatpush2.bf16.msra.mxu1 %v22771_v18  ;;  %8499 = vmatprep.subr.bf16.mxu0 %v22776_v8  ;;  %v22816_v18 = vld [vmem:[#allocation2 + $0x19a8] ss:$48 sps:$4 sm:$0xff]   ;;  %v22824_v8 = vld [vmem:[#allocation2 + $0x194c] ss:$48 sps:$4 sm:$0xff]  }
 0x4a9   :  { %8540 = vmatprep.subr.bf16.mxu1 %v22779_v9  ;;  %v22827_v9 = vld [vmem:[#allocation2 + $0x1f4c] ss:$48 sps:$4 sm:$0xff]  }
 0x4ab   :  { %8500 = vmatpush2.bf16.msra.mxu0 %v22774_v33  ;;  %v22830_v33 = vld [vmem:[#allocation2 + $0x18ec] ss:$48 sps:$4 sm:$0xff]  }
 0x4ac   :  { %8541 = vmatpush2.bf16.msra.mxu1 %v22777_v26  ;;  %8501 = vmatprep.subr.bf16.mxu0 %v22782_v61  ;;  %v22833_v26 = vld [vmem:[#allocation2 + $0x1eec] ss:$48 sps:$4 sm:$0xff]   ;;  %v22828_v61 = vld [vmem:[#allocation2 + $0x18e8] ss:$48 sps:$4 sm:$0xff]  }
 0x4ad   :  { %8542 = vmatprep.subr.bf16.mxu1 %v22785_v27  ;;  %v22831_v27 = vld [vmem:[#allocation2 + $0x1ee8] ss:$48 sps:$4 sm:$0xff]  }
 0x4af   :  { %8502 = vmatpush2.bf16.msra.mxu0 %v22780_v38  ;;  %v22836_v38 = vld [vmem:[#allocation2 + $0x188c] ss:$48 sps:$4 sm:$0xff]  }
 0x4b0   :  { %8543 = vmatpush2.bf16.msra.mxu1 %v22783_v49  ;;  %8503 = vmatprep.subr.bf16.mxu0 %v22788_v52  ;;  %v22839_v49 = vld [vmem:[#allocation2 + $0x1e8c] ss:$48 sps:$4 sm:$0xff]   ;;  %v22834_v52 = vld [vmem:[#allocation2 + $0x1888] ss:$48 sps:$4 sm:$0xff]  }
 0x4b1   :  { %8544 = vmatprep.subr.bf16.mxu1 %v22791_v55  ;;  %v22837_v55 = vld [vmem:[#allocation2 + $0x1e88] ss:$48 sps:$4 sm:$0xff]  }
 0x4b3   :  { %8504 = vmatpush2.bf16.msra.mxu0 %v22786_v37  ;;  %v22842_v37 = vld [vmem:[#allocation2 + $0x182c] ss:$48 sps:$4 sm:$0xff]  }
 0x4b4   :  { %8545 = vmatpush2.bf16.msra.mxu1 %v22789_v40  ;;  %8505 = vmatprep.subr.bf16.mxu0 %v22794_v44  ;;  %v22845_v40 = vld [vmem:[#allocation2 + $0x1e2c] ss:$48 sps:$4 sm:$0xff]   ;;  %v22840_v44 = vld [vmem:[#allocation2 + $0x1828] ss:$48 sps:$4 sm:$0xff]  }
 0x4b5   :  { %8546 = vmatprep.subr.bf16.mxu1 %v22797_v45  ;;  %v22843_v45 = vld [vmem:[#allocation2 + $0x1e28] ss:$48 sps:$4 sm:$0xff]  }
 0x4b7   :  { %8506 = vmatpush2.bf16.msra.mxu0 %v22792_v47  ;;  %v22848_v47 = vld [vmem:[#allocation2 + $0x1dcc] ss:$48 sps:$4 sm:$0xff]  }
 0x4b8   :  { %8547 = vmatpush2.bf16.msra.mxu1 %v22795_v62  ;;  %8557 = vmatprep.subr.bf16.mxu0 %v22800_v51  ;;  %v22851_v62 = vld [vmem:[#allocation2 + $0x23cc] ss:$48 sps:$4 sm:$0xff]   ;;  %v22846_v51 = vld [vmem:[#allocation2 + $0x1dc8] ss:$48 sps:$4 sm:$0xff]  }
 0x4b9   :  { %8598 = vmatprep.subr.bf16.mxu1 %v22803_v53  ;;  %v22849_v53 = vld [vmem:[#allocation2 + $0x23c8] ss:$48 sps:$4 sm:$0xff]  }
 0x4ba   :  { %v8263_v19 = vpop.f32.mrf.mxu0  ;;  %8508 = vmatmul.mubr.bf16.vlgmr.msra.gmra.mxu0 %v25094_v20 }
 0x4bb   :  { %v8304_v2 = vpop.f32.mrf.mxu1  ;;  %8549 = vmatmul.mubr.bf16.vlgmr.msra.gmra.mxu1 %v25096_v21  ;;  %v8264_v5 = vadd.f32 %v8263_v19, %v25276_v13  ;;  %8558 = vmatpush1.bf16.msra.mxu0 %v22798_v58  ;;  %v22821_v13 = vld [vmem:[#allocation2 + $0x1fac] ss:$48 sps:$4 sm:$0xff]   ;;  %v22858_v19 = vld [vmem:[#allocation2 + $0x1d08] ss:$48 sps:$4 sm:$0xff]  }
 0x4bc   :  { %8599 = vmatpush1.bf16.msra.mxu1 %v22801_v59  ;;  %v8265_v6 = vpop.f32.mrf.mxu0  ;;  %8559 = vmatprep.subr.bf16.mxu0 %v22806_v14  ;;  %v22854_v58 = vld [vmem:[#allocation2 + $0x1d6c] ss:$48 sps:$4 sm:$0xff]   ;;  %v22852_v14 = vld [vmem:[#allocation2 + $0x1d68] ss:$48 sps:$4 sm:$0xff]  }
 0x4bd   :  { %v8306_v7 = vpop.f32.mrf.mxu1  ;;  %8600 = vmatprep.subr.bf16.mxu1 %v22809_v63  ;;  %v25285_v10 = vadd.f32 %v8304_v2, %v8264_v5  ;;  %v8266_v15 = vadd.f32 %v8265_v6, %v25280_v36  ;;  %8589 = vmatprep.mubr.bf16.mxu0 %v25103_v29  ;;  %v22819_v36 = vld [vmem:[#allocation2 + $0x1fa8] ss:$48 sps:$4 sm:$0xff]   ;;  %v22857_v59 = vld [vmem:[#allocation2 + $0x236c] ss:$48 sps:$4 sm:$0xff]  }
 0x4be   :  { %8630 = vmatprep.mubr.bf16.mxu1 %v25108_v32  ;;  %v8267_v20 = vpop.f32.mrf.mxu0  ;;  %v22822_v29 = vld [vmem:[#allocation2 + $0x1948] ss:$48 sps:$4 sm:$0xff]  }
 0x4bf   :  { %v8308_v21 = vpop.f32.mrf.mxu1  ;;  %v25290_v28 = vadd.f32 %v8306_v7, %v8266_v15  ;;  %8560 = vmatpush1.bf16.msra.mxu0 %v22804_v0  ;;  %v22825_v32 = vld [vmem:[#allocation2 + $0x1f48] ss:$48 sps:$4 sm:$0xff]   ;;  %v22860_v0 = vld [vmem:[#allocation2 + $0x1d0c] ss:$48 sps:$4 sm:$0xff]  }
 0x4c0   :  { %8601 = vmatpush1.bf16.msra.mxu1 %v22807_v1  ;;  %v8268_v30 = vpop.f32.mrf.mxu0  ;;  %8561 = vmatprep.subr.bf16.mxu0 %v22812_v3  ;;  %v22855_v63 = vld [vmem:[#allocation2 + $0x2368] ss:$48 sps:$4 sm:$0xff]   ;;  %v22863_v1 = vld [vmem:[#allocation2 + $0x230c] ss:$48 sps:$4 sm:$0xff]  }
 0x4c1   :  { %v8309_v54 = vpop.f32.mrf.mxu1  ;;  %8602 = vmatprep.subr.bf16.mxu1 %v22815_v50  ;;  %v22861_v2 = vld [vmem:[#allocation2 + $0x2308] ss:$48 sps:$4 sm:$0xff]   ;;  %v22866_v3 = vld [vmem:[#allocation2 + $0x1cac] ss:$48 sps:$4 sm:$0xff]  }
 0x4c2   :  { %v22869_v50 = vld [vmem:[#allocation2 + $0x22ac] ss:$48 sps:$4 sm:$0xff]   ;;  %v22864_v5 = vld [vmem:[#allocation2 + $0x1ca8] ss:$48 sps:$4 sm:$0xff]  }
 0x4c3   :  { %8562 = vmatpush1.bf16.msra.mxu0 %v22810_v16  ;;  %v22867_v6 = vld [vmem:[#allocation2 + $0x22a8] ss:$48 sps:$4 sm:$0xff]   ;;  %v22872_v7 = vld [vmem:[#allocation2 + $0x1c4c] ss:$48 sps:$4 sm:$0xff]  }
 0x4c4   :  { %8603 = vmatpush1.bf16.msra.mxu1 %v22813_v17  ;;  %8563 = vmatprep.subr.bf16.mxu0 %v22818_v23  ;;  %v22875_v15 = vld [vmem:[#allocation2 + $0x224c] ss:$48 sps:$4 sm:$0xff]   ;;  %v22870_v16 = vld [vmem:[#allocation2 + $0x1c48] ss:$48 sps:$4 sm:$0xff]  }
 0x4c5   :  { %8604 = vmatprep.subr.bf16.mxu1 %v22821_v13  ;;  %v22873_v17 = vld [vmem:[#allocation2 + $0x2248] ss:$48 sps:$4 sm:$0xff]   ;;  %v22878_v20 = vld [vmem:[#allocation2 + $0x1bec] ss:$48 sps:$4 sm:$0xff]  }
 0x4c6   :  { %v22881_v21 = vld [vmem:[#allocation2 + $0x21ec] ss:$48 sps:$4 sm:$0xff]   ;;  %v22876_v23 = vld [vmem:[#allocation2 + $0x1be8] ss:$48 sps:$4 sm:$0xff]  }
 0x4c7   :  { %8564 = vmatpush1.bf16.msra.mxu0 %v22816_v18  ;;  %v22879_v13 = vld [vmem:[#allocation2 + $0x21e8] ss:$48 sps:$4 sm:$0xff]   ;;  %v22884_v30 = vld [vmem:[#allocation2 + $0x1b8c] ss:$48 sps:$4 sm:$0xff]  }
 0x4c8   :  { %8605 = vmatpush1.bf16.msra.mxu1 %v22819_v36  ;;  %8565 = vmatprep.subr.bf16.mxu0 %v22824_v8  ;;  %v22887_v54 = vld [vmem:[#allocation2 + $0x218c] ss:$48 sps:$4 sm:$0xff]   ;;  %v22882_v18 = vld [vmem:[#allocation2 + $0x1b88] ss:$48 sps:$4 sm:$0xff]  }
 0x4c9   :  { %8606 = vmatprep.subr.bf16.mxu1 %v22827_v9  ;;  %v22885_v36 = vld [vmem:[#allocation2 + $0x2188] ss:$48 sps:$4 sm:$0xff]   ;;  %v22890_v8 = vld [vmem:[#allocation2 + $0x1b2c] ss:$48 sps:$4 sm:$0xff]  }
 0x4ca   :  { %v22893_v9 = vld [vmem:[#allocation2 + $0x212c] ss:$48 sps:$4 sm:$0xff]  }
 0x4cb   :  { %8566 = vmatpush1.bf16.msra.mxu0 %v22822_v29  ;;  %v22888_v29 = vld [vmem:[#allocation2 + $0x1b28] ss:$48 sps:$4 sm:$0xff]  }
 0x4cc   :  { %8607 = vmatpush1.bf16.msra.mxu1 %v22825_v32  ;;  %8567 = vmatprep.subr.bf16.mxu0 %v22830_v33  ;;  %v22891_v32 = vld [vmem:[#allocation2 + $0x2128] ss:$48 sps:$4 sm:$0xff]  }
 0x4cd   :  { %8608 = vmatprep.subr.bf16.mxu1 %v22833_v26 }
 0x4cf   :  { %8568 = vmatpush1.bf16.msra.mxu0 %v22828_v61 }
 0x4d0   :  { %8609 = vmatpush1.bf16.msra.mxu1 %v22831_v27  ;;  %8569 = vmatprep.subr.bf16.mxu0 %v22836_v38 }
 0x4d1   :  { %8610 = vmatprep.subr.bf16.mxu1 %v22839_v49 }
 0x4d3   :  { %8570 = vmatpush1.bf16.msra.mxu0 %v22834_v52 }
 0x4d4   :  { %8611 = vmatpush1.bf16.msra.mxu1 %v22837_v55  ;;  %8571 = vmatprep.subr.bf16.mxu0 %v22842_v37 }
 0x4d5   :  { %8612 = vmatprep.subr.bf16.mxu1 %v22845_v40 }
 0x4d7   :  { %8572 = vmatpush1.bf16.msra.mxu0 %v22840_v44 }
 0x4d8   :  { %8613 = vmatpush1.bf16.msra.mxu1 %v22843_v45  ;;  %8573 = vmatprep.subr.bf16.mxu0 %v22848_v47  ;;  %v24729_v47 = vld [vmem:[#allocation4 + $0x8] sm:$0xf] }
 0x4d9   :  { %8614 = vmatprep.subr.bf16.mxu1 %v22851_v62  ;;  %v1386_v62 = vrot.slane %v24729_v47, %v25165_v43 }
 0x4db   :  { %8574 = vmatpush2.bf16.msra.mxu0 %v22846_v51 }
 0x4dc   :  { %8615 = vmatpush2.bf16.msra.mxu1 %v22849_v53  ;;  %8575 = vmatprep.subr.bf16.mxu0 %v22854_v58 }
 0x4dd   :  { %8616 = vmatprep.subr.bf16.mxu1 %v22857_v59 }
 0x4df   :  { %8576 = vmatpush2.bf16.msra.mxu0 %v22852_v14 }
 0x4e0   :  { %8617 = vmatpush2.bf16.msra.mxu1 %v22855_v63  ;;  %8577 = vmatprep.subr.bf16.mxu0 %v22860_v0 }
 0x4e1   :  { %8618 = vmatprep.subr.bf16.mxu1 %v22863_v1 }
 0x4e3   :  { %8578 = vmatpush2.bf16.msra.mxu0 %v22858_v19 }
 0x4e4   :  { %8619 = vmatpush2.bf16.msra.mxu1 %v22861_v2  ;;  %8579 = vmatprep.subr.bf16.mxu0 %v22866_v3  ;;  %v22894_v2 = vld [vmem:[#allocation9 + $0x2a0] ss:$48 sps:$4 sm:$0xff]   ;;  %v22896_v3 = vld [vmem:[#allocation9 + $0x2a4] ss:$48 sps:$4 sm:$0xff]  }
 0x4e5   :  { %8620 = vmatprep.subr.bf16.mxu1 %v22869_v50  ;;  %v22897_v50 = vld [vmem:[#allocation9 + $0x8a0] ss:$48 sps:$4 sm:$0xff]  }
 0x4e7   :  { %8580 = vmatpush2.bf16.msra.mxu0 %v22864_v5  ;;  %v22899_v5 = vld [vmem:[#allocation9 + $0x8a4] ss:$48 sps:$4 sm:$0xff]  }
 0x4e8   :  { %8621 = vmatpush2.bf16.msra.mxu1 %v22867_v6  ;;  %8581 = vmatprep.subr.bf16.mxu0 %v22872_v7  ;;  %v22902_v6 = vld [vmem:[#allocation9 + $0x244] ss:$48 sps:$4 sm:$0xff]  }
 0x4e9   :  { %8622 = vmatprep.subr.bf16.mxu1 %v22875_v15  ;;  %v22905_v7 = vld [vmem:[#allocation9 + $0x844] ss:$48 sps:$4 sm:$0xff]   ;;  %v22900_v15 = vld [vmem:[#allocation9 + $0x240] ss:$48 sps:$4 sm:$0xff]  }
 0x4eb   :  { %8582 = vmatpush2.bf16.msra.mxu0 %v22870_v16  ;;  %v22903_v16 = vld [vmem:[#allocation9 + $0x840] ss:$48 sps:$4 sm:$0xff]  }
 0x4ec   :  { %8623 = vmatpush2.bf16.msra.mxu1 %v22873_v17  ;;  %8583 = vmatprep.subr.bf16.mxu0 %v22878_v20  ;;  %v22908_v17 = vld [vmem:[#allocation9 + $0x1e4] ss:$48 sps:$4 sm:$0xff]  }
 0x4ed   :  { %8624 = vmatprep.subr.bf16.mxu1 %v22881_v21  ;;  %v22911_v20 = vld [vmem:[#allocation9 + $0x7e4] ss:$48 sps:$4 sm:$0xff]   ;;  %v22906_v21 = vld [vmem:[#allocation9 + $0x1e0] ss:$48 sps:$4 sm:$0xff]  }
 0x4ef   :  { %8584 = vmatpush2.bf16.msra.mxu0 %v22876_v23  ;;  %v22909_v23 = vld [vmem:[#allocation9 + $0x7e0] ss:$48 sps:$4 sm:$0xff]  }
 0x4f0   :  { %8625 = vmatpush2.bf16.msra.mxu1 %v22879_v13  ;;  %8585 = vmatprep.subr.bf16.mxu0 %v22884_v30  ;;  %v22914_v13 = vld [vmem:[#allocation9 + $0x184] ss:$48 sps:$4 sm:$0xff]  }
 0x4f1   :  { %8626 = vmatprep.subr.bf16.mxu1 %v22887_v54  ;;  %v22917_v30 = vld [vmem:[#allocation9 + $0x784] ss:$48 sps:$4 sm:$0xff]   ;;  %v22912_v54 = vld [vmem:[#allocation9 + $0x180] ss:$48 sps:$4 sm:$0xff]  }
 0x4f3   :  { %8586 = vmatpush2.bf16.msra.mxu0 %v22882_v18  ;;  %v22915_v18 = vld [vmem:[#allocation9 + $0x780] ss:$48 sps:$4 sm:$0xff]  }
 0x4f4   :  { %8627 = vmatpush2.bf16.msra.mxu1 %v22885_v36  ;;  %8587 = vmatprep.subr.bf16.mxu0 %v22890_v8  ;;  %v22920_v36 = vld [vmem:[#allocation9 + $0x124] ss:$48 sps:$4 sm:$0xff]  }
 0x4f5   :  { %8628 = vmatprep.subr.bf16.mxu1 %v22893_v9  ;;  %v22923_v8 = vld [vmem:[#allocation9 + $0x724] ss:$48 sps:$4 sm:$0xff]   ;;  %v22918_v9 = vld [vmem:[#allocation9 + $0x120] ss:$48 sps:$4 sm:$0xff]  }
 0x4f7   :  { %8588 = vmatpush2.bf16.msra.mxu0 %v22888_v29  ;;  %v22921_v29 = vld [vmem:[#allocation9 + $0x720] ss:$48 sps:$4 sm:$0xff]  }
 0x4f8   :  { %8629 = vmatpush2.bf16.msra.mxu1 %v22891_v32  ;;  %15859 = vmatprep.subr.bf16.mxu0 %v22896_v3  ;;  %v22926_v32 = vld [vmem:[#allocation9 + $0xc4] ss:$48 sps:$4 sm:$0xff]  }
 0x4f9   :  { %15900 = vmatprep.subr.bf16.mxu1 %v22899_v5  ;;  %v8659_v5 = vmul.f32 %v25198_v42, %v25198_v42 }
 0x4fa   :  { %v8345_v33 = vpop.f32.mrf.mxu0  ;;  %8590 = vmatmul.mubr.bf16.vlgmr.msra.gmra.mxu0 %v25118_v39  ;;  %v1390_v39 = vrot.slane %v24729_v47, %v25168_v48  ;;  %v22939_v47 = vld [vmem:[#allocation9 + $0x600] ss:$48 sps:$4 sm:$0xff]  }
 0x4fb   :  { %v8386_v26 = vpop.f32.mrf.mxu1  ;;  %8631 = vmatmul.mubr.bf16.vlgmr.msra.gmra.mxu1 %v25120_v41  ;;  %v8346_v61 = vadd.f32 %v8345_v33, %v25285_v10  ;;  %15860 = vmatpush1.bf16.msra.mxu0 %v22894_v2  ;;  %v22929_v33 = vld [vmem:[#allocation9 + $0x6c4] ss:$48 sps:$4 sm:$0xff]  }
 0x4fc   :  { %v8347_v27 = vpop.f32.mrf.mxu0  ;;  %15901 = vmatpush1.bf16.msra.mxu1 %v22897_v50  ;;  %15861 = vmatprep.subr.bf16.mxu0 %v22902_v6 }
 0x4fd   :  { %v8388_v38 = vpop.f32.mrf.mxu1  ;;  %v25295_v49 = vadd.f32 %v8386_v26, %v8346_v61  ;;  %v8348_v52 = vadd.f32 %v8347_v27, %v25290_v28  ;;  %15902 = vmatprep.subr.bf16.mxu1 %v22905_v7  ;;  %v22924_v26 = vld [vmem:[#allocation9 + $0xc0] ss:$48 sps:$4 sm:$0xff]   ;;  %v22932_v27 = vld [vmem:[#allocation9 + $0x64] ss:$48 sps:$4 sm:$0xff]   ;;  %v8660_v7 = vmul.f32 %v25229_v11, %v25229_v11 }
 0x4fe   :  { %v8349_v55 = vpop.f32.mrf.mxu0  ;;  %v22927_v61 = vld [vmem:[#allocation9 + $0x6c0] ss:$48 sps:$4 sm:$0xff]  }
 0x4ff   :  { %v8390_v37 = vpop.f32.mrf.mxu1  ;;  %v25298_v40 = vadd.f32 %v8388_v38, %v8348_v52  ;;  %15862 = vmatpush1.bf16.msra.mxu0 %v22900_v15  ;;  %v22935_v38 = vld [vmem:[#allocation9 + $0x664] ss:$48 sps:$4 sm:$0xff]   ;;  %v22930_v52 = vld [vmem:[#allocation9 + $0x60] ss:$48 sps:$4 sm:$0xff]  }
 0x500   :  { %v8350_v44 = vpop.f32.mrf.mxu0  ;;  %15903 = vmatpush1.bf16.msra.mxu1 %v22903_v16  ;;  %15863 = vmatprep.subr.bf16.mxu0 %v22908_v17  ;;  %v22933_v55 = vld [vmem:[#allocation9 + $0x660] ss:$48 sps:$4 sm:$0xff]   ;;  %v22938_v37 = vld [vmem:[#allocation9 + $0x4] ss:$48 sps:$4 sm:$0xff]  }
 0x501   :  { %v8391_v45 = vpop.f32.mrf.mxu1  ;;  %15904 = vmatprep.subr.bf16.mxu1 %v22911_v20  ;;  %v22941_v44 = vld [vmem:[#allocation9 + $0x604] ss:$48 sps:$4 sm:$0xff]   ;;  %v8661_v20 = vmul.f32 %v25234_v22, %v25234_v22 }
 0x502   :  { %v22936_v45 = vld [vmem:[#allocation9] ss:$48 sps:$4 sm:$0xff]  }
 0x503   :  { %15864 = vmatpush1.bf16.msra.mxu0 %v22906_v21 }
 0x504   :  { %15905 = vmatpush1.bf16.msra.mxu1 %v22909_v23  ;;  %15865 = vmatprep.subr.bf16.mxu0 %v22914_v13  ;;  %v8662_v23 = vmul.f32 %v25265_v24, %v25265_v24 }
 0x505   :  { %15906 = vmatprep.subr.bf16.mxu1 %v22917_v30 }
 0x507   :  { %15866 = vmatpush1.bf16.msra.mxu0 %v22912_v54 }
 0x508   :  { %15907 = vmatpush1.bf16.msra.mxu1 %v22915_v18  ;;  %15867 = vmatprep.subr.bf16.mxu0 %v22920_v36  ;;  %v8663_v18 = vmul.f32 %v25270_v35, %v25270_v35 }
 0x509   :  { %15908 = vmatprep.subr.bf16.mxu1 %v22923_v8 }
 0x50b   :  { %15868 = vmatpush1.bf16.msra.mxu0 %v22918_v9  ;;  %v8664_v9 = vmul.f32 %v25295_v49, %v25295_v49 }
 0x50c   :  { %15909 = vmatpush1.bf16.msra.mxu1 %v22921_v29  ;;  %15869 = vmatprep.subr.bf16.mxu0 %v22926_v32 }
 0x50d   :  { %15910 = vmatprep.subr.bf16.mxu1 %v22929_v33 }
 0x50f   :  { %15870 = vmatpush1.bf16.msra.mxu0 %v22924_v26 }
 0x510   :  { %15911 = vmatpush1.bf16.msra.mxu1 %v22927_v61  ;;  %15871 = vmatprep.subr.bf16.mxu0 %v22932_v27 }
 0x511   :  { %15912 = vmatprep.subr.bf16.mxu1 %v22935_v38 }
 0x513   :  { %15872 = vmatpush1.bf16.msra.mxu0 %v22930_v52  ;;  %v8665_v52 = vmul.f32 %v25298_v40, %v25298_v40 }
 0x514   :  { %15913 = vmatpush1.bf16.msra.mxu1 %v22933_v55  ;;  %15873 = vmatprep.subr.bf16.mxu0 %v22938_v37 }
 0x515   :  { %15914 = vmatprep.subr.bf16.mxu1 %v22941_v44 }
 0x517   :  { %15874 = vmatpush1.bf16.msra.mxu0 %v22936_v45 }
 0x518   :  { %15915 = vmatpush1.bf16.msra.mxu1 %v22939_v47 }
 0x53a   :  { %v8427_v41 = vpop.f32.mrf.mxu0 }
 0x53b   :  { %v8468_v51 = vpop.f32.mrf.mxu1  ;;  %v8428_v10 = vadd.f32 %v8427_v41, %v1386_v62 }
 0x53c   :  { %v8429_v53 = vpop.f32.mrf.mxu0 }
 0x53d   :  { %v8470_v58 = vpop.f32.mrf.mxu1  ;;  %v25302_v59 = vadd.f32 %v8468_v51, %v8428_v10  ;;  %v8430_v14 = vadd.f32 %v8429_v53, %v1390_v39 }
 0x53e   :  { %v8431_v28 = vpop.f32.mrf.mxu0 }
 0x53f   :  { %v8472_v63 = vpop.f32.mrf.mxu1  ;;  %v25304_v0 = vadd.f32 %v8470_v58, %v8430_v14  ;;  %v8657_v28 = vmul.f32 %v25162_v31, %v25162_v31 }
 0x540   :  { %v8432_v1 = vpop.f32.mrf.mxu0  ;;  %v8656_v63 = vmul.f32 %v25157_v25, %v25157_v25 }
 0x541   :  { %v8473_v19 = vpop.f32.mrf.mxu1  ;;  %v8643_v1 = vadd.f32 %v25162_v31, %v25157_v25 }
 0x542   :  { %v8658_v19 = vmul.f32 %v25193_v34, %v25193_v34  ;;  %v8668_v2 = vadd.f32 %v8657_v28, %v8656_v63 }
 0x543   :  { %v8644_v3 = vadd.f32 %v8643_v1, %v25193_v34 }
 0x544   :  { %v8669_v50 = vadd.f32 %v8668_v2, %v8658_v19  ;;  %v22942_v2 = vld [vmem:[#allocation9 + $0x5a0] ss:$48 sps:$4 sm:$0xff]  }
 0x545   :  { %v8645_v6 = vadd.f32 %v8644_v3, %v25198_v42  ;;  %v22944_v3 = vld [vmem:[#allocation9 + $0x5a4] ss:$48 sps:$4 sm:$0xff]  }
 0x546   :  { %v8670_v15 = vadd.f32 %v8669_v50, %v8659_v5  ;;  %v22945_v50 = vld [vmem:[#allocation9 + $0xba0] ss:$48 sps:$4 sm:$0xff]   ;;  %v22947_v5 = vld [vmem:[#allocation9 + $0xba4] ss:$48 sps:$4 sm:$0xff]   ;;  %15875 = vmatprep.subr.bf16.mxu0 %v22944_v3 }
 0x547   :  { %v8646_v16 = vadd.f32 %v8645_v6, %v25229_v11  ;;  %15916 = vmatprep.subr.bf16.mxu1 %v22947_v5  ;;  %15876 = vmatpush2.bf16.msra.mxu0 %v22942_v2  ;;  %v22950_v6 = vld [vmem:[#allocation9 + $0x544] ss:$48 sps:$4 sm:$0xff]  }
 0x548   :  { %v8671_v17 = vadd.f32 %v8670_v15, %v8660_v7  ;;  %15917 = vmatpush2.bf16.msra.mxu1 %v22945_v50  ;;  %v22953_v7 = vld [vmem:[#allocation9 + $0xb44] ss:$48 sps:$4 sm:$0xff]   ;;  %v22948_v15 = vld [vmem:[#allocation9 + $0x540] ss:$48 sps:$4 sm:$0xff]   ;;  %15877 = vmatprep.subr.bf16.mxu0 %v22950_v6 }
 0x549   :  { %v8647_v21 = vadd.f32 %v8646_v16, %v25234_v22  ;;  %v22951_v16 = vld [vmem:[#allocation9 + $0xb40] ss:$48 sps:$4 sm:$0xff]   ;;  %15918 = vmatprep.subr.bf16.mxu1 %v22953_v7 }
 0x54a   :  { %v8672_v13 = vadd.f32 %v8671_v17, %v8661_v20  ;;  %v22956_v17 = vld [vmem:[#allocation9 + $0x4e4] ss:$48 sps:$4 sm:$0xff]  }
 0x54b   :  { %v8648_v30 = vadd.f32 %v8647_v21, %v25265_v24  ;;  %15878 = vmatpush2.bf16.msra.mxu0 %v22948_v15  ;;  %v22959_v20 = vld [vmem:[#allocation9 + $0xae4] ss:$48 sps:$4 sm:$0xff]   ;;  %v22954_v21 = vld [vmem:[#allocation9 + $0x4e0] ss:$48 sps:$4 sm:$0xff]  }
 0x54c   :  { %v8673_v54 = vadd.f32 %v8672_v13, %v8662_v23  ;;  %15919 = vmatpush2.bf16.msra.mxu1 %v22951_v16  ;;  %v22957_v23 = vld [vmem:[#allocation9 + $0xae0] ss:$48 sps:$4 sm:$0xff]   ;;  %15879 = vmatprep.subr.bf16.mxu0 %v22956_v17  ;;  %v22962_v13 = vld [vmem:[#allocation9 + $0x484] ss:$48 sps:$4 sm:$0xff]  }
 0x54d   :  { %v8649_v8 = vadd.f32 %v8648_v30, %v25270_v35  ;;  %15920 = vmatprep.subr.bf16.mxu1 %v22959_v20  ;;  %v22960_v30 = vld [vmem:[#allocation9 + $0x480] ss:$48 sps:$4 sm:$0xff]  }
 0x54e   :  { %v8674_v32 = vadd.f32 %v8673_v54, %v8663_v18  ;;  %v22965_v54 = vld [vmem:[#allocation9 + $0xa84] ss:$48 sps:$4 sm:$0xff]   ;;  %v22963_v18 = vld [vmem:[#allocation9 + $0xa80] ss:$48 sps:$4 sm:$0xff]  }
 0x54f   :  { %v8650_v33 = vadd.f32 %v8649_v8, %v25295_v49  ;;  %15880 = vmatpush2.bf16.msra.mxu0 %v22954_v21  ;;  %v22971_v8 = vld [vmem:[#allocation9 + $0xa24] ss:$48 sps:$4 sm:$0xff]  }
 0x550   :  { %v8675_v38 = vadd.f32 %v8674_v32, %v8664_v9  ;;  %15921 = vmatpush2.bf16.msra.mxu1 %v22957_v23  ;;  %15881 = vmatprep.subr.bf16.mxu0 %v22962_v13  ;;  %v22966_v9 = vld [vmem:[#allocation9 + $0x420] ss:$48 sps:$4 sm:$0xff]   ;;  %v22974_v32 = vld [vmem:[#allocation9 + $0x3c4] ss:$48 sps:$4 sm:$0xff]  }
 0x551   :  { %15922 = vmatprep.subr.bf16.mxu1 %v22965_v54 }
 0x553   :  { %15882 = vmatpush2.bf16.msra.mxu0 %v22960_v30 }
 0x554   :  { %15923 = vmatpush2.bf16.msra.mxu1 %v22963_v18 }
 0x555   :  { %15924 = vmatprep.subr.bf16.mxu1 %v22971_v8 }
 0x57a   :  { %v8509_v62 = vpop.f32.mrf.mxu0 }
 0x57b   :  { %v8550_v39 = vpop.f32.mrf.mxu1  ;;  %v8510_v36 = vadd.f32 %v8509_v62, %v25302_v59  ;;  %v8651_v62 = vadd.f32 %v8650_v33, %v25298_v40  ;;  %v22977_v33 = vld [vmem:[#allocation9 + $0x9c4] ss:$48 sps:$4 sm:$0xff]  }
 0x57c   :  { %v8511_v41 = vpop.f32.mrf.mxu0 }
 0x57d   :  { %v8552_v51 = vpop.f32.mrf.mxu1  ;;  %v8512_v29 = vadd.f32 %v8511_v41, %v25304_v0  ;;  %v8551_v26 = vadd.f32 %v8550_v39, %v8510_v36  ;;  %v22968_v36 = vld [vmem:[#allocation9 + $0x424] ss:$48 sps:$4 sm:$0xff]  }
 0x57e   :  { %v8513_v10 = vpop.f32.mrf.mxu0  ;;  %15883 = vmatprep.subr.bf16.mxu0 %v22968_v36 }
 0x57f   :  { %v8554_v53 = vpop.f32.mrf.mxu1  ;;  %v8553_v55 = vadd.f32 %v8552_v51, %v8512_v29  ;;  %v22969_v29 = vld [vmem:[#allocation9 + $0xa20] ss:$48 sps:$4 sm:$0xff]   ;;  %15884 = vmatpush2.bf16.msra.mxu0 %v22966_v9 }
 0x580   :  { %v8514_v58 = vpop.f32.mrf.mxu0  ;;  %15925 = vmatpush2.bf16.msra.mxu1 %v22969_v29  ;;  %15885 = vmatprep.subr.bf16.mxu0 %v22974_v32 }
 0x581   :  { %v8555_v14 = vpop.f32.mrf.mxu1  ;;  %v8676_v58 = vadd.f32 %v8675_v38, %v8665_v52  ;;  %15926 = vmatprep.subr.bf16.mxu1 %v22977_v33  ;;  %v22983_v38 = vld [vmem:[#allocation9 + $0x964] ss:$48 sps:$4 sm:$0xff]   ;;  %v22978_v52 = vld [vmem:[#allocation9 + $0x360] ss:$48 sps:$4 sm:$0xff]  }
 0x5ba   :  { %v8591_v61 = vpop.f32.mrf.mxu0 }
 0x5bb   :  { %v8632_v27 = vpop.f32.mrf.mxu1  ;;  %v8592_v37 = vadd.f32 %v8591_v61, %v8551_v26  ;;  %v22972_v26 = vld [vmem:[#allocation9 + $0x3c0] ss:$48 sps:$4 sm:$0xff]  }
 0x5bc   :  { %v8593_v59 = vpop.f32.mrf.mxu0  ;;  %v22975_v61 = vld [vmem:[#allocation9 + $0x9c0] ss:$48 sps:$4 sm:$0xff]   ;;  %15886 = vmatpush2.bf16.msra.mxu0 %v22972_v26 }
 0x5bd   :  { %v8634_v44 = vpop.f32.mrf.mxu1  ;;  %v25337_v45 = vadd.f32 %v8632_v27, %v8592_v37  ;;  %v8594_v47 = vadd.f32 %v8593_v59, %v8553_v55  ;;  %v22980_v27 = vld [vmem:[#allocation9 + $0x364] ss:$48 sps:$4 sm:$0xff]   ;;  %15927 = vmatpush2.bf16.msra.mxu1 %v22975_v61  ;;  %v22981_v55 = vld [vmem:[#allocation9 + $0x960] ss:$48 sps:$4 sm:$0xff]  }
 0x5be   :  { %v8595_v0 = vpop.f32.mrf.mxu0  ;;  %15887 = vmatprep.subr.bf16.mxu0 %v22980_v27  ;;  %v22986_v37 = vld [vmem:[#allocation9 + $0x304] ss:$48 sps:$4 sm:$0xff]   ;;  %15928 = vmatprep.subr.bf16.mxu1 %v22983_v38 }
 0x5bf   :  { %v8636_v41 = vpop.f32.mrf.mxu1  ;;  %v8666_v39 = vmul.f32 %v25337_v45, %v25337_v45  ;;  %v25342_v10 = vadd.f32 %v8634_v44, %v8594_v47  ;;  %v8652_v53 = vadd.f32 %v8651_v62, %v25337_v45  ;;  %v22989_v59 = vld [vmem:[#allocation9 + $0x904] ss:$48 sps:$4 sm:$0xff]   ;;  %v22984_v44 = vld [vmem:[#allocation9 + $0x300] ss:$48 sps:$4 sm:$0xff]  }
 0x5c0   :  { %v8596_v14 = vpop.f32.mrf.mxu0  ;;  %15888 = vmatpush2.bf16.msra.mxu0 %v22978_v52  ;;  %v22987_v47 = vld [vmem:[#allocation9 + $0x900] ss:$48 sps:$4 sm:$0xff]   ;;  %v22992_v62 = vld [vmem:[#allocation9 + $0xea4] ss:$48 sps:$4 sm:$0xff]  }
 0x5c1   :  { %v8637_v51 = vpop.f32.mrf.mxu1  ;;  %v8653_v28 = vadd.f32 %v8652_v53, %v25342_v10  ;;  %v8667_v63 = vmul.f32 %v25342_v10, %v25342_v10  ;;  %v8677_v1 = vadd.f32 %v8676_v58, %v8666_v39  ;;  %15929 = vmatpush2.bf16.msra.mxu1 %v22981_v55  ;;  %15889 = vmatprep.subr.bf16.mxu0 %v22986_v37  ;;  %v22995_v0 = vld [vmem:[#allocation9 + $0x14a4] ss:$48 sps:$4 sm:$0xff]  }
 0x5c2   :  { %15930 = vmatprep.subr.bf16.mxu1 %v22989_v59 }
 0x5c3   :  { %8654 = vadd.xlane.f32.xlu0 %v8653_v28  ;;  %v8678_v19 = vadd.f32 %v8677_v1, %v8667_v63  ;;  %v8639_v63 = vld [vmem:[#allocation6] sm:$0xff]  ;;  %v8641_v1 = vld [vmem:[#allocation7] sm:$0xff] }
 0x5c4   :  { %15890 = vmatpush2.bf16.msra.mxu0 %v22984_v44  ;;  %v8728_v2 = vrot.slane %v8639_v63, %v25168_v48  ;;  %v8716_v3 = vrot.slane %v8639_v63, %v25129_v57  ;;  %v8724_v50 = vrot.slane %v8639_v63, %v25165_v43  ;;  %v8736_v5 = vrot.slane %v8639_v63, %v25204_v12 }
 0x5c5   :  { %15931 = vmatpush2.bf16.msra.mxu1 %v22987_v47  ;;  %15941 = vmatprep.subr.bf16.mxu0 %v22992_v62  ;;  %v8794_v6 = vrot.slane %v8641_v1, %v25132_v60  ;;  %v8802_v7 = vrot.slane %v8641_v1, %v25168_v48  ;;  %v8744_v15 = vrot.slane %v8639_v63, %v25240_v56 }
 0x5c6   :  { %15982 = vmatprep.subr.bf16.mxu1 %v22995_v0  ;;  %v8732_v16 = vrot.slane %v8639_v63, %v25201_v4  ;;  %v8790_v17 = vrot.slane %v8641_v1, %v25129_v57  ;;  %v8798_v20 = vrot.slane %v8641_v1, %v25165_v43  ;;  %v8810_v21 = vrot.slane %v8641_v1, %v25204_v12 }
 0x5c7   :  { %8679 = vadd.xlane.f32.xlu0 %v8678_v19  ;;  %v8720_v19 = vrot.slane %v8639_v63, %v25132_v60  ;;  %v8740_v23 = vrot.slane %v8639_v63, %v25237_v46  ;;  %v8818_v30 = vrot.slane %v8641_v1, %v25240_v56  ;;  %v8806_v54 = vrot.slane %v8641_v1, %v25201_v4  ;;  %v25390_v63 = vld [vmem:[#allocation6 + $0x8] sm:$0xf] }
 0x5c8   :  { %v8814_v18 = vrot.slane %v8641_v1, %v25237_v46 }
 0x64c   :  { %v8655_v41 = vpop.xlane.xlu0 %8654 }
 0x64d   :  { %v25348_v39 = vmul.f32 0.0006510417, %v8655_v41 }
 0x64f   :  { %v8683_v58 = vmul.f32 %v25348_v39, %v25348_v39  ;;  %v8686_v13 = vsub.f32 %v25162_v31, %v25348_v39  ;;  %v8688_v36 = vsub.f32 %v25198_v42, %v25348_v39  ;;  %v8685_v8 = vsub.f32 %v25157_v25, %v25348_v39 }
 0x650   :  { %v8680_v53 = vpop.xlane.xlu0 %8679  ;;  %v8687_v9 = vsub.f32 %v25193_v34, %v25348_v39  ;;  %v8690_v29 = vsub.f32 %v25234_v22, %v25348_v39  ;;  %v8692_v31 = vsub.f32 %v25270_v35, %v25348_v39  ;;  %v8689_v33 = vsub.f32 %v25229_v11, %v25348_v39 }
 0x651   :  { %v8682_v14 = vmul.f32 0.0006510417, %v8680_v53  ;;  %v8691_v26 = vsub.f32 %v25265_v24, %v25348_v39  ;;  %v8694_v42 = vsub.f32 %v25298_v40, %v25348_v39 }
 0x653   :  { %v8684_v51 = vsub.f32 %v8682_v14, %v8683_v58 }
 0x655   :  { %v8697_v28 = vadd.f32 1e-05, %v8684_v51 }
 0x657   :  { %24718 = vrsqrt.f32 %v8697_v28 }
 0x664   :  { %v24719_v32 = vpop.eup %24718 }
 0x665   :  { %v8700_v25 = vmul.f32 %v24719_v32, %v8686_v13  ;;  %v8702_v61 = vmul.f32 %v24719_v32, %v8688_v36  ;;  %v8699_v27 = vmul.f32 %v24719_v32, %v8685_v8  ;;  %v8701_v34 = vmul.f32 %v24719_v32, %v8687_v9 }
 0x666   :  { %v8704_v38 = vmul.f32 %v24719_v32, %v8690_v29  ;;  %v8706_v52 = vmul.f32 %v24719_v32, %v8692_v31  ;;  %v8703_v22 = vmul.f32 %v24719_v32, %v8689_v33  ;;  %v8705_v55 = vmul.f32 %v24719_v32, %v8691_v26  ;;  %v22996_v31 = vld [vmem:[#allocation9 + $0xe40] ss:$48 sps:$4 sm:$0xff]   ;;  %v23004_v26 = vld [vmem:[#allocation9 + $0xde4] ss:$48 sps:$4 sm:$0xff]  }
 0x667   :  { %v8774_v37 = vmul.f32 %v8720_v19, %v8700_v25  ;;  %v8776_v59 = vmul.f32 %v8728_v2, %v8702_v61  ;;  %v8773_v35 = vmul.f32 %v8716_v3, %v8699_v27  ;;  %v8775_v44 = vmul.f32 %v8724_v50, %v8701_v34  ;;  %v25392_v50 = vld [vmem:[#allocation7 + $0x8] sm:$0xf]  ;;  %v22999_v33 = vld [vmem:[#allocation9 + $0x1440] ss:$48 sps:$4 sm:$0xff]  }
 0x668   :  { %v8778_v47 = vmul.f32 %v8736_v5, %v8704_v38  ;;  %v8780_v11 = vmul.f32 %v8744_v15, %v8706_v52  ;;  %v8777_v62 = vmul.f32 %v8732_v16, %v8703_v22  ;;  %v8779_v0 = vmul.f32 %v8740_v23, %v8705_v55  ;;  %v23002_v27 = vld [vmem:[#allocation9 + $0xde0] ss:$48 sps:$4 sm:$0xff]   ;;  %v23013_v38 = vld [vmem:[#allocation9 + $0x1384] ss:$48 sps:$4 sm:$0xff]  }
 0x669   :  { %v8848_v24 = vadd.f32 %v8794_v6, %v8774_v37  ;;  %v8850_v41 = vadd.f32 %v8802_v7, %v8776_v59  ;;  %v8847_v53 = vadd.f32 %v8790_v17, %v8773_v35  ;;  %v8849_v40 = vadd.f32 %v8798_v20, %v8775_v44  ;;  %v22990_v20 = vld [vmem:[#allocation9 + $0xea0] ss:$48 sps:$4 sm:$0xff]   ;;  %v23016_v55 = vld [vmem:[#allocation9 + $0xd24] ss:$48 sps:$4 sm:$0xff]  }
 0x66a   :  { %v8852_v58 = vadd.f32 %v8810_v21, %v8778_v47  ;;  %v8854_v14 = vadd.f32 %v8818_v30, %v8780_v11  ;;  %v25386_v51 = vadd.f32 %v8806_v54, %v8777_v62  ;;  %v25388_v28 = vadd.f32 %v8814_v18, %v8779_v0  ;;  %v22993_v21 = vld [vmem:[#allocation9 + $0x14a0] ss:$48 sps:$4 sm:$0xff]   ;;  %v23001_v18 = vld [vmem:[#allocation9 + $0x1444] ss:$48 sps:$4 sm:$0xff]  }
 0x66b   :  { %v8860_v1 = vmax.f32 %v8848_v24, 0.0  ;;  %v8862_v19 = vmax.f32 %v8850_v41, 0.0  ;;  %v8859_v2 = vmax.f32 %v8847_v53, 0.0  ;;  %v8861_v3 = vmax.f32 %v8849_v40, 0.0  ;;  %v23005_v34 = vld [vmem:[#allocation9 + $0x13e0] ss:$48 sps:$4 sm:$0xff]  }
 0x66c   :  { %v8864_v5 = vmax.f32 %v8852_v58, 0.0  ;;  %v8866_v15 = vmax.f32 %v8854_v14, 0.0  ;;  %v8696_v6 = vsub.f32 %v25342_v10, %v25348_v39  ;;  %v8693_v7 = vsub.f32 %v25295_v49, %v25348_v39  ;;  %v22998_v49 = vld [vmem:[#allocation9 + $0xe44] ss:$48 sps:$4 sm:$0xff]   ;;  %v23008_v52 = vld [vmem:[#allocation9 + $0xd80] ss:$48 sps:$4 sm:$0xff]  }
 0x66d   :  { %v25398_v16 = vpack.c.bf16 %v8860_v1, %v8860_v1  ;;  %v25400_v17 = vpack.c.bf16 %v8862_v19, %v8862_v19  ;;  %v25402_v23 = vpack.c.bf16 %v8859_v2, %v8859_v2  ;;  %v25404_v13 = vpack.c.bf16 %v8861_v3, %v8861_v3  ;;  %v23011_v22 = vld [vmem:[#allocation9 + $0x1380] ss:$48 sps:$4 sm:$0xff]   ;;  %v23019_v37 = vld [vmem:[#allocation9 + $0x1324] ss:$48 sps:$4 sm:$0xff]  }
 0x66e   :  { %v8695_v30 = vsub.f32 %v25337_v45, %v25348_v39  ;;  %v8756_v54 = vrot.slane %v25390_v63, %v25165_v43  ;;  %v8830_v10 = vrot.slane %v25392_v50, %v25165_v43  ;;  %v25414_v36 = vmul.f32 %v24719_v32, %v8694_v42  ;;  %v23007_v42 = vld [vmem:[#allocation9 + $0x13e4] ss:$48 sps:$4 sm:$0xff]   ;;  %v23014_v59 = vld [vmem:[#allocation9 + $0xd20] ss:$48 sps:$4 sm:$0xff]  }
 0x66f   :  { %15891 = vmatprep.mubr.bf16.mxu0 %v25398_v16  ;;  %15932 = vmatprep.mubr.bf16.mxu1 %v25400_v17  ;;  %v25416_v8 = vmul.f32 %v24719_v32, %v8696_v6  ;;  %v25418_v9 = vmul.f32 %v24719_v32, %v8693_v7  ;;  %v25422_v45 = vpack.c.bf16 %v8864_v5, %v8864_v5  ;;  %v23017_v35 = vld [vmem:[#allocation9 + $0x1320] ss:$48 sps:$4 sm:$0xff]   ;;  %v23022_v44 = vld [vmem:[#allocation9 + $0xcc4] ss:$48 sps:$4 sm:$0xff]  }
 0x670   :  { %15892 = vmatmul.mubr.bf16.vlgmr.msra.gmra.mxu0 %v25402_v23  ;;  %15933 = vmatmul.mubr.bf16.vlgmr.msra.gmra.mxu1 %v25404_v13  ;;  %v25424_v39 = vpack.c.bf16 %v8866_v15, %v8866_v15  ;;  %v8709_v29 = vmul.f32 %v24719_v32, %v8695_v30  ;;  %v23010_v32 = vld [vmem:[#allocation9 + $0xd84] ss:$48 sps:$4 sm:$0xff]   ;;  %v23020_v11 = vld [vmem:[#allocation9 + $0xcc0] ss:$48 sps:$4 sm:$0xff]  }
 0x671   :  { %15942 = vmatpush1.bf16.msra.mxu0 %v22990_v20  ;;  %15983 = vmatpush1.bf16.msra.mxu1 %v22993_v21  ;;  %v23025_v47 = vld [vmem:[#allocation9 + $0x12c4] ss:$48 sps:$4 sm:$0xff]   ;;  %v23023_v62 = vld [vmem:[#allocation9 + $0x12c0] ss:$48 sps:$4 sm:$0xff]  }
 0x672   :  { %15973 = vmatprep.mubr.bf16.mxu0 %v25422_v45  ;;  %16014 = vmatprep.mubr.bf16.mxu1 %v25424_v39  ;;  %v8783_v25 = vmul.f32 %v8756_v54, %v8709_v29  ;;  %v23028_v0 = vld [vmem:[#allocation9 + $0xc64] ss:$48 sps:$4 sm:$0xff]   ;;  %v23026_v41 = vld [vmem:[#allocation9 + $0xc60] ss:$48 sps:$4 sm:$0xff]  }
 0x673   :  { %15943 = vmatprep.subr.bf16.mxu0 %v22998_v49  ;;  %15984 = vmatprep.subr.bf16.mxu1 %v23001_v18  ;;  %v23031_v24 = vld [vmem:[#allocation9 + $0x1264] ss:$48 sps:$4 sm:$0xff]   ;;  %v23029_v53 = vld [vmem:[#allocation9 + $0x1260] ss:$48 sps:$4 sm:$0xff]  }
 0x674   :  { %v25428_v61 = vadd.f32 %v8830_v10, %v8783_v25  ;;  %v23034_v40 = vld [vmem:[#allocation9 + $0xc04] ss:$48 sps:$4 sm:$0xff]   ;;  %v23032_v14 = vld [vmem:[#allocation9 + $0xc00] ss:$48 sps:$4 sm:$0xff]  }
 0x675   :  { %15944 = vmatpush1.bf16.msra.mxu0 %v22996_v31  ;;  %15985 = vmatpush1.bf16.msra.mxu1 %v22999_v33  ;;  %v23037_v58 = vld [vmem:[#allocation9 + $0x1204] ss:$48 sps:$4 sm:$0xff]   ;;  %v23035_v1 = vld [vmem:[#allocation9 + $0x1200] ss:$48 sps:$4 sm:$0xff]  }
 0x676   :  { %15945 = vmatprep.subr.bf16.mxu0 %v23004_v26  ;;  %15986 = vmatprep.subr.bf16.mxu1 %v23007_v42  ;;  %v23040_v19 = vld [vmem:[#allocation9 + $0x11a4] ss:$48 sps:$4 sm:$0xff]   ;;  %v23038_v3 = vld [vmem:[#allocation9 + $0x11a0] ss:$48 sps:$4 sm:$0xff]  }
 0x677   :  { %v23043_v2 = vld [vmem:[#allocation9 + $0x17a4] ss:$48 sps:$4 sm:$0xff]   ;;  %v23041_v5 = vld [vmem:[#allocation9 + $0x17a0] ss:$48 sps:$4 sm:$0xff]  }
 0x678   :  { %v23046_v15 = vld [vmem:[#allocation9 + $0x1144] ss:$48 sps:$4 sm:$0xff]   ;;  %v23044_v7 = vld [vmem:[#allocation9 + $0x1140] ss:$48 sps:$4 sm:$0xff]  }
 0x679   :  { %15946 = vmatpush1.bf16.msra.mxu0 %v23002_v27  ;;  %15987 = vmatpush1.bf16.msra.mxu1 %v23005_v34  ;;  %v23049_v6 = vld [vmem:[#allocation9 + $0x1744] ss:$48 sps:$4 sm:$0xff]   ;;  %v23047_v20 = vld [vmem:[#allocation9 + $0x1740] ss:$48 sps:$4 sm:$0xff]  }
 0x67a   :  { %15947 = vmatprep.subr.bf16.mxu0 %v23010_v32  ;;  %15988 = vmatprep.subr.bf16.mxu1 %v23013_v38  ;;  %v23052_v21 = vld [vmem:[#allocation9 + $0x10e4] ss:$48 sps:$4 sm:$0xff]   ;;  %v23050_v54 = vld [vmem:[#allocation9 + $0x10e0] ss:$48 sps:$4 sm:$0xff]   ;;  %v8752_v32 = vrot.slane %v25390_v63, %v25132_v60  ;;  %v8760_v38 = vrot.slane %v25390_v63, %v25168_v48 }
 0x67b   :  { %v23055_v30 = vld [vmem:[#allocation9 + $0x16e4] ss:$48 sps:$4 sm:$0xff]   ;;  %v23053_v10 = vld [vmem:[#allocation9 + $0x16e0] ss:$48 sps:$4 sm:$0xff]  }
 0x67c   :  { %v23058_v49 = vld [vmem:[#allocation9 + $0x1084] ss:$48 sps:$4 sm:$0xff]   ;;  %v23056_v29 = vld [vmem:[#allocation9 + $0x1080] ss:$48 sps:$4 sm:$0xff]  }
 0x67d   :  { %15948 = vmatpush1.bf16.msra.mxu0 %v23008_v52  ;;  %15989 = vmatpush1.bf16.msra.mxu1 %v23011_v22  ;;  %v23061_v18 = vld [vmem:[#allocation9 + $0x1684] ss:$48 sps:$4 sm:$0xff]   ;;  %v23059_v31 = vld [vmem:[#allocation9 + $0x1680] ss:$48 sps:$4 sm:$0xff]  }
 0x67e   :  { %15949 = vmatprep.subr.bf16.mxu0 %v23016_v55  ;;  %15990 = vmatprep.subr.bf16.mxu1 %v23019_v37  ;;  %v23064_v33 = vld [vmem:[#allocation9 + $0x1024] ss:$48 sps:$4 sm:$0xff]   ;;  %v23062_v42 = vld [vmem:[#allocation9 + $0x1020] ss:$48 sps:$4 sm:$0xff]  }
 0x67f   :  { %v23067_v26 = vld [vmem:[#allocation9 + $0x1624] ss:$48 sps:$4 sm:$0xff]   ;;  %v23065_v25 = vld [vmem:[#allocation9 + $0x1620] ss:$48 sps:$4 sm:$0xff]  }
 0x680   :  { %v23070_v27 = vld [vmem:[#allocation9 + $0xfc4] ss:$48 sps:$4 sm:$0xff]   ;;  %v23068_v52 = vld [vmem:[#allocation9 + $0xfc0] ss:$48 sps:$4 sm:$0xff]  }
 0x681   :  { %15950 = vmatpush1.bf16.msra.mxu0 %v23014_v59  ;;  %15991 = vmatpush1.bf16.msra.mxu1 %v23017_v35  ;;  %v23073_v34 = vld [vmem:[#allocation9 + $0x15c4] ss:$48 sps:$4 sm:$0xff]   ;;  %v23071_v22 = vld [vmem:[#allocation9 + $0x15c0] ss:$48 sps:$4 sm:$0xff]   ;;  %v8782_v59 = vmul.f32 %v8752_v32, %v25414_v36  ;;  %v8826_v35 = vrot.slane %v25392_v50, %v25132_v60 }
 0x682   :  { %15951 = vmatprep.subr.bf16.mxu0 %v23022_v44  ;;  %15992 = vmatprep.subr.bf16.mxu1 %v23025_v47  ;;  %v23076_v55 = vld [vmem:[#allocation9 + $0xf64] ss:$48 sps:$4 sm:$0xff]   ;;  %v8784_v44 = vmul.f32 %v8760_v38, %v25416_v8  ;;  %v8834_v47 = vrot.slane %v25392_v50, %v25168_v48  ;;  %v23080_v36 = vld [vmem:[#allocation9 + $0xf00] ss:$48 sps:$4 sm:$0xff]   ;;  %v8863_v8 = vmax.f32 %v25386_v51, 0.0 }
 0x683   :  { %v23079_v37 = vld [vmem:[#allocation9 + $0x1564] ss:$48 sps:$4 sm:$0xff]  }
 0x684   :  { %v23097_v51 = vld [vmem:[#allocation9 + $0x2044] ss:$48 sps:$4 sm:$0xff]  }
 0x685   :  { %15952 = vmatpush1.bf16.msra.mxu0 %v23020_v11  ;;  %15993 = vmatpush1.bf16.msra.mxu1 %v23023_v62  ;;  %v23074_v11 = vld [vmem:[#allocation9 + $0xf60] ss:$48 sps:$4 sm:$0xff]   ;;  %v23118_v32 = vld [vmem:[#allocation9 + $0x18c4] ss:$48 sps:$4 sm:$0xff]  }
 0x686   :  { %15953 = vmatprep.subr.bf16.mxu0 %v23028_v0  ;;  %15994 = vmatprep.subr.bf16.mxu1 %v23031_v24  ;;  %v23077_v62 = vld [vmem:[#allocation9 + $0x1560] ss:$48 sps:$4 sm:$0xff]   ;;  %v23082_v0 = vld [vmem:[#allocation9 + $0xf04] ss:$48 sps:$4 sm:$0xff]  }
 0x687   :  { %v23085_v24 = vld [vmem:[#allocation9 + $0x1504] ss:$48 sps:$4 sm:$0xff]  }
 0x688   :  { %v23121_v38 = vld [vmem:[#allocation9 + $0x1ec4] ss:$48 sps:$4 sm:$0xff]  }
 0x689   :  { %15954 = vmatpush1.bf16.msra.mxu0 %v23026_v41  ;;  %15995 = vmatpush1.bf16.msra.mxu1 %v23029_v53  ;;  %v8856_v41 = vadd.f32 %v8826_v35, %v8782_v59  ;;  %v8858_v53 = vadd.f32 %v8834_v47, %v8784_v44  ;;  %v23122_v59 = vld [vmem:[#allocation9 + $0x1860] ss:$48 sps:$4 sm:$0xff]   ;;  %v23130_v44 = vld [vmem:[#allocation9 + $0x1804] ss:$48 sps:$4 sm:$0xff]  }
 0x68a   :  { %15955 = vmatprep.subr.bf16.mxu0 %v23034_v40  ;;  %15996 = vmatprep.subr.bf16.mxu1 %v23037_v58  ;;  %v23083_v40 = vld [vmem:[#allocation9 + $0x1500] ss:$48 sps:$4 sm:$0xff]   ;;  %v8865_v58 = vmax.f32 %v25388_v28, 0.0  ;;  %v23133_v47 = vld [vmem:[#allocation9 + $0x1e04] ss:$48 sps:$4 sm:$0xff]  }
 0x68b   :  { %v23125_v35 = vld [vmem:[#allocation9 + $0x1e60] ss:$48 sps:$4 sm:$0xff]  }
 0x68d   :  { %15956 = vmatpush1.bf16.msra.mxu0 %v23032_v14  ;;  %15997 = vmatpush1.bf16.msra.mxu1 %v23035_v1  ;;  %v23088_v14 = vld [vmem:[#allocation9 + $0x1aa4] ss:$48 sps:$4 sm:$0xff]  }
 0x68e   :  { %15957 = vmatprep.subr.bf16.mxu0 %v23040_v19  ;;  %15998 = vmatprep.subr.bf16.mxu1 %v23043_v2  ;;  %v23091_v1 = vld [vmem:[#allocation9 + $0x20a4] ss:$48 sps:$4 sm:$0xff]   ;;  %v8868_v19 = vmax.f32 %v8856_v41, 0.0  ;;  %v8870_v2 = vmax.f32 %v8858_v53, 0.0  ;;  %v23134_v41 = vld [vmem:[#allocation9 + $0x1da0] ss:$48 sps:$4 sm:$0xff]  }
 0x68f   :  { %v23137_v53 = vld [vmem:[#allocation9 + $0x23a0] ss:$48 sps:$4 sm:$0xff]  }
 0x690   :  { %v25450_v28 = vpack.c.bf16 %v8870_v2, %v8870_v2  ;;  %v23149_v2 = vld [vmem:[#allocation9 + $0x22e0] ss:$48 sps:$4 sm:$0xff]  }
 0x691   :  { %15958 = vmatpush2.bf16.msra.mxu0 %v23038_v3  ;;  %15999 = vmatpush2.bf16.msra.mxu1 %v23041_v5  ;;  %v23086_v3 = vld [vmem:[#allocation9 + $0x1aa0] ss:$48 sps:$4 sm:$0xff]   ;;  %v25442_v5 = vpack.c.bf16 %v8863_v8, %v8863_v8 }
 0x692   :  { %15959 = vmatprep.subr.bf16.mxu0 %v23046_v15  ;;  %16000 = vmatprep.subr.bf16.mxu1 %v23049_v6  ;;  %v25444_v15 = vpack.c.bf16 %v8865_v58, %v8865_v58  ;;  %v23089_v6 = vld [vmem:[#allocation9 + $0x20a0] ss:$48 sps:$4 sm:$0xff]  }
 0x693   :  { %v23140_v8 = vld [vmem:[#allocation9 + $0x1d40] ss:$48 sps:$4 sm:$0xff]  }
 0x694   :  { %v23143_v58 = vld [vmem:[#allocation9 + $0x2340] ss:$48 sps:$4 sm:$0xff]  }
 0x695   :  { %15960 = vmatpush2.bf16.msra.mxu0 %v23044_v7  ;;  %16001 = vmatpush2.bf16.msra.mxu1 %v23047_v20  ;;  %v25446_v7 = vpack.c.bf16 %v8868_v19, %v8868_v19  ;;  %v23094_v20 = vld [vmem:[#allocation9 + $0x1a44] ss:$48 sps:$4 sm:$0xff]   ;;  %v23146_v19 = vld [vmem:[#allocation9 + $0x1ce0] ss:$48 sps:$4 sm:$0xff]  }
 0x696   :  { %15961 = vmatprep.subr.bf16.mxu0 %v23052_v21  ;;  %16002 = vmatprep.subr.bf16.mxu1 %v23055_v30  ;;  %v23092_v21 = vld [vmem:[#allocation9 + $0x1a40] ss:$48 sps:$4 sm:$0xff]  }
 0x697   :  { %v23095_v30 = vld [vmem:[#allocation9 + $0x2040] ss:$48 sps:$4 sm:$0xff]  }
 0x699   :  { %15962 = vmatpush2.bf16.msra.mxu0 %v23050_v54  ;;  %16003 = vmatpush2.bf16.msra.mxu1 %v23053_v10  ;;  %v23100_v54 = vld [vmem:[#allocation9 + $0x19e4] ss:$48 sps:$4 sm:$0xff]  }
 0x69a   :  { %15963 = vmatprep.subr.bf16.mxu0 %v23058_v49  ;;  %16004 = vmatprep.subr.bf16.mxu1 %v23061_v18  ;;  %v23103_v10 = vld [vmem:[#allocation9 + $0x1fe4] ss:$48 sps:$4 sm:$0xff]   ;;  %v23098_v49 = vld [vmem:[#allocation9 + $0x19e0] ss:$48 sps:$4 sm:$0xff]  }
 0x69b   :  { %v23101_v18 = vld [vmem:[#allocation9 + $0x1fe0] ss:$48 sps:$4 sm:$0xff]  }
 0x69d   :  { %15964 = vmatpush2.bf16.msra.mxu0 %v23056_v29  ;;  %16005 = vmatpush2.bf16.msra.mxu1 %v23059_v31  ;;  %v23106_v29 = vld [vmem:[#allocation9 + $0x1984] ss:$48 sps:$4 sm:$0xff]  }
 0x69e   :  { %15965 = vmatprep.subr.bf16.mxu0 %v23064_v33  ;;  %16006 = vmatprep.subr.bf16.mxu1 %v23067_v26  ;;  %v23109_v31 = vld [vmem:[#allocation9 + $0x1f84] ss:$48 sps:$4 sm:$0xff]   ;;  %v23104_v33 = vld [vmem:[#allocation9 + $0x1980] ss:$48 sps:$4 sm:$0xff]  }
 0x69f   :  { %v23107_v26 = vld [vmem:[#allocation9 + $0x1f80] ss:$48 sps:$4 sm:$0xff]  }
 0x6a1   :  { %15966 = vmatpush2.bf16.msra.mxu0 %v23062_v42  ;;  %16007 = vmatpush2.bf16.msra.mxu1 %v23065_v25  ;;  %v23112_v42 = vld [vmem:[#allocation9 + $0x1924] ss:$48 sps:$4 sm:$0xff]  }
 0x6a2   :  { %15967 = vmatprep.subr.bf16.mxu0 %v23070_v27  ;;  %16008 = vmatprep.subr.bf16.mxu1 %v23073_v34  ;;  %v23115_v25 = vld [vmem:[#allocation9 + $0x1f24] ss:$48 sps:$4 sm:$0xff]   ;;  %v23110_v27 = vld [vmem:[#allocation9 + $0x1920] ss:$48 sps:$4 sm:$0xff]  }
 0x6a3   :  { %v23113_v34 = vld [vmem:[#allocation9 + $0x1f20] ss:$48 sps:$4 sm:$0xff]  }
 0x6a5   :  { %15968 = vmatpush2.bf16.msra.mxu0 %v23068_v52  ;;  %16009 = vmatpush2.bf16.msra.mxu1 %v23071_v22  ;;  %v23116_v52 = vld [vmem:[#allocation9 + $0x18c0] ss:$48 sps:$4 sm:$0xff]  }
 0x6a6   :  { %15969 = vmatprep.subr.bf16.mxu0 %v23076_v55  ;;  %16010 = vmatprep.subr.bf16.mxu1 %v23079_v37  ;;  %v23119_v22 = vld [vmem:[#allocation9 + $0x1ec0] ss:$48 sps:$4 sm:$0xff]   ;;  %v23124_v55 = vld [vmem:[#allocation9 + $0x1864] ss:$48 sps:$4 sm:$0xff]  }
 0x6a7   :  { %v23127_v37 = vld [vmem:[#allocation9 + $0x1e64] ss:$48 sps:$4 sm:$0xff]  }
 0x6a9   :  { %15970 = vmatpush2.bf16.msra.mxu0 %v23074_v11  ;;  %16011 = vmatpush2.bf16.msra.mxu1 %v23077_v62  ;;  %v23128_v11 = vld [vmem:[#allocation9 + $0x1800] ss:$48 sps:$4 sm:$0xff]  }
 0x6aa   :  { %15971 = vmatprep.subr.bf16.mxu0 %v23082_v0  ;;  %16012 = vmatprep.subr.bf16.mxu1 %v23085_v24  ;;  %v23131_v62 = vld [vmem:[#allocation9 + $0x1e00] ss:$48 sps:$4 sm:$0xff]   ;;  %v23136_v0 = vld [vmem:[#allocation9 + $0x1da4] ss:$48 sps:$4 sm:$0xff]  }
 0x6ab   :  { %v23139_v24 = vld [vmem:[#allocation9 + $0x23a4] ss:$48 sps:$4 sm:$0xff]  }
 0x6ad   :  { %15972 = vmatpush2.bf16.msra.mxu0 %v23080_v36  ;;  %16013 = vmatpush2.bf16.msra.mxu1 %v23083_v40  ;;  %v23142_v36 = vld [vmem:[#allocation9 + $0x1d44] ss:$48 sps:$4 sm:$0xff]  }
 0x6ae   :  { %16023 = vmatprep.subr.bf16.mxu0 %v23088_v14  ;;  %16064 = vmatprep.subr.bf16.mxu1 %v23091_v1  ;;  %v23145_v40 = vld [vmem:[#allocation9 + $0x2344] ss:$48 sps:$4 sm:$0xff]  }
 0x6af   :  { %v23148_v14 = vld [vmem:[#allocation9 + $0x1ce4] ss:$48 sps:$4 sm:$0xff]  }
 0x6b0   :  { %15974 = vmatmul.mubr.bf16.vlgmr.msra.gmra.mxu0 %v25442_v5  ;;  %16015 = vmatmul.mubr.bf16.vlgmr.msra.gmra.mxu1 %v25444_v15  ;;  %v23151_v1 = vld [vmem:[#allocation9 + $0x22e4] ss:$48 sps:$4 sm:$0xff]  }
 0x6b1   :  { %16024 = vmatpush1.bf16.msra.mxu0 %v23086_v3  ;;  %16055 = vmatprep.mubr.bf16.mxu0 %v25446_v7  ;;  %v23154_v3 = vld [vmem:[#allocation9 + $0x1c84] ss:$48 sps:$4 sm:$0xff]  }
 0x6b2   :  { %16065 = vmatpush1.bf16.msra.mxu1 %v23089_v6  ;;  %16096 = vmatprep.mubr.bf16.mxu1 %v25450_v28  ;;  %v23157_v6 = vld [vmem:[#allocation9 + $0x2284] ss:$48 sps:$4 sm:$0xff]  }
 0x6b3   :  { %16025 = vmatprep.subr.bf16.mxu0 %v23094_v20  ;;  %16066 = vmatprep.subr.bf16.mxu1 %v23097_v51  ;;  %v23152_v20 = vld [vmem:[#allocation9 + $0x1c80] ss:$48 sps:$4 sm:$0xff]  }
 0x6b4   :  { %v23155_v51 = vld [vmem:[#allocation9 + $0x2280] ss:$48 sps:$4 sm:$0xff]  }
 0x6b5   :  { %16026 = vmatpush1.bf16.msra.mxu0 %v23092_v21  ;;  %v23160_v21 = vld [vmem:[#allocation9 + $0x1c24] ss:$48 sps:$4 sm:$0xff]  }
 0x6b6   :  { %16067 = vmatpush1.bf16.msra.mxu1 %v23095_v30  ;;  %16027 = vmatprep.subr.bf16.mxu0 %v23100_v54  ;;  %v23163_v30 = vld [vmem:[#allocation9 + $0x2224] ss:$48 sps:$4 sm:$0xff]   ;;  %v23158_v54 = vld [vmem:[#allocation9 + $0x1c20] ss:$48 sps:$4 sm:$0xff]  }
 0x6b7   :  { %16068 = vmatprep.subr.bf16.mxu1 %v23103_v10  ;;  %v23161_v10 = vld [vmem:[#allocation9 + $0x2220] ss:$48 sps:$4 sm:$0xff]  }
 0x6b9   :  { %16028 = vmatpush1.bf16.msra.mxu0 %v23098_v49  ;;  %v23166_v49 = vld [vmem:[#allocation9 + $0x1bc4] ss:$48 sps:$4 sm:$0xff]  }
 0x6ba   :  { %16069 = vmatpush1.bf16.msra.mxu1 %v23101_v18  ;;  %16029 = vmatprep.subr.bf16.mxu0 %v23106_v29  ;;  %v8748_v18 = vrot.slane %v25390_v63, %v25129_v57  ;;  %v23169_v29 = vld [vmem:[#allocation9 + $0x21c4] ss:$48 sps:$4 sm:$0xff]   ;;  %v23173_v63 = vld [vmem:[#allocation9 + $0x2160] ss:$48 sps:$4 sm:$0xff]  }
 0x6bb   :  { %16070 = vmatprep.subr.bf16.mxu1 %v23109_v31  ;;  %v23164_v31 = vld [vmem:[#allocation9 + $0x1bc0] ss:$48 sps:$4 sm:$0xff]  }
 0x6bd   :  { %16030 = vmatpush1.bf16.msra.mxu0 %v23104_v33  ;;  %v23167_v33 = vld [vmem:[#allocation9 + $0x21c0] ss:$48 sps:$4 sm:$0xff]  }
 0x6be   :  { %16071 = vmatpush1.bf16.msra.mxu1 %v23107_v26  ;;  %16031 = vmatprep.subr.bf16.mxu0 %v23112_v42  ;;  %v23172_v26 = vld [vmem:[#allocation9 + $0x1b64] ss:$48 sps:$4 sm:$0xff]   ;;  %v8781_v42 = vmul.f32 %v8748_v18, %v25418_v9  ;;  %v23221_v18 = vld [vmem:[#allocation9 + $0x668] ss:$48 sps:$4 sm:$0xff]  }
 0x6bf   :  { %16072 = vmatprep.subr.bf16.mxu1 %v23115_v25  ;;  %v8822_v25 = vrot.slane %v25392_v50, %v25129_v57  ;;  %v8869_v50 = vmax.f32 %v25428_v61, 0.0  ;;  %v23191_v61 = vld [vmem:[#allocation9 + $0x848] ss:$48 sps:$4 sm:$0xff]  }
 0x6c1   :  { %16032 = vmatpush1.bf16.msra.mxu0 %v23110_v27  ;;  %v23175_v27 = vld [vmem:[#allocation9 + $0x2164] ss:$48 sps:$4 sm:$0xff]  }
 0x6c2   :  { %16073 = vmatpush1.bf16.msra.mxu1 %v23113_v34  ;;  %16033 = vmatprep.subr.bf16.mxu0 %v23118_v32  ;;  %v23170_v34 = vld [vmem:[#allocation9 + $0x1b60] ss:$48 sps:$4 sm:$0xff]   ;;  %v23178_v32 = vld [vmem:[#allocation9 + $0x1b04] ss:$48 sps:$4 sm:$0xff]  }
 0x6c3   :  { %16074 = vmatprep.subr.bf16.mxu1 %v23121_v38  ;;  %v8855_v38 = vadd.f32 %v8822_v25, %v8781_v42  ;;  %v23232_v42 = vld [vmem:[#allocation9 + $0x5ac] ss:$48 sps:$4 sm:$0xff]  }
 0x6c4   :  { %v23235_v25 = vld [vmem:[#allocation9 + $0xbac] ss:$48 sps:$4 sm:$0xff]  }
 0x6c5   :  { %16034 = vmatpush1.bf16.msra.mxu0 %v23116_v52  ;;  %v23181_v52 = vld [vmem:[#allocation9 + $0x2104] ss:$48 sps:$4 sm:$0xff]   ;;  %v8867_v9 = vmax.f32 %v8855_v38, 0.0  ;;  %v23236_v38 = vld [vmem:[#allocation9 + $0x548] ss:$48 sps:$4 sm:$0xff]  }
 0x6c6   :  { %16075 = vmatpush1.bf16.msra.mxu1 %v23119_v22  ;;  %16035 = vmatprep.subr.bf16.mxu0 %v23124_v55  ;;  %v23176_v22 = vld [vmem:[#allocation9 + $0x1b00] ss:$48 sps:$4 sm:$0xff]  }
 0x6c7   :  { %16076 = vmatprep.subr.bf16.mxu1 %v23127_v37  ;;  %v23179_v55 = vld [vmem:[#allocation9 + $0x2100] ss:$48 sps:$4 sm:$0xff]   ;;  %v23184_v37 = vld [vmem:[#allocation9 + $0x2ac] ss:$48 sps:$4 sm:$0xff]  }
 0x6c9   :  { %16036 = vmatpush1.bf16.msra.mxu0 %v23122_v59  ;;  %v23187_v59 = vld [vmem:[#allocation9 + $0x8ac] ss:$48 sps:$4 sm:$0xff]  }
 0x6ca   :  { %16077 = vmatpush1.bf16.msra.mxu1 %v23125_v35  ;;  %16037 = vmatprep.subr.bf16.mxu0 %v23130_v44  ;;  %v23182_v35 = vld [vmem:[#allocation9 + $0x2a8] ss:$48 sps:$4 sm:$0xff]   ;;  %v25460_v44 = vpack.c.bf16 %v8867_v9, %v8867_v9 }
 0x6cb   :  { %16078 = vmatprep.subr.bf16.mxu1 %v23133_v47  ;;  %v23185_v47 = vld [vmem:[#allocation9 + $0x8a8] ss:$48 sps:$4 sm:$0xff]  }
 0x6cc   :  { %v23242_v9 = vld [vmem:[#allocation9 + $0x4e8] ss:$48 sps:$4 sm:$0xff]  }
 0x6cd   :  { %16038 = vmatpush1.bf16.msra.mxu0 %v23128_v11  ;;  %v25462_v11 = vpack.c.bf16 %v8869_v50, %v8869_v50  ;;  %v23250_v50 = vld [vmem:[#allocation9 + $0x48c] ss:$48 sps:$4 sm:$0xff]  }
 0x6ce   :  { %16079 = vmatpush1.bf16.msra.mxu1 %v23131_v62  ;;  %16039 = vmatprep.subr.bf16.mxu0 %v23136_v0  ;;  %v23190_v62 = vld [vmem:[#allocation9 + $0x24c] ss:$48 sps:$4 sm:$0xff]  }
 0x6cf   :  { %16080 = vmatprep.subr.bf16.mxu1 %v23139_v24  ;;  %v23193_v0 = vld [vmem:[#allocation9 + $0x84c] ss:$48 sps:$4 sm:$0xff]   ;;  %v23188_v24 = vld [vmem:[#allocation9 + $0x248] ss:$48 sps:$4 sm:$0xff]  }
 0x6d1   :  { %16040 = vmatpush2.bf16.msra.mxu0 %v23134_v41  ;;  %v23196_v41 = vld [vmem:[#allocation9 + $0x1ec] ss:$48 sps:$4 sm:$0xff]  }
 0x6d2   :  { %16081 = vmatpush2.bf16.msra.mxu1 %v23137_v53  ;;  %16041 = vmatprep.subr.bf16.mxu0 %v23142_v36  ;;  %v23199_v53 = vld [vmem:[#allocation9 + $0x7ec] ss:$48 sps:$4 sm:$0xff]   ;;  %v23194_v36 = vld [vmem:[#allocation9 + $0x1e8] ss:$48 sps:$4 sm:$0xff]  }
 0x6d3   :  { %16082 = vmatprep.subr.bf16.mxu1 %v23145_v40  ;;  %v23197_v40 = vld [vmem:[#allocation9 + $0x7e8] ss:$48 sps:$4 sm:$0xff]  }
 0x6d5   :  { %16042 = vmatpush2.bf16.msra.mxu0 %v23140_v8  ;;  %v23202_v8 = vld [vmem:[#allocation9 + $0x18c] ss:$48 sps:$4 sm:$0xff]  }
 0x6d6   :  { %16083 = vmatpush2.bf16.msra.mxu1 %v23143_v58  ;;  %16043 = vmatprep.subr.bf16.mxu0 %v23148_v14  ;;  %v23205_v58 = vld [vmem:[#allocation9 + $0x78c] ss:$48 sps:$4 sm:$0xff]   ;;  %v23200_v14 = vld [vmem:[#allocation9 + $0x188] ss:$48 sps:$4 sm:$0xff]  }
 0x6d7   :  { %16084 = vmatprep.subr.bf16.mxu1 %v23151_v1  ;;  %v23203_v1 = vld [vmem:[#allocation9 + $0x788] ss:$48 sps:$4 sm:$0xff]  }
 0x6d9   :  { %16044 = vmatpush2.bf16.msra.mxu0 %v23146_v19  ;;  %v23208_v19 = vld [vmem:[#allocation9 + $0x12c] ss:$48 sps:$4 sm:$0xff]  }
 0x6da   :  { %16085 = vmatpush2.bf16.msra.mxu1 %v23149_v2  ;;  %16045 = vmatprep.subr.bf16.mxu0 %v23154_v3  ;;  %v23211_v2 = vld [vmem:[#allocation9 + $0x72c] ss:$48 sps:$4 sm:$0xff]   ;;  %v23206_v3 = vld [vmem:[#allocation9 + $0x128] ss:$48 sps:$4 sm:$0xff]  }
 0x6db   :  { %16086 = vmatprep.subr.bf16.mxu1 %v23157_v6  ;;  %v23209_v6 = vld [vmem:[#allocation9 + $0x728] ss:$48 sps:$4 sm:$0xff]  }
 0x6dd   :  { %16046 = vmatpush2.bf16.msra.mxu0 %v23152_v20  ;;  %v23214_v20 = vld [vmem:[#allocation9 + $0xcc] ss:$48 sps:$4 sm:$0xff]  }
 0x6de   :  { %16087 = vmatpush2.bf16.msra.mxu1 %v23155_v51  ;;  %16047 = vmatprep.subr.bf16.mxu0 %v23160_v21  ;;  %v23217_v51 = vld [vmem:[#allocation9 + $0x6cc] ss:$48 sps:$4 sm:$0xff]   ;;  %v23212_v21 = vld [vmem:[#allocation9 + $0xc8] ss:$48 sps:$4 sm:$0xff]  }
 0x6df   :  { %16088 = vmatprep.subr.bf16.mxu1 %v23163_v30  ;;  %v23215_v30 = vld [vmem:[#allocation9 + $0x6c8] ss:$48 sps:$4 sm:$0xff]  }
 0x6e1   :  { %16048 = vmatpush2.bf16.msra.mxu0 %v23158_v54  ;;  %v23220_v54 = vld [vmem:[#allocation9 + $0x6c] ss:$48 sps:$4 sm:$0xff]  }
 0x6e2   :  { %16089 = vmatpush2.bf16.msra.mxu1 %v23161_v10  ;;  %16049 = vmatprep.subr.bf16.mxu0 %v23166_v49  ;;  %v23223_v10 = vld [vmem:[#allocation9 + $0x66c] ss:$48 sps:$4 sm:$0xff]   ;;  %v23218_v49 = vld [vmem:[#allocation9 + $0x68] ss:$48 sps:$4 sm:$0xff]  }
 0x6e3   :  { %16090 = vmatprep.subr.bf16.mxu1 %v23169_v29  ;;  %v23226_v29 = vld [vmem:[#allocation9 + $0xc] ss:$48 sps:$4 sm:$0xff]  }
 0x6e5   :  { %16050 = vmatpush2.bf16.msra.mxu0 %v23164_v31  ;;  %v23229_v31 = vld [vmem:[#allocation9 + $0x60c] ss:$48 sps:$4 sm:$0xff]  }
 0x6e6   :  { %16091 = vmatpush2.bf16.msra.mxu1 %v23167_v33  ;;  %16051 = vmatprep.subr.bf16.mxu0 %v23172_v26  ;;  %v23224_v33 = vld [vmem:[#allocation9 + $0x8] ss:$48 sps:$4 sm:$0xff]  }
 0x6e7   :  { %16092 = vmatprep.subr.bf16.mxu1 %v23175_v27  ;;  %v23227_v26 = vld [vmem:[#allocation9 + $0x608] ss:$48 sps:$4 sm:$0xff]  }
 0x6e8   :  { %v23230_v27 = vld [vmem:[#allocation9 + $0x5a8] ss:$48 sps:$4 sm:$0xff]  }
 0x6e9   :  { %16052 = vmatpush2.bf16.msra.mxu0 %v23170_v34  ;;  %v23233_v34 = vld [vmem:[#allocation9 + $0xba8] ss:$48 sps:$4 sm:$0xff]  }
 0x6ea   :  { %16093 = vmatpush2.bf16.msra.mxu1 %v23173_v63  ;;  %16053 = vmatprep.subr.bf16.mxu0 %v23178_v32  ;;  %v23238_v63 = vld [vmem:[#allocation9 + $0x54c] ss:$48 sps:$4 sm:$0xff]  }
 0x6eb   :  { %16094 = vmatprep.subr.bf16.mxu1 %v23181_v52  ;;  %v23241_v32 = vld [vmem:[#allocation9 + $0xb4c] ss:$48 sps:$4 sm:$0xff]   ;;  %v23239_v52 = vld [vmem:[#allocation9 + $0xb48] ss:$48 sps:$4 sm:$0xff]  }
 0x6ed   :  { %16054 = vmatpush2.bf16.msra.mxu0 %v23176_v22  ;;  %v23244_v22 = vld [vmem:[#allocation9 + $0x4ec] ss:$48 sps:$4 sm:$0xff]  }
 0x6ee   :  { %16095 = vmatpush2.bf16.msra.mxu1 %v23179_v55  ;;  %16105 = vmatprep.subr.bf16.mxu0 %v23184_v37  ;;  %v23247_v55 = vld [vmem:[#allocation9 + $0xaec] ss:$48 sps:$4 sm:$0xff]   ;;  %v23245_v37 = vld [vmem:[#allocation9 + $0xae8] ss:$48 sps:$4 sm:$0xff]  }
 0x6ef   :  { %16146 = vmatprep.subr.bf16.mxu1 %v23187_v59  ;;  %v23253_v59 = vld [vmem:[#allocation9 + $0xa8c] ss:$48 sps:$4 sm:$0xff]  }
 0x6f0   :  { %16056 = vmatmul.mubr.bf16.vlgmr.msra.gmra.mxu0 %v25460_v44 }
 0x6f1   :  { %16097 = vmatmul.mubr.bf16.vlgmr.msra.gmra.mxu1 %v25462_v11  ;;  %16106 = vmatpush1.bf16.msra.mxu0 %v23182_v35  ;;  %v23248_v35 = vld [vmem:[#allocation9 + $0x488] ss:$48 sps:$4 sm:$0xff]  }
 0x6f2   :  { %16137 = vmatprep.mubr.bf16.mxu0 %v25398_v16  ;;  %16147 = vmatpush1.bf16.msra.mxu1 %v23185_v47  ;;  %v23251_v47 = vld [vmem:[#allocation9 + $0xa88] ss:$48 sps:$4 sm:$0xff]  }
 0x6f3   :  { %16178 = vmatprep.mubr.bf16.mxu1 %v25400_v17  ;;  %16107 = vmatprep.subr.bf16.mxu0 %v23190_v62  ;;  %v23256_v62 = vld [vmem:[#allocation9 + $0x42c] ss:$48 sps:$4 sm:$0xff]  }
 0x6f4   :  { %16148 = vmatprep.subr.bf16.mxu1 %v23193_v0  ;;  %v23259_v0 = vld [vmem:[#allocation9 + $0xa2c] ss:$48 sps:$4 sm:$0xff]  }
 0x6f5   :  { %16108 = vmatpush1.bf16.msra.mxu0 %v23188_v24  ;;  %v23254_v24 = vld [vmem:[#allocation9 + $0x428] ss:$48 sps:$4 sm:$0xff]  }
 0x6f6   :  { %16149 = vmatpush1.bf16.msra.mxu1 %v23191_v61  ;;  %16109 = vmatprep.subr.bf16.mxu0 %v23196_v41  ;;  %v23257_v61 = vld [vmem:[#allocation9 + $0xa28] ss:$48 sps:$4 sm:$0xff]   ;;  %v23262_v41 = vld [vmem:[#allocation9 + $0x3cc] ss:$48 sps:$4 sm:$0xff]  }
 0x6f7   :  { %16150 = vmatprep.subr.bf16.mxu1 %v23199_v53  ;;  %v23265_v53 = vld [vmem:[#allocation9 + $0x9cc] ss:$48 sps:$4 sm:$0xff]  }
 0x6f9   :  { %16110 = vmatpush1.bf16.msra.mxu0 %v23194_v36  ;;  %v23260_v36 = vld [vmem:[#allocation9 + $0x3c8] ss:$48 sps:$4 sm:$0xff]  }
 0x6fa   :  { %16151 = vmatpush1.bf16.msra.mxu1 %v23197_v40  ;;  %16111 = vmatprep.subr.bf16.mxu0 %v23202_v8  ;;  %v23263_v40 = vld [vmem:[#allocation9 + $0x9c8] ss:$48 sps:$4 sm:$0xff]   ;;  %v23268_v8 = vld [vmem:[#allocation9 + $0x36c] ss:$48 sps:$4 sm:$0xff]  }
 0x6fb   :  { %16152 = vmatprep.subr.bf16.mxu1 %v23205_v58  ;;  %v23271_v58 = vld [vmem:[#allocation9 + $0x96c] ss:$48 sps:$4 sm:$0xff]  }
 0x6fd   :  { %16112 = vmatpush1.bf16.msra.mxu0 %v23200_v14  ;;  %v23266_v14 = vld [vmem:[#allocation9 + $0x368] ss:$48 sps:$4 sm:$0xff]  }
 0x6fe   :  { %16153 = vmatpush1.bf16.msra.mxu1 %v23203_v1  ;;  %16113 = vmatprep.subr.bf16.mxu0 %v23208_v19  ;;  %v23269_v1 = vld [vmem:[#allocation9 + $0x968] ss:$48 sps:$4 sm:$0xff]   ;;  %v23274_v19 = vld [vmem:[#allocation9 + $0x30c] ss:$48 sps:$4 sm:$0xff]  }
 0x6ff   :  { %16154 = vmatprep.subr.bf16.mxu1 %v23211_v2  ;;  %v23277_v2 = vld [vmem:[#allocation9 + $0x90c] ss:$48 sps:$4 sm:$0xff]  }
 0x701   :  { %16114 = vmatpush1.bf16.msra.mxu0 %v23206_v3  ;;  %v23272_v3 = vld [vmem:[#allocation9 + $0x308] ss:$48 sps:$4 sm:$0xff]  }
 0x702   :  { %16155 = vmatpush1.bf16.msra.mxu1 %v23209_v6  ;;  %16115 = vmatprep.subr.bf16.mxu0 %v23214_v20  ;;  %v23275_v6 = vld [vmem:[#allocation9 + $0x908] ss:$48 sps:$4 sm:$0xff]   ;;  %v23280_v20 = vld [vmem:[#allocation9 + $0xeac] ss:$48 sps:$4 sm:$0xff]  }
 0x703   :  { %16156 = vmatprep.subr.bf16.mxu1 %v23217_v51  ;;  %v25468_v51 = vld [vmem:[#allocation10] sm:$0xff] }
 0x705   :  { %16116 = vmatpush1.bf16.msra.mxu0 %v23212_v21  ;;  %v23283_v21 = vld [vmem:[#allocation9 + $0x14ac] ss:$48 sps:$4 sm:$0xff]  }
 0x706   :  { %16157 = vmatpush1.bf16.msra.mxu1 %v23215_v30  ;;  %16117 = vmatprep.subr.bf16.mxu0 %v23220_v54  ;;  %v23278_v30 = vld [vmem:[#allocation9 + $0xea8] ss:$48 sps:$4 sm:$0xff]   ;;  %v10042_v54 = vrot.slane %v25468_v51, %v25129_v57 }
 0x707   :  { %16158 = vmatprep.subr.bf16.mxu1 %v23223_v10  ;;  %v23281_v10 = vld [vmem:[#allocation9 + $0x14a8] ss:$48 sps:$4 sm:$0xff]  }
 0x709   :  { %16118 = vmatpush1.bf16.msra.mxu0 %v23218_v49  ;;  %v10046_v49 = vrot.slane %v25468_v51, %v25132_v60 }
 0x70a   :  { %16159 = vmatpush1.bf16.msra.mxu1 %v23221_v18  ;;  %16119 = vmatprep.subr.bf16.mxu0 %v23226_v29  ;;  %v23286_v18 = vld [vmem:[#allocation9 + $0xe4c] ss:$48 sps:$4 sm:$0xff]  }
 0x70b   :  { %16160 = vmatprep.subr.bf16.mxu1 %v23229_v31 }
 0x70d   :  { %16120 = vmatpush1.bf16.msra.mxu0 %v23224_v33  ;;  %v23289_v33 = vld [vmem:[#allocation9 + $0x144c] ss:$48 sps:$4 sm:$0xff]  }
 0x70e   :  { %16161 = vmatpush1.bf16.msra.mxu1 %v23227_v26  ;;  %16121 = vmatprep.subr.bf16.mxu0 %v23232_v42  ;;  %v23284_v42 = vld [vmem:[#allocation9 + $0xe48] ss:$48 sps:$4 sm:$0xff]  }
 0x70f   :  { %16162 = vmatprep.subr.bf16.mxu1 %v23235_v25 }
 0x711   :  { %16122 = vmatpush2.bf16.msra.mxu0 %v23230_v27 }
 0x712   :  { %16163 = vmatpush2.bf16.msra.mxu1 %v23233_v34  ;;  %16123 = vmatprep.subr.bf16.mxu0 %v23238_v63  ;;  %v23287_v34 = vld [vmem:[#allocation9 + $0x1448] ss:$48 sps:$4 sm:$0xff]   ;;  %v23292_v63 = vld [vmem:[#allocation9 + $0xdec] ss:$48 sps:$4 sm:$0xff]  }
 0x713   :  { %16164 = vmatprep.subr.bf16.mxu1 %v23241_v32 }
 0x715   :  { %16124 = vmatpush2.bf16.msra.mxu0 %v23236_v38 }
 0x716   :  { %16165 = vmatpush2.bf16.msra.mxu1 %v23239_v52  ;;  %16125 = vmatprep.subr.bf16.mxu0 %v23244_v22  ;;  %v23295_v52 = vld [vmem:[#allocation9 + $0x13ec] ss:$48 sps:$4 sm:$0xff]  }
 0x717   :  { %16166 = vmatprep.subr.bf16.mxu1 %v23247_v55 }
 0x719   :  { %16126 = vmatpush2.bf16.msra.mxu0 %v23242_v9 }
 0x71a   :  { %16167 = vmatpush2.bf16.msra.mxu1 %v23245_v37  ;;  %16127 = vmatprep.subr.bf16.mxu0 %v23250_v50  ;;  %v23290_v37 = vld [vmem:[#allocation9 + $0xde8] ss:$48 sps:$4 sm:$0xff]  }
 0x71b   :  { %16168 = vmatprep.subr.bf16.mxu1 %v23253_v59 }
 0x71d   :  { %16128 = vmatpush2.bf16.msra.mxu0 %v23248_v35  ;;  %v23293_v35 = vld [vmem:[#allocation9 + $0x13e8] ss:$48 sps:$4 sm:$0xff]  }
 0x71e   :  { %16169 = vmatpush2.bf16.msra.mxu1 %v23251_v47  ;;  %16129 = vmatprep.subr.bf16.mxu0 %v23256_v62  ;;  %v23298_v47 = vld [vmem:[#allocation9 + $0xd8c] ss:$48 sps:$4 sm:$0xff]  }
 0x71f   :  { %16170 = vmatprep.subr.bf16.mxu1 %v23259_v0  ;;  %v23301_v62 = vld [vmem:[#allocation9 + $0x138c] ss:$48 sps:$4 sm:$0xff]   ;;  %v23296_v0 = vld [vmem:[#allocation9 + $0xd88] ss:$48 sps:$4 sm:$0xff]  }
 0x721   :  { %16130 = vmatpush2.bf16.msra.mxu0 %v23254_v24  ;;  %v23299_v24 = vld [vmem:[#allocation9 + $0x1388] ss:$48 sps:$4 sm:$0xff]  }
 0x722   :  { %16171 = vmatpush2.bf16.msra.mxu1 %v23257_v61  ;;  %16131 = vmatprep.subr.bf16.mxu0 %v23262_v41  ;;  %v23304_v61 = vld [vmem:[#allocation9 + $0xd2c] ss:$48 sps:$4 sm:$0xff]  }
 0x723   :  { %16172 = vmatprep.subr.bf16.mxu1 %v23265_v53  ;;  %v23307_v41 = vld [vmem:[#allocation9 + $0x132c] ss:$48 sps:$4 sm:$0xff]   ;;  %v23302_v53 = vld [vmem:[#allocation9 + $0xd28] ss:$48 sps:$4 sm:$0xff]  }
 0x725   :  { %16132 = vmatpush2.bf16.msra.mxu0 %v23260_v36  ;;  %v23305_v36 = vld [vmem:[#allocation9 + $0x1328] ss:$48 sps:$4 sm:$0xff]  }
 0x726   :  { %16173 = vmatpush2.bf16.msra.mxu1 %v23263_v40  ;;  %16133 = vmatprep.subr.bf16.mxu0 %v23268_v8  ;;  %v23310_v40 = vld [vmem:[#allocation9 + $0xccc] ss:$48 sps:$4 sm:$0xff]  }
 0x727   :  { %16174 = vmatprep.subr.bf16.mxu1 %v23271_v58  ;;  %v23313_v8 = vld [vmem:[#allocation9 + $0x12cc] ss:$48 sps:$4 sm:$0xff]   ;;  %v23308_v58 = vld [vmem:[#allocation9 + $0xcc8] ss:$48 sps:$4 sm:$0xff]  }
 0x729   :  { %16134 = vmatpush2.bf16.msra.mxu0 %v23266_v14  ;;  %v23311_v14 = vld [vmem:[#allocation9 + $0x12c8] ss:$48 sps:$4 sm:$0xff]  }
 0x72a   :  { %16175 = vmatpush2.bf16.msra.mxu1 %v23269_v1  ;;  %16135 = vmatprep.subr.bf16.mxu0 %v23274_v19  ;;  %v23316_v1 = vld [vmem:[#allocation9 + $0xc6c] ss:$48 sps:$4 sm:$0xff]  }
 0x72b   :  { %16176 = vmatprep.subr.bf16.mxu1 %v23277_v2  ;;  %v23319_v19 = vld [vmem:[#allocation9 + $0x126c] ss:$48 sps:$4 sm:$0xff]   ;;  %v23314_v2 = vld [vmem:[#allocation9 + $0xc68] ss:$48 sps:$4 sm:$0xff]  }
 0x72d   :  { %16136 = vmatpush2.bf16.msra.mxu0 %v23272_v3  ;;  %v23317_v3 = vld [vmem:[#allocation9 + $0x1268] ss:$48 sps:$4 sm:$0xff]  }
 0x72e   :  { %16177 = vmatpush2.bf16.msra.mxu1 %v23275_v6  ;;  %16187 = vmatprep.subr.bf16.mxu0 %v23280_v20  ;;  %v23322_v6 = vld [vmem:[#allocation9 + $0xc0c] ss:$48 sps:$4 sm:$0xff]  }
 0x72f   :  { %16228 = vmatprep.subr.bf16.mxu1 %v23283_v21  ;;  %v23325_v20 = vld [vmem:[#allocation9 + $0x120c] ss:$48 sps:$4 sm:$0xff]   ;;  %v23320_v21 = vld [vmem:[#allocation9 + $0xc08] ss:$48 sps:$4 sm:$0xff]  }
 0x730   :  { %16138 = vmatmul.mubr.bf16.vlgmr.msra.gmra.mxu0 %v25402_v23  ;;  %v15893_v29 = vpop.f32.mrf.mxu0  ;;  %v15934_v31 = vpop.f32.mrf.mxu1 }
 0x731   :  { %16179 = vmatmul.mubr.bf16.vlgmr.msra.gmra.mxu1 %v25404_v13  ;;  %v15894_v26 = vadd.f32 %v15893_v29, %v10042_v54  ;;  %16188 = vmatpush1.bf16.msra.mxu0 %v23278_v30  ;;  %v23323_v30 = vld [vmem:[#allocation9 + $0x1208] ss:$48 sps:$4 sm:$0xff]   ;;  %v23328_v54 = vld [vmem:[#allocation9 + $0x11ac] ss:$48 sps:$4 sm:$0xff]  }
 0x732   :  { %16219 = vmatprep.mubr.bf16.mxu0 %v25422_v45  ;;  %16229 = vmatpush1.bf16.msra.mxu1 %v23281_v10  ;;  %v15895_v25 = vpop.f32.mrf.mxu0  ;;  %v15936_v27 = vpop.f32.mrf.mxu1  ;;  %v23331_v10 = vld [vmem:[#allocation9 + $0x17ac] ss:$48 sps:$4 sm:$0xff]  }
 0x733   :  { %v25477_v32 = vadd.f32 %v15934_v31, %v15894_v26  ;;  %16260 = vmatprep.mubr.bf16.mxu1 %v25424_v39  ;;  %v15896_v38 = vadd.f32 %v15895_v25, %v10046_v49  ;;  %16189 = vmatprep.subr.bf16.mxu0 %v23286_v18  ;;  %v23326_v49 = vld [vmem:[#allocation9 + $0x11a8] ss:$48 sps:$4 sm:$0xff]   ;;  %v23334_v29 = vld [vmem:[#allocation9 + $0x114c] ss:$48 sps:$4 sm:$0xff]  }
 0x734   :  { %16230 = vmatprep.subr.bf16.mxu1 %v23289_v33  ;;  %v15897_v22 = vpop.f32.mrf.mxu0  ;;  %v15938_v55 = vpop.f32.mrf.mxu1  ;;  %v23329_v18 = vld [vmem:[#allocation9 + $0x17a8] ss:$48 sps:$4 sm:$0xff]   ;;  %v23337_v31 = vld [vmem:[#allocation9 + $0x174c] ss:$48 sps:$4 sm:$0xff]  }
 0x735   :  { %v25480_v9 = vadd.f32 %v15936_v27, %v15896_v38  ;;  %16190 = vmatpush1.bf16.msra.mxu0 %v23284_v42  ;;  %v23332_v33 = vld [vmem:[#allocation9 + $0x1148] ss:$48 sps:$4 sm:$0xff]   ;;  %v23340_v42 = vld [vmem:[#allocation9 + $0x10ec] ss:$48 sps:$4 sm:$0xff]  }
 0x736   :  { %16231 = vmatpush1.bf16.msra.mxu1 %v23287_v34  ;;  %v15898_v50 = vpop.f32.mrf.mxu0  ;;  %v15939_v59 = vpop.f32.mrf.mxu1  ;;  %16191 = vmatprep.subr.bf16.mxu0 %v23292_v63  ;;  %v23335_v26 = vld [vmem:[#allocation9 + $0x1748] ss:$48 sps:$4 sm:$0xff]   ;;  %v23343_v25 = vld [vmem:[#allocation9 + $0x16ec] ss:$48 sps:$4 sm:$0xff]  }
 0x737   :  { %16232 = vmatprep.subr.bf16.mxu1 %v23295_v52  ;;  %v23338_v27 = vld [vmem:[#allocation9 + $0x10e8] ss:$48 sps:$4 sm:$0xff]   ;;  %v23346_v63 = vld [vmem:[#allocation9 + $0x108c] ss:$48 sps:$4 sm:$0xff]  }
 0x738   :  { %v23341_v34 = vld [vmem:[#allocation9 + $0x16e8] ss:$48 sps:$4 sm:$0xff]   ;;  %v23349_v38 = vld [vmem:[#allocation9 + $0x168c] ss:$48 sps:$4 sm:$0xff]  }
 0x739   :  { %16192 = vmatpush1.bf16.msra.mxu0 %v23290_v37  ;;  %v23344_v52 = vld [vmem:[#allocation9 + $0x1088] ss:$48 sps:$4 sm:$0xff]   ;;  %v23352_v55 = vld [vmem:[#allocation9 + $0x102c] ss:$48 sps:$4 sm:$0xff]  }
 0x73a   :  { %16233 = vmatpush1.bf16.msra.mxu1 %v23293_v35  ;;  %16193 = vmatprep.subr.bf16.mxu0 %v23298_v47  ;;  %v23347_v22 = vld [vmem:[#allocation9 + $0x1688] ss:$48 sps:$4 sm:$0xff]   ;;  %v23355_v37 = vld [vmem:[#allocation9 + $0x162c] ss:$48 sps:$4 sm:$0xff]  }
 0x73b   :  { %16234 = vmatprep.subr.bf16.mxu1 %v23301_v62  ;;  %v23350_v50 = vld [vmem:[#allocation9 + $0x1028] ss:$48 sps:$4 sm:$0xff]   ;;  %v23358_v35 = vld [vmem:[#allocation9 + $0xfcc] ss:$48 sps:$4 sm:$0xff]  }
 0x73c   :  { %v23353_v59 = vld [vmem:[#allocation9 + $0x1628] ss:$48 sps:$4 sm:$0xff]   ;;  %v23361_v47 = vld [vmem:[#allocation9 + $0x15cc] ss:$48 sps:$4 sm:$0xff]  }
 0x73d   :  { %16194 = vmatpush1.bf16.msra.mxu0 %v23296_v0  ;;  %v23356_v62 = vld [vmem:[#allocation9 + $0xfc8] ss:$48 sps:$4 sm:$0xff]  }
 0x73e   :  { %16235 = vmatpush1.bf16.msra.mxu1 %v23299_v24  ;;  %16195 = vmatprep.subr.bf16.mxu0 %v23304_v61  ;;  %v23359_v0 = vld [vmem:[#allocation9 + $0x15c8] ss:$48 sps:$4 sm:$0xff]   ;;  %v23364_v24 = vld [vmem:[#allocation9 + $0xf6c] ss:$48 sps:$4 sm:$0xff]  }
 0x73f   :  { %16236 = vmatprep.subr.bf16.mxu1 %v23307_v41  ;;  %v23367_v61 = vld [vmem:[#allocation9 + $0x156c] ss:$48 sps:$4 sm:$0xff]   ;;  %v23362_v41 = vld [vmem:[#allocation9 + $0xf68] ss:$48 sps:$4 sm:$0xff]  }
 0x741   :  { %16196 = vmatpush1.bf16.msra.mxu0 %v23302_v53  ;;  %v23365_v53 = vld [vmem:[#allocation9 + $0x1568] ss:$48 sps:$4 sm:$0xff]  }
 0x742   :  { %16237 = vmatpush1.bf16.msra.mxu1 %v23305_v36  ;;  %16197 = vmatprep.subr.bf16.mxu0 %v23310_v40  ;;  %v23370_v36 = vld [vmem:[#allocation9 + $0xf0c] ss:$48 sps:$4 sm:$0xff]  }
 0x743   :  { %16238 = vmatprep.subr.bf16.mxu1 %v23313_v8  ;;  %v23373_v40 = vld [vmem:[#allocation9 + $0x150c] ss:$48 sps:$4 sm:$0xff]   ;;  %v23368_v8 = vld [vmem:[#allocation9 + $0xf08] ss:$48 sps:$4 sm:$0xff]  }
 0x745   :  { %16198 = vmatpush1.bf16.msra.mxu0 %v23308_v58  ;;  %v23371_v58 = vld [vmem:[#allocation9 + $0x1508] ss:$48 sps:$4 sm:$0xff]  }
 0x746   :  { %16239 = vmatpush1.bf16.msra.mxu1 %v23311_v14  ;;  %16199 = vmatprep.subr.bf16.mxu0 %v23316_v1  ;;  %v23376_v14 = vld [vmem:[#allocation9 + $0x1aac] ss:$48 sps:$4 sm:$0xff]  }
 0x747   :  { %16240 = vmatprep.subr.bf16.mxu1 %v23319_v19  ;;  %v23379_v1 = vld [vmem:[#allocation9 + $0x20ac] ss:$48 sps:$4 sm:$0xff]   ;;  %v23374_v19 = vld [vmem:[#allocation9 + $0x1aa8] ss:$48 sps:$4 sm:$0xff]  }
 0x749   :  { %16200 = vmatpush1.bf16.msra.mxu0 %v23314_v2  ;;  %v23377_v2 = vld [vmem:[#allocation9 + $0x20a8] ss:$48 sps:$4 sm:$0xff]  }
 0x74a   :  { %16241 = vmatpush1.bf16.msra.mxu1 %v23317_v3  ;;  %16201 = vmatprep.subr.bf16.mxu0 %v23322_v6  ;;  %v23382_v3 = vld [vmem:[#allocation9 + $0x1a4c] ss:$48 sps:$4 sm:$0xff]  }
 0x74b   :  { %16242 = vmatprep.subr.bf16.mxu1 %v23325_v20 }
 0x74d   :  { %16202 = vmatpush1.bf16.msra.mxu0 %v23320_v21  ;;  %v23385_v21 = vld [vmem:[#allocation9 + $0x204c] ss:$48 sps:$4 sm:$0xff]  }
 0x74e   :  { %16243 = vmatpush1.bf16.msra.mxu1 %v23323_v30  ;;  %16203 = vmatprep.subr.bf16.mxu0 %v23328_v54  ;;  %v23380_v54 = vld [vmem:[#allocation9 + $0x1a48] ss:$48 sps:$4 sm:$0xff]  }
 0x74f   :  { %16244 = vmatprep.subr.bf16.mxu1 %v23331_v10 }
 0x751   :  { %16204 = vmatpush2.bf16.msra.mxu0 %v23326_v49 }
 0x752   :  { %16245 = vmatpush2.bf16.msra.mxu1 %v23329_v18  ;;  %16205 = vmatprep.subr.bf16.mxu0 %v23334_v29  ;;  %v23383_v18 = vld [vmem:[#allocation9 + $0x2048] ss:$48 sps:$4 sm:$0xff]   ;;  %v23388_v29 = vld [vmem:[#allocation9 + $0x19ec] ss:$48 sps:$4 sm:$0xff]  }
 0x753   :  { %16246 = vmatprep.subr.bf16.mxu1 %v23337_v31 }
 0x755   :  { %16206 = vmatpush2.bf16.msra.mxu0 %v23332_v33 }
 0x756   :  { %16247 = vmatpush2.bf16.msra.mxu1 %v23335_v26  ;;  %16207 = vmatprep.subr.bf16.mxu0 %v23340_v42  ;;  %v23391_v26 = vld [vmem:[#allocation9 + $0x1fec] ss:$48 sps:$4 sm:$0xff]  }
 0x757   :  { %16248 = vmatprep.subr.bf16.mxu1 %v23343_v25 }
 0x759   :  { %16208 = vmatpush2.bf16.msra.mxu0 %v23338_v27  ;;  %v23386_v27 = vld [vmem:[#allocation9 + $0x19e8] ss:$48 sps:$4 sm:$0xff]  }
 0x75a   :  { %16249 = vmatpush2.bf16.msra.mxu1 %v23341_v34  ;;  %16209 = vmatprep.subr.bf16.mxu0 %v23346_v63 }
 0x75b   :  { %16250 = vmatprep.subr.bf16.mxu1 %v23349_v38  ;;  %v23389_v38 = vld [vmem:[#allocation9 + $0x1fe8] ss:$48 sps:$4 sm:$0xff]  }
 0x75d   :  { %16210 = vmatpush2.bf16.msra.mxu0 %v23344_v52  ;;  %v23394_v52 = vld [vmem:[#allocation9 + $0x198c] ss:$48 sps:$4 sm:$0xff]  }
 0x75e   :  { %16251 = vmatpush2.bf16.msra.mxu1 %v23347_v22  ;;  %16211 = vmatprep.subr.bf16.mxu0 %v23352_v55  ;;  %v23397_v22 = vld [vmem:[#allocation9 + $0x1f8c] ss:$48 sps:$4 sm:$0xff]   ;;  %v23392_v55 = vld [vmem:[#allocation9 + $0x1988] ss:$48 sps:$4 sm:$0xff]  }
 0x75f   :  { %16252 = vmatprep.subr.bf16.mxu1 %v23355_v37  ;;  %v23400_v37 = vld [vmem:[#allocation9 + $0x192c] ss:$48 sps:$4 sm:$0xff]  }
 0x761   :  { %16212 = vmatpush2.bf16.msra.mxu0 %v23350_v50  ;;  %v23403_v50 = vld [vmem:[#allocation9 + $0x1f2c] ss:$48 sps:$4 sm:$0xff]  }
 0x762   :  { %16253 = vmatpush2.bf16.msra.mxu1 %v23353_v59  ;;  %16213 = vmatprep.subr.bf16.mxu0 %v23358_v35  ;;  %v23398_v59 = vld [vmem:[#allocation9 + $0x1928] ss:$48 sps:$4 sm:$0xff]  }
 0x763   :  { %16254 = vmatprep.subr.bf16.mxu1 %v23361_v47  ;;  %v23401_v35 = vld [vmem:[#allocation9 + $0x1f28] ss:$48 sps:$4 sm:$0xff]   ;;  %v23406_v47 = vld [vmem:[#allocation9 + $0x18cc] ss:$48 sps:$4 sm:$0xff]  }
 0x765   :  { %16214 = vmatpush2.bf16.msra.mxu0 %v23356_v62  ;;  %v23409_v62 = vld [vmem:[#allocation9 + $0x1ecc] ss:$48 sps:$4 sm:$0xff]  }
 0x766   :  { %16255 = vmatpush2.bf16.msra.mxu1 %v23359_v0  ;;  %16215 = vmatprep.subr.bf16.mxu0 %v23364_v24  ;;  %v23404_v0 = vld [vmem:[#allocation9 + $0x18c8] ss:$48 sps:$4 sm:$0xff]  }
 0x767   :  { %16256 = vmatprep.subr.bf16.mxu1 %v23367_v61  ;;  %v23407_v24 = vld [vmem:[#allocation9 + $0x1ec8] ss:$48 sps:$4 sm:$0xff]   ;;  %v23412_v61 = vld [vmem:[#allocation9 + $0x186c] ss:$48 sps:$4 sm:$0xff]  }
 0x769   :  { %16216 = vmatpush2.bf16.msra.mxu0 %v23362_v41  ;;  %v23415_v41 = vld [vmem:[#allocation9 + $0x1e6c] ss:$48 sps:$4 sm:$0xff]  }
 0x76a   :  { %16257 = vmatpush2.bf16.msra.mxu1 %v23365_v53  ;;  %16217 = vmatprep.subr.bf16.mxu0 %v23370_v36  ;;  %v23410_v53 = vld [vmem:[#allocation9 + $0x1868] ss:$48 sps:$4 sm:$0xff]  }
 0x76b   :  { %16258 = vmatprep.subr.bf16.mxu1 %v23373_v40  ;;  %v23413_v36 = vld [vmem:[#allocation9 + $0x1e68] ss:$48 sps:$4 sm:$0xff]   ;;  %v23418_v40 = vld [vmem:[#allocation9 + $0x180c] ss:$48 sps:$4 sm:$0xff]  }
 0x76d   :  { %16218 = vmatpush2.bf16.msra.mxu0 %v23368_v8  ;;  %v23421_v8 = vld [vmem:[#allocation9 + $0x1e0c] ss:$48 sps:$4 sm:$0xff]  }
 0x76e   :  { %16259 = vmatpush2.bf16.msra.mxu1 %v23371_v58  ;;  %16269 = vmatprep.subr.bf16.mxu0 %v23376_v14  ;;  %v23416_v58 = vld [vmem:[#allocation9 + $0x1808] ss:$48 sps:$4 sm:$0xff]  }
 0x76f   :  { %16310 = vmatprep.subr.bf16.mxu1 %v23379_v1  ;;  %v23419_v14 = vld [vmem:[#allocation9 + $0x1e08] ss:$48 sps:$4 sm:$0xff]   ;;  %v23424_v1 = vld [vmem:[#allocation9 + $0x1dac] ss:$48 sps:$4 sm:$0xff]  }
 0x770   :  { %v15975_v6 = vpop.f32.mrf.mxu0  ;;  %v16016_v20 = vpop.f32.mrf.mxu1  ;;  %16220 = vmatmul.mubr.bf16.vlgmr.msra.gmra.mxu0 %v25442_v5 }
 0x771   :  { %v15976_v30 = vadd.f32 %v15975_v6, %v25477_v32  ;;  %16261 = vmatmul.mubr.bf16.vlgmr.msra.gmra.mxu1 %v25444_v15  ;;  %16270 = vmatpush1.bf16.msra.mxu0 %v23374_v19  ;;  %v23427_v19 = vld [vmem:[#allocation9 + $0x23ac] ss:$48 sps:$4 sm:$0xff]  }
 0x772   :  { %16301 = vmatprep.mubr.bf16.mxu0 %v25446_v7  ;;  %16311 = vmatpush1.bf16.msra.mxu1 %v23377_v2  ;;  %v15977_v10 = vpop.f32.mrf.mxu0  ;;  %v16018_v49 = vpop.f32.mrf.mxu1  ;;  %v23422_v2 = vld [vmem:[#allocation9 + $0x1da8] ss:$48 sps:$4 sm:$0xff]   ;;  %v23430_v6 = vld [vmem:[#allocation9 + $0x1d4c] ss:$48 sps:$4 sm:$0xff]  }
 0x773   :  { %v25486_v31 = vadd.f32 %v16016_v20, %v15976_v30  ;;  %16342 = vmatprep.mubr.bf16.mxu1 %v25450_v28  ;;  %v15978_v33 = vadd.f32 %v15977_v10, %v25480_v9  ;;  %16271 = vmatprep.subr.bf16.mxu0 %v23382_v3  ;;  %v23395_v9 = vld [vmem:[#allocation9 + $0x1f88] ss:$48 sps:$4 sm:$0xff]   ;;  %v23433_v20 = vld [vmem:[#allocation9 + $0x234c] ss:$48 sps:$4 sm:$0xff]  }
 0x774   :  { %v15979_v32 = vpop.f32.mrf.mxu0  ;;  %v16020_v42 = vpop.f32.mrf.mxu1  ;;  %16312 = vmatprep.subr.bf16.mxu1 %v23385_v21  ;;  %v23425_v3 = vld [vmem:[#allocation9 + $0x23a8] ss:$48 sps:$4 sm:$0xff]   ;;  %v23439_v10 = vld [vmem:[#allocation9 + $0x22ec] ss:$48 sps:$4 sm:$0xff]  }
 0x775   :  { %v25490_v25 = vadd.f32 %v16018_v49, %v15978_v33  ;;  %16272 = vmatpush1.bf16.msra.mxu0 %v23380_v54  ;;  %v23428_v21 = vld [vmem:[#allocation9 + $0x1d48] ss:$48 sps:$4 sm:$0xff]   ;;  %v23436_v54 = vld [vmem:[#allocation9 + $0x1cec] ss:$48 sps:$4 sm:$0xff]  }
 0x776   :  { %16313 = vmatpush1.bf16.msra.mxu1 %v23383_v18  ;;  %v15980_v34 = vpop.f32.mrf.mxu0  ;;  %v16021_v63 = vpop.f32.mrf.mxu1  ;;  %16273 = vmatprep.subr.bf16.mxu0 %v23388_v29  ;;  %v23431_v30 = vld [vmem:[#allocation9 + $0x2348] ss:$48 sps:$4 sm:$0xff]   ;;  %v23442_v29 = vld [vmem:[#allocation9 + $0x1c8c] ss:$48 sps:$4 sm:$0xff]  }
 0x777   :  { %16314 = vmatprep.subr.bf16.mxu1 %v23391_v26  ;;  %v23434_v49 = vld [vmem:[#allocation9 + $0x1ce8] ss:$48 sps:$4 sm:$0xff]   ;;  %v23445_v33 = vld [vmem:[#allocation9 + $0x228c] ss:$48 sps:$4 sm:$0xff]  }
 0x778   :  { %v23437_v18 = vld [vmem:[#allocation9 + $0x22e8] ss:$48 sps:$4 sm:$0xff]   ;;  %v23448_v42 = vld [vmem:[#allocation9 + $0x1c2c] ss:$48 sps:$4 sm:$0xff]  }
 0x779   :  { %16274 = vmatpush1.bf16.msra.mxu0 %v23386_v27  ;;  %v23440_v26 = vld [vmem:[#allocation9 + $0x1c88] ss:$48 sps:$4 sm:$0xff]   ;;  %v23451_v27 = vld [vmem:[#allocation9 + $0x222c] ss:$48 sps:$4 sm:$0xff]  }
 0x77a   :  { %16315 = vmatpush1.bf16.msra.mxu1 %v23389_v38  ;;  %16275 = vmatprep.subr.bf16.mxu0 %v23394_v52  ;;  %v23443_v32 = vld [vmem:[#allocation9 + $0x2288] ss:$48 sps:$4 sm:$0xff]   ;;  %v23454_v38 = vld [vmem:[#allocation9 + $0x1bcc] ss:$48 sps:$4 sm:$0xff]  }
 0x77b   :  { %16316 = vmatprep.subr.bf16.mxu1 %v23397_v22  ;;  %v23446_v34 = vld [vmem:[#allocation9 + $0x1c28] ss:$48 sps:$4 sm:$0xff]   ;;  %v23457_v52 = vld [vmem:[#allocation9 + $0x21cc] ss:$48 sps:$4 sm:$0xff]  }
 0x77c   :  { %v23449_v63 = vld [vmem:[#allocation9 + $0x2228] ss:$48 sps:$4 sm:$0xff]  }
 0x77d   :  { %16276 = vmatpush1.bf16.msra.mxu0 %v23392_v55  ;;  %v23452_v22 = vld [vmem:[#allocation9 + $0x1bc8] ss:$48 sps:$4 sm:$0xff]  }
 0x77e   :  { %16317 = vmatpush1.bf16.msra.mxu1 %v23395_v9  ;;  %16277 = vmatprep.subr.bf16.mxu0 %v23400_v37  ;;  %v23455_v55 = vld [vmem:[#allocation9 + $0x21c8] ss:$48 sps:$4 sm:$0xff]   ;;  %v23460_v9 = vld [vmem:[#allocation9 + $0x1b6c] ss:$48 sps:$4 sm:$0xff]  }
 0x77f   :  { %16318 = vmatprep.subr.bf16.mxu1 %v23403_v50  ;;  %v23463_v37 = vld [vmem:[#allocation9 + $0x216c] ss:$48 sps:$4 sm:$0xff]   ;;  %v23458_v50 = vld [vmem:[#allocation9 + $0x1b68] ss:$48 sps:$4 sm:$0xff]  }
 0x781   :  { %16278 = vmatpush1.bf16.msra.mxu0 %v23398_v59  ;;  %v23461_v59 = vld [vmem:[#allocation9 + $0x2168] ss:$48 sps:$4 sm:$0xff]  }
 0x782   :  { %16319 = vmatpush1.bf16.msra.mxu1 %v23401_v35  ;;  %16279 = vmatprep.subr.bf16.mxu0 %v23406_v47  ;;  %v23466_v35 = vld [vmem:[#allocation9 + $0x1b0c] ss:$48 sps:$4 sm:$0xff]  }
 0x783   :  { %16320 = vmatprep.subr.bf16.mxu1 %v23409_v62  ;;  %v23469_v47 = vld [vmem:[#allocation9 + $0x210c] ss:$48 sps:$4 sm:$0xff]   ;;  %v23464_v62 = vld [vmem:[#allocation9 + $0x1b08] ss:$48 sps:$4 sm:$0xff]  }
 0x785   :  { %16280 = vmatpush1.bf16.msra.mxu0 %v23404_v0  ;;  %v23467_v0 = vld [vmem:[#allocation9 + $0x2108] ss:$48 sps:$4 sm:$0xff]  }
 0x786   :  { %16321 = vmatpush1.bf16.msra.mxu1 %v23407_v24  ;;  %16281 = vmatprep.subr.bf16.mxu0 %v23412_v61  ;;  %v23472_v24 = vld [vmem:[#allocation9 + $0x2b4] ss:$48 sps:$4 sm:$0xff]  }
 0x787   :  { %16322 = vmatprep.subr.bf16.mxu1 %v23415_v41  ;;  %v23475_v61 = vld [vmem:[#allocation9 + $0x8b4] ss:$48 sps:$4 sm:$0xff]   ;;  %v23470_v41 = vld [vmem:[#allocation9 + $0x2b0] ss:$48 sps:$4 sm:$0xff]  }
 0x789   :  { %16282 = vmatpush1.bf16.msra.mxu0 %v23410_v53  ;;  %v23473_v53 = vld [vmem:[#allocation9 + $0x8b0] ss:$48 sps:$4 sm:$0xff]  }
 0x78a   :  { %16323 = vmatpush1.bf16.msra.mxu1 %v23413_v36  ;;  %16283 = vmatprep.subr.bf16.mxu0 %v23418_v40  ;;  %v23478_v36 = vld [vmem:[#allocation9 + $0x254] ss:$48 sps:$4 sm:$0xff]  }
 0x78b   :  { %16324 = vmatprep.subr.bf16.mxu1 %v23421_v8  ;;  %v23481_v8 = vld [vmem:[#allocation9 + $0x854] ss:$48 sps:$4 sm:$0xff]  }
 0x78d   :  { %16284 = vmatpush1.bf16.msra.mxu0 %v23416_v58 }
 0x78e   :  { %16325 = vmatpush1.bf16.msra.mxu1 %v23419_v14  ;;  %16285 = vmatprep.subr.bf16.mxu0 %v23424_v1  ;;  %v23476_v1 = vld [vmem:[#allocation9 + $0x250] ss:$48 sps:$4 sm:$0xff]  }
 0x78f   :  { %16326 = vmatprep.subr.bf16.mxu1 %v23427_v19 }
 0x791   :  { %16286 = vmatpush2.bf16.msra.mxu0 %v23422_v2  ;;  %v23479_v2 = vld [vmem:[#allocation9 + $0x850] ss:$48 sps:$4 sm:$0xff]  }
 0x792   :  { %16327 = vmatpush2.bf16.msra.mxu1 %v23425_v3  ;;  %16287 = vmatprep.subr.bf16.mxu0 %v23430_v6  ;;  %v23484_v3 = vld [vmem:[#allocation9 + $0x1f4] ss:$48 sps:$4 sm:$0xff]  }
 0x793   :  { %16328 = vmatprep.subr.bf16.mxu1 %v23433_v20 }
 0x795   :  { %16288 = vmatpush2.bf16.msra.mxu0 %v23428_v21 }
 0x796   :  { %16329 = vmatpush2.bf16.msra.mxu1 %v23431_v30  ;;  %16289 = vmatprep.subr.bf16.mxu0 %v23436_v54 }
 0x797   :  { %16330 = vmatprep.subr.bf16.mxu1 %v23439_v10 }
 0x799   :  { %16290 = vmatpush2.bf16.msra.mxu0 %v23434_v49  ;;  %v23482_v49 = vld [vmem:[#allocation9 + $0x1f0] ss:$48 sps:$4 sm:$0xff]  }
 0x79a   :  { %16331 = vmatpush2.bf16.msra.mxu1 %v23437_v18  ;;  %16291 = vmatprep.subr.bf16.mxu0 %v23442_v29  ;;  %v23485_v29 = vld [vmem:[#allocation9 + $0x7f0] ss:$48 sps:$4 sm:$0xff]  }
 0x79b   :  { %16332 = vmatprep.subr.bf16.mxu1 %v23445_v33  ;;  %v23490_v33 = vld [vmem:[#allocation9 + $0x194] ss:$48 sps:$4 sm:$0xff]  }
 0x79d   :  { %16292 = vmatpush2.bf16.msra.mxu0 %v23440_v26 }
 0x79e   :  { %16333 = vmatpush2.bf16.msra.mxu1 %v23443_v32  ;;  %16293 = vmatprep.subr.bf16.mxu0 %v23448_v42  ;;  %v23493_v32 = vld [vmem:[#allocation9 + $0x794] ss:$48 sps:$4 sm:$0xff]   ;;  %v23491_v42 = vld [vmem:[#allocation9 + $0x790] ss:$48 sps:$4 sm:$0xff]  }
 0x79f   :  { %16334 = vmatprep.subr.bf16.mxu1 %v23451_v27  ;;  %v23496_v27 = vld [vmem:[#allocation9 + $0x134] ss:$48 sps:$4 sm:$0xff]  }
 0x7a1   :  { %16294 = vmatpush2.bf16.msra.mxu0 %v23446_v34  ;;  %v23499_v34 = vld [vmem:[#allocation9 + $0x734] ss:$48 sps:$4 sm:$0xff]  }
 0x7a2   :  { %16335 = vmatpush2.bf16.msra.mxu1 %v23449_v63  ;;  %16295 = vmatprep.subr.bf16.mxu0 %v23454_v38  ;;  %v23494_v63 = vld [vmem:[#allocation9 + $0x130] ss:$48 sps:$4 sm:$0xff]  }
 0x7a3   :  { %16336 = vmatprep.subr.bf16.mxu1 %v23457_v52  ;;  %v23497_v38 = vld [vmem:[#allocation9 + $0x730] ss:$48 sps:$4 sm:$0xff]   ;;  %v23502_v52 = vld [vmem:[#allocation9 + $0xd4] ss:$48 sps:$4 sm:$0xff]  }
 0x7a5   :  { %16296 = vmatpush2.bf16.msra.mxu0 %v23452_v22  ;;  %v23505_v22 = vld [vmem:[#allocation9 + $0x6d4] ss:$48 sps:$4 sm:$0xff]  }
 0x7a6   :  { %16337 = vmatpush2.bf16.msra.mxu1 %v23455_v55  ;;  %16297 = vmatprep.subr.bf16.mxu0 %v23460_v9  ;;  %v23500_v55 = vld [vmem:[#allocation9 + $0xd0] ss:$48 sps:$4 sm:$0xff]  }
 0x7a7   :  { %16338 = vmatprep.subr.bf16.mxu1 %v23463_v37  ;;  %v23503_v9 = vld [vmem:[#allocation9 + $0x6d0] ss:$48 sps:$4 sm:$0xff]   ;;  %v23508_v37 = vld [vmem:[#allocation9 + $0x74] ss:$48 sps:$4 sm:$0xff]  }
 0x7a9   :  { %16298 = vmatpush2.bf16.msra.mxu0 %v23458_v50  ;;  %v23511_v50 = vld [vmem:[#allocation9 + $0x674] ss:$48 sps:$4 sm:$0xff]  }
 0x7aa   :  { %16339 = vmatpush2.bf16.msra.mxu1 %v23461_v59  ;;  %16299 = vmatprep.subr.bf16.mxu0 %v23466_v35  ;;  %v23506_v59 = vld [vmem:[#allocation9 + $0x70] ss:$48 sps:$4 sm:$0xff]  }
 0x7ab   :  { %16340 = vmatprep.subr.bf16.mxu1 %v23469_v47  ;;  %v23509_v35 = vld [vmem:[#allocation9 + $0x670] ss:$48 sps:$4 sm:$0xff]   ;;  %v23514_v47 = vld [vmem:[#allocation9 + $0x14] ss:$48 sps:$4 sm:$0xff]  }
 0x7ad   :  { %16300 = vmatpush2.bf16.msra.mxu0 %v23464_v62  ;;  %v23517_v62 = vld [vmem:[#allocation9 + $0x614] ss:$48 sps:$4 sm:$0xff]  }
 0x7ae   :  { %16341 = vmatpush2.bf16.msra.mxu1 %v23467_v0  ;;  %16351 = vmatprep.subr.bf16.mxu0 %v23472_v24  ;;  %v23512_v0 = vld [vmem:[#allocation9 + $0x10] ss:$48 sps:$4 sm:$0xff]  }
 0x7af   :  { %16392 = vmatprep.subr.bf16.mxu1 %v23475_v61  ;;  %v23515_v24 = vld [vmem:[#allocation9 + $0x610] ss:$48 sps:$4 sm:$0xff]   ;;  %v23520_v61 = vld [vmem:[#allocation9 + $0x5b4] ss:$48 sps:$4 sm:$0xff]  }
 0x7b0   :  { %v16057_v40 = vpop.f32.mrf.mxu0  ;;  %16302 = vmatmul.mubr.bf16.vlgmr.msra.gmra.mxu0 %v25460_v44 }
 0x7b1   :  { %v16058_v58 = vadd.f32 %v16057_v40, %v25486_v31  ;;  %v16098_v14 = vpop.f32.mrf.mxu1  ;;  %16343 = vmatmul.mubr.bf16.vlgmr.msra.gmra.mxu1 %v25462_v11  ;;  %16352 = vmatpush1.bf16.msra.mxu0 %v23470_v41  ;;  %v23487_v31 = vld [vmem:[#allocation9 + $0x7f4] ss:$48 sps:$4 sm:$0xff]  }
 0x7b2   :  { %16383 = vmatprep.mubr.bf16.mxu0 %v25398_v16  ;;  %16393 = vmatpush1.bf16.msra.mxu1 %v23473_v53  ;;  %v16059_v19 = vpop.f32.mrf.mxu0  ;;  %v23523_v41 = vld [vmem:[#allocation9 + $0xbb4] ss:$48 sps:$4 sm:$0xff]   ;;  %v23518_v53 = vld [vmem:[#allocation9 + $0x5b0] ss:$48 sps:$4 sm:$0xff]  }
 0x7b3   :  { %v25496_v6 = vadd.f32 %v16098_v14, %v16058_v58  ;;  %16424 = vmatprep.mubr.bf16.mxu1 %v25400_v17  ;;  %v16060_v20 = vadd.f32 %v16059_v19, %v25490_v25  ;;  %v16100_v21 = vpop.f32.mrf.mxu1  ;;  %16353 = vmatprep.subr.bf16.mxu0 %v23478_v36  ;;  %v23488_v25 = vld [vmem:[#allocation9 + $0x190] ss:$48 sps:$4 sm:$0xff]   ;;  %v23526_v40 = vld [vmem:[#allocation9 + $0x554] ss:$48 sps:$4 sm:$0xff]  }
 0x7b4   :  { %v16061_v30 = vpop.f32.mrf.mxu0  ;;  %16394 = vmatprep.subr.bf16.mxu1 %v23481_v8  ;;  %v23521_v36 = vld [vmem:[#allocation9 + $0xbb0] ss:$48 sps:$4 sm:$0xff]   ;;  %v23529_v8 = vld [vmem:[#allocation9 + $0xb54] ss:$48 sps:$4 sm:$0xff]  }
 0x7b5   :  { %v25500_v54 = vadd.f32 %v16100_v21, %v16060_v20  ;;  %v16102_v10 = vpop.f32.mrf.mxu1  ;;  %16354 = vmatpush1.bf16.msra.mxu0 %v23476_v1  ;;  %v23524_v58 = vld [vmem:[#allocation9 + $0x550] ss:$48 sps:$4 sm:$0xff]   ;;  %v23532_v1 = vld [vmem:[#allocation9 + $0x4f4] ss:$48 sps:$4 sm:$0xff]  }
 0x7b6   :  { %16395 = vmatpush1.bf16.msra.mxu1 %v23479_v2  ;;  %v16062_v18 = vpop.f32.mrf.mxu0  ;;  %16355 = vmatprep.subr.bf16.mxu0 %v23484_v3  ;;  %v23527_v14 = vld [vmem:[#allocation9 + $0xb50] ss:$48 sps:$4 sm:$0xff]   ;;  %v23535_v19 = vld [vmem:[#allocation9 + $0xaf4] ss:$48 sps:$4 sm:$0xff]  }
 0x7b7   :  { %v16103_v26 = vpop.f32.mrf.mxu1  ;;  %16396 = vmatprep.subr.bf16.mxu1 %v23487_v31  ;;  %v23530_v2 = vld [vmem:[#allocation9 + $0x4f0] ss:$48 sps:$4 sm:$0xff]   ;;  %v23538_v20 = vld [vmem:[#allocation9 + $0x494] ss:$48 sps:$4 sm:$0xff]  }
 0x7b8   :  { %v23533_v3 = vld [vmem:[#allocation9 + $0xaf0] ss:$48 sps:$4 sm:$0xff]   ;;  %v23541_v21 = vld [vmem:[#allocation9 + $0xa94] ss:$48 sps:$4 sm:$0xff]  }
 0x7b9   :  { %16356 = vmatpush1.bf16.msra.mxu0 %v23482_v49  ;;  %v23536_v31 = vld [vmem:[#allocation9 + $0x490] ss:$48 sps:$4 sm:$0xff]   ;;  %v23544_v10 = vld [vmem:[#allocation9 + $0x434] ss:$48 sps:$4 sm:$0xff]  }
 0x7ba   :  { %16397 = vmatpush1.bf16.msra.mxu1 %v23485_v29  ;;  %16357 = vmatprep.subr.bf16.mxu0 %v23490_v33  ;;  %v23539_v30 = vld [vmem:[#allocation9 + $0xa90] ss:$48 sps:$4 sm:$0xff]   ;;  %v23547_v49 = vld [vmem:[#allocation9 + $0xa34] ss:$48 sps:$4 sm:$0xff]  }
 0x7bb   :  { %16398 = vmatprep.subr.bf16.mxu1 %v23493_v32  ;;  %v23542_v18 = vld [vmem:[#allocation9 + $0x430] ss:$48 sps:$4 sm:$0xff]   ;;  %v23550_v33 = vld [vmem:[#allocation9 + $0x3d4] ss:$48 sps:$4 sm:$0xff]  }
 0x7bc   :  { %v23545_v29 = vld [vmem:[#allocation9 + $0xa30] ss:$48 sps:$4 sm:$0xff]   ;;  %v23553_v26 = vld [vmem:[#allocation9 + $0x9d4] ss:$48 sps:$4 sm:$0xff]  }
 0x7bd   :  { %16358 = vmatpush1.bf16.msra.mxu0 %v23488_v25  ;;  %v23548_v32 = vld [vmem:[#allocation9 + $0x3d0] ss:$48 sps:$4 sm:$0xff]  }
 0x7be   :  { %16399 = vmatpush1.bf16.msra.mxu1 %v23491_v42  ;;  %16359 = vmatprep.subr.bf16.mxu0 %v23496_v27  ;;  %v23551_v25 = vld [vmem:[#allocation9 + $0x9d0] ss:$48 sps:$4 sm:$0xff]   ;;  %v23556_v42 = vld [vmem:[#allocation9 + $0x374] ss:$48 sps:$4 sm:$0xff]  }
 0x7bf   :  { %16400 = vmatprep.subr.bf16.mxu1 %v23499_v34  ;;  %v23559_v27 = vld [vmem:[#allocation9 + $0x974] ss:$48 sps:$4 sm:$0xff]   ;;  %v23554_v34 = vld [vmem:[#allocation9 + $0x370] ss:$48 sps:$4 sm:$0xff]  }
 0x7c1   :  { %16360 = vmatpush1.bf16.msra.mxu0 %v23494_v63  ;;  %v23557_v63 = vld [vmem:[#allocation9 + $0x970] ss:$48 sps:$4 sm:$0xff]  }
 0x7c2   :  { %16401 = vmatpush1.bf16.msra.mxu1 %v23497_v38  ;;  %16361 = vmatprep.subr.bf16.mxu0 %v23502_v52  ;;  %v23562_v38 = vld [vmem:[#allocation9 + $0x314] ss:$48 sps:$4 sm:$0xff]  }
 0x7c3   :  { %16402 = vmatprep.subr.bf16.mxu1 %v23505_v22  ;;  %v23565_v52 = vld [vmem:[#allocation9 + $0x914] ss:$48 sps:$4 sm:$0xff]   ;;  %v23560_v22 = vld [vmem:[#allocation9 + $0x310] ss:$48 sps:$4 sm:$0xff]  }
 0x7c5   :  { %16362 = vmatpush1.bf16.msra.mxu0 %v23500_v55  ;;  %v23563_v55 = vld [vmem:[#allocation9 + $0x910] ss:$48 sps:$4 sm:$0xff]  }
 0x7c6   :  { %16403 = vmatpush1.bf16.msra.mxu1 %v23503_v9  ;;  %16363 = vmatprep.subr.bf16.mxu0 %v23508_v37  ;;  %v23568_v9 = vld [vmem:[#allocation9 + $0xeb4] ss:$48 sps:$4 sm:$0xff]  }
 0x7c7   :  { %16404 = vmatprep.subr.bf16.mxu1 %v23511_v50  ;;  %v23571_v37 = vld [vmem:[#allocation9 + $0x14b4] ss:$48 sps:$4 sm:$0xff]   ;;  %v10050_v50 = vrot.slane %v25468_v51, %v25165_v43 }
 0x7c9   :  { %16364 = vmatpush1.bf16.msra.mxu0 %v23506_v59  ;;  %v23566_v59 = vld [vmem:[#allocation9 + $0xeb0] ss:$48 sps:$4 sm:$0xff]  }
 0x7ca   :  { %16405 = vmatpush1.bf16.msra.mxu1 %v23509_v35  ;;  %16365 = vmatprep.subr.bf16.mxu0 %v23514_v47  ;;  %v23569_v35 = vld [vmem:[#allocation9 + $0x14b0] ss:$48 sps:$4 sm:$0xff]   ;;  %v10054_v47 = vrot.slane %v25468_v51, %v25168_v48 }
 0x7cb   :  { %16406 = vmatprep.subr.bf16.mxu1 %v23517_v62  ;;  %v23574_v62 = vld [vmem:[#allocation9 + $0xe54] ss:$48 sps:$4 sm:$0xff]  }
 0x7cd   :  { %16366 = vmatpush1.bf16.msra.mxu0 %v23512_v0 }
 0x7ce   :  { %16407 = vmatpush1.bf16.msra.mxu1 %v23515_v24  ;;  %16367 = vmatprep.subr.bf16.mxu0 %v23520_v61  ;;  %v23577_v24 = vld [vmem:[#allocation9 + $0x1454] ss:$48 sps:$4 sm:$0xff]  }
 0x7cf   :  { %16408 = vmatprep.subr.bf16.mxu1 %v23523_v41 }
 0x7d1   :  { %16368 = vmatpush2.bf16.msra.mxu0 %v23518_v53  ;;  %v23572_v53 = vld [vmem:[#allocation9 + $0xe50] ss:$48 sps:$4 sm:$0xff]  }
 0x7d2   :  { %16409 = vmatpush2.bf16.msra.mxu1 %v23521_v36  ;;  %16369 = vmatprep.subr.bf16.mxu0 %v23526_v40  ;;  %v23575_v40 = vld [vmem:[#allocation9 + $0x1450] ss:$48 sps:$4 sm:$0xff]  }
 0x7d3   :  { %16410 = vmatprep.subr.bf16.mxu1 %v23529_v8  ;;  %v23580_v8 = vld [vmem:[#allocation9 + $0xdf4] ss:$48 sps:$4 sm:$0xff]  }
 0x7d5   :  { %16370 = vmatpush2.bf16.msra.mxu0 %v23524_v58 }
 0x7d6   :  { %16411 = vmatpush2.bf16.msra.mxu1 %v23527_v14  ;;  %16371 = vmatprep.subr.bf16.mxu0 %v23532_v1  ;;  %v23583_v1 = vld [vmem:[#allocation9 + $0x13f4] ss:$48 sps:$4 sm:$0xff]  }
 0x7d7   :  { %16412 = vmatprep.subr.bf16.mxu1 %v23535_v19 }
 0x7d9   :  { %16372 = vmatpush2.bf16.msra.mxu0 %v23530_v2 }
 0x7da   :  { %16413 = vmatpush2.bf16.msra.mxu1 %v23533_v3  ;;  %16373 = vmatprep.subr.bf16.mxu0 %v23538_v20  ;;  %v23578_v20 = vld [vmem:[#allocation9 + $0xdf0] ss:$48 sps:$4 sm:$0xff]  }
 0x7db   :  { %16414 = vmatprep.subr.bf16.mxu1 %v23541_v21 }
 0x7dd   :  { %16374 = vmatpush2.bf16.msra.mxu0 %v23536_v31  ;;  %v23581_v31 = vld [vmem:[#allocation9 + $0x13f0] ss:$48 sps:$4 sm:$0xff]  }
 0x7de   :  { %16415 = vmatpush2.bf16.msra.mxu1 %v23539_v30  ;;  %16375 = vmatprep.subr.bf16.mxu0 %v23544_v10  ;;  %v23586_v30 = vld [vmem:[#allocation9 + $0xd94] ss:$48 sps:$4 sm:$0xff]  }
 0x7df   :  { %16416 = vmatprep.subr.bf16.mxu1 %v23547_v49  ;;  %v23589_v49 = vld [vmem:[#allocation9 + $0x1394] ss:$48 sps:$4 sm:$0xff]  }
 0x7e1   :  { %16376 = vmatpush2.bf16.msra.mxu0 %v23542_v18  ;;  %v23584_v18 = vld [vmem:[#allocation9 + $0xd90] ss:$48 sps:$4 sm:$0xff]  }
 0x7e2   :  { %16417 = vmatpush2.bf16.msra.mxu1 %v23545_v29  ;;  %16377 = vmatprep.subr.bf16.mxu0 %v23550_v33  ;;  %v23587_v29 = vld [vmem:[#allocation9 + $0x1390] ss:$48 sps:$4 sm:$0xff]   ;;  %v23592_v33 = vld [vmem:[#allocation9 + $0xd34] ss:$48 sps:$4 sm:$0xff]  }
 0x7e3   :  { %16418 = vmatprep.subr.bf16.mxu1 %v23553_v26  ;;  %v23595_v26 = vld [vmem:[#allocation9 + $0x1334] ss:$48 sps:$4 sm:$0xff]  }
 0x7e5   :  { %16378 = vmatpush2.bf16.msra.mxu0 %v23548_v32  ;;  %v23590_v32 = vld [vmem:[#allocation9 + $0xd30] ss:$48 sps:$4 sm:$0xff]  }
 0x7e6   :  { %16419 = vmatpush2.bf16.msra.mxu1 %v23551_v25  ;;  %16379 = vmatprep.subr.bf16.mxu0 %v23556_v42  ;;  %v23593_v25 = vld [vmem:[#allocation9 + $0x1330] ss:$48 sps:$4 sm:$0xff]   ;;  %v23598_v42 = vld [vmem:[#allocation9 + $0xcd4] ss:$48 sps:$4 sm:$0xff]  }
 0x7e7   :  { %16420 = vmatprep.subr.bf16.mxu1 %v23559_v27  ;;  %v23601_v27 = vld [vmem:[#allocation9 + $0x12d4] ss:$48 sps:$4 sm:$0xff]  }
 0x7e9   :  { %16380 = vmatpush2.bf16.msra.mxu0 %v23554_v34  ;;  %v23596_v34 = vld [vmem:[#allocation9 + $0xcd0] ss:$48 sps:$4 sm:$0xff]  }
 0x7ea   :  { %16421 = vmatpush2.bf16.msra.mxu1 %v23557_v63  ;;  %16381 = vmatprep.subr.bf16.mxu0 %v23562_v38  ;;  %v23599_v63 = vld [vmem:[#allocation9 + $0x12d0] ss:$48 sps:$4 sm:$0xff]   ;;  %v23604_v38 = vld [vmem:[#allocation9 + $0xc74] ss:$48 sps:$4 sm:$0xff]  }
 0x7eb   :  { %16422 = vmatprep.subr.bf16.mxu1 %v23565_v52  ;;  %v23607_v52 = vld [vmem:[#allocation9 + $0x1274] ss:$48 sps:$4 sm:$0xff]  }
 0x7ed   :  { %16382 = vmatpush2.bf16.msra.mxu0 %v23560_v22  ;;  %v23602_v22 = vld [vmem:[#allocation9 + $0xc70] ss:$48 sps:$4 sm:$0xff]  }
 0x7ee   :  { %16423 = vmatpush2.bf16.msra.mxu1 %v23563_v55  ;;  %16433 = vmatprep.subr.bf16.mxu0 %v23568_v9  ;;  %v23605_v55 = vld [vmem:[#allocation9 + $0x1270] ss:$48 sps:$4 sm:$0xff]   ;;  %v23610_v9 = vld [vmem:[#allocation9 + $0xc14] ss:$48 sps:$4 sm:$0xff]  }
 0x7ef   :  { %16474 = vmatprep.subr.bf16.mxu1 %v23571_v37  ;;  %v23613_v37 = vld [vmem:[#allocation9 + $0x1214] ss:$48 sps:$4 sm:$0xff]  }
 0x7f0   :  { %v16139_v0 = vpop.f32.mrf.mxu0  ;;  %16384 = vmatmul.mubr.bf16.vlgmr.msra.gmra.mxu0 %v25402_v23 }
 0x7f1   :  { %v16140_v61 = vadd.f32 %v16139_v0, %v10050_v50  ;;  %v16180_v41 = vpop.f32.mrf.mxu1  ;;  %16425 = vmatmul.mubr.bf16.vlgmr.msra.gmra.mxu1 %v25404_v13  ;;  %16434 = vmatpush1.bf16.msra.mxu0 %v23566_v59  ;;  %v23608_v50 = vld [vmem:[#allocation9 + $0xc10] ss:$48 sps:$4 sm:$0xff]  }
 0x7f2   :  { %16465 = vmatprep.mubr.bf16.mxu0 %v25422_v45  ;;  %16475 = vmatpush1.bf16.msra.mxu1 %v23569_v35  ;;  %v16141_v36 = vpop.f32.mrf.mxu0  ;;  %v23611_v59 = vld [vmem:[#allocation9 + $0x1210] ss:$48 sps:$4 sm:$0xff]   ;;  %v23616_v35 = vld [vmem:[#allocation9 + $0x11b4] ss:$48 sps:$4 sm:$0xff]  }
 0x7f3   :  { %v25509_v58 = vadd.f32 %v16180_v41, %v16140_v61  ;;  %16506 = vmatprep.mubr.bf16.mxu1 %v25424_v39  ;;  %v16142_v51 = vadd.f32 %v16141_v36, %v10054_v47  ;;  %v16182_v14 = vpop.f32.mrf.mxu1  ;;  %16435 = vmatprep.subr.bf16.mxu0 %v23574_v62  ;;  %v23619_v47 = vld [vmem:[#allocation9 + $0x17b4] ss:$48 sps:$4 sm:$0xff]   ;;  %v23614_v62 = vld [vmem:[#allocation9 + $0x11b0] ss:$48 sps:$4 sm:$0xff]  }
 0x7f4   :  { %v16143_v19 = vpop.f32.mrf.mxu0  ;;  %16476 = vmatprep.subr.bf16.mxu1 %v23577_v24  ;;  %v23617_v0 = vld [vmem:[#allocation9 + $0x17b0] ss:$48 sps:$4 sm:$0xff]   ;;  %v23622_v24 = vld [vmem:[#allocation9 + $0x1154] ss:$48 sps:$4 sm:$0xff]  }
 0x7f5   :  { %v25512_v2 = vadd.f32 %v16182_v14, %v16142_v51  ;;  %v16184_v3 = vpop.f32.mrf.mxu1  ;;  %16436 = vmatpush1.bf16.msra.mxu0 %v23572_v53  ;;  %v23625_v61 = vld [vmem:[#allocation9 + $0x1754] ss:$48 sps:$4 sm:$0xff]   ;;  %v23620_v41 = vld [vmem:[#allocation9 + $0x1150] ss:$48 sps:$4 sm:$0xff]  }
 0x7f6   :  { %16477 = vmatpush1.bf16.msra.mxu1 %v23575_v40  ;;  %v16144_v21 = vpop.f32.mrf.mxu0  ;;  %16437 = vmatprep.subr.bf16.mxu0 %v23580_v8  ;;  %v23623_v53 = vld [vmem:[#allocation9 + $0x1750] ss:$48 sps:$4 sm:$0xff]   ;;  %v23628_v36 = vld [vmem:[#allocation9 + $0x10f4] ss:$48 sps:$4 sm:$0xff]  }
 0x7f7   :  { %v16185_v10 = vpop.f32.mrf.mxu1  ;;  %16478 = vmatprep.subr.bf16.mxu1 %v23583_v1  ;;  %v23631_v40 = vld [vmem:[#allocation9 + $0x16f4] ss:$48 sps:$4 sm:$0xff]   ;;  %v23626_v8 = vld [vmem:[#allocation9 + $0x10f0] ss:$48 sps:$4 sm:$0xff]  }
 0x7f8   :  { %v23629_v51 = vld [vmem:[#allocation9 + $0x16f0] ss:$48 sps:$4 sm:$0xff]   ;;  %v23634_v14 = vld [vmem:[#allocation9 + $0x1094] ss:$48 sps:$4 sm:$0xff]  }
 0x7f9   :  { %16438 = vmatpush1.bf16.msra.mxu0 %v23578_v20  ;;  %v23637_v1 = vld [vmem:[#allocation9 + $0x1694] ss:$48 sps:$4 sm:$0xff]   ;;  %v23632_v19 = vld [vmem:[#allocation9 + $0x1090] ss:$48 sps:$4 sm:$0xff]  }
 0x7fa   :  { %16479 = vmatpush1.bf16.msra.mxu1 %v23581_v31  ;;  %16439 = vmatprep.subr.bf16.mxu0 %v23586_v30  ;;  %v23635_v3 = vld [vmem:[#allocation9 + $0x1690] ss:$48 sps:$4 sm:$0xff]   ;;  %v23640_v20 = vld [vmem:[#allocation9 + $0x1034] ss:$48 sps:$4 sm:$0xff]  }
 0x7fb   :  { %16480 = vmatprep.subr.bf16.mxu1 %v23589_v49  ;;  %v23643_v21 = vld [vmem:[#allocation9 + $0x1634] ss:$48 sps:$4 sm:$0xff]   ;;  %v23638_v31 = vld [vmem:[#allocation9 + $0x1030] ss:$48 sps:$4 sm:$0xff]  }
 0x7fc   :  { %v23641_v30 = vld [vmem:[#allocation9 + $0x1630] ss:$48 sps:$4 sm:$0xff]   ;;  %v23646_v10 = vld [vmem:[#allocation9 + $0xfd4] ss:$48 sps:$4 sm:$0xff]  }
 0x7fd   :  { %16440 = vmatpush1.bf16.msra.mxu0 %v23584_v18  ;;  %v23649_v49 = vld [vmem:[#allocation9 + $0x15d4] ss:$48 sps:$4 sm:$0xff]   ;;  %v23644_v18 = vld [vmem:[#allocation9 + $0xfd0] ss:$48 sps:$4 sm:$0xff]  }
 0x7fe   :  { %16481 = vmatpush1.bf16.msra.mxu1 %v23587_v29  ;;  %16441 = vmatprep.subr.bf16.mxu0 %v23592_v33  ;;  %v23647_v29 = vld [vmem:[#allocation9 + $0x15d0] ss:$48 sps:$4 sm:$0xff]   ;;  %v23652_v33 = vld [vmem:[#allocation9 + $0xf74] ss:$48 sps:$4 sm:$0xff]  }
 0x7ff   :  { %16482 = vmatprep.subr.bf16.mxu1 %v23595_v26  ;;  %v23655_v26 = vld [vmem:[#allocation9 + $0x1574] ss:$48 sps:$4 sm:$0xff]  }
 0x801   :  { %16442 = vmatpush1.bf16.msra.mxu0 %v23590_v32  ;;  %v23650_v32 = vld [vmem:[#allocation9 + $0xf70] ss:$48 sps:$4 sm:$0xff]  }
 0x802   :  { %16483 = vmatpush1.bf16.msra.mxu1 %v23593_v25  ;;  %16443 = vmatprep.subr.bf16.mxu0 %v23598_v42  ;;  %v23653_v25 = vld [vmem:[#allocation9 + $0x1570] ss:$48 sps:$4 sm:$0xff]   ;;  %v23658_v42 = vld [vmem:[#allocation9 + $0xf14] ss:$48 sps:$4 sm:$0xff]  }
 0x803   :  { %16484 = vmatprep.subr.bf16.mxu1 %v23601_v27  ;;  %v23661_v27 = vld [vmem:[#allocation9 + $0x1514] ss:$48 sps:$4 sm:$0xff]  }
 0x805   :  { %16444 = vmatpush1.bf16.msra.mxu0 %v23596_v34  ;;  %v23656_v34 = vld [vmem:[#allocation9 + $0xf10] ss:$48 sps:$4 sm:$0xff]  }
 0x806   :  { %16485 = vmatpush1.bf16.msra.mxu1 %v23599_v63  ;;  %16445 = vmatprep.subr.bf16.mxu0 %v23604_v38  ;;  %v23659_v63 = vld [vmem:[#allocation9 + $0x1510] ss:$48 sps:$4 sm:$0xff]   ;;  %v23664_v38 = vld [vmem:[#allocation9 + $0x1ab4] ss:$48 sps:$4 sm:$0xff]  }
 0x807   :  { %16486 = vmatprep.subr.bf16.mxu1 %v23607_v52  ;;  %v23667_v52 = vld [vmem:[#allocation9 + $0x20b4] ss:$48 sps:$4 sm:$0xff]  }
 0x809   :  { %16446 = vmatpush1.bf16.msra.mxu0 %v23602_v22  ;;  %v23662_v22 = vld [vmem:[#allocation9 + $0x1ab0] ss:$48 sps:$4 sm:$0xff]  }
 0x80a   :  { %16487 = vmatpush1.bf16.msra.mxu1 %v23605_v55  ;;  %16447 = vmatprep.subr.bf16.mxu0 %v23610_v9  ;;  %v23665_v55 = vld [vmem:[#allocation9 + $0x20b0] ss:$48 sps:$4 sm:$0xff]   ;;  %v23670_v9 = vld [vmem:[#allocation9 + $0x1a54] ss:$48 sps:$4 sm:$0xff]  }
 0x80b   :  { %16488 = vmatprep.subr.bf16.mxu1 %v23613_v37 }
 0x80d   :  { %16448 = vmatpush1.bf16.msra.mxu0 %v23608_v50  ;;  %v23673_v50 = vld [vmem:[#allocation9 + $0x2054] ss:$48 sps:$4 sm:$0xff]  }
 0x80e   :  { %16489 = vmatpush1.bf16.msra.mxu1 %v23611_v59  ;;  %16449 = vmatprep.subr.bf16.mxu0 %v23616_v35 }
 0x80f   :  { %16490 = vmatprep.subr.bf16.mxu1 %v23619_v47  ;;  %v23668_v47 = vld [vmem:[#allocation9 + $0x1a50] ss:$48 sps:$4 sm:$0xff]  }
 0x811   :  { %16450 = vmatpush2.bf16.msra.mxu0 %v23614_v62 }
 0x812   :  { %16491 = vmatpush2.bf16.msra.mxu1 %v23617_v0  ;;  %16451 = vmatprep.subr.bf16.mxu0 %v23622_v24  ;;  %v23671_v0 = vld [vmem:[#allocation9 + $0x2050] ss:$48 sps:$4 sm:$0xff]   ;;  %v23676_v24 = vld [vmem:[#allocation9 + $0x19f4] ss:$48 sps:$4 sm:$0xff]  }
 0x813   :  { %16492 = vmatprep.subr.bf16.mxu1 %v23625_v61 }
 0x815   :  { %16452 = vmatpush2.bf16.msra.mxu0 %v23620_v41 }
 0x816   :  { %16493 = vmatpush2.bf16.msra.mxu1 %v23623_v53  ;;  %16453 = vmatprep.subr.bf16.mxu0 %v23628_v36 }
 0x817   :  { %16494 = vmatprep.subr.bf16.mxu1 %v23631_v40 }
 0x819   :  { %16454 = vmatpush2.bf16.msra.mxu0 %v23626_v8 }
 0x81a   :  { %16495 = vmatpush2.bf16.msra.mxu1 %v23629_v51  ;;  %16455 = vmatprep.subr.bf16.mxu0 %v23634_v14  ;;  %v23674_v51 = vld [vmem:[#allocation9 + $0x19f0] ss:$48 sps:$4 sm:$0xff]  }
 0x81b   :  { %16496 = vmatprep.subr.bf16.mxu1 %v23637_v1  ;;  %v23677_v1 = vld [vmem:[#allocation9 + $0x1ff0] ss:$48 sps:$4 sm:$0xff]  }
 0x81d   :  { %16456 = vmatpush2.bf16.msra.mxu0 %v23632_v19  ;;  %v23682_v19 = vld [vmem:[#allocation9 + $0x1994] ss:$48 sps:$4 sm:$0xff]  }
 0x81e   :  { %16497 = vmatpush2.bf16.msra.mxu1 %v23635_v3  ;;  %16457 = vmatprep.subr.bf16.mxu0 %v23640_v20  ;;  %v23685_v20 = vld [vmem:[#allocation9 + $0x1f94] ss:$48 sps:$4 sm:$0xff]  }
 0x81f   :  { %16498 = vmatprep.subr.bf16.mxu1 %v23643_v21  ;;  %v23683_v21 = vld [vmem:[#allocation9 + $0x1f90] ss:$48 sps:$4 sm:$0xff]  }
 0x821   :  { %16458 = vmatpush2.bf16.msra.mxu0 %v23638_v31  ;;  %v23688_v31 = vld [vmem:[#allocation9 + $0x1934] ss:$48 sps:$4 sm:$0xff]  }
 0x822   :  { %16499 = vmatpush2.bf16.msra.mxu1 %v23641_v30  ;;  %16459 = vmatprep.subr.bf16.mxu0 %v23646_v10  ;;  %v23691_v30 = vld [vmem:[#allocation9 + $0x1f34] ss:$48 sps:$4 sm:$0xff]   ;;  %v23686_v10 = vld [vmem:[#allocation9 + $0x1930] ss:$48 sps:$4 sm:$0xff]  }
 0x823   :  { %16500 = vmatprep.subr.bf16.mxu1 %v23649_v49  ;;  %v23689_v49 = vld [vmem:[#allocation9 + $0x1f30] ss:$48 sps:$4 sm:$0xff]  }
 0x825   :  { %16460 = vmatpush2.bf16.msra.mxu0 %v23644_v18  ;;  %v23694_v18 = vld [vmem:[#allocation9 + $0x18d4] ss:$48 sps:$4 sm:$0xff]  }
 0x826   :  { %16501 = vmatpush2.bf16.msra.mxu1 %v23647_v29  ;;  %16461 = vmatprep.subr.bf16.mxu0 %v23652_v33  ;;  %v23697_v29 = vld [vmem:[#allocation9 + $0x1ed4] ss:$48 sps:$4 sm:$0xff]   ;;  %v23692_v33 = vld [vmem:[#allocation9 + $0x18d0] ss:$48 sps:$4 sm:$0xff]  }
 0x827   :  { %16502 = vmatprep.subr.bf16.mxu1 %v23655_v26  ;;  %v23695_v26 = vld [vmem:[#allocation9 + $0x1ed0] ss:$48 sps:$4 sm:$0xff]  }
 0x829   :  { %16462 = vmatpush2.bf16.msra.mxu0 %v23650_v32  ;;  %v23700_v32 = vld [vmem:[#allocation9 + $0x1874] ss:$48 sps:$4 sm:$0xff]  }
 0x82a   :  { %16503 = vmatpush2.bf16.msra.mxu1 %v23653_v25  ;;  %16463 = vmatprep.subr.bf16.mxu0 %v23658_v42  ;;  %v23703_v25 = vld [vmem:[#allocation9 + $0x1e74] ss:$48 sps:$4 sm:$0xff]   ;;  %v23698_v42 = vld [vmem:[#allocation9 + $0x1870] ss:$48 sps:$4 sm:$0xff]  }
 0x82b   :  { %16504 = vmatprep.subr.bf16.mxu1 %v23661_v27  ;;  %v23701_v27 = vld [vmem:[#allocation9 + $0x1e70] ss:$48 sps:$4 sm:$0xff]  }
 0x82d   :  { %16464 = vmatpush2.bf16.msra.mxu0 %v23656_v34  ;;  %v23706_v34 = vld [vmem:[#allocation9 + $0x1814] ss:$48 sps:$4 sm:$0xff]  }
 0x82e   :  { %16505 = vmatpush2.bf16.msra.mxu1 %v23659_v63  ;;  %16515 = vmatprep.subr.bf16.mxu0 %v23664_v38  ;;  %v23709_v63 = vld [vmem:[#allocation9 + $0x1e14] ss:$48 sps:$4 sm:$0xff]   ;;  %v23704_v38 = vld [vmem:[#allocation9 + $0x1810] ss:$48 sps:$4 sm:$0xff]  }
 0x82f   :  { %16556 = vmatprep.subr.bf16.mxu1 %v23667_v52  ;;  %v23707_v52 = vld [vmem:[#allocation9 + $0x1e10] ss:$48 sps:$4 sm:$0xff]  }
 0x830   :  { %v16221_v37 = vpop.f32.mrf.mxu0  ;;  %16466 = vmatmul.mubr.bf16.vlgmr.msra.gmra.mxu0 %v25442_v5 }
 0x831   :  { %v16222_v59 = vadd.f32 %v16221_v37, %v25509_v58  ;;  %v16262_v35 = vpop.f32.mrf.mxu1  ;;  %16507 = vmatmul.mubr.bf16.vlgmr.msra.gmra.mxu1 %v25444_v15  ;;  %16516 = vmatpush1.bf16.msra.mxu0 %v23662_v22  ;;  %v23679_v58 = vld [vmem:[#allocation9 + $0x1ff4] ss:$48 sps:$4 sm:$0xff]   ;;  %v23713_v37 = vld [vmem:[#allocation9 + $0x23b0] ss:$48 sps:$4 sm:$0xff]  }
 0x832   :  { %16547 = vmatprep.mubr.bf16.mxu0 %v25446_v7  ;;  %16557 = vmatpush1.bf16.msra.mxu1 %v23665_v55  ;;  %v16223_v62 = vpop.f32.mrf.mxu0  ;;  %v23712_v22 = vld [vmem:[#allocation9 + $0x1db4] ss:$48 sps:$4 sm:$0xff]  }
 0x833   :  { %v25518_v61 = vadd.f32 %v16262_v35, %v16222_v59  ;;  %16588 = vmatprep.mubr.bf16.mxu1 %v25450_v28  ;;  %v16224_v41 = vadd.f32 %v16223_v62, %v25512_v2  ;;  %v16264_v53 = vpop.f32.mrf.mxu1  ;;  %16517 = vmatprep.subr.bf16.mxu0 %v23670_v9  ;;  %v23680_v2 = vld [vmem:[#allocation9 + $0x1990] ss:$48 sps:$4 sm:$0xff]   ;;  %v23715_v55 = vld [vmem:[#allocation9 + $0x23b4] ss:$48 sps:$4 sm:$0xff]  }
 0x834   :  { %v16225_v36 = vpop.f32.mrf.mxu0  ;;  %16558 = vmatprep.subr.bf16.mxu1 %v23673_v50  ;;  %v23710_v9 = vld [vmem:[#allocation9 + $0x1db0] ss:$48 sps:$4 sm:$0xff]   ;;  %v23718_v50 = vld [vmem:[#allocation9 + $0x1d54] ss:$48 sps:$4 sm:$0xff]  }
 0x835   :  { %v25522_v40 = vadd.f32 %v16264_v53, %v16224_v41  ;;  %v16266_v8 = vpop.f32.mrf.mxu1  ;;  %16518 = vmatpush1.bf16.msra.mxu0 %v23668_v47  ;;  %v23721_v59 = vld [vmem:[#allocation9 + $0x2354] ss:$48 sps:$4 sm:$0xff]   ;;  %v23716_v35 = vld [vmem:[#allocation9 + $0x1d50] ss:$48 sps:$4 sm:$0xff]  }
 0x836   :  { %16559 = vmatpush1.bf16.msra.mxu1 %v23671_v0  ;;  %v16226_v14 = vpop.f32.mrf.mxu0  ;;  %16519 = vmatprep.subr.bf16.mxu0 %v23676_v24  ;;  %v23719_v47 = vld [vmem:[#allocation9 + $0x2350] ss:$48 sps:$4 sm:$0xff]   ;;  %v23724_v62 = vld [vmem:[#allocation9 + $0x1cf4] ss:$48 sps:$4 sm:$0xff]  }
 0x837   :  { %v16267_v3 = vpop.f32.mrf.mxu1  ;;  %16560 = vmatprep.subr.bf16.mxu1 %v23679_v58  ;;  %v23727_v0 = vld [vmem:[#allocation9 + $0x22f4] ss:$48 sps:$4 sm:$0xff]   ;;  %v23722_v24 = vld [vmem:[#allocation9 + $0x1cf0] ss:$48 sps:$4 sm:$0xff]  }
 0x838   :  { %v23725_v41 = vld [vmem:[#allocation9 + $0x22f0] ss:$48 sps:$4 sm:$0xff]   ;;  %v23730_v53 = vld [vmem:[#allocation9 + $0x1c94] ss:$48 sps:$4 sm:$0xff]  }
 0x839   :  { %16520 = vmatpush1.bf16.msra.mxu0 %v23674_v51  ;;  %v23733_v58 = vld [vmem:[#allocation9 + $0x2294] ss:$48 sps:$4 sm:$0xff]   ;;  %v23728_v36 = vld [vmem:[#allocation9 + $0x1c90] ss:$48 sps:$4 sm:$0xff]  }
 0x83a   :  { %16561 = vmatpush1.bf16.msra.mxu1 %v23677_v1  ;;  %16521 = vmatprep.subr.bf16.mxu0 %v23682_v19  ;;  %v23731_v8 = vld [vmem:[#allocation9 + $0x2290] ss:$48 sps:$4 sm:$0xff]   ;;  %v23736_v51 = vld [vmem:[#allocation9 + $0x1c34] ss:$48 sps:$4 sm:$0xff]  }
 0x83b   :  { %16562 = vmatprep.subr.bf16.mxu1 %v23685_v20  ;;  %v23739_v14 = vld [vmem:[#allocation9 + $0x2234] ss:$48 sps:$4 sm:$0xff]   ;;  %v23734_v1 = vld [vmem:[#allocation9 + $0x1c30] ss:$48 sps:$4 sm:$0xff]  }
 0x83c   :  { %v23737_v19 = vld [vmem:[#allocation9 + $0x2230] ss:$48 sps:$4 sm:$0xff]   ;;  %v23742_v3 = vld [vmem:[#allocation9 + $0x1bd4] ss:$48 sps:$4 sm:$0xff]  }
 0x83d   :  { %16522 = vmatpush1.bf16.msra.mxu0 %v23680_v2  ;;  %v23745_v20 = vld [vmem:[#allocation9 + $0x21d4] ss:$48 sps:$4 sm:$0xff]   ;;  %v23740_v2 = vld [vmem:[#allocation9 + $0x1bd0] ss:$48 sps:$4 sm:$0xff]  }
 0x83e   :  { %16563 = vmatpush1.bf16.msra.mxu1 %v23683_v21  ;;  %16523 = vmatprep.subr.bf16.mxu0 %v23688_v31  ;;  %v23743_v21 = vld [vmem:[#allocation9 + $0x21d0] ss:$48 sps:$4 sm:$0xff]   ;;  %v23748_v31 = vld [vmem:[#allocation9 + $0x1b74] ss:$48 sps:$4 sm:$0xff]  }
 0x83f   :  { %16564 = vmatprep.subr.bf16.mxu1 %v23691_v30  ;;  %v23751_v30 = vld [vmem:[#allocation9 + $0x2174] ss:$48 sps:$4 sm:$0xff]  }
 0x841   :  { %16524 = vmatpush1.bf16.msra.mxu0 %v23686_v10  ;;  %v23746_v10 = vld [vmem:[#allocation9 + $0x1b70] ss:$48 sps:$4 sm:$0xff]  }
 0x842   :  { %16565 = vmatpush1.bf16.msra.mxu1 %v23689_v49  ;;  %16525 = vmatprep.subr.bf16.mxu0 %v23694_v18  ;;  %v23749_v49 = vld [vmem:[#allocation9 + $0x2170] ss:$48 sps:$4 sm:$0xff]   ;;  %v23754_v18 = vld [vmem:[#allocation9 + $0x1b14] ss:$48 sps:$4 sm:$0xff]  }
 0x843   :  { %16566 = vmatprep.subr.bf16.mxu1 %v23697_v29  ;;  %v23757_v29 = vld [vmem:[#allocation9 + $0x2114] ss:$48 sps:$4 sm:$0xff]  }
 0x845   :  { %16526 = vmatpush1.bf16.msra.mxu0 %v23692_v33  ;;  %v23752_v33 = vld [vmem:[#allocation9 + $0x1b10] ss:$48 sps:$4 sm:$0xff]  }
 0x846   :  { %16567 = vmatpush1.bf16.msra.mxu1 %v23695_v26  ;;  %16527 = vmatprep.subr.bf16.mxu0 %v23700_v32  ;;  %v23755_v26 = vld [vmem:[#allocation9 + $0x2110] ss:$48 sps:$4 sm:$0xff]   ;;  %v23760_v32 = vld [vmem:[#allocation9 + $0x2bc] ss:$48 sps:$4 sm:$0xff]  }
 0x847   :  { %16568 = vmatprep.subr.bf16.mxu1 %v23703_v25  ;;  %v23763_v25 = vld [vmem:[#allocation9 + $0x8bc] ss:$48 sps:$4 sm:$0xff]  }
 0x849   :  { %16528 = vmatpush1.bf16.msra.mxu0 %v23698_v42  ;;  %v23758_v42 = vld [vmem:[#allocation9 + $0x2b8] ss:$48 sps:$4 sm:$0xff]  }
 0x84a   :  { %16569 = vmatpush1.bf16.msra.mxu1 %v23701_v27  ;;  %16529 = vmatprep.subr.bf16.mxu0 %v23706_v34  ;;  %v23761_v27 = vld [vmem:[#allocation9 + $0x8b8] ss:$48 sps:$4 sm:$0xff]   ;;  %v23766_v34 = vld [vmem:[#allocation9 + $0x25c] ss:$48 sps:$4 sm:$0xff]  }
 0x84b   :  { %16570 = vmatprep.subr.bf16.mxu1 %v23709_v63 }
 0x84d   :  { %16530 = vmatpush1.bf16.msra.mxu0 %v23704_v38  ;;  %v23769_v38 = vld [vmem:[#allocation9 + $0x85c] ss:$48 sps:$4 sm:$0xff]  }
 0x84e   :  { %16571 = vmatpush1.bf16.msra.mxu1 %v23707_v52  ;;  %16531 = vmatprep.subr.bf16.mxu0 %v23712_v22 }
 0x84f   :  { %16572 = vmatprep.subr.bf16.mxu1 %v23715_v55  ;;  %v23764_v55 = vld [vmem:[#allocation9 + $0x258] ss:$48 sps:$4 sm:$0xff]  }
 0x851   :  { %16532 = vmatpush2.bf16.msra.mxu0 %v23710_v9 }
 0x852   :  { %16573 = vmatpush2.bf16.msra.mxu1 %v23713_v37  ;;  %16533 = vmatprep.subr.bf16.mxu0 %v23718_v50  ;;  %v23767_v37 = vld [vmem:[#allocation9 + $0x858] ss:$48 sps:$4 sm:$0xff]   ;;  %v23772_v50 = vld [vmem:[#allocation9 + $0x1fc] ss:$48 sps:$4 sm:$0xff]  }
 0x853   :  { %16574 = vmatprep.subr.bf16.mxu1 %v23721_v59 }
 0x855   :  { %16534 = vmatpush2.bf16.msra.mxu0 %v23716_v35 }
 0x856   :  { %16575 = vmatpush2.bf16.msra.mxu1 %v23719_v47  ;;  %16535 = vmatprep.subr.bf16.mxu0 %v23724_v62 }
 0x857   :  { %16576 = vmatprep.subr.bf16.mxu1 %v23727_v0 }
 0x859   :  { %16536 = vmatpush2.bf16.msra.mxu0 %v23722_v24 }
 0x85a   :  { %16577 = vmatpush2.bf16.msra.mxu1 %v23725_v41  ;;  %16537 = vmatprep.subr.bf16.mxu0 %v23730_v53  ;;  %v23770_v41 = vld [vmem:[#allocation9 + $0x1f8] ss:$48 sps:$4 sm:$0xff]  }
 0x85b   :  { %16578 = vmatprep.subr.bf16.mxu1 %v23733_v58  ;;  %v23773_v58 = vld [vmem:[#allocation9 + $0x7f8] ss:$48 sps:$4 sm:$0xff]  }
 0x85d   :  { %16538 = vmatpush2.bf16.msra.mxu0 %v23728_v36  ;;  %v23778_v36 = vld [vmem:[#allocation9 + $0x19c] ss:$48 sps:$4 sm:$0xff]  }
 0x85e   :  { %16579 = vmatpush2.bf16.msra.mxu1 %v23731_v8  ;;  %16539 = vmatprep.subr.bf16.mxu0 %v23736_v51  ;;  %v23781_v51 = vld [vmem:[#allocation9 + $0x79c] ss:$48 sps:$4 sm:$0xff]  }
 0x85f   :  { %16580 = vmatprep.subr.bf16.mxu1 %v23739_v14  ;;  %v23779_v14 = vld [vmem:[#allocation9 + $0x798] ss:$48 sps:$4 sm:$0xff]  }
 0x861   :  { %16540 = vmatpush2.bf16.msra.mxu0 %v23734_v1  ;;  %v23784_v1 = vld [vmem:[#allocation9 + $0x13c] ss:$48 sps:$4 sm:$0xff]  }
 0x862   :  { %16581 = vmatpush2.bf16.msra.mxu1 %v23737_v19  ;;  %16541 = vmatprep.subr.bf16.mxu0 %v23742_v3  ;;  %v23787_v19 = vld [vmem:[#allocation9 + $0x73c] ss:$48 sps:$4 sm:$0xff]   ;;  %v23782_v3 = vld [vmem:[#allocation9 + $0x138] ss:$48 sps:$4 sm:$0xff]  }
 0x863   :  { %16582 = vmatprep.subr.bf16.mxu1 %v23745_v20  ;;  %v23785_v20 = vld [vmem:[#allocation9 + $0x738] ss:$48 sps:$4 sm:$0xff]  }
 0x865   :  { %16542 = vmatpush2.bf16.msra.mxu0 %v23740_v2  ;;  %v23790_v2 = vld [vmem:[#allocation9 + $0xdc] ss:$48 sps:$4 sm:$0xff]  }
 0x866   :  { %16583 = vmatpush2.bf16.msra.mxu1 %v23743_v21  ;;  %16543 = vmatprep.subr.bf16.mxu0 %v23748_v31  ;;  %v23793_v21 = vld [vmem:[#allocation9 + $0x6dc] ss:$48 sps:$4 sm:$0xff]   ;;  %v23788_v31 = vld [vmem:[#allocation9 + $0xd8] ss:$48 sps:$4 sm:$0xff]  }
 0x867   :  { %16584 = vmatprep.subr.bf16.mxu1 %v23751_v30  ;;  %v23791_v30 = vld [vmem:[#allocation9 + $0x6d8] ss:$48 sps:$4 sm:$0xff]  }
 0x869   :  { %16544 = vmatpush2.bf16.msra.mxu0 %v23746_v10  ;;  %v23796_v10 = vld [vmem:[#allocation9 + $0x7c] ss:$48 sps:$4 sm:$0xff]  }
 0x86a   :  { %16585 = vmatpush2.bf16.msra.mxu1 %v23749_v49  ;;  %16545 = vmatprep.subr.bf16.mxu0 %v23754_v18  ;;  %v23799_v49 = vld [vmem:[#allocation9 + $0x67c] ss:$48 sps:$4 sm:$0xff]   ;;  %v23794_v18 = vld [vmem:[#allocation9 + $0x78] ss:$48 sps:$4 sm:$0xff]  }
 0x86b   :  { %16586 = vmatprep.subr.bf16.mxu1 %v23757_v29  ;;  %v23797_v29 = vld [vmem:[#allocation9 + $0x678] ss:$48 sps:$4 sm:$0xff]  }
 0x86d   :  { %16546 = vmatpush2.bf16.msra.mxu0 %v23752_v33  ;;  %v23802_v33 = vld [vmem:[#allocation9 + $0x1c] ss:$48 sps:$4 sm:$0xff]  }
 0x86e   :  { %16587 = vmatpush2.bf16.msra.mxu1 %v23755_v26  ;;  %16597 = vmatprep.subr.bf16.mxu0 %v23760_v32  ;;  %v23805_v26 = vld [vmem:[#allocation9 + $0x61c] ss:$48 sps:$4 sm:$0xff]   ;;  %v23800_v32 = vld [vmem:[#allocation9 + $0x18] ss:$48 sps:$4 sm:$0xff]  }
 0x86f   :  { %16638 = vmatprep.subr.bf16.mxu1 %v23763_v25  ;;  %v23803_v25 = vld [vmem:[#allocation9 + $0x618] ss:$48 sps:$4 sm:$0xff]  }
 0x870   :  { %v16303_v63 = vpop.f32.mrf.mxu0  ;;  %16548 = vmatmul.mubr.bf16.vlgmr.msra.gmra.mxu0 %v25460_v44 }
 0x871   :  { %v16304_v52 = vadd.f32 %v16303_v63, %v25518_v61  ;;  %v16344_v22 = vpop.f32.mrf.mxu1  ;;  %16589 = vmatmul.mubr.bf16.vlgmr.msra.gmra.mxu1 %v25462_v11  ;;  %16598 = vmatpush1.bf16.msra.mxu0 %v23758_v42  ;;  %v23775_v61 = vld [vmem:[#allocation9 + $0x7fc] ss:$48 sps:$4 sm:$0xff]   ;;  %v23809_v63 = vld [vmem:[#allocation9 + $0xbb8] ss:$48 sps:$4 sm:$0xff]  }
 0x872   :  { %16629 = vmatprep.mubr.bf16.mxu0 %v25398_v16  ;;  %16639 = vmatpush1.bf16.msra.mxu1 %v23761_v27  ;;  %v16305_v9 = vpop.f32.mrf.mxu0  ;;  %v23808_v42 = vld [vmem:[#allocation9 + $0x5bc] ss:$48 sps:$4 sm:$0xff]  }
 0x873   :  { %v25528_v59 = vadd.f32 %v16344_v22, %v16304_v52  ;;  %16670 = vmatprep.mubr.bf16.mxu1 %v25400_v17  ;;  %v16306_v35 = vadd.f32 %v16305_v9, %v25522_v40  ;;  %v16346_v47 = vpop.f32.mrf.mxu1  ;;  %16599 = vmatprep.subr.bf16.mxu0 %v23766_v34  ;;  %v23776_v40 = vld [vmem:[#allocation9 + $0x198] ss:$48 sps:$4 sm:$0xff]   ;;  %v23811_v27 = vld [vmem:[#allocation9 + $0xbbc] ss:$48 sps:$4 sm:$0xff]  }
 0x874   :  { %v16307_v62 = vpop.f32.mrf.mxu0  ;;  %16640 = vmatprep.subr.bf16.mxu1 %v23769_v38  ;;  %v23806_v34 = vld [vmem:[#allocation9 + $0x5b8] ss:$48 sps:$4 sm:$0xff]   ;;  %v23814_v38 = vld [vmem:[#allocation9 + $0x55c] ss:$48 sps:$4 sm:$0xff]  }
 0x875   :  { %v25532_v0 = vadd.f32 %v16346_v47, %v16306_v35  ;;  %v16348_v24 = vpop.f32.mrf.mxu1  ;;  %16600 = vmatpush1.bf16.msra.mxu0 %v23764_v55  ;;  %v23817_v52 = vld [vmem:[#allocation9 + $0xb5c] ss:$48 sps:$4 sm:$0xff]   ;;  %v23812_v22 = vld [vmem:[#allocation9 + $0x558] ss:$48 sps:$4 sm:$0xff]  }
 0x876   :  { %16641 = vmatpush1.bf16.msra.mxu1 %v23767_v37  ;;  %v16308_v53 = vpop.f32.mrf.mxu0  ;;  %16601 = vmatprep.subr.bf16.mxu0 %v23772_v50  ;;  %v23815_v55 = vld [vmem:[#allocation9 + $0xb58] ss:$48 sps:$4 sm:$0xff]   ;;  %v23820_v9 = vld [vmem:[#allocation9 + $0x4fc] ss:$48 sps:$4 sm:$0xff]  }
 0x877   :  { %v16349_v8 = vpop.f32.mrf.mxu1  ;;  %16642 = vmatprep.subr.bf16.mxu1 %v23775_v61  ;;  %v23823_v37 = vld [vmem:[#allocation9 + $0xafc] ss:$48 sps:$4 sm:$0xff]   ;;  %v23818_v50 = vld [vmem:[#allocation9 + $0x4f8] ss:$48 sps:$4 sm:$0xff]  }
 0x878   :  { %v23821_v35 = vld [vmem:[#allocation9 + $0xaf8] ss:$48 sps:$4 sm:$0xff]   ;;  %v23826_v47 = vld [vmem:[#allocation9 + $0x49c] ss:$48 sps:$4 sm:$0xff]  }
 0x879   :  { %16602 = vmatpush1.bf16.msra.mxu0 %v23770_v41  ;;  %v23829_v61 = vld [vmem:[#allocation9 + $0xa9c] ss:$48 sps:$4 sm:$0xff]   ;;  %v23824_v62 = vld [vmem:[#allocation9 + $0x498] ss:$48 sps:$4 sm:$0xff]  }
 0x87a   :  { %16643 = vmatpush1.bf16.msra.mxu1 %v23773_v58  ;;  %16603 = vmatprep.subr.bf16.mxu0 %v23778_v36  ;;  %v23827_v24 = vld [vmem:[#allocation9 + $0xa98] ss:$48 sps:$4 sm:$0xff]   ;;  %v23832_v41 = vld [vmem:[#allocation9 + $0x43c] ss:$48 sps:$4 sm:$0xff]  }
 0x87b   :  { %16644 = vmatprep.subr.bf16.mxu1 %v23781_v51  ;;  %v23835_v53 = vld [vmem:[#allocation9 + $0xa3c] ss:$48 sps:$4 sm:$0xff]   ;;  %v23830_v58 = vld [vmem:[#allocation9 + $0x438] ss:$48 sps:$4 sm:$0xff]  }
 0x87c   :  { %v23833_v36 = vld [vmem:[#allocation9 + $0xa38] ss:$48 sps:$4 sm:$0xff]   ;;  %v23838_v8 = vld [vmem:[#allocation9 + $0x3dc] ss:$48 sps:$4 sm:$0xff]  }
 0x87d   :  { %16604 = vmatpush1.bf16.msra.mxu0 %v23776_v40  ;;  %v23841_v51 = vld [vmem:[#allocation9 + $0x9dc] ss:$48 sps:$4 sm:$0xff]   ;;  %v23836_v40 = vld [vmem:[#allocation9 + $0x3d8] ss:$48 sps:$4 sm:$0xff]  }
 0x87e   :  { %16645 = vmatpush1.bf16.msra.mxu1 %v23779_v14  ;;  %16605 = vmatprep.subr.bf16.mxu0 %v23784_v1  ;;  %v23839_v14 = vld [vmem:[#allocation9 + $0x9d8] ss:$48 sps:$4 sm:$0xff]   ;;  %v23844_v1 = vld [vmem:[#allocation9 + $0x37c] ss:$48 sps:$4 sm:$0xff]  }
 0x87f   :  { %16646 = vmatprep.subr.bf16.mxu1 %v23787_v19  ;;  %v23847_v19 = vld [vmem:[#allocation9 + $0x97c] ss:$48 sps:$4 sm:$0xff]  }
 0x881   :  { %16606 = vmatpush1.bf16.msra.mxu0 %v23782_v3  ;;  %v23842_v3 = vld [vmem:[#allocation9 + $0x378] ss:$48 sps:$4 sm:$0xff]  }
 0x882   :  { %16647 = vmatpush1.bf16.msra.mxu1 %v23785_v20  ;;  %16607 = vmatprep.subr.bf16.mxu0 %v23790_v2  ;;  %v23845_v20 = vld [vmem:[#allocation9 + $0x978] ss:$48 sps:$4 sm:$0xff]   ;;  %v23850_v2 = vld [vmem:[#allocation9 + $0x31c] ss:$48 sps:$4 sm:$0xff]  }
 0x883   :  { %16648 = vmatprep.subr.bf16.mxu1 %v23793_v21  ;;  %v23853_v21 = vld [vmem:[#allocation9 + $0x91c] ss:$48 sps:$4 sm:$0xff]  }
 0x885   :  { %16608 = vmatpush1.bf16.msra.mxu0 %v23788_v31  ;;  %v23848_v31 = vld [vmem:[#allocation9 + $0x318] ss:$48 sps:$4 sm:$0xff]  }
 0x886   :  { %16649 = vmatpush1.bf16.msra.mxu1 %v23791_v30  ;;  %16609 = vmatprep.subr.bf16.mxu0 %v23796_v10  ;;  %v23851_v30 = vld [vmem:[#allocation9 + $0x918] ss:$48 sps:$4 sm:$0xff]   ;;  %v23856_v10 = vld [vmem:[#allocation9 + $0xebc] ss:$48 sps:$4 sm:$0xff]  }
 0x887   :  { %16650 = vmatprep.subr.bf16.mxu1 %v23799_v49  ;;  %v23859_v49 = vld [vmem:[#allocation9 + $0x14bc] ss:$48 sps:$4 sm:$0xff]  }
 0x889   :  { %16610 = vmatpush1.bf16.msra.mxu0 %v23794_v18  ;;  %v25534_v18 = vld [vmem:[#allocation10] sm:$0xff] }
 0x88a   :  { %16651 = vmatpush1.bf16.msra.mxu1 %v23797_v29  ;;  %16611 = vmatprep.subr.bf16.mxu0 %v23802_v33  ;;  %v10058_v29 = vrot.slane %v25534_v18, %v25201_v4  ;;  %v23854_v33 = vld [vmem:[#allocation9 + $0xeb8] ss:$48 sps:$4 sm:$0xff]  }
 0x88b   :  { %16652 = vmatprep.subr.bf16.mxu1 %v23805_v26  ;;  %v23857_v26 = vld [vmem:[#allocation9 + $0x14b8] ss:$48 sps:$4 sm:$0xff]  }
 0x88d   :  { %16612 = vmatpush1.bf16.msra.mxu0 %v23800_v32  ;;  %v10062_v32 = vrot.slane %v25534_v18, %v25204_v12 }
 0x88e   :  { %16653 = vmatpush1.bf16.msra.mxu1 %v23803_v25  ;;  %16613 = vmatprep.subr.bf16.mxu0 %v23808_v42  ;;  %v23862_v25 = vld [vmem:[#allocation9 + $0xe5c] ss:$48 sps:$4 sm:$0xff]  }
 0x88f   :  { %16654 = vmatprep.subr.bf16.mxu1 %v23811_v27  ;;  %v23865_v27 = vld [vmem:[#allocation9 + $0x145c] ss:$48 sps:$4 sm:$0xff]  }
 0x891   :  { %16614 = vmatpush2.bf16.msra.mxu0 %v23806_v34 }
 0x892   :  { %16655 = vmatpush2.bf16.msra.mxu1 %v23809_v63  ;;  %16615 = vmatprep.subr.bf16.mxu0 %v23814_v38  ;;  %v23860_v38 = vld [vmem:[#allocation9 + $0xe58] ss:$48 sps:$4 sm:$0xff]  }
 0x893   :  { %16656 = vmatprep.subr.bf16.mxu1 %v23817_v52 }
 0x895   :  { %16616 = vmatpush2.bf16.msra.mxu0 %v23812_v22  ;;  %v23863_v22 = vld [vmem:[#allocation9 + $0x1458] ss:$48 sps:$4 sm:$0xff]  }
 0x896   :  { %16657 = vmatpush2.bf16.msra.mxu1 %v23815_v55  ;;  %16617 = vmatprep.subr.bf16.mxu0 %v23820_v9  ;;  %v23868_v55 = vld [vmem:[#allocation9 + $0xdfc] ss:$48 sps:$4 sm:$0xff]  }
 0x897   :  { %16658 = vmatprep.subr.bf16.mxu1 %v23823_v37 }
 0x899   :  { %16618 = vmatpush2.bf16.msra.mxu0 %v23818_v50 }
 0x89a   :  { %16659 = vmatpush2.bf16.msra.mxu1 %v23821_v35  ;;  %16619 = vmatprep.subr.bf16.mxu0 %v23826_v47  ;;  %v23871_v35 = vld [vmem:[#allocation9 + $0x13fc] ss:$48 sps:$4 sm:$0xff]  }
 0x89b   :  { %16660 = vmatprep.subr.bf16.mxu1 %v23829_v61 }
 0x89d   :  { %16620 = vmatpush2.bf16.msra.mxu0 %v23824_v62 }
 0x89e   :  { %16661 = vmatpush2.bf16.msra.mxu1 %v23827_v24  ;;  %16621 = vmatprep.subr.bf16.mxu0 %v23832_v41  ;;  %v23866_v24 = vld [vmem:[#allocation9 + $0xdf8] ss:$48 sps:$4 sm:$0xff]  }
 0x89f   :  { %16662 = vmatprep.subr.bf16.mxu1 %v23835_v53  ;;  %v23869_v53 = vld [vmem:[#allocation9 + $0x13f8] ss:$48 sps:$4 sm:$0xff]  }
 0x8a1   :  { %16622 = vmatpush2.bf16.msra.mxu0 %v23830_v58  ;;  %v23874_v58 = vld [vmem:[#allocation9 + $0xd9c] ss:$48 sps:$4 sm:$0xff]  }
 0x8a2   :  { %16663 = vmatpush2.bf16.msra.mxu1 %v23833_v36  ;;  %16623 = vmatprep.subr.bf16.mxu0 %v23838_v8  ;;  %v23877_v8 = vld [vmem:[#allocation9 + $0x139c] ss:$48 sps:$4 sm:$0xff]  }
 0x8a3   :  { %16664 = vmatprep.subr.bf16.mxu1 %v23841_v51  ;;  %v23872_v51 = vld [vmem:[#allocation9 + $0xd98] ss:$48 sps:$4 sm:$0xff]  }
 0x8a5   :  { %16624 = vmatpush2.bf16.msra.mxu0 %v23836_v40  ;;  %v23875_v40 = vld [vmem:[#allocation9 + $0x1398] ss:$48 sps:$4 sm:$0xff]  }
 0x8a6   :  { %16665 = vmatpush2.bf16.msra.mxu1 %v23839_v14  ;;  %16625 = vmatprep.subr.bf16.mxu0 %v23844_v1  ;;  %v23880_v14 = vld [vmem:[#allocation9 + $0xd3c] ss:$48 sps:$4 sm:$0xff]  }
 0x8a7   :  { %16666 = vmatprep.subr.bf16.mxu1 %v23847_v19  ;;  %v23883_v1 = vld [vmem:[#allocation9 + $0x133c] ss:$48 sps:$4 sm:$0xff]   ;;  %v23878_v19 = vld [vmem:[#allocation9 + $0xd38] ss:$48 sps:$4 sm:$0xff]  }
 0x8a9   :  { %16626 = vmatpush2.bf16.msra.mxu0 %v23842_v3  ;;  %v23881_v3 = vld [vmem:[#allocation9 + $0x1338] ss:$48 sps:$4 sm:$0xff]  }
 0x8aa   :  { %16667 = vmatpush2.bf16.msra.mxu1 %v23845_v20  ;;  %16627 = vmatprep.subr.bf16.mxu0 %v23850_v2  ;;  %v23886_v20 = vld [vmem:[#allocation9 + $0xcdc] ss:$48 sps:$4 sm:$0xff]  }
 0x8ab   :  { %16668 = vmatprep.subr.bf16.mxu1 %v23853_v21  ;;  %v23889_v2 = vld [vmem:[#allocation9 + $0x12dc] ss:$48 sps:$4 sm:$0xff]   ;;  %v23884_v21 = vld [vmem:[#allocation9 + $0xcd8] ss:$48 sps:$4 sm:$0xff]  }
 0x8ad   :  { %16628 = vmatpush2.bf16.msra.mxu0 %v23848_v31  ;;  %v23887_v31 = vld [vmem:[#allocation9 + $0x12d8] ss:$48 sps:$4 sm:$0xff]  }
 0x8ae   :  { %16669 = vmatpush2.bf16.msra.mxu1 %v23851_v30  ;;  %16679 = vmatprep.subr.bf16.mxu0 %v23856_v10  ;;  %v23892_v30 = vld [vmem:[#allocation9 + $0xc7c] ss:$48 sps:$4 sm:$0xff]  }
 0x8af   :  { %16720 = vmatprep.subr.bf16.mxu1 %v23859_v49  ;;  %v23895_v10 = vld [vmem:[#allocation9 + $0x127c] ss:$48 sps:$4 sm:$0xff]   ;;  %v23890_v49 = vld [vmem:[#allocation9 + $0xc78] ss:$48 sps:$4 sm:$0xff]  }
 0x8b0   :  { %v16385_v42 = vpop.f32.mrf.mxu0  ;;  %16630 = vmatmul.mubr.bf16.vlgmr.msra.gmra.mxu0 %v25402_v23 }
 0x8b1   :  { %v16386_v34 = vadd.f32 %v16385_v42, %v10058_v29  ;;  %v16426_v63 = vpop.f32.mrf.mxu1  ;;  %16671 = vmatmul.mubr.bf16.vlgmr.msra.gmra.mxu1 %v25404_v13  ;;  %16680 = vmatpush1.bf16.msra.mxu0 %v23854_v33  ;;  %v23893_v29 = vld [vmem:[#allocation9 + $0x1278] ss:$48 sps:$4 sm:$0xff]   ;;  %v23898_v33 = vld [vmem:[#allocation9 + $0xc1c] ss:$48 sps:$4 sm:$0xff]  }
 0x8b2   :  { %16711 = vmatprep.mubr.bf16.mxu0 %v25422_v45  ;;  %16721 = vmatpush1.bf16.msra.mxu1 %v23857_v26  ;;  %v16387_v52 = vpop.f32.mrf.mxu0  ;;  %v23901_v26 = vld [vmem:[#allocation9 + $0x121c] ss:$48 sps:$4 sm:$0xff]  }
 0x8b3   :  { %v25543_v9 = vadd.f32 %v16426_v63, %v16386_v34  ;;  %16752 = vmatprep.mubr.bf16.mxu1 %v25424_v39  ;;  %v16388_v37 = vadd.f32 %v16387_v52, %v10062_v32  ;;  %v16428_v50 = vpop.f32.mrf.mxu1  ;;  %16681 = vmatprep.subr.bf16.mxu0 %v23862_v25  ;;  %v23896_v32 = vld [vmem:[#allocation9 + $0xc18] ss:$48 sps:$4 sm:$0xff]   ;;  %v23904_v42 = vld [vmem:[#allocation9 + $0x11bc] ss:$48 sps:$4 sm:$0xff]  }
 0x8b4   :  { %v16389_v47 = vpop.f32.mrf.mxu0  ;;  %16722 = vmatprep.subr.bf16.mxu1 %v23865_v27  ;;  %v23899_v25 = vld [vmem:[#allocation9 + $0x1218] ss:$48 sps:$4 sm:$0xff]   ;;  %v23907_v27 = vld [vmem:[#allocation9 + $0x17bc] ss:$48 sps:$4 sm:$0xff]  }
 0x8b5   :  { %v25546_v61 = vadd.f32 %v16428_v50, %v16388_v37  ;;  %v16430_v62 = vpop.f32.mrf.mxu1  ;;  %16682 = vmatpush1.bf16.msra.mxu0 %v23860_v38  ;;  %v23902_v34 = vld [vmem:[#allocation9 + $0x11b8] ss:$48 sps:$4 sm:$0xff]   ;;  %v23910_v38 = vld [vmem:[#allocation9 + $0x115c] ss:$48 sps:$4 sm:$0xff]  }
 0x8b6   :  { %16723 = vmatpush1.bf16.msra.mxu1 %v23863_v22  ;;  %v16390_v41 = vpop.f32.mrf.mxu0  ;;  %16683 = vmatprep.subr.bf16.mxu0 %v23868_v55  ;;  %v23905_v63 = vld [vmem:[#allocation9 + $0x17b8] ss:$48 sps:$4 sm:$0xff]   ;;  %v23913_v52 = vld [vmem:[#allocation9 + $0x175c] ss:$48 sps:$4 sm:$0xff]  }
 0x8b7   :  { %v16431_v36 = vpop.f32.mrf.mxu1  ;;  %16724 = vmatprep.subr.bf16.mxu1 %v23871_v35  ;;  %v23908_v22 = vld [vmem:[#allocation9 + $0x1158] ss:$48 sps:$4 sm:$0xff]   ;;  %v23916_v37 = vld [vmem:[#allocation9 + $0x10fc] ss:$48 sps:$4 sm:$0xff]  }
 0x8b8   :  { %v23911_v55 = vld [vmem:[#allocation9 + $0x1758] ss:$48 sps:$4 sm:$0xff]   ;;  %v23919_v50 = vld [vmem:[#allocation9 + $0x16fc] ss:$48 sps:$4 sm:$0xff]  }
 0x8b9   :  { %16684 = vmatpush1.bf16.msra.mxu0 %v23866_v24  ;;  %v23914_v35 = vld [vmem:[#allocation9 + $0x10f8] ss:$48 sps:$4 sm:$0xff]   ;;  %v23922_v62 = vld [vmem:[#allocation9 + $0x109c] ss:$48 sps:$4 sm:$0xff]  }
 0x8ba   :  { %16725 = vmatpush1.bf16.msra.mxu1 %v23869_v53  ;;  %16685 = vmatprep.subr.bf16.mxu0 %v23874_v58  ;;  %v23917_v47 = vld [vmem:[#allocation9 + $0x16f8] ss:$48 sps:$4 sm:$0xff]   ;;  %v23925_v24 = vld [vmem:[#allocation9 + $0x169c] ss:$48 sps:$4 sm:$0xff]  }
 0x8bb   :  { %16726 = vmatprep.subr.bf16.mxu1 %v23877_v8  ;;  %v23920_v41 = vld [vmem:[#allocation9 + $0x1098] ss:$48 sps:$4 sm:$0xff]   ;;  %v23928_v58 = vld [vmem:[#allocation9 + $0x103c] ss:$48 sps:$4 sm:$0xff]  }
 0x8bc   :  { %v23923_v53 = vld [vmem:[#allocation9 + $0x1698] ss:$48 sps:$4 sm:$0xff]   ;;  %v23931_v36 = vld [vmem:[#allocation9 + $0x163c] ss:$48 sps:$4 sm:$0xff]  }
 0x8bd   :  { %16686 = vmatpush1.bf16.msra.mxu0 %v23872_v51  ;;  %v23926_v8 = vld [vmem:[#allocation9 + $0x1038] ss:$48 sps:$4 sm:$0xff]  }
 0x8be   :  { %16727 = vmatpush1.bf16.msra.mxu1 %v23875_v40  ;;  %16687 = vmatprep.subr.bf16.mxu0 %v23880_v14  ;;  %v23929_v51 = vld [vmem:[#allocation9 + $0x1638] ss:$48 sps:$4 sm:$0xff]   ;;  %v23934_v40 = vld [vmem:[#allocation9 + $0xfdc] ss:$48 sps:$4 sm:$0xff]  }
 0x8bf   :  { %16728 = vmatprep.subr.bf16.mxu1 %v23883_v1  ;;  %v23937_v14 = vld [vmem:[#allocation9 + $0x15dc] ss:$48 sps:$4 sm:$0xff]   ;;  %v23932_v1 = vld [vmem:[#allocation9 + $0xfd8] ss:$48 sps:$4 sm:$0xff]  }
 0x8c1   :  { %16688 = vmatpush1.bf16.msra.mxu0 %v23878_v19  ;;  %v23935_v19 = vld [vmem:[#allocation9 + $0x15d8] ss:$48 sps:$4 sm:$0xff]  }
 0x8c2   :  { %16729 = vmatpush1.bf16.msra.mxu1 %v23881_v3  ;;  %16689 = vmatprep.subr.bf16.mxu0 %v23886_v20  ;;  %v23940_v3 = vld [vmem:[#allocation9 + $0xf7c] ss:$48 sps:$4 sm:$0xff]  }
 0x8c3   :  { %16730 = vmatprep.subr.bf16.mxu1 %v23889_v2  ;;  %v23943_v20 = vld [vmem:[#allocation9 + $0x157c] ss:$48 sps:$4 sm:$0xff]   ;;  %v23938_v2 = vld [vmem:[#allocation9 + $0xf78] ss:$48 sps:$4 sm:$0xff]  }
 0x8c5   :  { %16690 = vmatpush1.bf16.msra.mxu0 %v23884_v21  ;;  %v23941_v21 = vld [vmem:[#allocation9 + $0x1578] ss:$48 sps:$4 sm:$0xff]  }
 0x8c6   :  { %16731 = vmatpush1.bf16.msra.mxu1 %v23887_v31  ;;  %16691 = vmatprep.subr.bf16.mxu0 %v23892_v30  ;;  %v23946_v31 = vld [vmem:[#allocation9 + $0xf1c] ss:$48 sps:$4 sm:$0xff]  }
 0x8c7   :  { %16732 = vmatprep.subr.bf16.mxu1 %v23895_v10  ;;  %v23949_v30 = vld [vmem:[#allocation9 + $0x151c] ss:$48 sps:$4 sm:$0xff]   ;;  %v23944_v10 = vld [vmem:[#allocation9 + $0xf18] ss:$48 sps:$4 sm:$0xff]  }
 0x8c9   :  { %16692 = vmatpush1.bf16.msra.mxu0 %v23890_v49  ;;  %v23947_v49 = vld [vmem:[#allocation9 + $0x1518] ss:$48 sps:$4 sm:$0xff]  }
 0x8ca   :  { %16733 = vmatpush1.bf16.msra.mxu1 %v23893_v29  ;;  %16693 = vmatprep.subr.bf16.mxu0 %v23898_v33  ;;  %v23952_v29 = vld [vmem:[#allocation9 + $0x1abc] ss:$48 sps:$4 sm:$0xff]  }
 0x8cb   :  { %16734 = vmatprep.subr.bf16.mxu1 %v23901_v26  ;;  %v23955_v33 = vld [vmem:[#allocation9 + $0x20bc] ss:$48 sps:$4 sm:$0xff]   ;;  %v23950_v26 = vld [vmem:[#allocation9 + $0x1ab8] ss:$48 sps:$4 sm:$0xff]  }
 0x8cd   :  { %16694 = vmatpush1.bf16.msra.mxu0 %v23896_v32  ;;  %v23953_v32 = vld [vmem:[#allocation9 + $0x20b8] ss:$48 sps:$4 sm:$0xff]  }
 0x8ce   :  { %16735 = vmatpush1.bf16.msra.mxu1 %v23899_v25  ;;  %16695 = vmatprep.subr.bf16.mxu0 %v23904_v42  ;;  %v23958_v25 = vld [vmem:[#allocation9 + $0x1a5c] ss:$48 sps:$4 sm:$0xff]  }
 0x8cf   :  { %16736 = vmatprep.subr.bf16.mxu1 %v23907_v27  ;;  %v23961_v27 = vld [vmem:[#allocation9 + $0x205c] ss:$48 sps:$4 sm:$0xff]  }
 0x8d1   :  { %16696 = vmatpush2.bf16.msra.mxu0 %v23902_v34 }
 0x8d2   :  { %16737 = vmatpush2.bf16.msra.mxu1 %v23905_v63  ;;  %16697 = vmatprep.subr.bf16.mxu0 %v23910_v38  ;;  %v23956_v38 = vld [vmem:[#allocation9 + $0x1a58] ss:$48 sps:$4 sm:$0xff]  }
 0x8d3   :  { %16738 = vmatprep.subr.bf16.mxu1 %v23913_v52 }
 0x8d5   :  { %16698 = vmatpush2.bf16.msra.mxu0 %v23908_v22  ;;  %v23959_v22 = vld [vmem:[#allocation9 + $0x2058] ss:$48 sps:$4 sm:$0xff]  }
 0x8d6   :  { %16739 = vmatpush2.bf16.msra.mxu1 %v23911_v55  ;;  %16699 = vmatprep.subr.bf16.mxu0 %v23916_v37  ;;  %v23964_v55 = vld [vmem:[#allocation9 + $0x19fc] ss:$48 sps:$4 sm:$0xff]  }
 0x8d7   :  { %16740 = vmatprep.subr.bf16.mxu1 %v23919_v50 }
 0x8d9   :  { %16700 = vmatpush2.bf16.msra.mxu0 %v23914_v35 }
 0x8da   :  { %16741 = vmatpush2.bf16.msra.mxu1 %v23917_v47  ;;  %16701 = vmatprep.subr.bf16.mxu0 %v23922_v62 }
 0x8db   :  { %16742 = vmatprep.subr.bf16.mxu1 %v23925_v24 }
 0x8dd   :  { %16702 = vmatpush2.bf16.msra.mxu0 %v23920_v41  ;;  %v23962_v41 = vld [vmem:[#allocation9 + $0x19f8] ss:$48 sps:$4 sm:$0xff]  }
 0x8de   :  { %16743 = vmatpush2.bf16.msra.mxu1 %v23923_v53  ;;  %16703 = vmatprep.subr.bf16.mxu0 %v23928_v58  ;;  %v23965_v58 = vld [vmem:[#allocation9 + $0x1ff8] ss:$48 sps:$4 sm:$0xff]  }
 0x8df   :  { %16744 = vmatprep.subr.bf16.mxu1 %v23931_v36  ;;  %v23970_v36 = vld [vmem:[#allocation9 + $0x199c] ss:$48 sps:$4 sm:$0xff]  }
 0x8e1   :  { %16704 = vmatpush2.bf16.msra.mxu0 %v23926_v8 }
 0x8e2   :  { %16745 = vmatpush2.bf16.msra.mxu1 %v23929_v51  ;;  %16705 = vmatprep.subr.bf16.mxu0 %v23934_v40  ;;  %v23973_v51 = vld [vmem:[#allocation9 + $0x1f9c] ss:$48 sps:$4 sm:$0xff]   ;;  %v23971_v40 = vld [vmem:[#allocation9 + $0x1f98] ss:$48 sps:$4 sm:$0xff]  }
 0x8e3   :  { %16746 = vmatprep.subr.bf16.mxu1 %v23937_v14  ;;  %v23976_v14 = vld [vmem:[#allocation9 + $0x193c] ss:$48 sps:$4 sm:$0xff]  }
 0x8e5   :  { %16706 = vmatpush2.bf16.msra.mxu0 %v23932_v1  ;;  %v23979_v1 = vld [vmem:[#allocation9 + $0x1f3c] ss:$48 sps:$4 sm:$0xff]  }
 0x8e6   :  { %16747 = vmatpush2.bf16.msra.mxu1 %v23935_v19  ;;  %16707 = vmatprep.subr.bf16.mxu0 %v23940_v3  ;;  %v23974_v19 = vld [vmem:[#allocation9 + $0x1938] ss:$48 sps:$4 sm:$0xff]  }
 0x8e7   :  { %16748 = vmatprep.subr.bf16.mxu1 %v23943_v20  ;;  %v23977_v3 = vld [vmem:[#allocation9 + $0x1f38] ss:$48 sps:$4 sm:$0xff]   ;;  %v23982_v20 = vld [vmem:[#allocation9 + $0x18dc] ss:$48 sps:$4 sm:$0xff]  }
 0x8e9   :  { %16708 = vmatpush2.bf16.msra.mxu0 %v23938_v2  ;;  %v23985_v2 = vld [vmem:[#allocation9 + $0x1edc] ss:$48 sps:$4 sm:$0xff]  }
 0x8ea   :  { %16749 = vmatpush2.bf16.msra.mxu1 %v23941_v21  ;;  %16709 = vmatprep.subr.bf16.mxu0 %v23946_v31  ;;  %v23980_v21 = vld [vmem:[#allocation9 + $0x18d8] ss:$48 sps:$4 sm:$0xff]  }
 0x8eb   :  { %16750 = vmatprep.subr.bf16.mxu1 %v23949_v30  ;;  %v23983_v31 = vld [vmem:[#allocation9 + $0x1ed8] ss:$48 sps:$4 sm:$0xff]   ;;  %v23988_v30 = vld [vmem:[#allocation9 + $0x187c] ss:$48 sps:$4 sm:$0xff]  }
 0x8ed   :  { %16710 = vmatpush2.bf16.msra.mxu0 %v23944_v10  ;;  %v23991_v10 = vld [vmem:[#allocation9 + $0x1e7c] ss:$48 sps:$4 sm:$0xff]  }
 0x8ee   :  { %16751 = vmatpush2.bf16.msra.mxu1 %v23947_v49  ;;  %16761 = vmatprep.subr.bf16.mxu0 %v23952_v29  ;;  %v23986_v49 = vld [vmem:[#allocation9 + $0x1878] ss:$48 sps:$4 sm:$0xff]  }
 0x8ef   :  { %16802 = vmatprep.subr.bf16.mxu1 %v23955_v33  ;;  %v23989_v29 = vld [vmem:[#allocation9 + $0x1e78] ss:$48 sps:$4 sm:$0xff]   ;;  %v23994_v33 = vld [vmem:[#allocation9 + $0x181c] ss:$48 sps:$4 sm:$0xff]  }
 0x8f0   :  { %v16467_v42 = vpop.f32.mrf.mxu0  ;;  %16712 = vmatmul.mubr.bf16.vlgmr.msra.gmra.mxu0 %v25442_v5 }
 0x8f1   :  { %v16468_v34 = vadd.f32 %v16467_v42, %v25543_v9  ;;  %v16508_v63 = vpop.f32.mrf.mxu1  ;;  %16753 = vmatmul.mubr.bf16.vlgmr.msra.gmra.mxu1 %v25444_v15  ;;  %16762 = vmatpush1.bf16.msra.mxu0 %v23950_v26  ;;  %v23967_v9 = vld [vmem:[#allocation9 + $0x1ffc] ss:$48 sps:$4 sm:$0xff]  }
 0x8f2   :  { %16793 = vmatprep.mubr.bf16.mxu0 %v25446_v7  ;;  %16803 = vmatpush1.bf16.msra.mxu1 %v23953_v32  ;;  %v16469_v52 = vpop.f32.mrf.mxu0  ;;  %v23997_v26 = vld [vmem:[#allocation9 + $0x1e1c] ss:$48 sps:$4 sm:$0xff]   ;;  %v23992_v32 = vld [vmem:[#allocation9 + $0x1818] ss:$48 sps:$4 sm:$0xff]  }
 0x8f3   :  { %v25552_v37 = vadd.f32 %v16508_v63, %v16468_v34  ;;  %16834 = vmatprep.mubr.bf16.mxu1 %v25450_v28  ;;  %v16470_v50 = vadd.f32 %v16469_v52, %v25546_v61  ;;  %v16510_v35 = vpop.f32.mrf.mxu1  ;;  %16763 = vmatprep.subr.bf16.mxu0 %v23958_v25  ;;  %v23968_v61 = vld [vmem:[#allocation9 + $0x1998] ss:$48 sps:$4 sm:$0xff]   ;;  %v24000_v42 = vld [vmem:[#allocation9 + $0x1dbc] ss:$48 sps:$4 sm:$0xff]  }
 0x8f4   :  { %v16471_v47 = vpop.f32.mrf.mxu0  ;;  %16804 = vmatprep.subr.bf16.mxu1 %v23961_v27  ;;  %v23995_v25 = vld [vmem:[#allocation9 + $0x1e18] ss:$48 sps:$4 sm:$0xff]   ;;  %v24003_v27 = vld [vmem:[#allocation9 + $0x23bc] ss:$48 sps:$4 sm:$0xff]  }
 0x8f5   :  { %v25556_v62 = vadd.f32 %v16510_v35, %v16470_v50  ;;  %v16512_v24 = vpop.f32.mrf.mxu1  ;;  %16764 = vmatpush1.bf16.msra.mxu0 %v23956_v38  ;;  %v23998_v34 = vld [vmem:[#allocation9 + $0x1db8] ss:$48 sps:$4 sm:$0xff]   ;;  %v24006_v38 = vld [vmem:[#allocation9 + $0x1d5c] ss:$48 sps:$4 sm:$0xff]  }
 0x8f6   :  { %16805 = vmatpush1.bf16.msra.mxu1 %v23959_v22  ;;  %v16472_v53 = vpop.f32.mrf.mxu0  ;;  %16765 = vmatprep.subr.bf16.mxu0 %v23964_v55  ;;  %v24001_v63 = vld [vmem:[#allocation9 + $0x23b8] ss:$48 sps:$4 sm:$0xff]   ;;  %v24009_v52 = vld [vmem:[#allocation9 + $0x235c] ss:$48 sps:$4 sm:$0xff]  }
 0x8f7   :  { %v16513_v8 = vpop.f32.mrf.mxu1  ;;  %16806 = vmatprep.subr.bf16.mxu1 %v23967_v9  ;;  %v24004_v22 = vld [vmem:[#allocation9 + $0x1d58] ss:$48 sps:$4 sm:$0xff]   ;;  %v24012_v50 = vld [vmem:[#allocation9 + $0x1cfc] ss:$48 sps:$4 sm:$0xff]  }
 0x8f8   :  { %v24007_v55 = vld [vmem:[#allocation9 + $0x2358] ss:$48 sps:$4 sm:$0xff]   ;;  %v24015_v35 = vld [vmem:[#allocation9 + $0x22fc] ss:$48 sps:$4 sm:$0xff]  }
 0x8f9   :  { %16766 = vmatpush1.bf16.msra.mxu0 %v23962_v41  ;;  %v24010_v9 = vld [vmem:[#allocation9 + $0x1cf8] ss:$48 sps:$4 sm:$0xff]   ;;  %v24018_v24 = vld [vmem:[#allocation9 + $0x1c9c] ss:$48 sps:$4 sm:$0xff]  }
 0x8fa   :  { %16807 = vmatpush1.bf16.msra.mxu1 %v23965_v58  ;;  %16767 = vmatprep.subr.bf16.mxu0 %v23970_v36  ;;  %v24013_v47 = vld [vmem:[#allocation9 + $0x22f8] ss:$48 sps:$4 sm:$0xff]   ;;  %v24021_v41 = vld [vmem:[#allocation9 + $0x229c] ss:$48 sps:$4 sm:$0xff]  }
 0x8fb   :  { %16808 = vmatprep.subr.bf16.mxu1 %v23973_v51  ;;  %v24016_v53 = vld [vmem:[#allocation9 + $0x1c98] ss:$48 sps:$4 sm:$0xff]   ;;  %v24024_v36 = vld [vmem:[#allocation9 + $0x1c3c] ss:$48 sps:$4 sm:$0xff]  }
 0x8fc   :  { %v24019_v58 = vld [vmem:[#allocation9 + $0x2298] ss:$48 sps:$4 sm:$0xff]   ;;  %v24027_v8 = vld [vmem:[#allocation9 + $0x223c] ss:$48 sps:$4 sm:$0xff]  }
 0x8fd   :  { %16768 = vmatpush1.bf16.msra.mxu0 %v23968_v61  ;;  %v24022_v51 = vld [vmem:[#allocation9 + $0x1c38] ss:$48 sps:$4 sm:$0xff]  }
 0x8fe   :  { %16809 = vmatpush1.bf16.msra.mxu1 %v23971_v40  ;;  %16769 = vmatprep.subr.bf16.mxu0 %v23976_v14  ;;  %v24025_v61 = vld [vmem:[#allocation9 + $0x2238] ss:$48 sps:$4 sm:$0xff]   ;;  %v24030_v40 = vld [vmem:[#allocation9 + $0x1bdc] ss:$48 sps:$4 sm:$0xff]  }
 0x8ff   :  { %16810 = vmatprep.subr.bf16.mxu1 %v23979_v1  ;;  %v24033_v14 = vld [vmem:[#allocation9 + $0x21dc] ss:$48 sps:$4 sm:$0xff]   ;;  %v24028_v1 = vld [vmem:[#allocation9 + $0x1bd8] ss:$48 sps:$4 sm:$0xff]  }
 0x901   :  { %16770 = vmatpush1.bf16.msra.mxu0 %v23974_v19  ;;  %v24031_v19 = vld [vmem:[#allocation9 + $0x21d8] ss:$48 sps:$4 sm:$0xff]  }
 0x902   :  { %16811 = vmatpush1.bf16.msra.mxu1 %v23977_v3  ;;  %16771 = vmatprep.subr.bf16.mxu0 %v23982_v20  ;;  %v24036_v3 = vld [vmem:[#allocation9 + $0x1b7c] ss:$48 sps:$4 sm:$0xff]  }
 0x903   :  { %16812 = vmatprep.subr.bf16.mxu1 %v23985_v2  ;;  %v24039_v20 = vld [vmem:[#allocation9 + $0x217c] ss:$48 sps:$4 sm:$0xff]   ;;  %v24034_v2 = vld [vmem:[#allocation9 + $0x1b78] ss:$48 sps:$4 sm:$0xff]  }
 0x905   :  { %16772 = vmatpush1.bf16.msra.mxu0 %v23980_v21  ;;  %v24037_v21 = vld [vmem:[#allocation9 + $0x2178] ss:$48 sps:$4 sm:$0xff]  }
 0x906   :  { %16813 = vmatpush1.bf16.msra.mxu1 %v23983_v31  ;;  %16773 = vmatprep.subr.bf16.mxu0 %v23988_v30  ;;  %v24042_v31 = vld [vmem:[#allocation9 + $0x1b1c] ss:$48 sps:$4 sm:$0xff]  }
 0x907   :  { %16814 = vmatprep.subr.bf16.mxu1 %v23991_v10  ;;  %v24045_v30 = vld [vmem:[#allocation9 + $0x211c] ss:$48 sps:$4 sm:$0xff]   ;;  %v24040_v10 = vld [vmem:[#allocation9 + $0x1b18] ss:$48 sps:$4 sm:$0xff]  }
 0x909   :  { %16774 = vmatpush1.bf16.msra.mxu0 %v23986_v49  ;;  %v24043_v49 = vld [vmem:[#allocation9 + $0x2118] ss:$48 sps:$4 sm:$0xff]  }
 0x90a   :  { %16815 = vmatpush1.bf16.msra.mxu1 %v23989_v29  ;;  %16775 = vmatprep.subr.bf16.mxu0 %v23994_v33  ;;  %v24048_v29 = vld [vmem:[#allocation9 + $0x2c4] ss:$48 sps:$4 sm:$0xff]  }
 0x90b   :  { %16816 = vmatprep.subr.bf16.mxu1 %v23997_v26  ;;  %v24051_v33 = vld [vmem:[#allocation9 + $0x8c4] ss:$48 sps:$4 sm:$0xff]   ;;  %v24046_v26 = vld [vmem:[#allocation9 + $0x2c0] ss:$48 sps:$4 sm:$0xff]  }
 0x90d   :  { %16776 = vmatpush1.bf16.msra.mxu0 %v23992_v32  ;;  %v24049_v32 = vld [vmem:[#allocation9 + $0x8c0] ss:$48 sps:$4 sm:$0xff]  }
 0x90e   :  { %16817 = vmatpush1.bf16.msra.mxu1 %v23995_v25  ;;  %16777 = vmatprep.subr.bf16.mxu0 %v24000_v42  ;;  %v24054_v25 = vld [vmem:[#allocation9 + $0x264] ss:$48 sps:$4 sm:$0xff]  }
 0x90f   :  { %16818 = vmatprep.subr.bf16.mxu1 %v24003_v27  ;;  %v24057_v27 = vld [vmem:[#allocation9 + $0x864] ss:$48 sps:$4 sm:$0xff]  }
 0x911   :  { %16778 = vmatpush2.bf16.msra.mxu0 %v23998_v34 }
 0x912   :  { %16819 = vmatpush2.bf16.msra.mxu1 %v24001_v63  ;;  %16779 = vmatprep.subr.bf16.mxu0 %v24006_v38  ;;  %v24052_v38 = vld [vmem:[#allocation9 + $0x260] ss:$48 sps:$4 sm:$0xff]  }
 0x913   :  { %16820 = vmatprep.subr.bf16.mxu1 %v24009_v52 }
 0x915   :  { %16780 = vmatpush2.bf16.msra.mxu0 %v24004_v22  ;;  %v24055_v22 = vld [vmem:[#allocation9 + $0x860] ss:$48 sps:$4 sm:$0xff]  }
 0x916   :  { %16821 = vmatpush2.bf16.msra.mxu1 %v24007_v55  ;;  %16781 = vmatprep.subr.bf16.mxu0 %v24012_v50  ;;  %v24060_v55 = vld [vmem:[#allocation9 + $0x204] ss:$48 sps:$4 sm:$0xff]  }
 0x917   :  { %16822 = vmatprep.subr.bf16.mxu1 %v24015_v35 }
 0x919   :  { %16782 = vmatpush2.bf16.msra.mxu0 %v24010_v9 }
 0x91a   :  { %16823 = vmatpush2.bf16.msra.mxu1 %v24013_v47  ;;  %16783 = vmatprep.subr.bf16.mxu0 %v24018_v24 }
 0x91b   :  { %16824 = vmatprep.subr.bf16.mxu1 %v24021_v41 }
 0x91d   :  { %16784 = vmatpush2.bf16.msra.mxu0 %v24016_v53  ;;  %v24058_v53 = vld [vmem:[#allocation9 + $0x200] ss:$48 sps:$4 sm:$0xff]  }
 0x91e   :  { %16825 = vmatpush2.bf16.msra.mxu1 %v24019_v58  ;;  %16785 = vmatprep.subr.bf16.mxu0 %v24024_v36  ;;  %v24061_v36 = vld [vmem:[#allocation9 + $0x800] ss:$48 sps:$4 sm:$0xff]  }
 0x91f   :  { %16826 = vmatprep.subr.bf16.mxu1 %v24027_v8  ;;  %v24066_v8 = vld [vmem:[#allocation9 + $0x1a4] ss:$48 sps:$4 sm:$0xff]  }
 0x921   :  { %16786 = vmatpush2.bf16.msra.mxu0 %v24022_v51 }
 0x922   :  { %16827 = vmatpush2.bf16.msra.mxu1 %v24025_v61  ;;  %16787 = vmatprep.subr.bf16.mxu0 %v24030_v40  ;;  %v24069_v61 = vld [vmem:[#allocation9 + $0x7a4] ss:$48 sps:$4 sm:$0xff]   ;;  %v24067_v40 = vld [vmem:[#allocation9 + $0x7a0] ss:$48 sps:$4 sm:$0xff]  }
 0x923   :  { %16828 = vmatprep.subr.bf16.mxu1 %v24033_v14  ;;  %v24072_v14 = vld [vmem:[#allocation9 + $0x144] ss:$48 sps:$4 sm:$0xff]  }
 0x925   :  { %16788 = vmatpush2.bf16.msra.mxu0 %v24028_v1  ;;  %v24075_v1 = vld [vmem:[#allocation9 + $0x744] ss:$48 sps:$4 sm:$0xff]  }
 0x926   :  { %16829 = vmatpush2.bf16.msra.mxu1 %v24031_v19  ;;  %16789 = vmatprep.subr.bf16.mxu0 %v24036_v3  ;;  %v24070_v19 = vld [vmem:[#allocation9 + $0x140] ss:$48 sps:$4 sm:$0xff]  }
 0x927   :  { %16830 = vmatprep.subr.bf16.mxu1 %v24039_v20  ;;  %v24073_v3 = vld [vmem:[#allocation9 + $0x740] ss:$48 sps:$4 sm:$0xff]   ;;  %v24078_v20 = vld [vmem:[#allocation9 + $0xe4] ss:$48 sps:$4 sm:$0xff]  }
 0x929   :  { %16790 = vmatpush2.bf16.msra.mxu0 %v24034_v2  ;;  %v24081_v2 = vld [vmem:[#allocation9 + $0x6e4] ss:$48 sps:$4 sm:$0xff]  }
 0x92a   :  { %16831 = vmatpush2.bf16.msra.mxu1 %v24037_v21  ;;  %16791 = vmatprep.subr.bf16.mxu0 %v24042_v31  ;;  %v24076_v21 = vld [vmem:[#allocation9 + $0xe0] ss:$48 sps:$4 sm:$0xff]  }
 0x92b   :  { %16832 = vmatprep.subr.bf16.mxu1 %v24045_v30  ;;  %v24079_v31 = vld [vmem:[#allocation9 + $0x6e0] ss:$48 sps:$4 sm:$0xff]   ;;  %v24084_v30 = vld [vmem:[#allocation9 + $0x84] ss:$48 sps:$4 sm:$0xff]  }
 0x92d   :  { %16792 = vmatpush2.bf16.msra.mxu0 %v24040_v10  ;;  %v24087_v10 = vld [vmem:[#allocation9 + $0x684] ss:$48 sps:$4 sm:$0xff]  }
 0x92e   :  { %16833 = vmatpush2.bf16.msra.mxu1 %v24043_v49  ;;  %16843 = vmatprep.subr.bf16.mxu0 %v24048_v29  ;;  %v24082_v49 = vld [vmem:[#allocation9 + $0x80] ss:$48 sps:$4 sm:$0xff]  }
 0x92f   :  { %16884 = vmatprep.subr.bf16.mxu1 %v24051_v33  ;;  %v24085_v29 = vld [vmem:[#allocation9 + $0x680] ss:$48 sps:$4 sm:$0xff]   ;;  %v24090_v33 = vld [vmem:[#allocation9 + $0x24] ss:$48 sps:$4 sm:$0xff]  }
 0x930   :  { %v16549_v42 = vpop.f32.mrf.mxu0  ;;  %16794 = vmatmul.mubr.bf16.vlgmr.msra.gmra.mxu0 %v25460_v44 }
 0x931   :  { %v16550_v34 = vadd.f32 %v16549_v42, %v25552_v37  ;;  %v16590_v63 = vpop.f32.mrf.mxu1  ;;  %16835 = vmatmul.mubr.bf16.vlgmr.msra.gmra.mxu1 %v25462_v11  ;;  %16844 = vmatpush1.bf16.msra.mxu0 %v24046_v26  ;;  %v24063_v37 = vld [vmem:[#allocation9 + $0x804] ss:$48 sps:$4 sm:$0xff]  }
 0x932   :  { %16875 = vmatprep.mubr.bf16.mxu0 %v25398_v16  ;;  %16885 = vmatpush1.bf16.msra.mxu1 %v24049_v32  ;;  %v16551_v52 = vpop.f32.mrf.mxu0  ;;  %v24093_v26 = vld [vmem:[#allocation9 + $0x624] ss:$48 sps:$4 sm:$0xff]   ;;  %v24088_v32 = vld [vmem:[#allocation9 + $0x20] ss:$48 sps:$4 sm:$0xff]  }
 0x933   :  { %v25562_v50 = vadd.f32 %v16590_v63, %v16550_v34  ;;  %16916 = vmatprep.mubr.bf16.mxu1 %v25400_v17  ;;  %v16552_v35 = vadd.f32 %v16551_v52, %v25556_v62  ;;  %v16592_v9 = vpop.f32.mrf.mxu1  ;;  %16845 = vmatprep.subr.bf16.mxu0 %v24054_v25  ;;  %v24064_v62 = vld [vmem:[#allocation9 + $0x1a0] ss:$48 sps:$4 sm:$0xff]   ;;  %v24096_v42 = vld [vmem:[#allocation9 + $0x5c4] ss:$48 sps:$4 sm:$0xff]  }
 0x934   :  { %v16553_v47 = vpop.f32.mrf.mxu0  ;;  %16886 = vmatprep.subr.bf16.mxu1 %v24057_v27  ;;  %v24091_v25 = vld [vmem:[#allocation9 + $0x620] ss:$48 sps:$4 sm:$0xff]   ;;  %v24099_v27 = vld [vmem:[#allocation9 + $0xbc4] ss:$48 sps:$4 sm:$0xff]  }
 0x935   :  { %v25566_v24 = vadd.f32 %v16592_v9, %v16552_v35  ;;  %v16594_v41 = vpop.f32.mrf.mxu1  ;;  %16846 = vmatpush1.bf16.msra.mxu0 %v24052_v38  ;;  %v24094_v34 = vld [vmem:[#allocation9 + $0x5c0] ss:$48 sps:$4 sm:$0xff]   ;;  %v24102_v38 = vld [vmem:[#allocation9 + $0x564] ss:$48 sps:$4 sm:$0xff]  }
 0x936   :  { %16887 = vmatpush1.bf16.msra.mxu1 %v24055_v22  ;;  %v16554_v58 = vpop.f32.mrf.mxu0  ;;  %16847 = vmatprep.subr.bf16.mxu0 %v24060_v55  ;;  %v24097_v63 = vld [vmem:[#allocation9 + $0xbc0] ss:$48 sps:$4 sm:$0xff]   ;;  %v24105_v52 = vld [vmem:[#allocation9 + $0xb64] ss:$48 sps:$4 sm:$0xff]  }
 0x937   :  { %v16595_v51 = vpop.f32.mrf.mxu1  ;;  %16888 = vmatprep.subr.bf16.mxu1 %v24063_v37  ;;  %v24100_v22 = vld [vmem:[#allocation9 + $0x560] ss:$48 sps:$4 sm:$0xff]   ;;  %v24108_v35 = vld [vmem:[#allocation9 + $0x504] ss:$48 sps:$4 sm:$0xff]  }
 0x938   :  { %v24103_v55 = vld [vmem:[#allocation9 + $0xb60] ss:$48 sps:$4 sm:$0xff]   ;;  %v24111_v9 = vld [vmem:[#allocation9 + $0xb04] ss:$48 sps:$4 sm:$0xff]  }
 0x939   :  { %16848 = vmatpush1.bf16.msra.mxu0 %v24058_v53  ;;  %v24106_v37 = vld [vmem:[#allocation9 + $0x500] ss:$48 sps:$4 sm:$0xff]   ;;  %v24114_v41 = vld [vmem:[#allocation9 + $0x4a4] ss:$48 sps:$4 sm:$0xff]  }
 0x93a   :  { %16889 = vmatpush1.bf16.msra.mxu1 %v24061_v36  ;;  %16849 = vmatprep.subr.bf16.mxu0 %v24066_v8  ;;  %v24109_v47 = vld [vmem:[#allocation9 + $0xb00] ss:$48 sps:$4 sm:$0xff]   ;;  %v24117_v53 = vld [vmem:[#allocation9 + $0xaa4] ss:$48 sps:$4 sm:$0xff]  }
 0x93b   :  { %16890 = vmatprep.subr.bf16.mxu1 %v24069_v61  ;;  %v24112_v58 = vld [vmem:[#allocation9 + $0x4a0] ss:$48 sps:$4 sm:$0xff]   ;;  %v24120_v8 = vld [vmem:[#allocation9 + $0x444] ss:$48 sps:$4 sm:$0xff]  }
 0x93c   :  { %v24115_v36 = vld [vmem:[#allocation9 + $0xaa0] ss:$48 sps:$4 sm:$0xff]   ;;  %v24123_v51 = vld [vmem:[#allocation9 + $0xa44] ss:$48 sps:$4 sm:$0xff]  }
 0x93d   :  { %16850 = vmatpush1.bf16.msra.mxu0 %v24064_v62  ;;  %v24118_v61 = vld [vmem:[#allocation9 + $0x440] ss:$48 sps:$4 sm:$0xff]  }
 0x93e   :  { %16891 = vmatpush1.bf16.msra.mxu1 %v24067_v40  ;;  %16851 = vmatprep.subr.bf16.mxu0 %v24072_v14  ;;  %v24121_v62 = vld [vmem:[#allocation9 + $0xa40] ss:$48 sps:$4 sm:$0xff]   ;;  %v24126_v40 = vld [vmem:[#allocation9 + $0x3e4] ss:$48 sps:$4 sm:$0xff]  }
 0x93f   :  { %16892 = vmatprep.subr.bf16.mxu1 %v24075_v1  ;;  %v24129_v14 = vld [vmem:[#allocation9 + $0x9e4] ss:$48 sps:$4 sm:$0xff]   ;;  %v24124_v1 = vld [vmem:[#allocation9 + $0x3e0] ss:$48 sps:$4 sm:$0xff]  }
 0x941   :  { %16852 = vmatpush1.bf16.msra.mxu0 %v24070_v19  ;;  %v24127_v19 = vld [vmem:[#allocation9 + $0x9e0] ss:$48 sps:$4 sm:$0xff]  }
 0x942   :  { %16893 = vmatpush1.bf16.msra.mxu1 %v24073_v3  ;;  %16853 = vmatprep.subr.bf16.mxu0 %v24078_v20  ;;  %v24132_v3 = vld [vmem:[#allocation9 + $0x384] ss:$48 sps:$4 sm:$0xff]  }
 0x943   :  { %16894 = vmatprep.subr.bf16.mxu1 %v24081_v2  ;;  %v24135_v20 = vld [vmem:[#allocation9 + $0x984] ss:$48 sps:$4 sm:$0xff]   ;;  %v24130_v2 = vld [vmem:[#allocation9 + $0x380] ss:$48 sps:$4 sm:$0xff]  }
 0x945   :  { %16854 = vmatpush1.bf16.msra.mxu0 %v24076_v21  ;;  %v24133_v21 = vld [vmem:[#allocation9 + $0x980] ss:$48 sps:$4 sm:$0xff]  }
 0x946   :  { %16895 = vmatpush1.bf16.msra.mxu1 %v24079_v31  ;;  %16855 = vmatprep.subr.bf16.mxu0 %v24084_v30  ;;  %v24138_v31 = vld [vmem:[#allocation9 + $0x324] ss:$48 sps:$4 sm:$0xff]  }
 0x947   :  { %16896 = vmatprep.subr.bf16.mxu1 %v24087_v10  ;;  %v24141_v30 = vld [vmem:[#allocation9 + $0x924] ss:$48 sps:$4 sm:$0xff]   ;;  %v24136_v10 = vld [vmem:[#allocation9 + $0x320] ss:$48 sps:$4 sm:$0xff]  }
 0x949   :  { %16856 = vmatpush1.bf16.msra.mxu0 %v24082_v49  ;;  %v24139_v49 = vld [vmem:[#allocation9 + $0x920] ss:$48 sps:$4 sm:$0xff]  }
 0x94a   :  { %16897 = vmatpush1.bf16.msra.mxu1 %v24085_v29  ;;  %16857 = vmatprep.subr.bf16.mxu0 %v24090_v33  ;;  %v24144_v29 = vld [vmem:[#allocation9 + $0xec4] ss:$48 sps:$4 sm:$0xff]  }
 0x94b   :  { %16898 = vmatprep.subr.bf16.mxu1 %v24093_v26  ;;  %v24147_v33 = vld [vmem:[#allocation9 + $0x14c4] ss:$48 sps:$4 sm:$0xff]   ;;  %v10066_v26 = vrot.slane %v25534_v18, %v25237_v46 }
 0x94d   :  { %16858 = vmatpush1.bf16.msra.mxu0 %v24088_v32  ;;  %v24142_v32 = vld [vmem:[#allocation9 + $0xec0] ss:$48 sps:$4 sm:$0xff]  }
 0x94e   :  { %16899 = vmatpush1.bf16.msra.mxu1 %v24091_v25  ;;  %16859 = vmatprep.subr.bf16.mxu0 %v24096_v42  ;;  %v24145_v25 = vld [vmem:[#allocation9 + $0x14c0] ss:$48 sps:$4 sm:$0xff]   ;;  %v10070_v42 = vrot.slane %v25534_v18, %v25240_v56 }
 0x94f   :  { %16900 = vmatprep.subr.bf16.mxu1 %v24099_v27  ;;  %v24150_v27 = vld [vmem:[#allocation9 + $0xe64] ss:$48 sps:$4 sm:$0xff]  }
 0x951   :  { %16860 = vmatpush2.bf16.msra.mxu0 %v24094_v34 }
 0x952   :  { %16901 = vmatpush2.bf16.msra.mxu1 %v24097_v63  ;;  %16861 = vmatprep.subr.bf16.mxu0 %v24102_v38  ;;  %v24153_v63 = vld [vmem:[#allocation9 + $0x1464] ss:$48 sps:$4 sm:$0xff]  }
 0x953   :  { %16902 = vmatprep.subr.bf16.mxu1 %v24105_v52 }
 0x955   :  { %16862 = vmatpush2.bf16.msra.mxu0 %v24100_v22  ;;  %v24148_v22 = vld [vmem:[#allocation9 + $0xe60] ss:$48 sps:$4 sm:$0xff]  }
 0x956   :  { %16903 = vmatpush2.bf16.msra.mxu1 %v24103_v55  ;;  %16863 = vmatprep.subr.bf16.mxu0 %v24108_v35  ;;  %v24151_v35 = vld [vmem:[#allocation9 + $0x1460] ss:$48 sps:$4 sm:$0xff]  }
 0x957   :  { %16904 = vmatprep.subr.bf16.mxu1 %v24111_v9  ;;  %v24156_v9 = vld [vmem:[#allocation9 + $0xe04] ss:$48 sps:$4 sm:$0xff]  }
 0x959   :  { %16864 = vmatpush2.bf16.msra.mxu0 %v24106_v37 }
 0x95a   :  { %16905 = vmatpush2.bf16.msra.mxu1 %v24109_v47  ;;  %16865 = vmatprep.subr.bf16.mxu0 %v24114_v41  ;;  %v24159_v41 = vld [vmem:[#allocation9 + $0x1404] ss:$48 sps:$4 sm:$0xff]  }
 0x95b   :  { %16906 = vmatprep.subr.bf16.mxu1 %v24117_v53 }
 0x95d   :  { %16866 = vmatpush2.bf16.msra.mxu0 %v24112_v58 }
 0x95e   :  { %16907 = vmatpush2.bf16.msra.mxu1 %v24115_v36  ;;  %16867 = vmatprep.subr.bf16.mxu0 %v24120_v8  ;;  %v24154_v8 = vld [vmem:[#allocation9 + $0xe00] ss:$48 sps:$4 sm:$0xff]  }
 0x95f   :  { %16908 = vmatprep.subr.bf16.mxu1 %v24123_v51 }
 0x961   :  { %16868 = vmatpush2.bf16.msra.mxu0 %v24118_v61  ;;  %v24157_v61 = vld [vmem:[#allocation9 + $0x1400] ss:$48 sps:$4 sm:$0xff]  }
 0x962   :  { %16909 = vmatpush2.bf16.msra.mxu1 %v24121_v62  ;;  %16869 = vmatprep.subr.bf16.mxu0 %v24126_v40  ;;  %v24162_v62 = vld [vmem:[#allocation9 + $0xda4] ss:$48 sps:$4 sm:$0xff]  }
 0x963   :  { %16910 = vmatprep.subr.bf16.mxu1 %v24129_v14  ;;  %v24165_v14 = vld [vmem:[#allocation9 + $0x13a4] ss:$48 sps:$4 sm:$0xff]  }
 0x965   :  { %16870 = vmatpush2.bf16.msra.mxu0 %v24124_v1  ;;  %v24160_v1 = vld [vmem:[#allocation9 + $0xda0] ss:$48 sps:$4 sm:$0xff]  }
 0x966   :  { %16911 = vmatpush2.bf16.msra.mxu1 %v24127_v19  ;;  %16871 = vmatprep.subr.bf16.mxu0 %v24132_v3  ;;  %v24163_v19 = vld [vmem:[#allocation9 + $0x13a0] ss:$48 sps:$4 sm:$0xff]   ;;  %v24168_v3 = vld [vmem:[#allocation9 + $0xd44] ss:$48 sps:$4 sm:$0xff]  }
 0x967   :  { %16912 = vmatprep.subr.bf16.mxu1 %v24135_v20  ;;  %v24171_v20 = vld [vmem:[#allocation9 + $0x1344] ss:$48 sps:$4 sm:$0xff]  }
 0x969   :  { %16872 = vmatpush2.bf16.msra.mxu0 %v24130_v2  ;;  %v24166_v2 = vld [vmem:[#allocation9 + $0xd40] ss:$48 sps:$4 sm:$0xff]  }
 0x96a   :  { %16913 = vmatpush2.bf16.msra.mxu1 %v24133_v21  ;;  %16873 = vmatprep.subr.bf16.mxu0 %v24138_v31  ;;  %v24169_v21 = vld [vmem:[#allocation9 + $0x1340] ss:$48 sps:$4 sm:$0xff]   ;;  %v24174_v31 = vld [vmem:[#allocation9 + $0xce4] ss:$48 sps:$4 sm:$0xff]  }
 0x96b   :  { %16914 = vmatprep.subr.bf16.mxu1 %v24141_v30  ;;  %v24177_v30 = vld [vmem:[#allocation9 + $0x12e4] ss:$48 sps:$4 sm:$0xff]  }
 0x96d   :  { %16874 = vmatpush2.bf16.msra.mxu0 %v24136_v10  ;;  %v24172_v10 = vld [vmem:[#allocation9 + $0xce0] ss:$48 sps:$4 sm:$0xff]  }
 0x96e   :  { %16915 = vmatpush2.bf16.msra.mxu1 %v24139_v49  ;;  %16925 = vmatprep.subr.bf16.mxu0 %v24144_v29  ;;  %v24175_v49 = vld [vmem:[#allocation9 + $0x12e0] ss:$48 sps:$4 sm:$0xff]   ;;  %v24180_v29 = vld [vmem:[#allocation9 + $0xc84] ss:$48 sps:$4 sm:$0xff]  }
 0x96f   :  { %16966 = vmatprep.subr.bf16.mxu1 %v24147_v33  ;;  %v24183_v33 = vld [vmem:[#allocation9 + $0x1284] ss:$48 sps:$4 sm:$0xff]  }
 0x970   :  { %v16631_v34 = vpop.f32.mrf.mxu0  ;;  %16876 = vmatmul.mubr.bf16.vlgmr.msra.gmra.mxu0 %v25402_v23 }
 0x971   :  { %v16632_v38 = vadd.f32 %v16631_v34, %v10066_v26  ;;  %v16672_v52 = vpop.f32.mrf.mxu1  ;;  %16917 = vmatmul.mubr.bf16.vlgmr.msra.gmra.mxu1 %v25404_v13  ;;  %16926 = vmatpush1.bf16.msra.mxu0 %v24142_v32  ;;  %v24178_v26 = vld [vmem:[#allocation9 + $0xc80] ss:$48 sps:$4 sm:$0xff]  }
 0x972   :  { %16957 = vmatprep.mubr.bf16.mxu0 %v25422_v45  ;;  %16967 = vmatpush1.bf16.msra.mxu1 %v24145_v25  ;;  %v16633_v55 = vpop.f32.mrf.mxu0  ;;  %v24181_v32 = vld [vmem:[#allocation9 + $0x1280] ss:$48 sps:$4 sm:$0xff]   ;;  %v24186_v25 = vld [vmem:[#allocation9 + $0xc24] ss:$48 sps:$4 sm:$0xff]  }
 0x973   :  { %v25575_v37 = vadd.f32 %v16672_v52, %v16632_v38  ;;  %16998 = vmatprep.mubr.bf16.mxu1 %v25424_v39  ;;  %v16634_v18 = vadd.f32 %v16633_v55, %v10070_v42  ;;  %v16674_v47 = vpop.f32.mrf.mxu1  ;;  %16927 = vmatprep.subr.bf16.mxu0 %v24150_v27  ;;  %v24189_v42 = vld [vmem:[#allocation9 + $0x1224] ss:$48 sps:$4 sm:$0xff]   ;;  %v24184_v27 = vld [vmem:[#allocation9 + $0xc20] ss:$48 sps:$4 sm:$0xff]  }
 0x974   :  { %v16635_v53 = vpop.f32.mrf.mxu0  ;;  %16968 = vmatprep.subr.bf16.mxu1 %v24153_v63  ;;  %v24187_v34 = vld [vmem:[#allocation9 + $0x1220] ss:$48 sps:$4 sm:$0xff]   ;;  %v24192_v63 = vld [vmem:[#allocation9 + $0x11c4] ss:$48 sps:$4 sm:$0xff]  }
 0x975   :  { %v25578_v58 = vadd.f32 %v16674_v47, %v16634_v18  ;;  %v16676_v36 = vpop.f32.mrf.mxu1  ;;  %16928 = vmatpush1.bf16.msra.mxu0 %v24148_v22  ;;  %v24195_v38 = vld [vmem:[#allocation9 + $0x17c4] ss:$48 sps:$4 sm:$0xff]   ;;  %v24190_v52 = vld [vmem:[#allocation9 + $0x11c0] ss:$48 sps:$4 sm:$0xff]  }
 0x976   :  { %16969 = vmatpush1.bf16.msra.mxu1 %v24151_v35  ;;  %v16636_v51 = vpop.f32.mrf.mxu0  ;;  %16929 = vmatprep.subr.bf16.mxu0 %v24156_v9  ;;  %v24193_v22 = vld [vmem:[#allocation9 + $0x17c0] ss:$48 sps:$4 sm:$0xff]   ;;  %v24198_v55 = vld [vmem:[#allocation9 + $0x1164] ss:$48 sps:$4 sm:$0xff]  }
 0x977   :  { %v16677_v40 = vpop.f32.mrf.mxu1  ;;  %16970 = vmatprep.subr.bf16.mxu1 %v24159_v41  ;;  %v24201_v35 = vld [vmem:[#allocation9 + $0x1764] ss:$48 sps:$4 sm:$0xff]   ;;  %v24196_v9 = vld [vmem:[#allocation9 + $0x1160] ss:$48 sps:$4 sm:$0xff]  }
 0x978   :  { %v24199_v18 = vld [vmem:[#allocation9 + $0x1760] ss:$48 sps:$4 sm:$0xff]   ;;  %v24204_v47 = vld [vmem:[#allocation9 + $0x1104] ss:$48 sps:$4 sm:$0xff]  }
 0x979   :  { %16930 = vmatpush1.bf16.msra.mxu0 %v24154_v8  ;;  %v24207_v41 = vld [vmem:[#allocation9 + $0x1704] ss:$48 sps:$4 sm:$0xff]   ;;  %v24202_v53 = vld [vmem:[#allocation9 + $0x1100] ss:$48 sps:$4 sm:$0xff]  }
 0x97a   :  { %16971 = vmatpush1.bf16.msra.mxu1 %v24157_v61  ;;  %16931 = vmatprep.subr.bf16.mxu0 %v24162_v62  ;;  %v24205_v36 = vld [vmem:[#allocation9 + $0x1700] ss:$48 sps:$4 sm:$0xff]   ;;  %v24210_v8 = vld [vmem:[#allocation9 + $0x10a4] ss:$48 sps:$4 sm:$0xff]  }
 0x97b   :  { %16972 = vmatprep.subr.bf16.mxu1 %v24165_v14  ;;  %v24213_v51 = vld [vmem:[#allocation9 + $0x16a4] ss:$48 sps:$4 sm:$0xff]   ;;  %v24208_v61 = vld [vmem:[#allocation9 + $0x10a0] ss:$48 sps:$4 sm:$0xff]  }
 0x97c   :  { %v24211_v62 = vld [vmem:[#allocation9 + $0x16a0] ss:$48 sps:$4 sm:$0xff]   ;;  %v24216_v40 = vld [vmem:[#allocation9 + $0x1044] ss:$48 sps:$4 sm:$0xff]  }
 0x97d   :  { %16932 = vmatpush1.bf16.msra.mxu0 %v24160_v1  ;;  %v24219_v14 = vld [vmem:[#allocation9 + $0x1644] ss:$48 sps:$4 sm:$0xff]   ;;  %v24214_v1 = vld [vmem:[#allocation9 + $0x1040] ss:$48 sps:$4 sm:$0xff]  }
 0x97e   :  { %16973 = vmatpush1.bf16.msra.mxu1 %v24163_v19  ;;  %16933 = vmatprep.subr.bf16.mxu0 %v24168_v3  ;;  %v24217_v19 = vld [vmem:[#allocation9 + $0x1640] ss:$48 sps:$4 sm:$0xff]   ;;  %v24222_v3 = vld [vmem:[#allocation9 + $0xfe4] ss:$48 sps:$4 sm:$0xff]  }
 0x97f   :  { %16974 = vmatprep.subr.bf16.mxu1 %v24171_v20  ;;  %v24225_v20 = vld [vmem:[#allocation9 + $0x15e4] ss:$48 sps:$4 sm:$0xff]  }
 0x981   :  { %16934 = vmatpush1.bf16.msra.mxu0 %v24166_v2  ;;  %v24220_v2 = vld [vmem:[#allocation9 + $0xfe0] ss:$48 sps:$4 sm:$0xff]  }
 0x982   :  { %16975 = vmatpush1.bf16.msra.mxu1 %v24169_v21  ;;  %16935 = vmatprep.subr.bf16.mxu0 %v24174_v31  ;;  %v24223_v21 = vld [vmem:[#allocation9 + $0x15e0] ss:$48 sps:$4 sm:$0xff]   ;;  %v24228_v31 = vld [vmem:[#allocation9 + $0xf84] ss:$48 sps:$4 sm:$0xff]  }
 0x983   :  { %16976 = vmatprep.subr.bf16.mxu1 %v24177_v30  ;;  %v24231_v30 = vld [vmem:[#allocation9 + $0x1584] ss:$48 sps:$4 sm:$0xff]  }
 0x985   :  { %16936 = vmatpush1.bf16.msra.mxu0 %v24172_v10  ;;  %v24226_v10 = vld [vmem:[#allocation9 + $0xf80] ss:$48 sps:$4 sm:$0xff]  }
 0x986   :  { %16977 = vmatpush1.bf16.msra.mxu1 %v24175_v49  ;;  %16937 = vmatprep.subr.bf16.mxu0 %v24180_v29  ;;  %v24229_v49 = vld [vmem:[#allocation9 + $0x1580] ss:$48 sps:$4 sm:$0xff]   ;;  %v24234_v29 = vld [vmem:[#allocation9 + $0xf24] ss:$48 sps:$4 sm:$0xff]  }
 0x987   :  { %16978 = vmatprep.subr.bf16.mxu1 %v24183_v33  ;;  %v24237_v33 = vld [vmem:[#allocation9 + $0x1524] ss:$48 sps:$4 sm:$0xff]  }
 0x989   :  { %16938 = vmatpush1.bf16.msra.mxu0 %v24178_v26  ;;  %v24232_v26 = vld [vmem:[#allocation9 + $0xf20] ss:$48 sps:$4 sm:$0xff]  }
 0x98a   :  { %16979 = vmatpush1.bf16.msra.mxu1 %v24181_v32  ;;  %16939 = vmatprep.subr.bf16.mxu0 %v24186_v25  ;;  %v24235_v32 = vld [vmem:[#allocation9 + $0x1520] ss:$48 sps:$4 sm:$0xff]   ;;  %v24240_v25 = vld [vmem:[#allocation9 + $0x1ac4] ss:$48 sps:$4 sm:$0xff]  }
 0x98b   :  { %16980 = vmatprep.subr.bf16.mxu1 %v24189_v42  ;;  %v24243_v42 = vld [vmem:[#allocation9 + $0x20c4] ss:$48 sps:$4 sm:$0xff]  }
 0x98d   :  { %16940 = vmatpush1.bf16.msra.mxu0 %v24184_v27  ;;  %v24238_v27 = vld [vmem:[#allocation9 + $0x1ac0] ss:$48 sps:$4 sm:$0xff]  }
 0x98e   :  { %16981 = vmatpush1.bf16.msra.mxu1 %v24187_v34  ;;  %16941 = vmatprep.subr.bf16.mxu0 %v24192_v63  ;;  %v24241_v34 = vld [vmem:[#allocation9 + $0x20c0] ss:$48 sps:$4 sm:$0xff]   ;;  %v24246_v63 = vld [vmem:[#allocation9 + $0x1a64] ss:$48 sps:$4 sm:$0xff]  }
 0x98f   :  { %16982 = vmatprep.subr.bf16.mxu1 %v24195_v38 }
 0x991   :  { %16942 = vmatpush2.bf16.msra.mxu0 %v24190_v52  ;;  %v24249_v52 = vld [vmem:[#allocation9 + $0x2064] ss:$48 sps:$4 sm:$0xff]  }
 0x992   :  { %16983 = vmatpush2.bf16.msra.mxu1 %v24193_v22  ;;  %16943 = vmatprep.subr.bf16.mxu0 %v24198_v55 }
 0x993   :  { %16984 = vmatprep.subr.bf16.mxu1 %v24201_v35  ;;  %v24244_v35 = vld [vmem:[#allocation9 + $0x1a60] ss:$48 sps:$4 sm:$0xff]  }
 0x995   :  { %16944 = vmatpush2.bf16.msra.mxu0 %v24196_v9 }
 0x996   :  { %16985 = vmatpush2.bf16.msra.mxu1 %v24199_v18  ;;  %16945 = vmatprep.subr.bf16.mxu0 %v24204_v47  ;;  %v24247_v18 = vld [vmem:[#allocation9 + $0x2060] ss:$48 sps:$4 sm:$0xff]   ;;  %v24252_v47 = vld [vmem:[#allocation9 + $0x1a04] ss:$48 sps:$4 sm:$0xff]  }
 0x997   :  { %16986 = vmatprep.subr.bf16.mxu1 %v24207_v41 }
 0x999   :  { %16946 = vmatpush2.bf16.msra.mxu0 %v24202_v53 }
 0x99a   :  { %16987 = vmatpush2.bf16.msra.mxu1 %v24205_v36  ;;  %16947 = vmatprep.subr.bf16.mxu0 %v24210_v8 }
 0x99b   :  { %16988 = vmatprep.subr.bf16.mxu1 %v24213_v51 }
 0x99d   :  { %16948 = vmatpush2.bf16.msra.mxu0 %v24208_v61 }
 0x99e   :  { %16989 = vmatpush2.bf16.msra.mxu1 %v24211_v62  ;;  %16949 = vmatprep.subr.bf16.mxu0 %v24216_v40  ;;  %v24250_v62 = vld [vmem:[#allocation9 + $0x1a00] ss:$48 sps:$4 sm:$0xff]  }
 0x99f   :  { %16990 = vmatprep.subr.bf16.mxu1 %v24219_v14  ;;  %v24253_v14 = vld [vmem:[#allocation9 + $0x2000] ss:$48 sps:$4 sm:$0xff]  }
 0x9a1   :  { %16950 = vmatpush2.bf16.msra.mxu0 %v24214_v1  ;;  %v24258_v1 = vld [vmem:[#allocation9 + $0x19a4] ss:$48 sps:$4 sm:$0xff]  }
 0x9a2   :  { %16991 = vmatpush2.bf16.msra.mxu1 %v24217_v19  ;;  %16951 = vmatprep.subr.bf16.mxu0 %v24222_v3  ;;  %v24261_v3 = vld [vmem:[#allocation9 + $0x1fa4] ss:$48 sps:$4 sm:$0xff]  }
 0x9a3   :  { %16992 = vmatprep.subr.bf16.mxu1 %v24225_v20  ;;  %v24259_v20 = vld [vmem:[#allocation9 + $0x1fa0] ss:$48 sps:$4 sm:$0xff]  }
 0x9a5   :  { %16952 = vmatpush2.bf16.msra.mxu0 %v24220_v2  ;;  %v24264_v2 = vld [vmem:[#allocation9 + $0x1944] ss:$48 sps:$4 sm:$0xff]  }
 0x9a6   :  { %16993 = vmatpush2.bf16.msra.mxu1 %v24223_v21  ;;  %16953 = vmatprep.subr.bf16.mxu0 %v24228_v31  ;;  %v24267_v21 = vld [vmem:[#allocation9 + $0x1f44] ss:$48 sps:$4 sm:$0xff]   ;;  %v24262_v31 = vld [vmem:[#allocation9 + $0x1940] ss:$48 sps:$4 sm:$0xff]  }
 0x9a7   :  { %16994 = vmatprep.subr.bf16.mxu1 %v24231_v30  ;;  %v24265_v30 = vld [vmem:[#allocation9 + $0x1f40] ss:$48 sps:$4 sm:$0xff]  }
 0x9a9   :  { %16954 = vmatpush2.bf16.msra.mxu0 %v24226_v10  ;;  %v24270_v10 = vld [vmem:[#allocation9 + $0x18e4] ss:$48 sps:$4 sm:$0xff]  }
 0x9aa   :  { %16995 = vmatpush2.bf16.msra.mxu1 %v24229_v49  ;;  %16955 = vmatprep.subr.bf16.mxu0 %v24234_v29  ;;  %v24273_v49 = vld [vmem:[#allocation9 + $0x1ee4] ss:$48 sps:$4 sm:$0xff]   ;;  %v24268_v29 = vld [vmem:[#allocation9 + $0x18e0] ss:$48 sps:$4 sm:$0xff]  }
 0x9ab   :  { %16996 = vmatprep.subr.bf16.mxu1 %v24237_v33  ;;  %v24271_v33 = vld [vmem:[#allocation9 + $0x1ee0] ss:$48 sps:$4 sm:$0xff]  }
 0x9ad   :  { %16956 = vmatpush2.bf16.msra.mxu0 %v24232_v26  ;;  %v24276_v26 = vld [vmem:[#allocation9 + $0x1884] ss:$48 sps:$4 sm:$0xff]  }
 0x9ae   :  { %16997 = vmatpush2.bf16.msra.mxu1 %v24235_v32  ;;  %17007 = vmatprep.subr.bf16.mxu0 %v24240_v25  ;;  %v24279_v32 = vld [vmem:[#allocation9 + $0x1e84] ss:$48 sps:$4 sm:$0xff]   ;;  %v24274_v25 = vld [vmem:[#allocation9 + $0x1880] ss:$48 sps:$4 sm:$0xff]  }
 0x9af   :  { %17048 = vmatprep.subr.bf16.mxu1 %v24243_v42  ;;  %v24277_v42 = vld [vmem:[#allocation9 + $0x1e80] ss:$48 sps:$4 sm:$0xff]  }
 0x9b0   :  { %v16713_v38 = vpop.f32.mrf.mxu0  ;;  %16958 = vmatmul.mubr.bf16.vlgmr.msra.gmra.mxu0 %v25442_v5 }
 0x9b1   :  { %v16714_v22 = vadd.f32 %v16713_v38, %v25575_v37  ;;  %v16754_v55 = vpop.f32.mrf.mxu1  ;;  %16999 = vmatmul.mubr.bf16.vlgmr.msra.gmra.mxu1 %v25444_v15  ;;  %17008 = vmatpush1.bf16.msra.mxu0 %v24238_v27  ;;  %v24255_v37 = vld [vmem:[#allocation9 + $0x2004] ss:$48 sps:$4 sm:$0xff]   ;;  %v24283_v38 = vld [vmem:[#allocation9 + $0x1e20] ss:$48 sps:$4 sm:$0xff]  }
 0x9b2   :  { %17039 = vmatprep.mubr.bf16.mxu0 %v25446_v7  ;;  %17049 = vmatpush1.bf16.msra.mxu1 %v24241_v34  ;;  %v16715_v9 = vpop.f32.mrf.mxu0  ;;  %v24282_v27 = vld [vmem:[#allocation9 + $0x1824] ss:$48 sps:$4 sm:$0xff]  }
 0x9b3   :  { %v25584_v41 = vadd.f32 %v16754_v55, %v16714_v22  ;;  %17080 = vmatprep.mubr.bf16.mxu1 %v25450_v28  ;;  %v16716_v53 = vadd.f32 %v16715_v9, %v25578_v58  ;;  %v16756_v36 = vpop.f32.mrf.mxu1  ;;  %17009 = vmatprep.subr.bf16.mxu0 %v24246_v63  ;;  %v24256_v58 = vld [vmem:[#allocation9 + $0x19a0] ss:$48 sps:$4 sm:$0xff]   ;;  %v24285_v34 = vld [vmem:[#allocation9 + $0x1e24] ss:$48 sps:$4 sm:$0xff]  }
 0x9b4   :  { %v16717_v8 = vpop.f32.mrf.mxu0  ;;  %17050 = vmatprep.subr.bf16.mxu1 %v24249_v52  ;;  %v24280_v63 = vld [vmem:[#allocation9 + $0x1820] ss:$48 sps:$4 sm:$0xff]   ;;  %v24288_v52 = vld [vmem:[#allocation9 + $0x1dc4] ss:$48 sps:$4 sm:$0xff]  }
 0x9b5   :  { %v25588_v51 = vadd.f32 %v16756_v36, %v16716_v53  ;;  %v16758_v61 = vpop.f32.mrf.mxu1  ;;  %17010 = vmatpush1.bf16.msra.mxu0 %v24244_v35  ;;  %v24291_v22 = vld [vmem:[#allocation9 + $0x23c4] ss:$48 sps:$4 sm:$0xff]   ;;  %v24286_v55 = vld [vmem:[#allocation9 + $0x1dc0] ss:$48 sps:$4 sm:$0xff]  }
 0x9b6   :  { %17051 = vmatpush1.bf16.msra.mxu1 %v24247_v18  ;;  %v16718_v40 = vpop.f32.mrf.mxu0  ;;  %17011 = vmatprep.subr.bf16.mxu0 %v24252_v47  ;;  %v24289_v35 = vld [vmem:[#allocation9 + $0x23c0] ss:$48 sps:$4 sm:$0xff]   ;;  %v24294_v9 = vld [vmem:[#allocation9 + $0x1d64] ss:$48 sps:$4 sm:$0xff]  }
 0x9b7   :  { %v16759_v19 = vpop.f32.mrf.mxu1  ;;  %17052 = vmatprep.subr.bf16.mxu1 %v24255_v37  ;;  %v24297_v18 = vld [vmem:[#allocation9 + $0x2364] ss:$48 sps:$4 sm:$0xff]   ;;  %v24292_v47 = vld [vmem:[#allocation9 + $0x1d60] ss:$48 sps:$4 sm:$0xff]  }
 0x9b8   :  { %v24295_v53 = vld [vmem:[#allocation9 + $0x2360] ss:$48 sps:$4 sm:$0xff]   ;;  %v24300_v36 = vld [vmem:[#allocation9 + $0x1d04] ss:$48 sps:$4 sm:$0xff]  }
 0x9b9   :  { %17012 = vmatpush1.bf16.msra.mxu0 %v24250_v62  ;;  %v24303_v37 = vld [vmem:[#allocation9 + $0x2304] ss:$48 sps:$4 sm:$0xff]   ;;  %v24298_v8 = vld [vmem:[#allocation9 + $0x1d00] ss:$48 sps:$4 sm:$0xff]  }
 0x9ba   :  { %17053 = vmatpush1.bf16.msra.mxu1 %v24253_v14  ;;  %17013 = vmatprep.subr.bf16.mxu0 %v24258_v1  ;;  %v24301_v61 = vld [vmem:[#allocation9 + $0x2300] ss:$48 sps:$4 sm:$0xff]   ;;  %v24306_v62 = vld [vmem:[#allocation9 + $0x1ca4] ss:$48 sps:$4 sm:$0xff]  }
 0x9bb   :  { %17054 = vmatprep.subr.bf16.mxu1 %v24261_v3  ;;  %v24309_v40 = vld [vmem:[#allocation9 + $0x22a4] ss:$48 sps:$4 sm:$0xff]   ;;  %v24304_v14 = vld [vmem:[#allocation9 + $0x1ca0] ss:$48 sps:$4 sm:$0xff]  }
 0x9bc   :  { %v24307_v1 = vld [vmem:[#allocation9 + $0x22a0] ss:$48 sps:$4 sm:$0xff]   ;;  %v24312_v19 = vld [vmem:[#allocation9 + $0x1c44] ss:$48 sps:$4 sm:$0xff]  }
 0x9bd   :  { %17014 = vmatpush1.bf16.msra.mxu0 %v24256_v58  ;;  %v24315_v3 = vld [vmem:[#allocation9 + $0x2244] ss:$48 sps:$4 sm:$0xff]   ;;  %v24310_v58 = vld [vmem:[#allocation9 + $0x1c40] ss:$48 sps:$4 sm:$0xff]  }
 0x9be   :  { %17055 = vmatpush1.bf16.msra.mxu1 %v24259_v20  ;;  %17015 = vmatprep.subr.bf16.mxu0 %v24264_v2  ;;  %v24313_v20 = vld [vmem:[#allocation9 + $0x2240] ss:$48 sps:$4 sm:$0xff]   ;;  %v24318_v2 = vld [vmem:[#allocation9 + $0x1be4] ss:$48 sps:$4 sm:$0xff]  }
 0x9bf   :  { %17056 = vmatprep.subr.bf16.mxu1 %v24267_v21  ;;  %v24321_v21 = vld [vmem:[#allocation9 + $0x21e4] ss:$48 sps:$4 sm:$0xff]  }
 0x9c1   :  { %17016 = vmatpush1.bf16.msra.mxu0 %v24262_v31  ;;  %v24316_v31 = vld [vmem:[#allocation9 + $0x1be0] ss:$48 sps:$4 sm:$0xff]  }
 0x9c2   :  { %17057 = vmatpush1.bf16.msra.mxu1 %v24265_v30  ;;  %17017 = vmatprep.subr.bf16.mxu0 %v24270_v10  ;;  %v24319_v30 = vld [vmem:[#allocation9 + $0x21e0] ss:$48 sps:$4 sm:$0xff]   ;;  %v24324_v10 = vld [vmem:[#allocation9 + $0x1b84] ss:$48 sps:$4 sm:$0xff]  }
 0x9c3   :  { %17058 = vmatprep.subr.bf16.mxu1 %v24273_v49  ;;  %v24327_v49 = vld [vmem:[#allocation9 + $0x2184] ss:$48 sps:$4 sm:$0xff]  }
 0x9c5   :  { %17018 = vmatpush1.bf16.msra.mxu0 %v24268_v29  ;;  %v24322_v29 = vld [vmem:[#allocation9 + $0x1b80] ss:$48 sps:$4 sm:$0xff]  }
 0x9c6   :  { %17059 = vmatpush1.bf16.msra.mxu1 %v24271_v33  ;;  %17019 = vmatprep.subr.bf16.mxu0 %v24276_v26  ;;  %v24325_v33 = vld [vmem:[#allocation9 + $0x2180] ss:$48 sps:$4 sm:$0xff]   ;;  %v24330_v26 = vld [vmem:[#allocation9 + $0x1b24] ss:$48 sps:$4 sm:$0xff]  }
 0x9c7   :  { %17060 = vmatprep.subr.bf16.mxu1 %v24279_v32  ;;  %v24333_v32 = vld [vmem:[#allocation9 + $0x2124] ss:$48 sps:$4 sm:$0xff]  }
 0x9c9   :  { %17020 = vmatpush1.bf16.msra.mxu0 %v24274_v25  ;;  %v24328_v25 = vld [vmem:[#allocation9 + $0x1b20] ss:$48 sps:$4 sm:$0xff]  }
 0x9ca   :  { %17061 = vmatpush1.bf16.msra.mxu1 %v24277_v42  ;;  %17021 = vmatprep.subr.bf16.mxu0 %v24282_v27  ;;  %v24331_v42 = vld [vmem:[#allocation9 + $0x2120] ss:$48 sps:$4 sm:$0xff]   ;;  %v24336_v27 = vld [vmem:[#allocation9 + $0x2cc] ss:$48 sps:$4 sm:$0xff]  }
 0x9cb   :  { %17062 = vmatprep.subr.bf16.mxu1 %v24285_v34  ;;  %v24339_v34 = vld [vmem:[#allocation9 + $0x8cc] ss:$48 sps:$4 sm:$0xff]  }
 0x9cd   :  { %17022 = vmatpush1.bf16.msra.mxu0 %v24280_v63  ;;  %v24334_v63 = vld [vmem:[#allocation9 + $0x2c8] ss:$48 sps:$4 sm:$0xff]  }
 0x9ce   :  { %17063 = vmatpush1.bf16.msra.mxu1 %v24283_v38  ;;  %17023 = vmatprep.subr.bf16.mxu0 %v24288_v52  ;;  %v24337_v38 = vld [vmem:[#allocation9 + $0x8c8] ss:$48 sps:$4 sm:$0xff]   ;;  %v24342_v52 = vld [vmem:[#allocation9 + $0x26c] ss:$48 sps:$4 sm:$0xff]  }
 0x9cf   :  { %17064 = vmatprep.subr.bf16.mxu1 %v24291_v22 }
 0x9d1   :  { %17024 = vmatpush2.bf16.msra.mxu0 %v24286_v55  ;;  %v24345_v55 = vld [vmem:[#allocation9 + $0x86c] ss:$48 sps:$4 sm:$0xff]  }
 0x9d2   :  { %17065 = vmatpush2.bf16.msra.mxu1 %v24289_v35  ;;  %17025 = vmatprep.subr.bf16.mxu0 %v24294_v9 }
 0x9d3   :  { %17066 = vmatprep.subr.bf16.mxu1 %v24297_v18  ;;  %v24340_v18 = vld [vmem:[#allocation9 + $0x268] ss:$48 sps:$4 sm:$0xff]  }
 0x9d5   :  { %17026 = vmatpush2.bf16.msra.mxu0 %v24292_v47 }
 0x9d6   :  { %17067 = vmatpush2.bf16.msra.mxu1 %v24295_v53  ;;  %17027 = vmatprep.subr.bf16.mxu0 %v24300_v36  ;;  %v24343_v53 = vld [vmem:[#allocation9 + $0x868] ss:$48 sps:$4 sm:$0xff]   ;;  %v24348_v36 = vld [vmem:[#allocation9 + $0x20c] ss:$48 sps:$4 sm:$0xff]  }
 0x9d7   :  { %17068 = vmatprep.subr.bf16.mxu1 %v24303_v37 }
 0x9d9   :  { %17028 = vmatpush2.bf16.msra.mxu0 %v24298_v8 }
 0x9da   :  { %17069 = vmatpush2.bf16.msra.mxu1 %v24301_v61  ;;  %17029 = vmatprep.subr.bf16.mxu0 %v24306_v62 }
 0x9db   :  { %17070 = vmatprep.subr.bf16.mxu1 %v24309_v40 }
 0x9dd   :  { %17030 = vmatpush2.bf16.msra.mxu0 %v24304_v14 }
 0x9de   :  { %17071 = vmatpush2.bf16.msra.mxu1 %v24307_v1  ;;  %17031 = vmatprep.subr.bf16.mxu0 %v24312_v19  ;;  %v24349_v19 = vld [vmem:[#allocation9 + $0x808] ss:$48 sps:$4 sm:$0xff]  }
 0x9df   :  { %17072 = vmatprep.subr.bf16.mxu1 %v24315_v3  ;;  %v24354_v3 = vld [vmem:[#allocation9 + $0x1ac] ss:$48 sps:$4 sm:$0xff]  }
 0x9e1   :  { %17032 = vmatpush2.bf16.msra.mxu0 %v24310_v58 }
 0x9e2   :  { %17073 = vmatpush2.bf16.msra.mxu1 %v24313_v20  ;;  %17033 = vmatprep.subr.bf16.mxu0 %v24318_v2  ;;  %v24355_v20 = vld [vmem:[#allocation9 + $0x7a8] ss:$48 sps:$4 sm:$0xff]   ;;  %v24360_v2 = vld [vmem:[#allocation9 + $0x14c] ss:$48 sps:$4 sm:$0xff]  }
 0x9e3   :  { %17074 = vmatprep.subr.bf16.mxu1 %v24321_v21  ;;  %v24363_v21 = vld [vmem:[#allocation9 + $0x74c] ss:$48 sps:$4 sm:$0xff]  }
 0x9e5   :  { %17034 = vmatpush2.bf16.msra.mxu0 %v24316_v31  ;;  %v24358_v31 = vld [vmem:[#allocation9 + $0x148] ss:$48 sps:$4 sm:$0xff]  }
 0x9e6   :  { %17075 = vmatpush2.bf16.msra.mxu1 %v24319_v30  ;;  %17035 = vmatprep.subr.bf16.mxu0 %v24324_v10  ;;  %v24361_v30 = vld [vmem:[#allocation9 + $0x748] ss:$48 sps:$4 sm:$0xff]   ;;  %v24366_v10 = vld [vmem:[#allocation9 + $0xec] ss:$48 sps:$4 sm:$0xff]  }
 0x9e7   :  { %17076 = vmatprep.subr.bf16.mxu1 %v24327_v49  ;;  %v24369_v49 = vld [vmem:[#allocation9 + $0x6ec] ss:$48 sps:$4 sm:$0xff]  }
 0x9e9   :  { %17036 = vmatpush2.bf16.msra.mxu0 %v24322_v29  ;;  %v24364_v29 = vld [vmem:[#allocation9 + $0xe8] ss:$48 sps:$4 sm:$0xff]  }
 0x9ea   :  { %17077 = vmatpush2.bf16.msra.mxu1 %v24325_v33  ;;  %17037 = vmatprep.subr.bf16.mxu0 %v24330_v26  ;;  %v24367_v33 = vld [vmem:[#allocation9 + $0x6e8] ss:$48 sps:$4 sm:$0xff]   ;;  %v24372_v26 = vld [vmem:[#allocation9 + $0x8c] ss:$48 sps:$4 sm:$0xff]  }
 0x9eb   :  { %17078 = vmatprep.subr.bf16.mxu1 %v24333_v32  ;;  %v24375_v32 = vld [vmem:[#allocation9 + $0x68c] ss:$48 sps:$4 sm:$0xff]  }
 0x9ed   :  { %17038 = vmatpush2.bf16.msra.mxu0 %v24328_v25  ;;  %v24370_v25 = vld [vmem:[#allocation9 + $0x88] ss:$48 sps:$4 sm:$0xff]  }
 0x9ee   :  { %17079 = vmatpush2.bf16.msra.mxu1 %v24331_v42  ;;  %17089 = vmatprep.subr.bf16.mxu0 %v24336_v27  ;;  %v24373_v42 = vld [vmem:[#allocation9 + $0x688] ss:$48 sps:$4 sm:$0xff]   ;;  %v24378_v27 = vld [vmem:[#allocation9 + $0x2c] ss:$48 sps:$4 sm:$0xff]  }
 0x9ef   :  { %17130 = vmatprep.subr.bf16.mxu1 %v24339_v34  ;;  %v24381_v34 = vld [vmem:[#allocation9 + $0x62c] ss:$48 sps:$4 sm:$0xff]  }
 0x9f0   :  { %v16795_v22 = vpop.f32.mrf.mxu0  ;;  %17040 = vmatmul.mubr.bf16.vlgmr.msra.gmra.mxu0 %v25460_v44 }
 0x9f1   :  { %v16796_v35 = vadd.f32 %v16795_v22, %v25584_v41  ;;  %v16836_v9 = vpop.f32.mrf.mxu1  ;;  %17081 = vmatmul.mubr.bf16.vlgmr.msra.gmra.mxu1 %v25462_v11  ;;  %17090 = vmatpush1.bf16.msra.mxu0 %v24334_v63  ;;  %v24351_v41 = vld [vmem:[#allocation9 + $0x80c] ss:$48 sps:$4 sm:$0xff]   ;;  %v24376_v63 = vld [vmem:[#allocation9 + $0x28] ss:$48 sps:$4 sm:$0xff]  }
 0x9f2   :  { %17121 = vmatprep.mubr.bf16.mxu0 %v25398_v16  ;;  %17131 = vmatpush1.bf16.msra.mxu1 %v24337_v38  ;;  %v16797_v47 = vpop.f32.mrf.mxu0  ;;  %v24346_v16 = vld [vmem:[#allocation9 + $0x208] ss:$48 sps:$4 sm:$0xff]   ;;  %v24387_v22 = vld [vmem:[#allocation9 + $0xbcc] ss:$48 sps:$4 sm:$0xff]  }
 0x9f3   :  { %v25594_v37 = vadd.f32 %v16836_v9, %v16796_v35  ;;  %17162 = vmatprep.mubr.bf16.mxu1 %v25400_v17  ;;  %v16798_v8 = vadd.f32 %v16797_v47, %v25588_v51  ;;  %v16838_v61 = vpop.f32.mrf.mxu1  ;;  %17091 = vmatprep.subr.bf16.mxu0 %v24342_v52  ;;  %v24357_v17 = vld [vmem:[#allocation9 + $0x7ac] ss:$48 sps:$4 sm:$0xff]   ;;  %v24352_v51 = vld [vmem:[#allocation9 + $0x1a8] ss:$48 sps:$4 sm:$0xff]  }
 0x9f4   :  { %v16799_v62 = vpop.f32.mrf.mxu0  ;;  %17132 = vmatprep.subr.bf16.mxu1 %v24345_v55  ;;  %v24379_v38 = vld [vmem:[#allocation9 + $0x628] ss:$48 sps:$4 sm:$0xff]   ;;  %v24384_v52 = vld [vmem:[#allocation9 + $0x5cc] ss:$48 sps:$4 sm:$0xff]  }
 0x9f5   :  { %v25598_v40 = vadd.f32 %v16838_v61, %v16798_v8  ;;  %v16840_v14 = vpop.f32.mrf.mxu1  ;;  %17092 = vmatpush1.bf16.msra.mxu0 %v24340_v18  ;;  %v24382_v55 = vld [vmem:[#allocation9 + $0x5c8] ss:$48 sps:$4 sm:$0xff]   ;;  %v24390_v9 = vld [vmem:[#allocation9 + $0x56c] ss:$48 sps:$4 sm:$0xff]  }
 0x9f6   :  { %17133 = vmatpush1.bf16.msra.mxu1 %v24343_v53  ;;  %v16800_v1 = vpop.f32.mrf.mxu0  ;;  %17093 = vmatprep.subr.bf16.mxu0 %v24348_v36  ;;  %v24385_v35 = vld [vmem:[#allocation9 + $0xbc8] ss:$48 sps:$4 sm:$0xff]   ;;  %v24393_v18 = vld [vmem:[#allocation9 + $0xb6c] ss:$48 sps:$4 sm:$0xff]  }
 0x9f7   :  { %v16841_v58 = vpop.f32.mrf.mxu1  ;;  %17134 = vmatprep.subr.bf16.mxu1 %v24351_v41  ;;  %v24388_v47 = vld [vmem:[#allocation9 + $0x568] ss:$48 sps:$4 sm:$0xff]   ;;  %v24396_v36 = vld [vmem:[#allocation9 + $0x50c] ss:$48 sps:$4 sm:$0xff]  }
 0x9f8   :  { %v24391_v53 = vld [vmem:[#allocation9 + $0xb68] ss:$48 sps:$4 sm:$0xff]   ;;  %v24399_v8 = vld [vmem:[#allocation9 + $0xb0c] ss:$48 sps:$4 sm:$0xff]  }
 0x9f9   :  { %17094 = vmatpush1.bf16.msra.mxu0 %v24346_v16  ;;  %v24394_v61 = vld [vmem:[#allocation9 + $0x508] ss:$48 sps:$4 sm:$0xff]   ;;  %v24402_v62 = vld [vmem:[#allocation9 + $0x4ac] ss:$48 sps:$4 sm:$0xff]  }
 0x9fa   :  { %17135 = vmatpush1.bf16.msra.mxu1 %v24349_v19  ;;  %17095 = vmatprep.subr.bf16.mxu0 %v24354_v3  ;;  %v24397_v41 = vld [vmem:[#allocation9 + $0xb08] ss:$48 sps:$4 sm:$0xff]   ;;  %v24405_v14 = vld [vmem:[#allocation9 + $0xaac] ss:$48 sps:$4 sm:$0xff]  }
 0x9fb   :  { %17136 = vmatprep.subr.bf16.mxu1 %v24357_v17  ;;  %v24400_v16 = vld [vmem:[#allocation9 + $0x4a8] ss:$48 sps:$4 sm:$0xff]   ;;  %v24408_v19 = vld [vmem:[#allocation9 + $0x44c] ss:$48 sps:$4 sm:$0xff]  }
 0x9fc   :  { %v24403_v1 = vld [vmem:[#allocation9 + $0xaa8] ss:$48 sps:$4 sm:$0xff]   ;;  %v24411_v3 = vld [vmem:[#allocation9 + $0xa4c] ss:$48 sps:$4 sm:$0xff]  }
 0x9fd   :  { %17096 = vmatpush1.bf16.msra.mxu0 %v24352_v51  ;;  %v24406_v58 = vld [vmem:[#allocation9 + $0x448] ss:$48 sps:$4 sm:$0xff]   ;;  %v24414_v51 = vld [vmem:[#allocation9 + $0x3ec] ss:$48 sps:$4 sm:$0xff]  }
 0x9fe   :  { %17137 = vmatpush1.bf16.msra.mxu1 %v24355_v20  ;;  %17097 = vmatprep.subr.bf16.mxu0 %v24360_v2  ;;  %v24409_v17 = vld [vmem:[#allocation9 + $0xa48] ss:$48 sps:$4 sm:$0xff]   ;;  %v24417_v20 = vld [vmem:[#allocation9 + $0x9ec] ss:$48 sps:$4 sm:$0xff]  }
 0x9ff   :  { %17138 = vmatprep.subr.bf16.mxu1 %v24363_v21  ;;  %v24412_v2 = vld [vmem:[#allocation9 + $0x3e8] ss:$48 sps:$4 sm:$0xff]  }
 0xa00   :  { %v24415_v21 = vld [vmem:[#allocation9 + $0x9e8] ss:$48 sps:$4 sm:$0xff]  }
 0xa01   :  { %17098 = vmatpush1.bf16.msra.mxu0 %v24358_v31  ;;  %v24420_v31 = vld [vmem:[#allocation9 + $0x38c] ss:$48 sps:$4 sm:$0xff]  }
 0xa02   :  { %17139 = vmatpush1.bf16.msra.mxu1 %v24361_v30  ;;  %17099 = vmatprep.subr.bf16.mxu0 %v24366_v10  ;;  %v24423_v30 = vld [vmem:[#allocation9 + $0x98c] ss:$48 sps:$4 sm:$0xff]   ;;  %v24418_v10 = vld [vmem:[#allocation9 + $0x388] ss:$48 sps:$4 sm:$0xff]  }
 0xa03   :  { %17140 = vmatprep.subr.bf16.mxu1 %v24369_v49  ;;  %v24421_v49 = vld [vmem:[#allocation9 + $0x988] ss:$48 sps:$4 sm:$0xff]  }
 0xa05   :  { %17100 = vmatpush1.bf16.msra.mxu0 %v24364_v29  ;;  %v24426_v29 = vld [vmem:[#allocation9 + $0x32c] ss:$48 sps:$4 sm:$0xff]  }
 0xa06   :  { %17141 = vmatpush1.bf16.msra.mxu1 %v24367_v33  ;;  %17101 = vmatprep.subr.bf16.mxu0 %v24372_v26  ;;  %v24429_v33 = vld [vmem:[#allocation9 + $0x92c] ss:$48 sps:$4 sm:$0xff]   ;;  %v24424_v26 = vld [vmem:[#allocation9 + $0x328] ss:$48 sps:$4 sm:$0xff]  }
 0xa07   :  { %17142 = vmatprep.subr.bf16.mxu1 %v24375_v32  ;;  %v24427_v32 = vld [vmem:[#allocation9 + $0x928] ss:$48 sps:$4 sm:$0xff]  }
 0xa09   :  { %17102 = vmatpush1.bf16.msra.mxu0 %v24370_v25  ;;  %v25600_v25 = vld [vmem:[#allocation10 + $0x8] sm:$0xf] }
 0xa0a   :  { %17143 = vmatpush1.bf16.msra.mxu1 %v24373_v42  ;;  %17103 = vmatprep.subr.bf16.mxu0 %v24378_v27  ;;  %v24432_v42 = vld [vmem:[#allocation9 + $0xecc] ss:$48 sps:$4 sm:$0xff]  }
 0xa0b   :  { %17144 = vmatprep.subr.bf16.mxu1 %v24381_v34  ;;  %v24435_v27 = vld [vmem:[#allocation9 + $0x14cc] ss:$48 sps:$4 sm:$0xff]   ;;  %v10074_v34 = vrot.slane %v25600_v25, %v25129_v57 }
 0xa0d   :  { %17104 = vmatpush1.bf16.msra.mxu0 %v24376_v63  ;;  %v24430_v63 = vld [vmem:[#allocation9 + $0xec8] ss:$48 sps:$4 sm:$0xff]  }
 0xa0e   :  { %17145 = vmatpush1.bf16.msra.mxu1 %v24379_v38  ;;  %17105 = vmatprep.subr.bf16.mxu0 %v24384_v52  ;;  %v24433_v38 = vld [vmem:[#allocation9 + $0x14c8] ss:$48 sps:$4 sm:$0xff]   ;;  %v10078_v52 = vrot.slane %v25600_v25, %v25132_v60 }
 0xa0f   :  { %17146 = vmatprep.subr.bf16.mxu1 %v24387_v22  ;;  %v24438_v22 = vld [vmem:[#allocation9 + $0xe6c] ss:$48 sps:$4 sm:$0xff]  }
 0xa11   :  { %17106 = vmatpush2.bf16.msra.mxu0 %v24382_v55 }
 0xa12   :  { %17147 = vmatpush2.bf16.msra.mxu1 %v24385_v35  ;;  %17107 = vmatprep.subr.bf16.mxu0 %v24390_v9  ;;  %v24441_v35 = vld [vmem:[#allocation9 + $0x146c] ss:$48 sps:$4 sm:$0xff]  }
 0xa13   :  { %17148 = vmatprep.subr.bf16.mxu1 %v24393_v18 }
 0xa15   :  { %17108 = vmatpush2.bf16.msra.mxu0 %v24388_v47  ;;  %v24436_v47 = vld [vmem:[#allocation9 + $0xe68] ss:$48 sps:$4 sm:$0xff]  }
 0xa16   :  { %17149 = vmatpush2.bf16.msra.mxu1 %v24391_v53  ;;  %17109 = vmatprep.subr.bf16.mxu0 %v24396_v36  ;;  %v24439_v36 = vld [vmem:[#allocation9 + $0x1468] ss:$48 sps:$4 sm:$0xff]  }
 0xa17   :  { %17150 = vmatprep.subr.bf16.mxu1 %v24399_v8  ;;  %v24444_v8 = vld [vmem:[#allocation9 + $0xe0c] ss:$48 sps:$4 sm:$0xff]  }
 0xa19   :  { %17110 = vmatpush2.bf16.msra.mxu0 %v24394_v61 }
 0xa1a   :  { %17151 = vmatpush2.bf16.msra.mxu1 %v24397_v41  ;;  %17111 = vmatprep.subr.bf16.mxu0 %v24402_v62 }
 0xa1b   :  { %17152 = vmatprep.subr.bf16.mxu1 %v24405_v14 }
 0xa1d   :  { %17112 = vmatpush2.bf16.msra.mxu0 %v24400_v16 }
 0xa1e   :  { %17153 = vmatpush2.bf16.msra.mxu1 %v24403_v1  ;;  %17113 = vmatprep.subr.bf16.mxu0 %v24408_v19  ;;  %v24442_v1 = vld [vmem:[#allocation9 + $0xe08] ss:$48 sps:$4 sm:$0xff]  }
 0xa1f   :  { %17154 = vmatprep.subr.bf16.mxu1 %v24411_v3  ;;  %v24445_v19 = vld [vmem:[#allocation9 + $0x1408] ss:$48 sps:$4 sm:$0xff]   ;;  %v24450_v3 = vld [vmem:[#allocation9 + $0xdac] ss:$48 sps:$4 sm:$0xff]  }
 0xa21   :  { %17114 = vmatpush2.bf16.msra.mxu0 %v24406_v58 }
 0xa22   :  { %17155 = vmatpush2.bf16.msra.mxu1 %v24409_v17  ;;  %17115 = vmatprep.subr.bf16.mxu0 %v24414_v51  ;;  %v24453_v17 = vld [vmem:[#allocation9 + $0x13ac] ss:$48 sps:$4 sm:$0xff]   ;;  %v24451_v51 = vld [vmem:[#allocation9 + $0x13a8] ss:$48 sps:$4 sm:$0xff]  }
 0xa23   :  { %17156 = vmatprep.subr.bf16.mxu1 %v24417_v20  ;;  %v24456_v20 = vld [vmem:[#allocation9 + $0xd4c] ss:$48 sps:$4 sm:$0xff]  }
 0xa25   :  { %17116 = vmatpush2.bf16.msra.mxu0 %v24412_v2  ;;  %v24459_v2 = vld [vmem:[#allocation9 + $0x134c] ss:$48 sps:$4 sm:$0xff]  }
 0xa26   :  { %17157 = vmatpush2.bf16.msra.mxu1 %v24415_v21  ;;  %17117 = vmatprep.subr.bf16.mxu0 %v24420_v31  ;;  %v24454_v21 = vld [vmem:[#allocation9 + $0xd48] ss:$48 sps:$4 sm:$0xff]  }
 0xa27   :  { %17158 = vmatprep.subr.bf16.mxu1 %v24423_v30  ;;  %v24457_v31 = vld [vmem:[#allocation9 + $0x1348] ss:$48 sps:$4 sm:$0xff]   ;;  %v24462_v30 = vld [vmem:[#allocation9 + $0xcec] ss:$48 sps:$4 sm:$0xff]  }
 0xa29   :  { %17118 = vmatpush2.bf16.msra.mxu0 %v24418_v10  ;;  %v24465_v10 = vld [vmem:[#allocation9 + $0x12ec] ss:$48 sps:$4 sm:$0xff]  }
 0xa2a   :  { %17159 = vmatpush2.bf16.msra.mxu1 %v24421_v49  ;;  %17119 = vmatprep.subr.bf16.mxu0 %v24426_v29  ;;  %v24460_v49 = vld [vmem:[#allocation9 + $0xce8] ss:$48 sps:$4 sm:$0xff]  }
 0xa2b   :  { %17160 = vmatprep.subr.bf16.mxu1 %v24429_v33  ;;  %v24463_v29 = vld [vmem:[#allocation9 + $0x12e8] ss:$48 sps:$4 sm:$0xff]   ;;  %v24468_v33 = vld [vmem:[#allocation9 + $0xc8c] ss:$48 sps:$4 sm:$0xff]  }
 0xa2d   :  { %17120 = vmatpush2.bf16.msra.mxu0 %v24424_v26  ;;  %v24471_v26 = vld [vmem:[#allocation9 + $0x128c] ss:$48 sps:$4 sm:$0xff]  }
 0xa2e   :  { %17161 = vmatpush2.bf16.msra.mxu1 %v24427_v32  ;;  %17171 = vmatprep.subr.bf16.mxu0 %v24432_v42  ;;  %v24466_v32 = vld [vmem:[#allocation9 + $0xc88] ss:$48 sps:$4 sm:$0xff]  }
 0xa2f   :  { %17212 = vmatprep.subr.bf16.mxu1 %v24435_v27  ;;  %v24469_v42 = vld [vmem:[#allocation9 + $0x1288] ss:$48 sps:$4 sm:$0xff]   ;;  %v24474_v27 = vld [vmem:[#allocation9 + $0xc2c] ss:$48 sps:$4 sm:$0xff]  }
 0xa30   :  { %v16877_v55 = vpop.f32.mrf.mxu0  ;;  %17122 = vmatmul.mubr.bf16.vlgmr.msra.gmra.mxu0 %v25402_v23  ;;  %v24447_v23 = vld [vmem:[#allocation9 + $0x140c] ss:$48 sps:$4 sm:$0xff]  }
 0xa31   :  { %v16878_v9 = vadd.f32 %v16877_v55, %v10074_v34  ;;  %v16918_v18 = vpop.f32.mrf.mxu1  ;;  %17163 = vmatmul.mubr.bf16.vlgmr.msra.gmra.mxu1 %v25404_v13  ;;  %17172 = vmatpush1.bf16.msra.mxu0 %v24430_v63  ;;  %v24477_v34 = vld [vmem:[#allocation9 + $0x122c] ss:$48 sps:$4 sm:$0xff]   ;;  %v24472_v63 = vld [vmem:[#allocation9 + $0xc28] ss:$48 sps:$4 sm:$0xff]  }
 0xa32   :  { %17203 = vmatprep.mubr.bf16.mxu0 %v25422_v45  ;;  %17213 = vmatpush1.bf16.msra.mxu1 %v24433_v38  ;;  %v16879_v53 = vpop.f32.mrf.mxu0  ;;  %v24475_v38 = vld [vmem:[#allocation9 + $0x1228] ss:$48 sps:$4 sm:$0xff]  }
 0xa33   :  { %v25609_v61 = vadd.f32 %v16918_v18, %v16878_v9  ;;  %17244 = vmatprep.mubr.bf16.mxu1 %v25424_v39  ;;  %v16880_v41 = vadd.f32 %v16879_v53, %v10078_v52  ;;  %v16920_v62 = vpop.f32.mrf.mxu1  ;;  %17173 = vmatprep.subr.bf16.mxu0 %v24438_v22  ;;  %v24448_v39 = vld [vmem:[#allocation9 + $0xda8] ss:$48 sps:$4 sm:$0xff]   ;;  %v24480_v52 = vld [vmem:[#allocation9 + $0x11cc] ss:$48 sps:$4 sm:$0xff]  }
 0xa34   :  { %v16881_v14 = vpop.f32.mrf.mxu0  ;;  %17214 = vmatprep.subr.bf16.mxu1 %v24441_v35  ;;  %v24483_v22 = vld [vmem:[#allocation9 + $0x17cc] ss:$48 sps:$4 sm:$0xff]   ;;  %v24478_v55 = vld [vmem:[#allocation9 + $0x11c8] ss:$48 sps:$4 sm:$0xff]  }
 0xa35   :  { %v25612_v16 = vadd.f32 %v16920_v62, %v16880_v41  ;;  %v16922_v13 = vpop.f32.mrf.mxu1  ;;  %17174 = vmatpush1.bf16.msra.mxu0 %v24436_v47  ;;  %v24481_v35 = vld [vmem:[#allocation9 + $0x17c8] ss:$48 sps:$4 sm:$0xff]   ;;  %v24486_v9 = vld [vmem:[#allocation9 + $0x116c] ss:$48 sps:$4 sm:$0xff]  }
 0xa36   :  { %17215 = vmatpush1.bf16.msra.mxu1 %v24439_v36  ;;  %v16882_v45 = vpop.f32.mrf.mxu0  ;;  %17175 = vmatprep.subr.bf16.mxu0 %v24444_v8  ;;  %v24489_v18 = vld [vmem:[#allocation9 + $0x176c] ss:$48 sps:$4 sm:$0xff]   ;;  %v24484_v47 = vld [vmem:[#allocation9 + $0x1168] ss:$48 sps:$4 sm:$0xff]  }
 0xa37   :  { %v16923_v58 = vpop.f32.mrf.mxu1  ;;  %17216 = vmatprep.subr.bf16.mxu1 %v24447_v23  ;;  %v24487_v53 = vld [vmem:[#allocation9 + $0x1768] ss:$48 sps:$4 sm:$0xff]   ;;  %v24492_v36 = vld [vmem:[#allocation9 + $0x110c] ss:$48 sps:$4 sm:$0xff]  }
 0xa38   :  { %v24495_v8 = vld [vmem:[#allocation9 + $0x170c] ss:$48 sps:$4 sm:$0xff]   ;;  %v24490_v41 = vld [vmem:[#allocation9 + $0x1108] ss:$48 sps:$4 sm:$0xff]  }
 0xa39   :  { %17176 = vmatpush1.bf16.msra.mxu0 %v24442_v1  ;;  %v24493_v62 = vld [vmem:[#allocation9 + $0x1708] ss:$48 sps:$4 sm:$0xff]   ;;  %v24498_v23 = vld [vmem:[#allocation9 + $0x10ac] ss:$48 sps:$4 sm:$0xff]  }
 0xa3a   :  { %17217 = vmatpush1.bf16.msra.mxu1 %v24445_v19  ;;  %17177 = vmatprep.subr.bf16.mxu0 %v24450_v3  ;;  %v24501_v14 = vld [vmem:[#allocation9 + $0x16ac] ss:$48 sps:$4 sm:$0xff]   ;;  %v24496_v13 = vld [vmem:[#allocation9 + $0x10a8] ss:$48 sps:$4 sm:$0xff]  }
 0xa3b   :  { %17218 = vmatprep.subr.bf16.mxu1 %v24453_v17  ;;  %v24499_v1 = vld [vmem:[#allocation9 + $0x16a8] ss:$48 sps:$4 sm:$0xff]   ;;  %v24504_v45 = vld [vmem:[#allocation9 + $0x104c] ss:$48 sps:$4 sm:$0xff]  }
 0xa3c   :  { %v24507_v19 = vld [vmem:[#allocation9 + $0x164c] ss:$48 sps:$4 sm:$0xff]   ;;  %v24502_v3 = vld [vmem:[#allocation9 + $0x1048] ss:$48 sps:$4 sm:$0xff]  }
 0xa3d   :  { %17178 = vmatpush1.bf16.msra.mxu0 %v24448_v39  ;;  %v24505_v58 = vld [vmem:[#allocation9 + $0x1648] ss:$48 sps:$4 sm:$0xff]   ;;  %v24510_v17 = vld [vmem:[#allocation9 + $0xfec] ss:$48 sps:$4 sm:$0xff]  }
 0xa3e   :  { %17219 = vmatpush1.bf16.msra.mxu1 %v24451_v51  ;;  %17179 = vmatprep.subr.bf16.mxu0 %v24456_v20  ;;  %v24513_v39 = vld [vmem:[#allocation9 + $0x15ec] ss:$48 sps:$4 sm:$0xff]   ;;  %v24508_v51 = vld [vmem:[#allocation9 + $0xfe8] ss:$48 sps:$4 sm:$0xff]  }
 0xa3f   :  { %17220 = vmatprep.subr.bf16.mxu1 %v24459_v2  ;;  %v24511_v20 = vld [vmem:[#allocation9 + $0x15e8] ss:$48 sps:$4 sm:$0xff]   ;;  %v24516_v2 = vld [vmem:[#allocation9 + $0xf8c] ss:$48 sps:$4 sm:$0xff]  }
 0xa41   :  { %17180 = vmatpush1.bf16.msra.mxu0 %v24454_v21  ;;  %v24519_v21 = vld [vmem:[#allocation9 + $0x158c] ss:$48 sps:$4 sm:$0xff]  }
 0xa42   :  { %17221 = vmatpush1.bf16.msra.mxu1 %v24457_v31  ;;  %17181 = vmatprep.subr.bf16.mxu0 %v24462_v30  ;;  %v24514_v31 = vld [vmem:[#allocation9 + $0xf88] ss:$48 sps:$4 sm:$0xff]  }
 0xa43   :  { %17222 = vmatprep.subr.bf16.mxu1 %v24465_v10  ;;  %v24517_v30 = vld [vmem:[#allocation9 + $0x1588] ss:$48 sps:$4 sm:$0xff]   ;;  %v24522_v10 = vld [vmem:[#allocation9 + $0xf2c] ss:$48 sps:$4 sm:$0xff]  }
 0xa45   :  { %17182 = vmatpush1.bf16.msra.mxu0 %v24460_v49  ;;  %v24525_v49 = vld [vmem:[#allocation9 + $0x152c] ss:$48 sps:$4 sm:$0xff]  }
 0xa46   :  { %17223 = vmatpush1.bf16.msra.mxu1 %v24463_v29  ;;  %17183 = vmatprep.subr.bf16.mxu0 %v24468_v33  ;;  %v24520_v29 = vld [vmem:[#allocation9 + $0xf28] ss:$48 sps:$4 sm:$0xff]  }
 0xa47   :  { %17224 = vmatprep.subr.bf16.mxu1 %v24471_v26  ;;  %v24523_v33 = vld [vmem:[#allocation9 + $0x1528] ss:$48 sps:$4 sm:$0xff]   ;;  %v24528_v26 = vld [vmem:[#allocation9 + $0x1acc] ss:$48 sps:$4 sm:$0xff]  }
 0xa49   :  { %17184 = vmatpush1.bf16.msra.mxu0 %v24466_v32  ;;  %v24531_v32 = vld [vmem:[#allocation9 + $0x20cc] ss:$48 sps:$4 sm:$0xff]  }
 0xa4a   :  { %17225 = vmatpush1.bf16.msra.mxu1 %v24469_v42  ;;  %17185 = vmatprep.subr.bf16.mxu0 %v24474_v27  ;;  %v24526_v42 = vld [vmem:[#allocation9 + $0x1ac8] ss:$48 sps:$4 sm:$0xff]  }
 0xa4b   :  { %17226 = vmatprep.subr.bf16.mxu1 %v24477_v34  ;;  %v24529_v27 = vld [vmem:[#allocation9 + $0x20c8] ss:$48 sps:$4 sm:$0xff]   ;;  %v24534_v34 = vld [vmem:[#allocation9 + $0x1a6c] ss:$48 sps:$4 sm:$0xff]  }
 0xa4d   :  { %17186 = vmatpush1.bf16.msra.mxu0 %v24472_v63 }
 0xa4e   :  { %17227 = vmatpush1.bf16.msra.mxu1 %v24475_v38  ;;  %17187 = vmatprep.subr.bf16.mxu0 %v24480_v52  ;;  %v24537_v38 = vld [vmem:[#allocation9 + $0x206c] ss:$48 sps:$4 sm:$0xff]  }
 0xa4f   :  { %17228 = vmatprep.subr.bf16.mxu1 %v24483_v22 }
 0xa51   :  { %17188 = vmatpush2.bf16.msra.mxu0 %v24478_v55  ;;  %v24532_v55 = vld [vmem:[#allocation9 + $0x1a68] ss:$48 sps:$4 sm:$0xff]  }
 0xa52   :  { %17229 = vmatpush2.bf16.msra.mxu1 %v24481_v35  ;;  %17189 = vmatprep.subr.bf16.mxu0 %v24486_v9  ;;  %v24535_v9 = vld [vmem:[#allocation9 + $0x2068] ss:$48 sps:$4 sm:$0xff]  }
 0xa53   :  { %17230 = vmatprep.subr.bf16.mxu1 %v24489_v18  ;;  %v24540_v18 = vld [vmem:[#allocation9 + $0x1a0c] ss:$48 sps:$4 sm:$0xff]  }
 0xa55   :  { %17190 = vmatpush2.bf16.msra.mxu0 %v24484_v47 }
 0xa56   :  { %17231 = vmatpush2.bf16.msra.mxu1 %v24487_v53  ;;  %17191 = vmatprep.subr.bf16.mxu0 %v24492_v36 }
 0xa57   :  { %17232 = vmatprep.subr.bf16.mxu1 %v24495_v8 }
 0xa59   :  { %17192 = vmatpush2.bf16.msra.mxu0 %v24490_v41 }
 0xa5a   :  { %17233 = vmatpush2.bf16.msra.mxu1 %v24493_v62  ;;  %17193 = vmatprep.subr.bf16.mxu0 %v24498_v23  ;;  %v24541_v62 = vld [vmem:[#allocation9 + $0x2008] ss:$48 sps:$4 sm:$0xff]   ;;  %v24546_v23 = vld [vmem:[#allocation9 + $0x19ac] ss:$48 sps:$4 sm:$0xff]  }
 0xa5b   :  { %17234 = vmatprep.subr.bf16.mxu1 %v24501_v14 }
 0xa5d   :  { %17194 = vmatpush2.bf16.msra.mxu0 %v24496_v13  ;;  %v24547_v13 = vld [vmem:[#allocation9 + $0x1fa8] ss:$48 sps:$4 sm:$0xff]  }
 0xa5e   :  { %17235 = vmatpush2.bf16.msra.mxu1 %v24499_v1  ;;  %17195 = vmatprep.subr.bf16.mxu0 %v24504_v45  ;;  %v24552_v1 = vld [vmem:[#allocation9 + $0x194c] ss:$48 sps:$4 sm:$0xff]  }
 0xa5f   :  { %17236 = vmatprep.subr.bf16.mxu1 %v24507_v19  ;;  %v24555_v45 = vld [vmem:[#allocation9 + $0x1f4c] ss:$48 sps:$4 sm:$0xff]   ;;  %v24550_v19 = vld [vmem:[#allocation9 + $0x1948] ss:$48 sps:$4 sm:$0xff]  }
 0xa61   :  { %17196 = vmatpush2.bf16.msra.mxu0 %v24502_v3  ;;  %v24553_v3 = vld [vmem:[#allocation9 + $0x1f48] ss:$48 sps:$4 sm:$0xff]  }
 0xa62   :  { %17237 = vmatpush2.bf16.msra.mxu1 %v24505_v58  ;;  %17197 = vmatprep.subr.bf16.mxu0 %v24510_v17  ;;  %v24558_v58 = vld [vmem:[#allocation9 + $0x18ec] ss:$48 sps:$4 sm:$0xff]  }
 0xa63   :  { %17238 = vmatprep.subr.bf16.mxu1 %v24513_v39  ;;  %v24561_v17 = vld [vmem:[#allocation9 + $0x1eec] ss:$48 sps:$4 sm:$0xff]   ;;  %v24556_v39 = vld [vmem:[#allocation9 + $0x18e8] ss:$48 sps:$4 sm:$0xff]  }
 0xa65   :  { %17198 = vmatpush2.bf16.msra.mxu0 %v24508_v51  ;;  %v24559_v51 = vld [vmem:[#allocation9 + $0x1ee8] ss:$48 sps:$4 sm:$0xff]  }
 0xa66   :  { %17239 = vmatpush2.bf16.msra.mxu1 %v24511_v20  ;;  %17199 = vmatprep.subr.bf16.mxu0 %v24516_v2  ;;  %v24564_v20 = vld [vmem:[#allocation9 + $0x188c] ss:$48 sps:$4 sm:$0xff]  }
 0xa67   :  { %17240 = vmatprep.subr.bf16.mxu1 %v24519_v21  ;;  %v24567_v2 = vld [vmem:[#allocation9 + $0x1e8c] ss:$48 sps:$4 sm:$0xff]   ;;  %v24562_v21 = vld [vmem:[#allocation9 + $0x1888] ss:$48 sps:$4 sm:$0xff]  }
 0xa69   :  { %17200 = vmatpush2.bf16.msra.mxu0 %v24514_v31  ;;  %v24565_v31 = vld [vmem:[#allocation9 + $0x1e88] ss:$48 sps:$4 sm:$0xff]  }
 0xa6a   :  { %17241 = vmatpush2.bf16.msra.mxu1 %v24517_v30  ;;  %17201 = vmatprep.subr.bf16.mxu0 %v24522_v10  ;;  %v24570_v30 = vld [vmem:[#allocation9 + $0x182c] ss:$48 sps:$4 sm:$0xff]  }
 0xa6b   :  { %17242 = vmatprep.subr.bf16.mxu1 %v24525_v49  ;;  %v24573_v10 = vld [vmem:[#allocation9 + $0x1e2c] ss:$48 sps:$4 sm:$0xff]   ;;  %v24568_v49 = vld [vmem:[#allocation9 + $0x1828] ss:$48 sps:$4 sm:$0xff]  }
 0xa6d   :  { %17202 = vmatpush2.bf16.msra.mxu0 %v24520_v29  ;;  %v24571_v29 = vld [vmem:[#allocation9 + $0x1e28] ss:$48 sps:$4 sm:$0xff]  }
 0xa6e   :  { %17243 = vmatpush2.bf16.msra.mxu1 %v24523_v33  ;;  %17253 = vmatprep.subr.bf16.mxu0 %v24528_v26  ;;  %v24576_v33 = vld [vmem:[#allocation9 + $0x1dcc] ss:$48 sps:$4 sm:$0xff]  }
 0xa6f   :  { %17294 = vmatprep.subr.bf16.mxu1 %v24531_v32  ;;  %v24579_v26 = vld [vmem:[#allocation9 + $0x23cc] ss:$48 sps:$4 sm:$0xff]   ;;  %v24574_v32 = vld [vmem:[#allocation9 + $0x1dc8] ss:$48 sps:$4 sm:$0xff]  }
 0xa70   :  { %v16959_v63 = vpop.f32.mrf.mxu0  ;;  %17204 = vmatmul.mubr.bf16.vlgmr.msra.gmra.mxu0 %v25442_v5 }
 0xa71   :  { %v16960_v52 = vadd.f32 %v16959_v63, %v25609_v61  ;;  %v17000_v22 = vpop.f32.mrf.mxu1  ;;  %17245 = vmatmul.mubr.bf16.vlgmr.msra.gmra.mxu1 %v25444_v15  ;;  %17254 = vmatpush1.bf16.msra.mxu0 %v24526_v42  ;;  %v24543_v61 = vld [vmem:[#allocation9 + $0x200c] ss:$48 sps:$4 sm:$0xff]   ;;  %v24577_v42 = vld [vmem:[#allocation9 + $0x23c8] ss:$48 sps:$4 sm:$0xff]  }
 0xa72   :  { %17285 = vmatprep.mubr.bf16.mxu0 %v25446_v7  ;;  %17295 = vmatpush1.bf16.msra.mxu1 %v24529_v27  ;;  %v16961_v35 = vpop.f32.mrf.mxu0  ;;  %v24538_v7 = vld [vmem:[#allocation9 + $0x1a08] ss:$48 sps:$4 sm:$0xff]   ;;  %v24582_v27 = vld [vmem:[#allocation9 + $0x1d6c] ss:$48 sps:$4 sm:$0xff]  }
 0xa73   :  { %v25618_v47 = vadd.f32 %v17000_v22, %v16960_v52  ;;  %17326 = vmatprep.mubr.bf16.mxu1 %v25450_v28  ;;  %v16962_v5 = vadd.f32 %v16961_v35, %v25612_v16  ;;  %v17002_v53 = vpop.f32.mrf.mxu1  ;;  %17255 = vmatprep.subr.bf16.mxu0 %v24534_v34  ;;  %v24549_v28 = vld [vmem:[#allocation9 + $0x1fac] ss:$48 sps:$4 sm:$0xff]   ;;  %v24544_v16 = vld [vmem:[#allocation9 + $0x19a8] ss:$48 sps:$4 sm:$0xff]  }
 0xa74   :  { %v16963_v36 = vpop.f32.mrf.mxu0  ;;  %17296 = vmatprep.subr.bf16.mxu1 %v24537_v38  ;;  %v24585_v34 = vld [vmem:[#allocation9 + $0x236c] ss:$48 sps:$4 sm:$0xff]   ;;  %v24580_v63 = vld [vmem:[#allocation9 + $0x1d68] ss:$48 sps:$4 sm:$0xff]  }
 0xa75   :  { %v25622_v15 = vadd.f32 %v17002_v53, %v16962_v5  ;;  %v17004_v8 = vpop.f32.mrf.mxu1  ;;  %17256 = vmatpush1.bf16.msra.mxu0 %v24532_v55  ;;  %v24583_v38 = vld [vmem:[#allocation9 + $0x2368] ss:$48 sps:$4 sm:$0xff]   ;;  %v24588_v52 = vld [vmem:[#allocation9 + $0x1d0c] ss:$48 sps:$4 sm:$0xff]  }
 0xa76   :  { %17297 = vmatpush1.bf16.msra.mxu1 %v24535_v9  ;;  %v16964_v41 = vpop.f32.mrf.mxu0  ;;  %17257 = vmatprep.subr.bf16.mxu0 %v24540_v18  ;;  %v24591_v22 = vld [vmem:[#allocation9 + $0x230c] ss:$48 sps:$4 sm:$0xff]   ;;  %v24586_v55 = vld [vmem:[#allocation9 + $0x1d08] ss:$48 sps:$4 sm:$0xff]  }
 0xa77   :  { %v17005_v14 = vpop.f32.mrf.mxu1  ;;  %17298 = vmatprep.subr.bf16.mxu1 %v24543_v61  ;;  %v24589_v35 = vld [vmem:[#allocation9 + $0x2308] ss:$48 sps:$4 sm:$0xff]   ;;  %v24594_v9 = vld [vmem:[#allocation9 + $0x1cac] ss:$48 sps:$4 sm:$0xff]  }
 0xa78   :  { %v24597_v18 = vld [vmem:[#allocation9 + $0x22ac] ss:$48 sps:$4 sm:$0xff]   ;;  %v24592_v5 = vld [vmem:[#allocation9 + $0x1ca8] ss:$48 sps:$4 sm:$0xff]  }
 0xa79   :  { %17258 = vmatpush1.bf16.msra.mxu0 %v24538_v7  ;;  %v24595_v53 = vld [vmem:[#allocation9 + $0x22a8] ss:$48 sps:$4 sm:$0xff]   ;;  %v24600_v61 = vld [vmem:[#allocation9 + $0x1c4c] ss:$48 sps:$4 sm:$0xff]  }
 0xa7a   :  { %17299 = vmatpush1.bf16.msra.mxu1 %v24541_v62  ;;  %17259 = vmatprep.subr.bf16.mxu0 %v24546_v23  ;;  %v24603_v36 = vld [vmem:[#allocation9 + $0x224c] ss:$48 sps:$4 sm:$0xff]   ;;  %v24598_v8 = vld [vmem:[#allocation9 + $0x1c48] ss:$48 sps:$4 sm:$0xff]  }
 0xa7b   :  { %17300 = vmatprep.subr.bf16.mxu1 %v24549_v28  ;;  %v24601_v7 = vld [vmem:[#allocation9 + $0x2248] ss:$48 sps:$4 sm:$0xff]   ;;  %v24606_v41 = vld [vmem:[#allocation9 + $0x1bec] ss:$48 sps:$4 sm:$0xff]  }
 0xa7c   :  { %v24609_v62 = vld [vmem:[#allocation9 + $0x21ec] ss:$48 sps:$4 sm:$0xff]   ;;  %v24604_v23 = vld [vmem:[#allocation9 + $0x1be8] ss:$48 sps:$4 sm:$0xff]  }
 0xa7d   :  { %17260 = vmatpush1.bf16.msra.mxu0 %v24544_v16  ;;  %v24607_v14 = vld [vmem:[#allocation9 + $0x21e8] ss:$48 sps:$4 sm:$0xff]   ;;  %v24612_v28 = vld [vmem:[#allocation9 + $0x1b8c] ss:$48 sps:$4 sm:$0xff]  }
 0xa7e   :  { %17301 = vmatpush1.bf16.msra.mxu1 %v24547_v13  ;;  %17261 = vmatprep.subr.bf16.mxu0 %v24552_v1  ;;  %v24615_v16 = vld [vmem:[#allocation9 + $0x218c] ss:$48 sps:$4 sm:$0xff]   ;;  %v24610_v13 = vld [vmem:[#allocation9 + $0x1b88] ss:$48 sps:$4 sm:$0xff]  }
 0xa7f   :  { %17302 = vmatprep.subr.bf16.mxu1 %v24555_v45  ;;  %v24613_v1 = vld [vmem:[#allocation9 + $0x2188] ss:$48 sps:$4 sm:$0xff]   ;;  %v24618_v45 = vld [vmem:[#allocation9 + $0x1b2c] ss:$48 sps:$4 sm:$0xff]  }
 0xa81   :  { %17262 = vmatpush1.bf16.msra.mxu0 %v24550_v19  ;;  %v24621_v19 = vld [vmem:[#allocation9 + $0x212c] ss:$48 sps:$4 sm:$0xff]  }
 0xa82   :  { %17303 = vmatpush1.bf16.msra.mxu1 %v24553_v3  ;;  %17263 = vmatprep.subr.bf16.mxu0 %v24558_v58  ;;  %v24616_v3 = vld [vmem:[#allocation9 + $0x1b28] ss:$48 sps:$4 sm:$0xff]  }
 0xa83   :  { %17304 = vmatprep.subr.bf16.mxu1 %v24561_v17  ;;  %v24619_v58 = vld [vmem:[#allocation9 + $0x2128] ss:$48 sps:$4 sm:$0xff]  }
 0xa85   :  { %17264 = vmatpush1.bf16.msra.mxu0 %v24556_v39 }
 0xa86   :  { %17305 = vmatpush1.bf16.msra.mxu1 %v24559_v51  ;;  %17265 = vmatprep.subr.bf16.mxu0 %v24564_v20 }
 0xa87   :  { %17306 = vmatprep.subr.bf16.mxu1 %v24567_v2 }
 0xa89   :  { %17266 = vmatpush1.bf16.msra.mxu0 %v24562_v21 }
 0xa8a   :  { %17307 = vmatpush1.bf16.msra.mxu1 %v24565_v31  ;;  %17267 = vmatprep.subr.bf16.mxu0 %v24570_v30 }
 0xa8b   :  { %17308 = vmatprep.subr.bf16.mxu1 %v24573_v10 }
 0xa8d   :  { %17268 = vmatpush1.bf16.msra.mxu0 %v24568_v49 }
 0xa8e   :  { %17309 = vmatpush1.bf16.msra.mxu1 %v24571_v29  ;;  %17269 = vmatprep.subr.bf16.mxu0 %v24576_v33 }
 0xa8f   :  { %17310 = vmatprep.subr.bf16.mxu1 %v24579_v26 }
 0xa91   :  { %17270 = vmatpush2.bf16.msra.mxu0 %v24574_v32 }
 0xa92   :  { %17311 = vmatpush2.bf16.msra.mxu1 %v24577_v42  ;;  %17271 = vmatprep.subr.bf16.mxu0 %v24582_v27 }
 0xa93   :  { %17312 = vmatprep.subr.bf16.mxu1 %v24585_v34 }
 0xa95   :  { %17272 = vmatpush2.bf16.msra.mxu0 %v24580_v63 }
 0xa96   :  { %17313 = vmatpush2.bf16.msra.mxu1 %v24583_v38  ;;  %17273 = vmatprep.subr.bf16.mxu0 %v24588_v52 }
 0xa97   :  { %17314 = vmatprep.subr.bf16.mxu1 %v24591_v22 }
 0xa99   :  { %17274 = vmatpush2.bf16.msra.mxu0 %v24586_v55 }
 0xa9a   :  { %17315 = vmatpush2.bf16.msra.mxu1 %v24589_v35  ;;  %17275 = vmatprep.subr.bf16.mxu0 %v24594_v9 }
 0xa9b   :  { %17316 = vmatprep.subr.bf16.mxu1 %v24597_v18 }
 0xa9d   :  { %17276 = vmatpush2.bf16.msra.mxu0 %v24592_v5 }
 0xa9e   :  { %17317 = vmatpush2.bf16.msra.mxu1 %v24595_v53  ;;  %17277 = vmatprep.subr.bf16.mxu0 %v24600_v61 }
 0xa9f   :  { %17318 = vmatprep.subr.bf16.mxu1 %v24603_v36 }
 0xaa1   :  { %17278 = vmatpush2.bf16.msra.mxu0 %v24598_v8  ;;  %v17353_v8 = vmul.f32 %v25500_v54, %v25500_v54 }
 0xaa2   :  { %17319 = vmatpush2.bf16.msra.mxu1 %v24601_v7  ;;  %17279 = vmatprep.subr.bf16.mxu0 %v24606_v41  ;;  %v17352_v7 = vmul.f32 %v25496_v6, %v25496_v6  ;;  %v17339_v41 = vadd.f32 %v25500_v54, %v25496_v6 }
 0xaa3   :  { %17320 = vmatprep.subr.bf16.mxu1 %v24609_v62  ;;  %v17354_v62 = vmul.f32 %v25528_v59, %v25528_v59 }
 0xaa5   :  { %17280 = vmatpush2.bf16.msra.mxu0 %v24604_v23  ;;  %v17364_v23 = vadd.f32 %v17353_v8, %v17352_v7 }
 0xaa6   :  { %17321 = vmatpush2.bf16.msra.mxu1 %v24607_v14  ;;  %17281 = vmatprep.subr.bf16.mxu0 %v24612_v28  ;;  %v17340_v14 = vadd.f32 %v17339_v41, %v25528_v59 }
 0xaa7   :  { %17322 = vmatprep.subr.bf16.mxu1 %v24615_v16  ;;  %v17365_v28 = vadd.f32 %v17364_v23, %v17354_v62  ;;  %v17355_v16 = vmul.f32 %v25532_v0, %v25532_v0  ;;  %v24622_v23 = vld [vmem:[#allocation15 + $0x78] sm:$0xff]  }
 0xaa9   :  { %17282 = vmatpush2.bf16.msra.mxu0 %v24610_v13  ;;  %v17341_v13 = vadd.f32 %v17340_v14, %v25532_v0  ;;  %v24623_v14 = vld [vmem:[#allocation15 + $0xf8] sm:$0xff]  }
 0xaaa   :  { %17323 = vmatpush2.bf16.msra.mxu1 %v24613_v1  ;;  %17283 = vmatprep.subr.bf16.mxu0 %v24618_v45  ;;  %v17356_v1 = vmul.f32 %v25562_v50, %v25562_v50  ;;  %v17366_v45 = vadd.f32 %v17365_v28, %v17355_v16  ;;  %v24624_v28 = vld [vmem:[#allocation15 + $0x38] sm:$0xff]  }
 0xaab   :  { %17324 = vmatprep.subr.bf16.mxu1 %v24621_v19  ;;  %v17342_v19 = vadd.f32 %v17341_v13, %v25562_v50  ;;  %v24625_v16 = vld [vmem:[#allocation15 + $0xb8] sm:$0xff]   ;;  %v24626_v13 = vld [vmem:[#allocation15 + $0x70] sm:$0xff]  }
 0xaad   :  { %17284 = vmatpush2.bf16.msra.mxu0 %v24616_v3  ;;  %v17367_v3 = vadd.f32 %v17366_v45, %v17356_v1  ;;  %v24627_v1 = vld [vmem:[#allocation15 + $0xf0] sm:$0xff]  }
 0xaae   :  { %17325 = vmatpush2.bf16.msra.mxu1 %v24619_v58  ;;  %v17357_v58 = vmul.f32 %v25566_v24, %v25566_v24  ;;  %21020 = vmatprep.subr.bf16.mxu0 %v24622_v23  ;;  %v24628_v45 = vld [vmem:[#allocation15 + $0x30] sm:$0xff]  }
 0xaaf   :  { %21042 = vmatprep.subr.bf16.mxu1 %v24623_v14 }
 0xab0   :  { %v17041_v17 = vpop.f32.mrf.mxu0  ;;  %17286 = vmatmul.mubr.bf16.vlgmr.msra.gmra.mxu0 %v25460_v44  ;;  %v10082_v44 = vrot.slane %v25600_v25, %v25165_v43 }
 0xab1   :  { %v17042_v39 = vadd.f32 %v17041_v17, %v25618_v47  ;;  %v17082_v51 = vpop.f32.mrf.mxu1  ;;  %17327 = vmatmul.mubr.bf16.vlgmr.msra.gmra.mxu1 %v25462_v11  ;;  %v10086_v47 = vrot.slane %v25600_v25, %v25168_v48  ;;  %v17343_v17 = vadd.f32 %v17342_v19, %v25566_v24  ;;  %21021 = vmatpush3.bf16.msra.mxu0 %v24624_v28  ;;  %v24629_v19 = vld [vmem:[#allocation15 + $0xb0] sm:$0xff]  }
 0xab2   :  { %v17043_v20 = vpop.f32.mrf.mxu0  ;;  %21043 = vmatpush3.bf16.msra.mxu1 %v24625_v16  ;;  %21022 = vmatprep.subr.bf16.mxu0 %v24626_v13 }
 0xab3   :  { %v25627_v2 = vadd.f32 %v17082_v51, %v17042_v39  ;;  %v17044_v21 = vadd.f32 %v17043_v20, %v25622_v15  ;;  %v17084_v31 = vpop.f32.mrf.mxu1  ;;  %v17358_v39 = vmul.f32 %v25594_v37, %v25594_v37  ;;  %v17368_v51 = vadd.f32 %v17367_v3, %v17357_v58  ;;  %v24630_v3 = vld [vmem:[#allocation15 + $0x68] sm:$0xff]   ;;  %21044 = vmatprep.subr.bf16.mxu1 %v24627_v1 }
 0xab4   :  { %v17045_v30 = vpop.f32.mrf.mxu0  ;;  %v17344_v20 = vadd.f32 %v17343_v17, %v25594_v37  ;;  %v24631_v58 = vld [vmem:[#allocation15 + $0xe8] sm:$0xff]  }
 0xab5   :  { %v25630_v10 = vadd.f32 %v17084_v31, %v17044_v21  ;;  %v17086_v49 = vpop.f32.mrf.mxu1  ;;  %v17369_v21 = vadd.f32 %v17368_v51, %v17358_v39  ;;  %v17359_v31 = vmul.f32 %v25598_v40, %v25598_v40  ;;  %21023 = vmatpush3.bf16.msra.mxu0 %v24628_v45  ;;  %v24632_v17 = vld [vmem:[#allocation15 + $0x28] sm:$0xff]   ;;  %v24634_v51 = vld [vmem:[#allocation15 + $0x60] sm:$0xff]  }
 0xab6   :  { %v17046_v29 = vpop.f32.mrf.mxu0  ;;  %v17345_v49 = vadd.f32 %v17344_v20, %v25598_v40  ;;  %21045 = vmatpush3.bf16.msra.mxu1 %v24629_v19  ;;  %v24633_v39 = vld [vmem:[#allocation15 + $0xa8] sm:$0xff]   ;;  %21024 = vmatprep.subr.bf16.mxu0 %v24630_v3  ;;  %v24635_v20 = vld [vmem:[#allocation15 + $0xe0] sm:$0xff]  }
 0xab7   :  { %v17087_v33 = vpop.f32.mrf.mxu1  ;;  %v17360_v29 = vmul.f32 %v25627_v2, %v25627_v2  ;;  %21046 = vmatprep.subr.bf16.mxu1 %v24631_v58 }
 0xab9   :  { %21025 = vmatpush3.bf16.msra.mxu0 %v24632_v17 }
 0xaba   :  { %21047 = vmatpush3.bf16.msra.mxu1 %v24633_v39  ;;  %21026 = vmatprep.subr.bf16.mxu0 %v24634_v51 }
 0xabb   :  { %21048 = vmatprep.subr.bf16.mxu1 %v24635_v20 }
 0xaf0   :  { %v17123_v26 = vpop.f32.mrf.mxu0 }
 0xaf1   :  { %v17124_v11 = vadd.f32 %v17123_v26, %v10082_v44  ;;  %v17164_v32 = vpop.f32.mrf.mxu1  ;;  %v17370_v44 = vadd.f32 %v17369_v21, %v17359_v31  ;;  %v24636_v21 = vld [vmem:[#allocation15 + $0x20] sm:$0xff]  }
 0xaf2   :  { %v17125_v42 = vpop.f32.mrf.mxu0  ;;  %v24637_v31 = vld [vmem:[#allocation15 + $0xa0] sm:$0xff]   ;;  %21027 = vmatpush3.bf16.msra.mxu0 %v24636_v21 }
 0xaf3   :  { %v17165_v27 = vadd.f32 %v17164_v32, %v17124_v11  ;;  %v17126_v34 = vadd.f32 %v17125_v42, %v10086_v47  ;;  %v17166_v15 = vpop.f32.mrf.mxu1  ;;  %v17346_v47 = vadd.f32 %v17345_v49, %v25627_v2  ;;  %v17371_v32 = vadd.f32 %v17370_v44, %v17360_v29  ;;  %v24639_v49 = vld [vmem:[#allocation15 + $0xd8] sm:$0xff]   ;;  %21049 = vmatpush3.bf16.msra.mxu1 %v24637_v31  ;;  %v24642_v44 = vld [vmem:[#allocation15 + $0x50] sm:$0xff]  }
 0xaf4   :  { %v17127_v63 = vpop.f32.mrf.mxu0  ;;  %v17361_v42 = vmul.f32 %v25630_v10, %v25630_v10  ;;  %v24640_v29 = vld [vmem:[#allocation15 + $0x18] sm:$0xff]   ;;  %21050 = vmatprep.subr.bf16.mxu1 %v24639_v49 }
 0xaf5   :  { %v17167_v38 = vadd.f32 %v17166_v15, %v17126_v34  ;;  %v17168_v52 = vpop.f32.mrf.mxu1 }
 0xaf6   :  { %v17128_v22 = vpop.f32.mrf.mxu0 }
 0xaf7   :  { %v17169_v55 = vpop.f32.mrf.mxu1 }
 0xb30   :  { %v17205_v35 = vpop.f32.mrf.mxu0 }
 0xb31   :  { %v17246_v9 = vpop.f32.mrf.mxu1  ;;  %v17206_v30 = vadd.f32 %v17205_v35, %v17165_v27  ;;  %v17347_v35 = vadd.f32 %v17346_v47, %v25630_v10  ;;  %v24643_v47 = vld [vmem:[#allocation15 + $0xd0] sm:$0xff]  }
 0xb32   :  { %v17207_v18 = vpop.f32.mrf.mxu0 }
 0xb33   :  { %v17248_v5 = vpop.f32.mrf.mxu1  ;;  %v17208_v33 = vadd.f32 %v17207_v18, %v17167_v38  ;;  %v17247_v26 = vadd.f32 %v17246_v9, %v17206_v30  ;;  %v24638_v30 = vld [vmem:[#allocation15 + $0x58] sm:$0xff]  }
 0xb34   :  { %v17209_v53 = vpop.f32.mrf.mxu0  ;;  %21028 = vmatprep.subr.bf16.mxu0 %v24638_v30 }
 0xb35   :  { %v17250_v61 = vpop.f32.mrf.mxu1  ;;  %v17249_v34 = vadd.f32 %v17248_v5, %v17208_v33  ;;  %v24641_v33 = vld [vmem:[#allocation15 + $0x98] sm:$0xff]   ;;  %21029 = vmatpush3.bf16.msra.mxu0 %v24640_v29 }
 0xb36   :  { %v17210_v36 = vpop.f32.mrf.mxu0  ;;  %21051 = vmatpush3.bf16.msra.mxu1 %v24641_v33  ;;  %21030 = vmatprep.subr.bf16.mxu0 %v24642_v44 }
 0xb37   :  { %v17251_v25 = vpop.f32.mrf.mxu1  ;;  %v17372_v36 = vadd.f32 %v17371_v32, %v17361_v42  ;;  %21052 = vmatprep.subr.bf16.mxu1 %v24643_v47  ;;  %v24646_v32 = vld [vmem:[#allocation15 + $0x48] sm:$0xff]  }
 0xb38   :  { %v24647_v42 = vld [vmem:[#allocation15 + $0xc8] sm:$0xff]  }
 0xb70   :  { %v17287_v11 = vpop.f32.mrf.mxu0 }
 0xb71   :  { %v17288_v15 = vadd.f32 %v17287_v11, %v17247_v26  ;;  %v17328_v63 = vpop.f32.mrf.mxu1  ;;  %v24644_v26 = vld [vmem:[#allocation15 + $0x10] sm:$0xff]  }
 0xb72   :  { %v17289_v52 = vpop.f32.mrf.mxu0  ;;  %v24645_v11 = vld [vmem:[#allocation15 + $0x90] sm:$0xff]   ;;  %21031 = vmatpush3.bf16.msra.mxu0 %v24644_v26 }
 0xb73   :  { %v25665_v27 = vadd.f32 %v17328_v63, %v17288_v15  ;;  %v17290_v22 = vadd.f32 %v17289_v52, %v17249_v34  ;;  %v17330_v55 = vpop.f32.mrf.mxu1  ;;  %21053 = vmatpush3.bf16.msra.mxu1 %v24645_v11  ;;  %v24648_v34 = vld [vmem:[#allocation15 + $0x8] sm:$0xff]   ;;  %21032 = vmatprep.subr.bf16.mxu0 %v24646_v32  ;;  %v24650_v63 = vld [vmem:[#allocation15 + $0x40] sm:$0xff]  }
 0xb74   :  { %v17291_v38 = vpop.f32.mrf.mxu0  ;;  %v24649_v15 = vld [vmem:[#allocation15 + $0x88] sm:$0xff]   ;;  %21054 = vmatprep.subr.bf16.mxu1 %v24647_v42  ;;  %v24651_v52 = vld [vmem:[#allocation15 + $0xc0] sm:$0xff]  }
 0xb75   :  { %v17362_v18 = vmul.f32 %v25665_v27, %v25665_v27  ;;  %v25670_v9 = vadd.f32 %v17330_v55, %v17290_v22  ;;  %v17332_v53 = vpop.f32.mrf.mxu1  ;;  %v17348_v61 = vadd.f32 %v17347_v35, %v25665_v27  ;;  %v24652_v22 = vld [vmem:[#allocation15] sm:$0xff]   ;;  %v24654_v35 = vld [vmem:[#allocation15 + $0x178] sm:$0xff]  }
 0xb76   :  { %v17292_v5 = vpop.f32.mrf.mxu0  ;;  %21033 = vmatpush3.bf16.msra.mxu0 %v24648_v34  ;;  %v24653_v55 = vld [vmem:[#allocation15 + $0x80] sm:$0xff]   ;;  %v24655_v38 = vld [vmem:[#allocation15 + $0x1f8] sm:$0xff]  }
 0xb77   :  { %v17333_v25 = vpop.f32.mrf.mxu1  ;;  %v17349_v8 = vadd.f32 %v17348_v61, %v25670_v9  ;;  %v17363_v7 = vmul.f32 %v25670_v9, %v25670_v9  ;;  %v17373_v41 = vadd.f32 %v17372_v36, %v17362_v18  ;;  %21055 = vmatpush3.bf16.msra.mxu1 %v24649_v15  ;;  %21034 = vmatprep.subr.bf16.mxu0 %v24650_v63 }
 0xb78   :  { %21056 = vmatprep.subr.bf16.mxu1 %v24651_v52 }
 0xb79   :  { %17350 = vadd.xlane.f32.xlu1 %v17349_v8  ;;  %v17374_v62 = vadd.f32 %v17373_v41, %v17363_v7  ;;  %v25680_v7 = vld [vmem:[#allocation12] sm:$0xff]  ;;  %v25682_v41 = vld [vmem:[#allocation13] sm:$0xff] }
 0xb7a   :  { %21035 = vmatpush3.bf16.msra.mxu0 %v24652_v22  ;;  %v17490_v23 = vrot.slane %v25682_v41, %v25132_v60  ;;  %v17424_v14 = vrot.slane %v25680_v7, %v25168_v48  ;;  %v17498_v28 = vrot.slane %v25682_v41, %v25168_v48  ;;  %v17412_v16 = vrot.slane %v25680_v7, %v25129_v57 }
 0xb7b   :  { %21057 = vmatpush3.bf16.msra.mxu1 %v24653_v55  ;;  %21064 = vmatprep.subr.bf16.mxu0 %v24654_v35  ;;  %v17486_v13 = vrot.slane %v25682_v41, %v25129_v57  ;;  %v17420_v1 = vrot.slane %v25680_v7, %v25165_v43  ;;  %v17494_v45 = vrot.slane %v25682_v41, %v25165_v43 }
 0xb7c   :  { %21086 = vmatprep.subr.bf16.mxu1 %v24655_v38  ;;  %v17432_v20 = vrot.slane %v25680_v7, %v25204_v12 }
 0xb7d   :  { %17375 = vadd.xlane.f32.xlu1 %v17374_v62  ;;  %v17416_v62 = vrot.slane %v25680_v7, %v25132_v60 }
 0xc02   :  { %v17351_v18 = vpop.xlane.xlu1 %17350 }
 0xc03   :  { %v25676_v53 = vmul.f32 0.0006510417, %v17351_v18 }
 0xc05   :  { %v17379_v36 = vmul.f32 %v25676_v53, %v25676_v53  ;;  %v17382_v19 = vsub.f32 %v25500_v54, %v25676_v53  ;;  %v17384_v3 = vsub.f32 %v25532_v0, %v25676_v53  ;;  %v17381_v58 = vsub.f32 %v25496_v6, %v25676_v53 }
 0xc06   :  { %v17376_v61 = vpop.xlane.xlu1 %17375  ;;  %v17383_v17 = vsub.f32 %v25528_v59, %v25676_v53  ;;  %v17386_v51 = vsub.f32 %v25566_v24, %v25676_v53  ;;  %v17388_v54 = vsub.f32 %v25598_v40, %v25676_v53  ;;  %v17440_v0 = vrot.slane %v25680_v7, %v25240_v56 }
 0xc07   :  { %v17378_v5 = vmul.f32 0.0006510417, %v17376_v61  ;;  %v17506_v24 = vrot.slane %v25682_v41, %v25204_v12  ;;  %v17514_v40 = vrot.slane %v25682_v41, %v25240_v56  ;;  %v17389_v56 = vsub.f32 %v25627_v2, %v25676_v53 }
 0xc09   :  { %v17380_v25 = vsub.f32 %v17378_v5, %v17379_v36 }
 0xc0b   :  { %v17393_v8 = vadd.f32 1e-05, %v17380_v25 }
 0xc0d   :  { %24720 = vrsqrt.f32 %v17393_v8  ;;  %v24656_v8 = vld [vmem:[#allocation15 + $0x138] sm:$0xff]  }
 0xc1a   :  { %v25708_v39 = vpop.eup %24720 }
 0xc1b   :  { %v17396_v21 = vmul.f32 %v25708_v39, %v17382_v19  ;;  %v17398_v6 = vmul.f32 %v25708_v39, %v17384_v3  ;;  %v17395_v59 = vmul.f32 %v25708_v39, %v17381_v58  ;;  %v17397_v31 = vmul.f32 %v25708_v39, %v17383_v17  ;;  %v24661_v19 = vld [vmem:[#allocation15 + $0x1b0] sm:$0xff]   ;;  %v24663_v3 = vld [vmem:[#allocation15 + $0x1e8] sm:$0xff]  }
 0xc1c   :  { %v17400_v30 = vmul.f32 %v25708_v39, %v17386_v51  ;;  %v17402_v49 = vmul.f32 %v25708_v39, %v17388_v54  ;;  %v24664_v58 = vld [vmem:[#allocation15 + $0x128] sm:$0xff]   ;;  %v24666_v51 = vld [vmem:[#allocation15 + $0x160] sm:$0xff]  }
 0xc1d   :  { %v17470_v29 = vmul.f32 %v17416_v62, %v17396_v21  ;;  %v17472_v33 = vmul.f32 %v17424_v14, %v17398_v6  ;;  %v17469_v44 = vmul.f32 %v17412_v16, %v17395_v59  ;;  %v17471_v47 = vmul.f32 %v17420_v1, %v17397_v31  ;;  %v24657_v62 = vld [vmem:[#allocation15 + $0x1b8] sm:$0xff]   ;;  %v24658_v14 = vld [vmem:[#allocation15 + $0x170] sm:$0xff]   ;;  %v24665_v17 = vld [vmem:[#allocation15 + $0x1a8] sm:$0xff]  }
 0xc1e   :  { %v17474_v26 = vmul.f32 %v17432_v20, %v17400_v30  ;;  %v17476_v11 = vmul.f32 %v17440_v0, %v17402_v49  ;;  %v25733_v16 = vmul.f32 %v25708_v39, %v17389_v56  ;;  %v24667_v20 = vld [vmem:[#allocation15 + $0x1e0] sm:$0xff]   ;;  %v24670_v21 = vld [vmem:[#allocation15 + $0x158] sm:$0xff]   ;;  %v17385_v59 = vsub.f32 %v25562_v50, %v25676_v53  ;;  %v25742_v30 = vld [vmem:[#allocation12 + $0x8] sm:$0xf] }
 0xc1f   :  { %v17544_v32 = vadd.f32 %v17490_v23, %v17470_v29  ;;  %v17546_v42 = vadd.f32 %v17498_v28, %v17472_v33  ;;  %v17543_v34 = vadd.f32 %v17486_v13, %v17469_v44  ;;  %v17545_v15 = vadd.f32 %v17494_v45, %v17471_v47  ;;  %v24659_v28 = vld [vmem:[#allocation15 + $0x1f0] sm:$0xff]   ;;  %v24668_v54 = vld [vmem:[#allocation15 + $0x120] sm:$0xff]   ;;  %v24671_v6 = vld [vmem:[#allocation15 + $0x1d8] sm:$0xff]  }
 0xc20   :  { %v17548_v63 = vadd.f32 %v17506_v24, %v17474_v26  ;;  %v17550_v52 = vadd.f32 %v17514_v40, %v17476_v11  ;;  %v17391_v23 = vsub.f32 %v25665_v27, %v25676_v53  ;;  %v24660_v45 = vld [vmem:[#allocation15 + $0x130] sm:$0xff]   ;;  %v24662_v27 = vld [vmem:[#allocation15 + $0x168] sm:$0xff]   ;;  %v24669_v0 = vld [vmem:[#allocation15 + $0x1a0] sm:$0xff]   ;;  %v17387_v31 = vsub.f32 %v25594_v37, %v25676_v53 }
 0xc21   :  { %v17556_v22 = vmax.f32 %v17544_v32, 0.0  ;;  %v17558_v55 = vmax.f32 %v17546_v42, 0.0  ;;  %v17555_v12 = vmax.f32 %v17543_v34, 0.0  ;;  %v17557_v35 = vmax.f32 %v17545_v15, 0.0  ;;  %v24672_v24 = vld [vmem:[#allocation15 + $0x118] sm:$0xff]   ;;  %v24674_v50 = vld [vmem:[#allocation15 + $0x150] sm:$0xff]  }
 0xc22   :  { %v17560_v38 = vmax.f32 %v17548_v63, 0.0  ;;  %v17562_v18 = vmax.f32 %v17550_v52, 0.0  ;;  %v25736_v1 = vmul.f32 %v25708_v39, %v17391_v23  ;;  %v24673_v49 = vld [vmem:[#allocation15 + $0x198] sm:$0xff]   ;;  %v17428_v40 = vrot.slane %v25680_v7, %v25201_v4  ;;  %v24675_v44 = vld [vmem:[#allocation15 + $0x1d0] sm:$0xff]   ;;  %v24682_v56 = vld [vmem:[#allocation15 + $0x140] sm:$0xff]  }
 0xc23   :  { %v17568_v61 = vpack.c.bf16 %v17556_v22, %v17556_v22  ;;  %v17570_v36 = vpack.c.bf16 %v17558_v55, %v17558_v55  ;;  %v17567_v5 = vpack.c.bf16 %v17555_v12, %v17555_v12  ;;  %v17569_v25 = vpack.c.bf16 %v17557_v35, %v17557_v35  ;;  %v24676_v34 = vld [vmem:[#allocation15 + $0x110] sm:$0xff]   ;;  %v24687_v23 = vld [vmem:[#allocation15 + $0x2f8] sm:$0xff]  }
 0xc24   :  { %v17572_v13 = vpack.c.bf16 %v17560_v38, %v17560_v38  ;;  %v17574_v2 = vpack.c.bf16 %v17562_v18, %v17562_v18  ;;  %v17436_v29 = vrot.slane %v25680_v7, %v25237_v46  ;;  %v17390_v33 = vsub.f32 %v25630_v10, %v25676_v53  ;;  %v25757_v7 = vld [vmem:[#allocation13 + $0x8] sm:$0xf]  ;;  %v24677_v15 = vld [vmem:[#allocation15 + $0x190] sm:$0xff]   ;;  %v24681_v18 = vld [vmem:[#allocation15 + $0x188] sm:$0xff]  }
 0xc25   :  { %18386 = vmatprep.mubr.bf16.mxu0 %v17568_v61  ;;  %18426 = vmatprep.mubr.bf16.mxu1 %v17570_v36  ;;  %v17399_v37 = vmul.f32 %v25708_v39, %v17385_v59  ;;  %v17401_v47 = vmul.f32 %v25708_v39, %v17387_v31  ;;  %v17392_v26 = vsub.f32 %v25670_v9, %v25676_v53  ;;  %v24678_v9 = vld [vmem:[#allocation15 + $0x148] sm:$0xff]   ;;  %v24683_v61 = vld [vmem:[#allocation15 + $0x1c0] sm:$0xff]  }
 0xc26   :  { %18387 = vmatmul.mubr.bf16.vlgmr.msra.gmra.mxu0 %v17567_v5  ;;  %18427 = vmatmul.mubr.bf16.vlgmr.msra.gmra.mxu1 %v17569_v25  ;;  %v17404_v11 = vmul.f32 %v25708_v39, %v17390_v33  ;;  %v17448_v32 = vrot.slane %v25742_v30, %v25132_v60  ;;  %v17456_v42 = vrot.slane %v25742_v30, %v25168_v48  ;;  %v24679_v53 = vld [vmem:[#allocation15 + $0x1c8] sm:$0xff]   ;;  %v24698_v59 = vld [vmem:[#allocation15 + $0x260] sm:$0xff]   ;;  %v24704_v33 = vld [vmem:[#allocation15 + $0x218] sm:$0xff]  }
 0xc27   :  { %21065 = vmatpush3.bf16.msra.mxu0 %v24656_v8  ;;  %21087 = vmatpush3.bf16.msra.mxu1 %v24657_v62  ;;  %v17406_v10 = vmul.f32 %v25708_v39, %v17392_v26  ;;  %v17502_v63 = vrot.slane %v25682_v41, %v25201_v4  ;;  %v17473_v52 = vmul.f32 %v17428_v40, %v17399_v37  ;;  %v24680_v4 = vld [vmem:[#allocation15 + $0x108] sm:$0xff]   ;;  %v24686_v62 = vld [vmem:[#allocation15 + $0x278] sm:$0xff]   ;;  %v24699_v31 = vld [vmem:[#allocation15 + $0x2e0] sm:$0xff]  }
 0xc28   :  { %18466 = vmatprep.mubr.bf16.mxu0 %v17572_v13  ;;  %18506 = vmatprep.mubr.bf16.mxu1 %v17574_v2  ;;  %v17475_v22 = vmul.f32 %v17436_v29, %v17401_v47  ;;  %v17510_v55 = vrot.slane %v25682_v41, %v25237_v46  ;;  %v17478_v39 = vmul.f32 %v17448_v32, %v17404_v11  ;;  %v24684_v41 = vld [vmem:[#allocation15 + $0x100] sm:$0xff]   ;;  %v24688_v13 = vld [vmem:[#allocation15 + $0x238] sm:$0xff]   ;;  %v24707_v47 = vld [vmem:[#allocation15 + $0x2d0] sm:$0xff]  }
 0xc29   :  { %21066 = vmatprep.subr.bf16.mxu0 %v24658_v14  ;;  %21088 = vmatprep.subr.bf16.mxu1 %v24659_v28  ;;  %v17522_v12 = vrot.slane %v25757_v7, %v25132_v60  ;;  %v17480_v35 = vmul.f32 %v17456_v42, %v17406_v10  ;;  %v17530_v38 = vrot.slane %v25757_v7, %v25168_v48  ;;  %v24685_v60 = vld [vmem:[#allocation15 + $0x180] sm:$0xff]   ;;  %v24702_v40 = vld [vmem:[#allocation15 + $0x258] sm:$0xff]   ;;  %v24708_v11 = vld [vmem:[#allocation15 + $0x210] sm:$0xff]  }
 0xc2a   :  { %v17547_v36 = vadd.f32 %v17502_v63, %v17473_v52  ;;  %v17549_v5 = vadd.f32 %v17510_v55, %v17475_v22  ;;  %v24703_v29 = vld [vmem:[#allocation15 + $0x2d8] sm:$0xff]   ;;  %v17444_v37 = vrot.slane %v25742_v30, %v25129_v57  ;;  %v17452_v26 = vrot.slane %v25742_v30, %v25165_v43  ;;  %v24709_v32 = vld [vmem:[#allocation15 + $0x290] sm:$0xff]   ;;  %v24710_v10 = vld [vmem:[#allocation15 + $0x248] sm:$0xff]  }
 0xc2b   :  { %21067 = vmatpush3.bf16.msra.mxu0 %v24660_v45  ;;  %21089 = vmatpush3.bf16.msra.mxu1 %v24661_v19  ;;  %v17552_v25 = vadd.f32 %v17522_v12, %v17478_v39  ;;  %v17554_v46 = vadd.f32 %v17530_v38, %v17480_v35  ;;  %v24689_v19 = vld [vmem:[#allocation15 + $0x2b8] sm:$0xff]   ;;  %v24712_v30 = vld [vmem:[#allocation15 + $0x208] sm:$0xff]   ;;  %v24714_v52 = vld [vmem:[#allocation15 + $0x240] sm:$0xff]  }
 0xc2c   :  { %21068 = vmatprep.subr.bf16.mxu0 %v24662_v27  ;;  %21090 = vmatprep.subr.bf16.mxu1 %v24663_v3  ;;  %v17559_v8 = vmax.f32 %v17547_v36, 0.0  ;;  %v17561_v48 = vmax.f32 %v17549_v5, 0.0  ;;  %v24690_v3 = vld [vmem:[#allocation15 + $0x270] sm:$0xff]   ;;  %v17477_v42 = vmul.f32 %v17444_v37, %v25733_v16  ;;  %v17479_v63 = vmul.f32 %v17452_v26, %v25736_v1  ;;  %v24715_v55 = vld [vmem:[#allocation15 + $0x2c0] sm:$0xff]  }
 0xc2d   :  { %v17564_v14 = vmax.f32 %v17552_v25, 0.0  ;;  %v17566_v28 = vmax.f32 %v17554_v46, 0.0  ;;  %v24716_v39 = vld [vmem:[#allocation15 + $0x200] sm:$0xff]  }
 0xc2e   :  { %v17571_v2 = vpack.c.bf16 %v17559_v8, %v17559_v8  ;;  %v17573_v45 = vpack.c.bf16 %v17561_v48, %v17561_v48 }
 0xc2f   :  { %21069 = vmatpush3.bf16.msra.mxu0 %v24664_v58  ;;  %21091 = vmatpush3.bf16.msra.mxu1 %v24665_v17  ;;  %v17576_v27 = vpack.c.bf16 %v17564_v14, %v17564_v14  ;;  %v24691_v58 = vld [vmem:[#allocation15 + $0x2f0] sm:$0xff]   ;;  %v17578_v17 = vpack.c.bf16 %v17566_v28, %v17566_v28  ;;  %v20923_v28 = vld [vmem:[#allocation16] ss:$0 sm:$0xff] }
 0xc30   :  { %21070 = vmatprep.subr.bf16.mxu0 %v24666_v51  ;;  %21092 = vmatprep.subr.bf16.mxu1 %v24667_v20  ;;  %v24692_v51 = vld [vmem:[#allocation15 + $0x230] sm:$0xff]  }
 0xc31   :  { %v24693_v20 = vld [vmem:[#allocation15 + $0x2b0] sm:$0xff]  }
 0xc33   :  { %21071 = vmatpush3.bf16.msra.mxu0 %v24668_v54  ;;  %21093 = vmatpush3.bf16.msra.mxu1 %v24669_v0  ;;  %v24694_v54 = vld [vmem:[#allocation15 + $0x268] sm:$0xff]  }
 0xc34   :  { %21072 = vmatprep.subr.bf16.mxu0 %v24670_v21  ;;  %21094 = vmatprep.subr.bf16.mxu1 %v24671_v6  ;;  %v24695_v0 = vld [vmem:[#allocation15 + $0x2e8] sm:$0xff]  }
 0xc35   :  { %v24696_v21 = vld [vmem:[#allocation15 + $0x228] sm:$0xff]  }
 0xc36   :  { %v24697_v6 = vld [vmem:[#allocation15 + $0x2a8] sm:$0xff]  }
 0xc37   :  { %21073 = vmatpush3.bf16.msra.mxu0 %v24672_v24  ;;  %21095 = vmatpush3.bf16.msra.mxu1 %v24673_v49  ;;  %v24700_v24 = vld [vmem:[#allocation15 + $0x220] sm:$0xff]  }
 0xc38   :  { %21074 = vmatprep.subr.bf16.mxu0 %v24674_v50  ;;  %21096 = vmatprep.subr.bf16.mxu1 %v24675_v44  ;;  %v24701_v49 = vld [vmem:[#allocation15 + $0x2a0] sm:$0xff]   ;;  %v24705_v50 = vld [vmem:[#allocation15 + $0x298] sm:$0xff]   ;;  %v24706_v44 = vld [vmem:[#allocation15 + $0x250] sm:$0xff]  }
 0xc3b   :  { %21075 = vmatpush3.bf16.msra.mxu0 %v24676_v34  ;;  %21097 = vmatpush3.bf16.msra.mxu1 %v24677_v15  ;;  %v17518_v34 = vrot.slane %v25757_v7, %v25129_v57  ;;  %v24711_v15 = vld [vmem:[#allocation15 + $0x2c8] sm:$0xff]   ;;  %v24717_v57 = vld [vmem:[#allocation15 + $0x280] sm:$0xff]  }
 0xc3c   :  { %21076 = vmatprep.subr.bf16.mxu0 %v24678_v9  ;;  %21098 = vmatprep.subr.bf16.mxu1 %v24679_v53  ;;  %v17526_v9 = vrot.slane %v25757_v7, %v25165_v43  ;;  %v24713_v53 = vld [vmem:[#allocation15 + $0x288] sm:$0xff]  }
 0xc3d   :  { %v17551_v22 = vadd.f32 %v17518_v34, %v17477_v42 }
 0xc3e   :  { %v17553_v16 = vadd.f32 %v17526_v9, %v17479_v63 }
 0xc3f   :  { %21077 = vmatpush3.bf16.msra.mxu0 %v24680_v4  ;;  %21099 = vmatpush3.bf16.msra.mxu1 %v24681_v18  ;;  %v17563_v12 = vmax.f32 %v17551_v22, 0.0 }
 0xc40   :  { %21078 = vmatprep.subr.bf16.mxu0 %v24682_v56  ;;  %21100 = vmatprep.subr.bf16.mxu1 %v24683_v61  ;;  %v17565_v1 = vmax.f32 %v17553_v16, 0.0 }
 0xc41   :  { %v17575_v43 = vpack.c.bf16 %v17563_v12, %v17563_v12 }
 0xc42   :  { %v17577_v7 = vpack.c.bf16 %v17565_v1, %v17565_v1 }
 0xc43   :  { %21079 = vmatpush3.bf16.msra.mxu0 %v24684_v41  ;;  %21101 = vmatpush3.bf16.msra.mxu1 %v24685_v60 }
 0xc44   :  { %21108 = vmatprep.subr.bf16.mxu0 %v24686_v62  ;;  %21130 = vmatprep.subr.bf16.mxu1 %v24687_v23 }
 0xc46   :  { %18467 = vmatmul.mubr.bf16.vlgmr.msra.gmra.mxu0 %v17571_v2  ;;  %18507 = vmatmul.mubr.bf16.vlgmr.msra.gmra.mxu1 %v17573_v45 }
 0xc47   :  { %21109 = vmatpush3.bf16.msra.mxu0 %v24688_v13  ;;  %18546 = vmatprep.mubr.bf16.mxu0 %v17576_v27 }
 0xc48   :  { %21131 = vmatpush3.bf16.msra.mxu1 %v24689_v19  ;;  %18586 = vmatprep.mubr.bf16.mxu1 %v17578_v17 }
 0xc49   :  { %21110 = vmatprep.subr.bf16.mxu0 %v24690_v3  ;;  %21132 = vmatprep.subr.bf16.mxu1 %v24691_v58 }
 0xc4b   :  { %21111 = vmatpush3.bf16.msra.mxu0 %v24692_v51 }
 0xc4c   :  { %21133 = vmatpush3.bf16.msra.mxu1 %v24693_v20  ;;  %21112 = vmatprep.subr.bf16.mxu0 %v24694_v54 }
 0xc4d   :  { %21134 = vmatprep.subr.bf16.mxu1 %v24695_v0 }
 0xc4f   :  { %21113 = vmatpush3.bf16.msra.mxu0 %v24696_v21 }
 0xc50   :  { %21135 = vmatpush3.bf16.msra.mxu1 %v24697_v6  ;;  %21114 = vmatprep.subr.bf16.mxu0 %v24698_v59 }
 0xc51   :  { %21136 = vmatprep.subr.bf16.mxu1 %v24699_v31 }
 0xc53   :  { %21115 = vmatpush3.bf16.msra.mxu0 %v24700_v24 }
 0xc54   :  { %21137 = vmatpush3.bf16.msra.mxu1 %v24701_v49  ;;  %21116 = vmatprep.subr.bf16.mxu0 %v24702_v40 }
 0xc55   :  { %21138 = vmatprep.subr.bf16.mxu1 %v24703_v29 }
 0xc57   :  { %21117 = vmatpush3.bf16.msra.mxu0 %v24704_v33 }
 0xc58   :  { %21139 = vmatpush3.bf16.msra.mxu1 %v24705_v50  ;;  %21118 = vmatprep.subr.bf16.mxu0 %v24706_v44 }
 0xc59   :  { %21140 = vmatprep.subr.bf16.mxu1 %v24707_v47 }
 0xc5b   :  { %21119 = vmatpush3.bf16.msra.mxu0 %v24708_v11 }
 0xc5c   :  { %21141 = vmatpush3.bf16.msra.mxu1 %v24709_v32  ;;  %21120 = vmatprep.subr.bf16.mxu0 %v24710_v10 }
 0xc5d   :  { %21142 = vmatprep.subr.bf16.mxu1 %v24711_v15 }
 0xc5f   :  { %21121 = vmatpush3.bf16.msra.mxu0 %v24712_v30 }
 0xc60   :  { %21143 = vmatpush3.bf16.msra.mxu1 %v24713_v53  ;;  %21122 = vmatprep.subr.bf16.mxu0 %v24714_v52 }
 0xc61   :  { %21144 = vmatprep.subr.bf16.mxu1 %v24715_v55 }
 0xc63   :  { %21123 = vmatpush3.bf16.msra.mxu0 %v24716_v39 }
 0xc64   :  { %21145 = vmatpush3.bf16.msra.mxu1 %v24717_v57 }
 0xc66   :  { %18547 = vmatmul.mubr.bf16.vlgmr.msra.gmra.mxu0 %v17575_v43 }
 0xc67   :  { %18587 = vmatmul.mubr.bf16.vlgmr.msra.gmra.mxu1 %v17577_v7 }
 0xce6   :  { %v21036_v35 = vpop.f32.mrf.mxu0  ;;  %v21058_v38 = vpop.f32.mrf.mxu1 }
 0xce8   :  { %v21037_v4 = vpop.f32.mrf.mxu0  ;;  %v21059_v18 = vpop.f32.mrf.mxu1 }
 0xce9   :  { %v21038_v14 = vadd.f32 %v21037_v4, %v21036_v35  ;;  %v21060_v2 = vadd.f32 %v21059_v18, %v21058_v38 }
 0xcea   :  { %v21039_v56 = vpop.f32.mrf.mxu0  ;;  %v21061_v61 = vpop.f32.mrf.mxu1 }
 0xceb   :  { %v18389_v13 = vadd.f32 %v21038_v14, %v20923_v28 }
 0xcec   :  { %v21040_v36 = vpop.f32.mrf.mxu0  ;;  %v21062_v5 = vpop.f32.mrf.mxu1 }
 0xced   :  { %v18429_v19 = vadd.f32 %v21060_v2, %v18389_v13 }
 0xd06   :  { %v21080_v25 = vpop.f32.mrf.mxu0  ;;  %v21102_v46 = vpop.f32.mrf.mxu1 }
 0xd08   :  { %v21081_v41 = vpop.f32.mrf.mxu0  ;;  %v21103_v60 = vpop.f32.mrf.mxu1 }
 0xd09   :  { %v21082_v45 = vadd.f32 %v21081_v41, %v21080_v25  ;;  %v21104_v58 = vadd.f32 %v21103_v60, %v21102_v46 }
 0xd0a   :  { %v21083_v8 = vpop.f32.mrf.mxu0  ;;  %v21105_v48 = vpop.f32.mrf.mxu1 }
 0xd0b   :  { %v18469_v27 = vadd.f32 %v21082_v45, %v18429_v19 }
 0xd0c   :  { %v21084_v62 = vpop.f32.mrf.mxu0  ;;  %v21106_v23 = vpop.f32.mrf.mxu1 }
 0xd0d   :  { %v18509_v20 = vadd.f32 %v21104_v58, %v18469_v27 }
 0xd26   :  { %v21124_v3 = vpop.f32.mrf.mxu0 }
 0xd27   :  { %v21146_v17 = vpop.f32.mrf.mxu1 }
 0xd28   :  { %v21125_v51 = vpop.f32.mrf.mxu0 }
 0xd29   :  { %v21126_v54 = vadd.f32 %v21125_v51, %v21124_v3  ;;  %v21147_v0 = vpop.f32.mrf.mxu1 }
 0xd2a   :  { %v21127_v21 = vpop.f32.mrf.mxu0  ;;  %v21148_v59 = vadd.f32 %v21147_v0, %v21146_v17 }
 0xd2b   :  { %v18549_v6 = vadd.f32 %v21126_v54, %v18509_v20  ;;  %v21149_v31 = vpop.f32.mrf.mxu1 }
 0xd2c   :  { %v21128_v24 = vpop.f32.mrf.mxu0 }
 0xd2d   :  { %v18589_v49 = vadd.f32 %v21148_v59, %v18549_v6  ;;  %v21150_v40 = vpop.f32.mrf.mxu1 }
 0xd2f   :  { %18594 = vst [vmem:[%s25797_s11] sm:$0xff] %v18589_v49  ;;  %18595 = vmax.xlane.f32.xlu0 %v18589_v49 }
 0xdb8   :  { %v18596_v29 = vpop.xlane.xlu0 %18595 }
 0xdb9   :  { %v18597_v33 = vsub.f32 %v18589_v49, %v18596_v29 }
 0xdbb   :  { %v18598_v50 = vmul.f32 1.442695, %v18597_v33 }
 0xdbd   :  { %24722 = vpow2.f32 %v18598_v50 }
 0xdca   :  { %v24723_v44 = vpop.eup %24722 }
 0xdcb   :  { %18600 = vadd.xlane.f32.xlu1 %v24723_v44 }
 0xe54   :  { %v18601_v37 = vpop.xlane.xlu1 %18600 }
 0xe55   :  { %24724 = vrcp.f32 %v18601_v37 }
 0xe62   :  { %v24725_v47 = vpop.eup %24724 }
 0xe63   :  { %v18603_v26 = vmul.f32 %v24725_v47, %v24723_v44 }
 0xe65   :  { %18604 = vst [vmem:[%s25798_s12] sm:$0xff] %v18603_v26 }
 0xe66   :  { %18613 = vsyncpa [#allocation3], 1 }
 0xe67   :  { %18614 = vsyncpa [#allocation5], 1 }
 0xe68   :  { %18615 = vsyncpa [#allocation8], 1 }
 0xe69   :  { %18616 = vsyncpa [#allocation11], 1 }
 0xe6a   :  { %18617 = vsyncpa [#allocation14], 1 }
 0xe6b   :  { %18618 = vsyncpa [#allocation17], 1 }

</bundles_post_ra>
